<compile_context>
chip_gen: v7x
topology: tpu7x:2x2x1
jax: 0.10.0
libtpu: 0.0.40
codegen_flags: <defaults>
</compile_context>

<pallas_src>
from functools import partial

import jax
import jax.numpy as jnp
from jax.experimental import pallas as pl
from jax.experimental.pallas import tpu as pltpu

_COMPUTE_DTYPE = jnp.bfloat16
_VMEM_LIMIT = 32 * 1024 * 1024  # safe on v5e/v6e (128 MiB) and v7x (64 MiB)


# ---------------------------------------------------------------------------
# helpers
# ---------------------------------------------------------------------------
def _round_up(x, m):
    return (x + m - 1) // m * m


def _row_tiling(M):
    """(padded_M, tile_M): prefer one big block; for large M use 1024-row tiles
    and keep the step count even (v7x has 2 TensorCores)."""
    if M <= 2048:
        mp = _round_up(M, 8)
        return mp, mp
    tm = 1024
    return _round_up(M, 2 * tm), tm


def _pad_rows(x, mp):
    M = x.shape[0]
    if mp == M:
        return x
    return jnp.pad(x, ((0, mp - M),) + ((0, 0),) * (x.ndim - 1))


def _silu(y):
    return y * jax.nn.sigmoid(y)


def _mosaic_params():
    return pltpu.CompilerParams(dimension_semantics=("parallel",),
                                vmem_limit_bytes=_VMEM_LIMIT)


# ---------------------------------------------------------------------------
# Kernel 1: pointwise matmul + folded BN affine + activation
#           (used for cv1 and for the dense 3x3 conv as a single K=9*Cin matmul)
# ---------------------------------------------------------------------------
def _pw_kernel(x_ref, w_ref, s_ref, b_ref, o_ref, *, act):
    y = jnp.dot(x_ref[...], w_ref[...], preferred_element_type=jnp.float32)
    y = y * s_ref[...] + b_ref[...]
    if act == "silu":
        y = _silu(y)
    elif act == "relu":
        y = jnp.maximum(y, 0.0)
    o_ref[...] = y.astype(o_ref.dtype)


def pointwise_bn_act(x2d, w, scale, bias, act):
    M, Cin = x2d.shape
    Cout = w.shape[1]
    mp, tm = _row_tiling(M)
    xp = _pad_rows(x2d, mp)
    out = pl.pallas_call(
        partial(_pw_kernel, act=act),
        out_shape=jax.ShapeDtypeStruct((mp, Cout), _COMPUTE_DTYPE),
        grid=(mp // tm,),
        in_specs=[
            pl.BlockSpec((tm, Cin), lambda i: (i, 0)),
            pl.BlockSpec((Cin, Cout), lambda i: (0, 0)),
            pl.BlockSpec((1, Cout), lambda i: (0, 0)),
            pl.BlockSpec((1, Cout), lambda i: (0, 0)),
        ],
        out_specs=pl.BlockSpec((tm, Cout), lambda i: (i, 0)),
        compiler_params=_mosaic_params(),
    )(xp, w, scale.reshape(1, Cout), bias.reshape(1, Cout))
    return out[:M] if mp != M else out


# ---------------------------------------------------------------------------
# Kernel 2: fused (norm-folded) qk|v projection: y = x @ W + b, ReLU on v lanes
# ---------------------------------------------------------------------------
def _qkv_kernel(x_ref, w_ref, b_ref, o_ref, *, relu_from):
    y = jnp.dot(x_ref[...], w_ref[...], preferred_element_type=jnp.float32)
    y = y + b_ref[...]
    lane = jax.lax.broadcasted_iota(jnp.int32, y.shape, 1)
    y = jnp.where(lane >= relu_from, jnp.maximum(y, 0.0), y)
    o_ref[...] = y.astype(o_ref.dtype)


def qkv_projection(x2d, w, bias, relu_from):
    M, Cin = x2d.shape
    Cout = w.shape[1]
    mp, tm = _row_tiling(M)
    xp = _pad_rows(x2d, mp)
    out = pl.pallas_call(
        partial(_qkv_kernel, relu_from=relu_from),
        out_shape=jax.ShapeDtypeStruct((mp, Cout), _COMPUTE_DTYPE),
        grid=(mp // tm,),
        in_specs=[
            pl.BlockSpec((tm, Cin), lambda i: (i, 0)),
            pl.BlockSpec((Cin, Cout), lambda i: (0, 0)),
            pl.BlockSpec((1, Cout), lambda i: (0, 0)),
        ],
        out_specs=pl.BlockSpec((tm, Cout), lambda i: (i, 0)),
        compiler_params=_mosaic_params(),
    )(xp, w, bias.reshape(1, Cout))
    return out[:M] if mp != M else out


# ---------------------------------------------------------------------------
# Kernel 3: proj 1x1 (no norm/act) fused with the outer residual add
# ---------------------------------------------------------------------------
def _proj_res_kernel(x_ref, short_ref, w_ref, o_ref):
    y = jnp.dot(x_ref[...], w_ref[...], preferred_element_type=jnp.float32)
    y = y + short_ref[...].astype(jnp.float32)
    o_ref[...] = y.astype(o_ref.dtype)


def proj_residual(x2d, short2d, w):
    M, Cin = x2d.shape
    Cout = w.shape[1]
    mp, tm = _row_tiling(M)
    xp, sp = _pad_rows(x2d, mp), _pad_rows(short2d, mp)
    out = pl.pallas_call(
        _proj_res_kernel,
        out_shape=jax.ShapeDtypeStruct((mp, Cout), _COMPUTE_DTYPE),
        grid=(mp // tm,),
        in_specs=[
            pl.BlockSpec((tm, Cin), lambda i: (i, 0)),
            pl.BlockSpec((tm, Cout), lambda i: (i, 0)),
            pl.BlockSpec((Cin, Cout), lambda i: (0, 0)),
        ],
        out_specs=pl.BlockSpec((tm, Cout), lambda i: (i, 0)),
        compiler_params=_mosaic_params(),
    )(xp, sp, w)
    return out[:M] if mp != M else out


# ---------------------------------------------------------------------------
# Kernel 4: cv2 without the concat: silu(bn(t @ W01 + y2 @ W2))
# ---------------------------------------------------------------------------
def _cv2_kernel(a_ref, c_ref, wa_ref, wc_ref, s_ref, b_ref, o_ref):
    y = jnp.dot(a_ref[...], wa_ref[...], preferred_element_type=jnp.float32)
    y = y + jnp.dot(c_ref[...], wc_ref[...], preferred_element_type=jnp.float32)
    y = y * s_ref[...] + b_ref[...]
    y = _silu(y)
    o_ref[...] = y.astype(o_ref.dtype)


def cv2_dual(a2d, c2d, wa, wc, scale, bias, out_dtype=_COMPUTE_DTYPE):
    M, Ca = a2d.shape
    Cc = c2d.shape[1]
    Cout = wa.shape[1]
    mp, tm = _row_tiling(M)
    ap, cp = _pad_rows(a2d, mp), _pad_rows(c2d, mp)
    out = pl.pallas_call(
        _cv2_kernel,
        out_shape=jax.ShapeDtypeStruct((mp, Cout), out_dtype),
        grid=(mp // tm,),
        in_specs=[
            pl.BlockSpec((tm, Ca), lambda i: (i, 0)),
            pl.BlockSpec((tm, Cc), lambda i: (i, 0)),
            pl.BlockSpec((Ca, Cout), lambda i: (0, 0)),
            pl.BlockSpec((Cc, Cout), lambda i: (0, 0)),
            pl.BlockSpec((1, Cout), lambda i: (0, 0)),
            pl.BlockSpec((1, Cout), lambda i: (0, 0)),
        ],
        out_specs=pl.BlockSpec((tm, Cout), lambda i: (i, 0)),
        compiler_params=_mosaic_params(),
    )(ap, cp, wa, wc, scale.reshape(1, Cout), bias.reshape(1, Cout))
    return out[:M] if mp != M else out


# ---------------------------------------------------------------------------
# Kernel 5: depthwise 3x3 + BN + SiLU + skip add, no im2col
#           (whole padded image per grid step; 9 shifted taps read in-kernel)
# ---------------------------------------------------------------------------
def _dw_res_kernel(x_ref, short_ref, w_ref, s_ref, b_ref, o_ref, *, H, W):
    C = o_ref.shape[-1]
    acc = jnp.zeros((H, W, C), jnp.float32)
    for dy in range(3):
        for dx in range(3):
            tap = x_ref[0, dy:dy + H, dx:dx + W, :].astype(jnp.float32)
            acc = acc + tap * w_ref[dy * 3 + dx]
    y = acc * s_ref[...] + b_ref[...]
    y = _silu(y)
    y = y + short_ref[0].astype(jnp.float32)
    o_ref[0] = y.astype(o_ref.dtype)


def dwconv3x3_bn_silu_res(x, wdw, scale, bias):
    # x: (B,H,W,C) NHWC; wdw: (9,1,C) with tap = dy*3+dx. out = x + silu(bn(dwconv(x)))
    B, H, W, C = x.shape
    xp = jnp.pad(x, ((0, 0), (1, 1), (1, 1), (0, 0)))
    Hp, Wp = H + 2, W + 2
    return pl.pallas_call(
        partial(_dw_res_kernel, H=H, W=W),
        out_shape=jax.ShapeDtypeStruct((B, H, W, C), x.dtype),
        grid=(B,),
        in_specs=[
            pl.BlockSpec((1, Hp, Wp, C), lambda b: (b, 0, 0, 0)),
            pl.BlockSpec((1, H, W, C), lambda b: (b, 0, 0, 0)),
            pl.BlockSpec((9, 1, C), lambda b: (0, 0, 0)),
            pl.BlockSpec((1, C), lambda b: (0, 0)),
            pl.BlockSpec((1, C), lambda b: (0, 0)),
        ],
        out_specs=pl.BlockSpec((1, H, W, C), lambda b: (b, 0, 0, 0)),
        compiler_params=_mosaic_params(),
    )(xp, x, wdw, scale.reshape(1, C), bias.reshape(1, C))


# ---------------------------------------------------------------------------
# Kernel 6: window self-attention, several windows per grid step
#           (attention scale is pre-folded into the q projection weights)
# ---------------------------------------------------------------------------
def _attn_kernel(q_ref, k_ref, v_ref, o_ref):
    s = jnp.einsum("bqd,bkd->bqk", q_ref[...], k_ref[...],
                   preferred_element_type=jnp.float32)
    s = s - jnp.max(s, axis=-1, keepdims=True)
    p = jnp.exp(s)
    inv = pl.reciprocal(jnp.sum(p, axis=-1, keepdims=True), approx=True)
    o = jnp.einsum("bqk,bkd->bqd", (p * inv).astype(v_ref.dtype), v_ref[...],
                   preferred_element_type=jnp.float32)
    o_ref[...] = o.astype(o_ref.dtype)


def window_attention(q, k, v):
    Bh, S, D = q.shape
    nb = min(8, Bh)
    while nb > 1 and Bh % nb != 0:
        nb -= 1
    if Bh // nb == 1 and nb % 2 == 0:
        nb //= 2  # make the grid even so v7x's two TensorCores split it
    return pl.pallas_call(
        _attn_kernel,
        out_shape=jax.ShapeDtypeStruct((Bh, S, D), q.dtype),
        grid=(Bh // nb,),
        in_specs=[pl.BlockSpec((nb, S, D), lambda b: (b, 0, 0))] * 3,
        out_specs=pl.BlockSpec((nb, S, D), lambda b: (b, 0, 0)),
        compiler_params=_mosaic_params(),
    )(q, k, v)


# ---------------------------------------------------------------------------
# dense 3x3 conv: im2col along channels -> ONE K=9*Cin matmul (fills the MXU)
# ---------------------------------------------------------------------------
def conv3x3_bn_silu(x, w_flat, scale, bias):
    # x: (B,H,W,Cin); w_flat: (9*Cin, Cout), rows tap-major (dy*3+dx) then Cin
    B, H, W, Cin = x.shape
    xp = jnp.pad(x, ((0, 0), (1, 1), (1, 1), (0, 0)))
    taps = jnp.concatenate(
        [xp[:, dy:dy + H, dx:dx + W, :] for dy in range(3) for dx in range(3)],
        axis=-1)
    out = pointwise_bn_act(taps.reshape(B * H * W, 9 * Cin), w_flat, scale, bias,
                           act="silu")
    return out.reshape(B, H, W, -1)


# ---------------------------------------------------------------------------
# parameters (deterministic, synthetic) + inference-time fusion
# ---------------------------------------------------------------------------
def _bn_fold(key, ch, eps):
    k1, k2, k3, k4 = jax.random.split(key, 4)
    gamma = 1.0 + 0.1 * jax.random.normal(k1, (ch,), jnp.float32)
    beta = 0.1 * jax.random.normal(k2, (ch,), jnp.float32)
    mean = 0.1 * jax.random.normal(k3, (ch,), jnp.float32)
    var = 0.5 + jax.random.uniform(k4, (ch,), jnp.float32)
    s = gamma / jnp.sqrt(var + eps)
    return s, beta - mean * s


def init_params(key, c1, c2, n=1, e=0.5, dim_head=64, window_size=7):
    assert n == 1, "this script instantiates C2f_iRMB with n=1"
    c = int(c2 * e)
    assert c % dim_head == 0, "dim should be divisible by num_heads (iRMB assert)"
    ks = jax.random.split(key, 12)
    std = 0.1
    p = {"c": c, "c1": c1, "c2": c2, "dim_head": dim_head,
         "num_head": c // dim_head, "window_size": window_size}
    # C2f.cv1 : 1x1 conv + BN(1e-5) + SiLU
    p["cv1_w"] = std * jax.random.normal(ks[0], (c1, 2 * c), jnp.float32)
    p["cv1_s"], p["cv1_b"] = _bn_fold(ks[1], 2 * c, 1e-5)
    # Bottleneck_iRMB.cv1 : 3x3 conv + BN(1e-5) + SiLU   (rows: tap-major, then Cin)
    p["m_cv1_w"] = std * jax.random.normal(ks[2], (9 * c, c), jnp.float32)
    p["m_cv1_s"], p["m_cv1_b"] = _bn_fold(ks[3], c, 1e-5)
    # iRMB: norm (BN eps 1e-6), qk / v 1x1 (bias-free), dw 3x3 + BN(1e-6) + SiLU, proj 1x1
    p["irmb_norm_s"], p["irmb_norm_b"] = _bn_fold(ks[4], c, 1e-6)
    p["qk_w"] = std * jax.random.normal(ks[5], (c, 2 * c), jnp.float32)
    p["v_w"] = std * jax.random.normal(ks[6], (c, c), jnp.float32)
    p["dw_w"] = std * jax.random.normal(ks[7], (9, 1, c), jnp.float32)
    p["dw_s"], p["dw_b"] = _bn_fold(ks[8], c, 1e-6)
    p["proj_w"] = std * jax.random.normal(ks[9], (c, c), jnp.float32)
    # C2f.cv2 : 1x1 conv + BN(1e-5) + SiLU
    p["cv2_w"] = std * jax.random.normal(ks[10], ((2 + n) * c, c2), jnp.float32)
    p["cv2_s"], p["cv2_b"] = _bn_fold(ks[11], c2, 1e-5)
    return p


def fuse_params(p):
    """Fold the iRMB pre-norm into a fused qk|v weight, fold the attention scale
    into the q columns, split cv2 row-wise, and cast matmul/conv weights to bf16
    (f32 accumulation happens in-kernel)."""
    c = p["c"]
    f = dict(p)
    w_qkv = jnp.concatenate([p["qk_w"], p["v_w"]], axis=1)            # (c, 3c)
    b_qkv = p["irmb_norm_b"] @ w_qkv                                  # (3c,)
    w_qkv = p["irmb_norm_s"][:, None] * w_qkv
    attn_scale = float(p["dim_head"]) ** -0.5
    col_scale = jnp.concatenate([jnp.full((c,), attn_scale, jnp.float32),
                                 jnp.ones((2 * c,), jnp.float32)])
    f["qkv_w"] = (w_qkv * col_scale[None, :]).astype(_COMPUTE_DTYPE)
    f["qkv_b"] = (b_qkv * col_scale).astype(jnp.float32)
    f["cv2_w01"] = p["cv2_w"][: 2 * c].astype(_COMPUTE_DTYPE)
    f["cv2_w2"] = p["cv2_w"][2 * c:].astype(_COMPUTE_DTYPE)
    for k in ("cv1_w", "m_cv1_w", "proj_w", "dw_w"):
        f[k] = p[k].astype(_COMPUTE_DTYPE)
    for k in ("qk_w", "v_w", "cv2_w", "irmb_norm_s", "irmb_norm_b"):
        f.pop(k)
    return f


# ---------------------------------------------------------------------------
# forward pass
# ---------------------------------------------------------------------------
def irmb_forward(p, z):
    # z: (B, H, W, c) NHWC bf16. iRMB defaults: attn_s=True, exp_ratio=1,
    # has_skip=True, attn_pre=False, se_ratio=0, dw_ks=3, act=relu (v), ws=7.
    B, H, W, c = z.shape
    dh, heads, ws = p["dim_head"], p["num_head"], p["window_size"]
    M = B * H * W

    # fused pre-norm + qk + v (1x1 convs commute with the window rearrange;
    # padded positions stay exact zeros as in torch because padding zeros before
    # a bias-free projection == zero-padding the projected tensor).
    qkv = qkv_projection(z.reshape(M, c), p["qkv_w"], p["qkv_b"], relu_from=2 * c)
    qkv = qkv.reshape(B, H, W, 3 * c)

    pad_b, pad_r = (-H) % ws, (-W) % ws
    qkv = jnp.pad(qkv, ((0, 0), (0, pad_b), (0, pad_r), (0, 0)))
    Hp, Wp = H + pad_b, W + pad_r
    n1, n2 = Hp // ws, Wp // ws
    # 'b c (h1 n1) (w1 n2) -> (b n1 n2) c h1 w1' (strided windows), NHWC form
    qkv_w = (qkv.reshape(B, ws, n1, ws, n2, 3 * c)
                .transpose(0, 2, 4, 1, 3, 5)
                .reshape(B * n1 * n2, ws * ws, 3 * c))
    BW, S = B * n1 * n2, ws * ws

    def to_heads(a):  # (BW, S, heads*dh) -> (BW*heads, S, dh)
        return a.reshape(BW, S, heads, dh).transpose(0, 2, 1, 3).reshape(BW * heads, S, dh)

    q = to_heads(qkv_w[..., :c])
    k = to_heads(qkv_w[..., c:2 * c])
    v = to_heads(qkv_w[..., 2 * c:])
    o = window_attention(q, k, v)                                 # (BW*heads, S, dh)
    o = (o.reshape(BW, heads, S, dh)
           .transpose(0, 2, 1, 3)
           .reshape(BW, ws, ws, c))
    # '(b n1 n2) c h1 w1 -> b c (h1 n1) (w1 n2)' + crop padding
    x_spa = (o.reshape(B, n1, n2, ws, ws, c)
               .transpose(0, 3, 1, 4, 2, 5)
               .reshape(B, Hp, Wp, c))[:, :H, :W, :]
    # conv_local (depthwise 3x3 + BN + SiLU) fused with its skip connection
    u = dwconv3x3_bn_silu_res(x_spa, p["dw_w"], p["dw_s"], p["dw_b"])
    # proj (1x1, no norm / act) fused with the outer residual (shortcut = z)
    out = proj_residual(u.reshape(M, c), z.reshape(M, c), p["proj_w"])
    return out.reshape(B, H, W, c)


def c2f_irmb_forward(p, x_nchw):
    x = jnp.transpose(x_nchw, (0, 2, 3, 1)).astype(_COMPUTE_DTYPE)  # NCHW -> NHWC
    B, H, W, c1 = x.shape
    c, c2 = p["c"], p["c2"]
    M = B * H * W
    # cv1: 1x1 conv + BN + SiLU ; t = concat([y0, y1]) kept whole for cv2
    t = pointwise_bn_act(x.reshape(M, c1), p["cv1_w"], p["cv1_s"], p["cv1_b"],
                         act="silu")                                 # (M, 2c)
    y1 = t[:, c:].reshape(B, H, W, c)
    # Bottleneck_iRMB (shortcut=False -> no residual): iRMB(Conv3x3_BN_SiLU(y1))
    z = conv3x3_bn_silu(y1, p["m_cv1_w"], p["m_cv1_s"], p["m_cv1_b"])
    y2 = irmb_forward(p, z)
    # cv2 on concat([y0, y1, y2]) without materializing the concat; f32 out
    out = cv2_dual(t, y2.reshape(M, c), p["cv2_w01"], p["cv2_w2"],
                   p["cv2_s"], p["cv2_b"], out_dtype=jnp.float32)
    return jnp.transpose(out.reshape(B, H, W, c2), (0, 3, 1, 2))


# ---------------------------------------------------------------------------
if __name__ == "__main__":
    key = jax.random.PRNGKey(0)
    kx, kp = jax.random.split(key)
    # c2*e = 64 hidden channels => divisible by dim_head=64 (iRMB assert);
    # H = W = 14 is a multiple of window_size 7 (padding path exists, no-op here).
    B, c1, c2, H, W = 2, 16, 128, 14, 14
    x = jax.random.normal(kx, (B, c1, H, W), jnp.float32)
    params = fuse_params(init_params(kp, c1, c2, n=1))
    fwd = jax.jit(partial(c2f_irmb_forward, params))
    out = fwd(x)
    jax.block_until_ready(out)
    assert out.shape == (B, c2, H, W), out.shape
    assert out.dtype == jnp.float32
    assert bool(jnp.all(jnp.isfinite(out)))
    print("KERNEL_OK")
</pallas_src>

<mosaic_0001>
module attributes {stable_mosaic.version = 11 : i64} {
  func.func @_pw_kernel(%arg0: i32, %arg1: memref<392x16xbf16, #tpu.memory_space<vmem>>, %arg2: memref<16x128xbf16, #tpu.memory_space<vmem>>, %arg3: memref<1x128xf32, #tpu.memory_space<vmem>>, %arg4: memref<1x128xf32, #tpu.memory_space<vmem>>, %arg5: memref<392x128xbf16, #tpu.memory_space<vmem>>) attributes {dimension_semantics = [#tpu.dimension_semantics<parallel>], iteration_bounds = array<i64: 1>, scalar_prefetch = 0 : i64, scratch_operands = 0 : i64, tpu.core_type = #tpu.core_type<tc>, window_params = [{transform_indices = @transform_0, window_bounds = array<i64: 392, 16>}, {pipeline_mode = #tpu.pipeline_mode<synchronous>, transform_indices = @transform_1, window_bounds = array<i64: 16, 128>}, {pipeline_mode = #tpu.pipeline_mode<synchronous>, transform_indices = @transform_2, window_bounds = array<i64: 1, 128>}, {pipeline_mode = #tpu.pipeline_mode<synchronous>, transform_indices = @transform_3, window_bounds = array<i64: 1, 128>}, {transform_indices = @transform_4, window_bounds = array<i64: 392, 128>}]} {
    %c0 = arith.constant 0 : index
    %c0_0 = arith.constant 0 : index
    %0 = vector.load %arg1[%c0, %c0_0] : memref<392x16xbf16, #tpu.memory_space<vmem>>, vector<392x16xbf16>
    %c0_1 = arith.constant 0 : index
    %c0_2 = arith.constant 0 : index
    %1 = vector.load %arg2[%c0_1, %c0_2] : memref<16x128xbf16, #tpu.memory_space<vmem>>, vector<16x128xbf16>
    %cst = arith.constant dense<0.000000e+00> : vector<392x128xf32>
    %2 = tpu.matmul %0, %1, %cst {dimension_numbers = #tpu.dot_dimension_numbers<[1], [0], [0], [1], [0, 0, 1, 1], [], []>} : vector<392x16xbf16>, vector<16x128xbf16>, vector<392x128xf32> -> vector<392x128xf32>
    %c0_3 = arith.constant 0 : index
    %c0_4 = arith.constant 0 : index
    %3 = vector.load %arg3[%c0_3, %c0_4] : memref<1x128xf32, #tpu.memory_space<vmem>>, vector<1x128xf32>
    %4 = vector.broadcast %3 : vector<1x128xf32> to vector<392x128xf32>
    %5 = arith.mulf %2, %4 : vector<392x128xf32>
    %c0_5 = arith.constant 0 : index
    %c0_6 = arith.constant 0 : index
    %6 = vector.load %arg4[%c0_5, %c0_6] : memref<1x128xf32, #tpu.memory_space<vmem>>, vector<1x128xf32>
    %7 = vector.broadcast %6 : vector<1x128xf32> to vector<392x128xf32>
    %8 = arith.addf %5, %7 : vector<392x128xf32>
    %9 = arith.negf %8 : vector<392x128xf32>
    %10 = math.exp %9 : vector<392x128xf32>
    %cst_7 = arith.constant 1.000000e+00 : f32
    %11 = vector.broadcast %cst_7 : f32 to vector<392x128xf32>
    %12 = arith.addf %11, %10 : vector<392x128xf32>
    %13 = arith.divf %11, %12 : vector<392x128xf32>
    %14 = arith.mulf %8, %13 : vector<392x128xf32>
    %15 = arith.truncf %14 : vector<392x128xf32> to vector<392x128xbf16>
    %c0_8 = arith.constant 0 : index
    %c0_9 = arith.constant 0 : index
    %16 = vector.load %arg5[%c0_8, %c0_9] : memref<392x128xbf16, #tpu.memory_space<vmem>>, vector<392x128xbf16>
    tpu.vector_store %arg5[%c0_8, %c0_9], %15 {strides = array<i32>} : memref<392x128xbf16, #tpu.memory_space<vmem>>, vector<392x128xbf16>,
    return
  }
  func.func @transform_0(%arg0: i32) -> (i32, i32) {
    %c0_i32 = arith.constant 0 : i32
    %c0_i32_0 = arith.constant 0 : i32
    return %arg0, %c0_i32 : i32, i32
  }
  func.func @transform_1(%arg0: i32) -> (i32, i32) {
    %c0_i32 = arith.constant 0 : i32
    %c0_i32_0 = arith.constant 0 : i32
    %c0_i32_1 = arith.constant 0 : i32
    return %c0_i32, %c0_i32_0 : i32, i32
  }
  func.func @transform_2(%arg0: i32) -> (i32, i32) {
    %c0_i32 = arith.constant 0 : i32
    %c0_i32_0 = arith.constant 0 : i32
    %c0_i32_1 = arith.constant 0 : i32
    return %c0_i32, %c0_i32_0 : i32, i32
  }
  func.func @transform_3(%arg0: i32) -> (i32, i32) {
    %c0_i32 = arith.constant 0 : i32
    %c0_i32_0 = arith.constant 0 : i32
    %c0_i32_1 = arith.constant 0 : i32
    return %c0_i32, %c0_i32_0 : i32, i32
  }
  func.func @transform_4(%arg0: i32) -> (i32, i32) {
    %c0_i32 = arith.constant 0 : i32
    %c0_i32_0 = arith.constant 0 : i32
    return %arg0, %c0_i32 : i32, i32
  }
}

module attributes {stable_mosaic.version = 11 : i64} {
  func.func @_pw_kernel(%arg0: i32, %arg1: memref<392x576xbf16, #tpu.memory_space<vmem>>, %arg2: memref<576x64xbf16, #tpu.memory_space<vmem>>, %arg3: memref<1x64xf32, #tpu.memory_space<vmem>>, %arg4: memref<1x64xf32, #tpu.memory_space<vmem>>, %arg5: memref<392x64xbf16, #tpu.memory_space<vmem>>) attributes {dimension_semantics = [#tpu.dimension_semantics<parallel>], iteration_bounds = array<i64: 1>, scalar_prefetch = 0 : i64, scratch_operands = 0 : i64, tpu.core_type = #tpu.core_type<tc>, window_params = [{transform_indices = @transform_0, window_bounds = array<i64: 392, 576>}, {pipeline_mode = #tpu.pipeline_mode<synchronous>, transform_indices = @transform_1, window_bounds = array<i64: 576, 64>}, {pipeline_mode = #tpu.pipeline_mode<synchronous>, transform_indices = @transform_2, window_bounds = array<i64: 1, 64>}, {pipeline_mode = #tpu.pipeline_mode<synchronous>, transform_indices = @transform_3, window_bounds = array<i64: 1, 64>}, {transform_indices = @transform_4, window_bounds = array<i64: 392, 64>}]} {
    %c0 = arith.constant 0 : index
    %c0_0 = arith.constant 0 : index
    %0 = vector.load %arg1[%c0, %c0_0] : memref<392x576xbf16, #tpu.memory_space<vmem>>, vector<392x576xbf16>
    %c0_1 = arith.constant 0 : index
    %c0_2 = arith.constant 0 : index
    %1 = vector.load %arg2[%c0_1, %c0_2] : memref<576x64xbf16, #tpu.memory_space<vmem>>, vector<576x64xbf16>
    %cst = arith.constant dense<0.000000e+00> : vector<392x64xf32>
    %2 = tpu.matmul %0, %1, %cst {dimension_numbers = #tpu.dot_dimension_numbers<[1], [0], [0], [1], [0, 0, 1, 1], [], []>} : vector<392x576xbf16>, vector<576x64xbf16>, vector<392x64xf32> -> vector<392x64xf32>
    %c0_3 = arith.constant 0 : index
    %c0_4 = arith.constant 0 : index
    %3 = vector.load %arg3[%c0_3, %c0_4] : memref<1x64xf32, #tpu.memory_space<vmem>>, vector<1x64xf32>
    %4 = vector.broadcast %3 : vector<1x64xf32> to vector<392x64xf32>
    %5 = arith.mulf %2, %4 : vector<392x64xf32>
    %c0_5 = arith.constant 0 : index
    %c0_6 = arith.constant 0 : index
    %6 = vector.load %arg4[%c0_5, %c0_6] : memref<1x64xf32, #tpu.memory_space<vmem>>, vector<1x64xf32>
    %7 = vector.broadcast %6 : vector<1x64xf32> to vector<392x64xf32>
    %8 = arith.addf %5, %7 : vector<392x64xf32>
    %9 = arith.negf %8 : vector<392x64xf32>
    %10 = math.exp %9 : vector<392x64xf32>
    %cst_7 = arith.constant 1.000000e+00 : f32
    %11 = vector.broadcast %cst_7 : f32 to vector<392x64xf32>
    %12 = arith.addf %11, %10 : vector<392x64xf32>
    %13 = arith.divf %11, %12 : vector<392x64xf32>
    %14 = arith.mulf %8, %13 : vector<392x64xf32>
    %15 = arith.truncf %14 : vector<392x64xf32> to vector<392x64xbf16>
    %c0_8 = arith.constant 0 : index
    %c0_9 = arith.constant 0 : index
    %16 = vector.load %arg5[%c0_8, %c0_9] : memref<392x64xbf16, #tpu.memory_space<vmem>>, vector<392x64xbf16>
    tpu.vector_store %arg5[%c0_8, %c0_9], %15 {strides = array<i32>} : memref<392x64xbf16, #tpu.memory_space<vmem>>, vector<392x64xbf16>,
    return
  }
  func.func @transform_0(%arg0: i32) -> (i32, i32) {
    %c0_i32 = arith.constant 0 : i32
    %c0_i32_0 = arith.constant 0 : i32
    return %arg0, %c0_i32 : i32, i32
  }
  func.func @transform_1(%arg0: i32) -> (i32, i32) {
    %c0_i32 = arith.constant 0 : i32
    %c0_i32_0 = arith.constant 0 : i32
    %c0_i32_1 = arith.constant 0 : i32
    return %c0_i32, %c0_i32_0 : i32, i32
  }
  func.func @transform_2(%arg0: i32) -> (i32, i32) {
    %c0_i32 = arith.constant 0 : i32
    %c0_i32_0 = arith.constant 0 : i32
    %c0_i32_1 = arith.constant 0 : i32
    return %c0_i32, %c0_i32_0 : i32, i32
  }
  func.func @transform_3(%arg0: i32) -> (i32, i32) {
    %c0_i32 = arith.constant 0 : i32
    %c0_i32_0 = arith.constant 0 : i32
    %c0_i32_1 = arith.constant 0 : i32
    return %c0_i32, %c0_i32_0 : i32, i32
  }
  func.func @transform_4(%arg0: i32) -> (i32, i32) {
    %c0_i32 = arith.constant 0 : i32
    %c0_i32_0 = arith.constant 0 : i32
    return %arg0, %c0_i32 : i32, i32
  }
}

module attributes {stable_mosaic.version = 11 : i64} {
  func.func @_qkv_kernel(%arg0: i32, %arg1: memref<392x64xbf16, #tpu.memory_space<vmem>>, %arg2: memref<64x192xbf16, #tpu.memory_space<vmem>>, %arg3: memref<1x192xf32, #tpu.memory_space<vmem>>, %arg4: memref<392x192xbf16, #tpu.memory_space<vmem>>) attributes {dimension_semantics = [#tpu.dimension_semantics<parallel>], iteration_bounds = array<i64: 1>, scalar_prefetch = 0 : i64, scratch_operands = 0 : i64, tpu.core_type = #tpu.core_type<tc>, window_params = [{transform_indices = @transform_0, window_bounds = array<i64: 392, 64>}, {pipeline_mode = #tpu.pipeline_mode<synchronous>, transform_indices = @transform_1, window_bounds = array<i64: 64, 192>}, {pipeline_mode = #tpu.pipeline_mode<synchronous>, transform_indices = @transform_2, window_bounds = array<i64: 1, 192>}, {transform_indices = @transform_3, window_bounds = array<i64: 392, 192>}]} {
    %c0 = arith.constant 0 : index
    %c0_0 = arith.constant 0 : index
    %0 = vector.load %arg1[%c0, %c0_0] : memref<392x64xbf16, #tpu.memory_space<vmem>>, vector<392x64xbf16>
    %c0_1 = arith.constant 0 : index
    %c0_2 = arith.constant 0 : index
    %1 = vector.load %arg2[%c0_1, %c0_2] : memref<64x192xbf16, #tpu.memory_space<vmem>>, vector<64x192xbf16>
    %cst = arith.constant dense<0.000000e+00> : vector<392x192xf32>
    %2 = tpu.matmul %0, %1, %cst {dimension_numbers = #tpu.dot_dimension_numbers<[1], [0], [0], [1], [0, 0, 1, 1], [], []>} : vector<392x64xbf16>, vector<64x192xbf16>, vector<392x192xf32> -> vector<392x192xf32>
    %c0_3 = arith.constant 0 : index
    %c0_4 = arith.constant 0 : index
    %3 = vector.load %arg3[%c0_3, %c0_4] : memref<1x192xf32, #tpu.memory_space<vmem>>, vector<1x192xf32>
    %4 = vector.broadcast %3 : vector<1x192xf32> to vector<392x192xf32>
    %5 = arith.addf %2, %4 : vector<392x192xf32>
    %6 = tpu.iota {dimensions = array<i32: 1>} : vector<392x192xi32>
    %c128_i32 = arith.constant 128 : i32
    %7 = vector.broadcast %c128_i32 : i32 to vector<392x192xi32>
    %8 = arith.cmpi sge, %6, %7 : vector<392x192xi32>
    %cst_5 = arith.constant 0.000000e+00 : f32
    %9 = vector.broadcast %cst_5 : f32 to vector<392x192xf32>
    %10 = arith.maximumf %5, %9 : vector<392x192xf32>
    %11 = arith.select %8, %10, %5 : vector<392x192xi1>, vector<392x192xf32>
    %12 = arith.truncf %11 : vector<392x192xf32> to vector<392x192xbf16>
    %c0_6 = arith.constant 0 : index
    %c0_7 = arith.constant 0 : index
    %13 = vector.load %arg4[%c0_6, %c0_7] : memref<392x192xbf16, #tpu.memory_space<vmem>>, vector<392x192xbf16>
    tpu.vector_store %arg4[%c0_6, %c0_7], %12 {strides = array<i32>} : memref<392x192xbf16, #tpu.memory_space<vmem>>, vector<392x192xbf16>,
    return
  }
  func.func @transform_0(%arg0: i32) -> (i32, i32) {
    %c0_i32 = arith.constant 0 : i32
    %c0_i32_0 = arith.constant 0 : i32
    return %arg0, %c0_i32 : i32, i32
  }
  func.func @transform_1(%arg0: i32) -> (i32, i32) {
    %c0_i32 = arith.constant 0 : i32
    %c0_i32_0 = arith.constant 0 : i32
    %c0_i32_1 = arith.constant 0 : i32
    return %c0_i32, %c0_i32_0 : i32, i32
  }
  func.func @transform_2(%arg0: i32) -> (i32, i32) {
    %c0_i32 = arith.constant 0 : i32
    %c0_i32_0 = arith.constant 0 : i32
    %c0_i32_1 = arith.constant 0 : i32
    return %c0_i32, %c0_i32_0 : i32, i32
  }
  func.func @transform_3(%arg0: i32) -> (i32, i32) {
    %c0_i32 = arith.constant 0 : i32
    %c0_i32_0 = arith.constant 0 : i32
    return %arg0, %c0_i32 : i32, i32
  }
}

module attributes {stable_mosaic.version = 11 : i64} {
  func.func @_attn_kernel(%arg0: i32, %arg1: memref<4x49x64xbf16, #tpu.memory_space<vmem>>, %arg2: memref<4x49x64xbf16, #tpu.memory_space<vmem>>, %arg3: memref<4x49x64xbf16, #tpu.memory_space<vmem>>, %arg4: memref<4x49x64xbf16, #tpu.memory_space<vmem>>) attributes {dimension_semantics = [#tpu.dimension_semantics<parallel>], iteration_bounds = array<i64: 2>, scalar_prefetch = 0 : i64, scratch_operands = 0 : i64, tpu.core_type = #tpu.core_type<tc>, window_params = [{transform_indices = @transform_0, window_bounds = array<i64: 4, 49, 64>}, {transform_indices = @transform_1, window_bounds = array<i64: 4, 49, 64>}, {transform_indices = @transform_2, window_bounds = array<i64: 4, 49, 64>}, {transform_indices = @transform_3, window_bounds = array<i64: 4, 49, 64>}]} {
    %c0 = arith.constant 0 : index
    %c0_0 = arith.constant 0 : index
    %c0_1 = arith.constant 0 : index
    %0 = vector.load %arg1[%c0, %c0_0, %c0_1] : memref<4x49x64xbf16, #tpu.memory_space<vmem>>, vector<4x49x64xbf16>
    %c0_2 = arith.constant 0 : index
    %c0_3 = arith.constant 0 : index
    %c0_4 = arith.constant 0 : index
    %1 = vector.load %arg2[%c0_2, %c0_3, %c0_4] : memref<4x49x64xbf16, #tpu.memory_space<vmem>>, vector<4x49x64xbf16>
    "tpu.trace_start"() <{level = 10 : i32, message = "bqd,bkd->bqk"}> : () -> ()
    %cst = arith.constant dense<0.000000e+00> : vector<4x49x49xf32>
    %2 = tpu.matmul %0, %1, %cst {dimension_numbers = #tpu.dot_dimension_numbers<[2], [2], [1], [1], [0, 0, 0, 1, 1, 1], [0], [0]>} : vector<4x49x64xbf16>, vector<4x49x64xbf16>, vector<4x49x49xf32> -> vector<4x49x49xf32>
    "tpu.trace_stop"() : () -> ()
    %cst_5 = arith.constant dense<0xFF800000> : vector<4x49xf32>
    %3 = vector.multi_reduction <maximumf>, %2, %cst_5 [2] : vector<4x49x49xf32> to vector<4x49xf32>
    %4 = vector.shape_cast %3 : vector<4x49xf32> to vector<4x49x1xf32>
    %5 = vector.broadcast %4 : vector<4x49x1xf32> to vector<4x49x49xf32>
    %6 = arith.subf %2, %5 : vector<4x49x49xf32>
    %7 = math.exp %6 : vector<4x49x49xf32>
    %cst_6 = arith.constant dense<0.000000e+00> : vector<4x49xf32>
    %8 = vector.multi_reduction <add>, %7, %cst_6 [2] : vector<4x49x49xf32> to vector<4x49xf32>
    %9 = vector.shape_cast %8 : vector<4x49xf32> to vector<4x49x1xf32>
    %10 = tpu.reciprocal %9 {approx = true} : vector<4x49x1xf32> -> vector<4x49x1xf32>
    %11 = vector.broadcast %10 : vector<4x49x1xf32> to vector<4x49x49xf32>
    %12 = arith.mulf %7, %11 : vector<4x49x49xf32>
    %13 = arith.truncf %12 : vector<4x49x49xf32> to vector<4x49x49xbf16>
    %c0_7 = arith.constant 0 : index
    %c0_8 = arith.constant 0 : index
    %c0_9 = arith.constant 0 : index
    %14 = vector.load %arg3[%c0_7, %c0_8, %c0_9] : memref<4x49x64xbf16, #tpu.memory_space<vmem>>, vector<4x49x64xbf16>
    "tpu.trace_start"() <{level = 10 : i32, message = "bqk,bkd->bqd"}> : () -> ()
    %cst_10 = arith.constant dense<0.000000e+00> : vector<4x49x64xf32>
    %15 = tpu.matmul %13, %14, %cst_10 {dimension_numbers = #tpu.dot_dimension_numbers<[2], [1], [1], [2], [0, 0, 0, 1, 1, 2], [0], [0]>} : vector<4x49x49xbf16>, vector<4x49x64xbf16>, vector<4x49x64xf32> -> vector<4x49x64xf32>
    "tpu.trace_stop"() : () -> ()
    %16 = arith.truncf %15 : vector<4x49x64xf32> to vector<4x49x64xbf16>
    %c0_11 = arith.constant 0 : index
    %c0_12 = arith.constant 0 : index
    %c0_13 = arith.constant 0 : index
    %17 = vector.load %arg4[%c0_11, %c0_12, %c0_13] : memref<4x49x64xbf16, #tpu.memory_space<vmem>>, vector<4x49x64xbf16>
    tpu.vector_store %arg4[%c0_11, %c0_12, %c0_13], %16 {strides = array<i32>} : memref<4x49x64xbf16, #tpu.memory_space<vmem>>, vector<4x49x64xbf16>,
    return
  }
  func.func @transform_0(%arg0: i32) -> (i32, i32, i32) {
    %c0_i32 = arith.constant 0 : i32
    %c0_i32_0 = arith.constant 0 : i32
    %c0_i32_1 = arith.constant 0 : i32
    return %arg0, %c0_i32, %c0_i32_0 : i32, i32, i32
  }
  func.func @transform_1(%arg0: i32) -> (i32, i32, i32) {
    %c0_i32 = arith.constant 0 : i32
    %c0_i32_0 = arith.constant 0 : i32
    %c0_i32_1 = arith.constant 0 : i32
    return %arg0, %c0_i32, %c0_i32_0 : i32, i32, i32
  }
  func.func @transform_2(%arg0: i32) -> (i32, i32, i32) {
    %c0_i32 = arith.constant 0 : i32
    %c0_i32_0 = arith.constant 0 : i32
    %c0_i32_1 = arith.constant 0 : i32
    return %arg0, %c0_i32, %c0_i32_0 : i32, i32, i32
  }
  func.func @transform_3(%arg0: i32) -> (i32, i32, i32) {
    %c0_i32 = arith.constant 0 : i32
    %c0_i32_0 = arith.constant 0 : i32
    %c0_i32_1 = arith.constant 0 : i32
    return %arg0, %c0_i32, %c0_i32_0 : i32, i32, i32
  }
}

module attributes {stable_mosaic.version = 11 : i64} {
  func.func @_proj_res_kernel(%arg0: i32, %arg1: memref<392x64xbf16, #tpu.memory_space<vmem>>, %arg2: memref<392x64xbf16, #tpu.memory_space<vmem>>, %arg3: memref<64x64xbf16, #tpu.memory_space<vmem>>, %arg4: memref<392x64xbf16, #tpu.memory_space<vmem>>) attributes {dimension_semantics = [#tpu.dimension_semantics<parallel>], iteration_bounds = array<i64: 1>, scalar_prefetch = 0 : i64, scratch_operands = 0 : i64, tpu.core_type = #tpu.core_type<tc>, window_params = [{transform_indices = @transform_0, window_bounds = array<i64: 392, 64>}, {transform_indices = @transform_1, window_bounds = array<i64: 392, 64>}, {pipeline_mode = #tpu.pipeline_mode<synchronous>, transform_indices = @transform_2, window_bounds = array<i64: 64, 64>}, {transform_indices = @transform_3, window_bounds = array<i64: 392, 64>}]} {
    %c0 = arith.constant 0 : index
    %c0_0 = arith.constant 0 : index
    %0 = vector.load %arg1[%c0, %c0_0] : memref<392x64xbf16, #tpu.memory_space<vmem>>, vector<392x64xbf16>
    %c0_1 = arith.constant 0 : index
    %c0_2 = arith.constant 0 : index
    %1 = vector.load %arg3[%c0_1, %c0_2] : memref<64x64xbf16, #tpu.memory_space<vmem>>, vector<64x64xbf16>
    %cst = arith.constant dense<0.000000e+00> : vector<392x64xf32>
    %2 = tpu.matmul %0, %1, %cst {dimension_numbers = #tpu.dot_dimension_numbers<[1], [0], [0], [1], [0, 0, 1, 1], [], []>} : vector<392x64xbf16>, vector<64x64xbf16>, vector<392x64xf32> -> vector<392x64xf32>
    %c0_3 = arith.constant 0 : index
    %c0_4 = arith.constant 0 : index
    %3 = vector.load %arg2[%c0_3, %c0_4] : memref<392x64xbf16, #tpu.memory_space<vmem>>, vector<392x64xbf16>
    %4 = arith.extf %3 : vector<392x64xbf16> to vector<392x64xf32>
    %5 = arith.addf %2, %4 : vector<392x64xf32>
    %6 = arith.truncf %5 : vector<392x64xf32> to vector<392x64xbf16>
    %c0_5 = arith.constant 0 : index
    %c0_6 = arith.constant 0 : index
    %7 = vector.load %arg4[%c0_5, %c0_6] : memref<392x64xbf16, #tpu.memory_space<vmem>>, vector<392x64xbf16>
    tpu.vector_store %arg4[%c0_5, %c0_6], %6 {strides = array<i32>} : memref<392x64xbf16, #tpu.memory_space<vmem>>, vector<392x64xbf16>,
    return
  }
  func.func @transform_0(%arg0: i32) -> (i32, i32) {
    %c0_i32 = arith.constant 0 : i32
    %c0_i32_0 = arith.constant 0 : i32
    return %arg0, %c0_i32 : i32, i32
  }
  func.func @transform_1(%arg0: i32) -> (i32, i32) {
    %c0_i32 = arith.constant 0 : i32
    %c0_i32_0 = arith.constant 0 : i32
    return %arg0, %c0_i32 : i32, i32
  }
  func.func @transform_2(%arg0: i32) -> (i32, i32) {
    %c0_i32 = arith.constant 0 : i32
    %c0_i32_0 = arith.constant 0 : i32
    %c0_i32_1 = arith.constant 0 : i32
    return %c0_i32, %c0_i32_0 : i32, i32
  }
  func.func @transform_3(%arg0: i32) -> (i32, i32) {
    %c0_i32 = arith.constant 0 : i32
    %c0_i32_0 = arith.constant 0 : i32
    return %arg0, %c0_i32 : i32, i32
  }
}

module attributes {stable_mosaic.version = 11 : i64} {
  func.func @_cv2_kernel(%arg0: i32, %arg1: memref<392x128xbf16, #tpu.memory_space<vmem>>, %arg2: memref<392x64xbf16, #tpu.memory_space<vmem>>, %arg3: memref<128x128xbf16, #tpu.memory_space<vmem>>, %arg4: memref<64x128xbf16, #tpu.memory_space<vmem>>, %arg5: memref<1x128xf32, #tpu.memory_space<vmem>>, %arg6: memref<1x128xf32, #tpu.memory_space<vmem>>, %arg7: memref<392x128xf32, #tpu.memory_space<vmem>>) attributes {dimension_semantics = [#tpu.dimension_semantics<parallel>], iteration_bounds = array<i64: 1>, scalar_prefetch = 0 : i64, scratch_operands = 0 : i64, tpu.core_type = #tpu.core_type<tc>, window_params = [{transform_indices = @transform_0, window_bounds = array<i64: 392, 128>}, {transform_indices = @transform_1, window_bounds = array<i64: 392, 64>}, {pipeline_mode = #tpu.pipeline_mode<synchronous>, transform_indices = @transform_2, window_bounds = array<i64: 128, 128>}, {pipeline_mode = #tpu.pipeline_mode<synchronous>, transform_indices = @transform_3, window_bounds = array<i64: 64, 128>}, {pipeline_mode = #tpu.pipeline_mode<synchronous>, transform_indices = @transform_4, window_bounds = array<i64: 1, 128>}, {pipeline_mode = #tpu.pipeline_mode<synchronous>, transform_indices = @transform_5, window_bounds = array<i64: 1, 128>}, {transform_indices = @transform_6, window_bounds = array<i64: 392, 128>}]} {
    %c0 = arith.constant 0 : index
    %c0_0 = arith.constant 0 : index
    %0 = vector.load %arg1[%c0, %c0_0] : memref<392x128xbf16, #tpu.memory_space<vmem>>, vector<392x128xbf16>
    %c0_1 = arith.constant 0 : index
    %c0_2 = arith.constant 0 : index
    %1 = vector.load %arg3[%c0_1, %c0_2] : memref<128x128xbf16, #tpu.memory_space<vmem>>, vector<128x128xbf16>
    %cst = arith.constant dense<0.000000e+00> : vector<392x128xf32>
    %2 = tpu.matmul %0, %1, %cst {dimension_numbers = #tpu.dot_dimension_numbers<[1], [0], [0], [1], [0, 0, 1, 1], [], []>} : vector<392x128xbf16>, vector<128x128xbf16>, vector<392x128xf32> -> vector<392x128xf32>
    %c0_3 = arith.constant 0 : index
    %c0_4 = arith.constant 0 : index
    %3 = vector.load %arg2[%c0_3, %c0_4] : memref<392x64xbf16, #tpu.memory_space<vmem>>, vector<392x64xbf16>
    %c0_5 = arith.constant 0 : index
    %c0_6 = arith.constant 0 : index
    %4 = vector.load %arg4[%c0_5, %c0_6] : memref<64x128xbf16, #tpu.memory_space<vmem>>, vector<64x128xbf16>
    %cst_7 = arith.constant dense<0.000000e+00> : vector<392x128xf32>
    %5 = tpu.matmul %3, %4, %cst_7 {dimension_numbers = #tpu.dot_dimension_numbers<[1], [0], [0], [1], [0, 0, 1, 1], [], []>} : vector<392x64xbf16>, vector<64x128xbf16>, vector<392x128xf32> -> vector<392x128xf32>
    %6 = arith.addf %2, %5 : vector<392x128xf32>
    %c0_8 = arith.constant 0 : index
    %c0_9 = arith.constant 0 : index
    %7 = vector.load %arg5[%c0_8, %c0_9] : memref<1x128xf32, #tpu.memory_space<vmem>>, vector<1x128xf32>
    %8 = vector.broadcast %7 : vector<1x128xf32> to vector<392x128xf32>
    %9 = arith.mulf %6, %8 : vector<392x128xf32>
    %c0_10 = arith.constant 0 : index
    %c0_11 = arith.constant 0 : index
    %10 = vector.load %arg6[%c0_10, %c0_11] : memref<1x128xf32, #tpu.memory_space<vmem>>, vector<1x128xf32>
    %11 = vector.broadcast %10 : vector<1x128xf32> to vector<392x128xf32>
    %12 = arith.addf %9, %11 : vector<392x128xf32>
    %13 = arith.negf %12 : vector<392x128xf32>
    %14 = math.exp %13 : vector<392x128xf32>
    %cst_12 = arith.constant 1.000000e+00 : f32
    %15 = vector.broadcast %cst_12 : f32 to vector<392x128xf32>
    %16 = arith.addf %15, %14 : vector<392x128xf32>
    %17 = arith.divf %15, %16 : vector<392x128xf32>
    %18 = arith.mulf %12, %17 : vector<392x128xf32>
    %c0_13 = arith.constant 0 : index
    %c0_14 = arith.constant 0 : index
    %19 = vector.load %arg7[%c0_13, %c0_14] : memref<392x128xf32, #tpu.memory_space<vmem>>, vector<392x128xf32>
    tpu.vector_store %arg7[%c0_13, %c0_14], %18 {strides = array<i32>} : memref<392x128xf32, #tpu.memory_space<vmem>>, vector<392x128xf32>,
    return
  }
  func.func @transform_0(%arg0: i32) -> (i32, i32) {
    %c0_i32 = arith.constant 0 : i32
    %c0_i32_0 = arith.constant 0 : i32
    return %arg0, %c0_i32 : i32, i32
  }
  func.func @transform_1(%arg0: i32) -> (i32, i32) {
    %c0_i32 = arith.constant 0 : i32
    %c0_i32_0 = arith.constant 0 : i32
    return %arg0, %c0_i32 : i32, i32
  }
  func.func @transform_2(%arg0: i32) -> (i32, i32) {
    %c0_i32 = arith.constant 0 : i32
    %c0_i32_0 = arith.constant 0 : i32
    %c0_i32_1 = arith.constant 0 : i32
    return %c0_i32, %c0_i32_0 : i32, i32
  }
  func.func @transform_3(%arg0: i32) -> (i32, i32) {
    %c0_i32 = arith.constant 0 : i32
    %c0_i32_0 = arith.constant 0 : i32
    %c0_i32_1 = arith.constant 0 : i32
    return %c0_i32, %c0_i32_0 : i32, i32
  }
  func.func @transform_4(%arg0: i32) -> (i32, i32) {
    %c0_i32 = arith.constant 0 : i32
    %c0_i32_0 = arith.constant 0 : i32
    %c0_i32_1 = arith.constant 0 : i32
    return %c0_i32, %c0_i32_0 : i32, i32
  }
  func.func @transform_5(%arg0: i32) -> (i32, i32) {
    %c0_i32 = arith.constant 0 : i32
    %c0_i32_0 = arith.constant 0 : i32
    %c0_i32_1 = arith.constant 0 : i32
    return %c0_i32, %c0_i32_0 : i32, i32
  }
  func.func @transform_6(%arg0: i32) -> (i32, i32) {
    %c0_i32 = arith.constant 0 : i32
    %c0_i32_0 = arith.constant 0 : i32
    return %arg0, %c0_i32 : i32, i32
  }
}

module attributes {stable_mosaic.version = 11 : i64} {
  func.func @_dw_res_kernel(%arg0: i32, %arg1: memref<1x16x16x64xbf16, #tpu.memory_space<vmem>>, %arg2: memref<1x14x14x64xbf16, #tpu.memory_space<vmem>>, %arg3: memref<9x1x64xbf16, #tpu.memory_space<vmem>>, %arg4: memref<1x64xf32, #tpu.memory_space<vmem>>, %arg5: memref<1x64xf32, #tpu.memory_space<vmem>>, %arg6: memref<1x14x14x64xbf16, #tpu.memory_space<vmem>>) attributes {dimension_semantics = [#tpu.dimension_semantics<parallel>], iteration_bounds = array<i64: 2>, scalar_prefetch = 0 : i64, scratch_operands = 0 : i64, tpu.core_type = #tpu.core_type<tc>, window_params = [{transform_indices = @transform_0, window_bounds = array<i64: 1, 16, 16, 64>}, {transform_indices = @transform_1, window_bounds = array<i64: 1, 14, 14, 64>}, {pipeline_mode = #tpu.pipeline_mode<synchronous>, transform_indices = @transform_2, window_bounds = array<i64: 9, 1, 64>}, {pipeline_mode = #tpu.pipeline_mode<synchronous>, transform_indices = @transform_3, window_bounds = array<i64: 1, 64>}, {pipeline_mode = #tpu.pipeline_mode<synchronous>, transform_indices = @transform_4, window_bounds = array<i64: 1, 64>}, {transform_indices = @transform_5, window_bounds = array<i64: 1, 14, 14, 64>}]} {
    %cst = arith.constant 0.000000e+00 : f32
    %0 = vector.broadcast %cst : f32 to vector<14x14x64xf32>
    %c0 = arith.constant 0 : index
    %c0_0 = arith.constant 0 : index
    %c0_1 = arith.constant 0 : index
    %c0_2 = arith.constant 0 : index
    %1 = vector.load %arg1[%c0, %c0_0, %c0_1, %c0_2] : memref<1x16x16x64xbf16, #tpu.memory_space<vmem>>, vector<1x14x14x64xbf16>
    %2 = vector.shape_cast %1 : vector<1x14x14x64xbf16> to vector<14x14x64xbf16>
    %3 = arith.extf %2 : vector<14x14x64xbf16> to vector<14x14x64xf32>
    %c0_3 = arith.constant 0 : index
    %c0_4 = arith.constant 0 : index
    %c0_5 = arith.constant 0 : index
    %4 = vector.load %arg3[%c0_3, %c0_4, %c0_5] : memref<9x1x64xbf16, #tpu.memory_space<vmem>>, vector<1x1x64xbf16>
    %5 = vector.shape_cast %4 : vector<1x1x64xbf16> to vector<1x64xbf16>
    %6 = arith.extf %5 : vector<1x64xbf16> to vector<1x64xf32>
    %7 = vector.shape_cast %6 : vector<1x64xf32> to vector<1x1x64xf32>
    %8 = vector.broadcast %7 : vector<1x1x64xf32> to vector<14x14x64xf32>
    %9 = arith.mulf %3, %8 : vector<14x14x64xf32>
    %10 = arith.addf %0, %9 : vector<14x14x64xf32>
    %c0_6 = arith.constant 0 : index
    %c0_7 = arith.constant 0 : index
    %c1 = arith.constant 1 : index
    %c0_8 = arith.constant 0 : index
    %11 = vector.load %arg1[%c0_6, %c0_7, %c1, %c0_8] : memref<1x16x16x64xbf16, #tpu.memory_space<vmem>>, vector<1x14x14x64xbf16>
    %12 = vector.shape_cast %11 : vector<1x14x14x64xbf16> to vector<14x14x64xbf16>
    %13 = arith.extf %12 : vector<14x14x64xbf16> to vector<14x14x64xf32>
    %c1_9 = arith.constant 1 : index
    %c0_10 = arith.constant 0 : index
    %c0_11 = arith.constant 0 : index
    %14 = vector.load %arg3[%c1_9, %c0_10, %c0_11] : memref<9x1x64xbf16, #tpu.memory_space<vmem>>, vector<1x1x64xbf16>
    %15 = vector.shape_cast %14 : vector<1x1x64xbf16> to vector<1x64xbf16>
    %16 = arith.extf %15 : vector<1x64xbf16> to vector<1x64xf32>
    %17 = vector.shape_cast %16 : vector<1x64xf32> to vector<1x1x64xf32>
    %18 = vector.broadcast %17 : vector<1x1x64xf32> to vector<14x14x64xf32>
    %19 = arith.mulf %13, %18 : vector<14x14x64xf32>
    %20 = arith.addf %10, %19 : vector<14x14x64xf32>
    %c0_12 = arith.constant 0 : index
    %c0_13 = arith.constant 0 : index
    %c2 = arith.constant 2 : index
    %c0_14 = arith.constant 0 : index
    %21 = vector.load %arg1[%c0_12, %c0_13, %c2, %c0_14] : memref<1x16x16x64xbf16, #tpu.memory_space<vmem>>, vector<1x14x14x64xbf16>
    %22 = vector.shape_cast %21 : vector<1x14x14x64xbf16> to vector<14x14x64xbf16>
    %23 = arith.extf %22 : vector<14x14x64xbf16> to vector<14x14x64xf32>
    %c2_15 = arith.constant 2 : index
    %c0_16 = arith.constant 0 : index
    %c0_17 = arith.constant 0 : index
    %24 = vector.load %arg3[%c2_15, %c0_16, %c0_17] : memref<9x1x64xbf16, #tpu.memory_space<vmem>>, vector<1x1x64xbf16>
    %25 = vector.shape_cast %24 : vector<1x1x64xbf16> to vector<1x64xbf16>
    %26 = arith.extf %25 : vector<1x64xbf16> to vector<1x64xf32>
    %27 = vector.shape_cast %26 : vector<1x64xf32> to vector<1x1x64xf32>
    %28 = vector.broadcast %27 : vector<1x1x64xf32> to vector<14x14x64xf32>
    %29 = arith.mulf %23, %28 : vector<14x14x64xf32>
    %30 = arith.addf %20, %29 : vector<14x14x64xf32>
    %c0_18 = arith.constant 0 : index
    %c1_19 = arith.constant 1 : index
    %c0_20 = arith.constant 0 : index
    %c0_21 = arith.constant 0 : index
    %31 = vector.load %arg1[%c0_18, %c1_19, %c0_20, %c0_21] : memref<1x16x16x64xbf16, #tpu.memory_space<vmem>>, vector<1x14x14x64xbf16>
    %32 = vector.shape_cast %31 : vector<1x14x14x64xbf16> to vector<14x14x64xbf16>
    %33 = arith.extf %32 : vector<14x14x64xbf16> to vector<14x14x64xf32>
    %c3 = arith.constant 3 : index
    %c0_22 = arith.constant 0 : index
    %c0_23 = arith.constant 0 : index
    %34 = vector.load %arg3[%c3, %c0_22, %c0_23] : memref<9x1x64xbf16, #tpu.memory_space<vmem>>, vector<1x1x64xbf16>
    %35 = vector.shape_cast %34 : vector<1x1x64xbf16> to vector<1x64xbf16>
    %36 = arith.extf %35 : vector<1x64xbf16> to vector<1x64xf32>
    %37 = vector.shape_cast %36 : vector<1x64xf32> to vector<1x1x64xf32>
    %38 = vector.broadcast %37 : vector<1x1x64xf32> to vector<14x14x64xf32>
    %39 = arith.mulf %33, %38 : vector<14x14x64xf32>
    %40 = arith.addf %30, %39 : vector<14x14x64xf32>
    %c0_24 = arith.constant 0 : index
    %c1_25 = arith.constant 1 : index
    %c1_26 = arith.constant 1 : index
    %c0_27 = arith.constant 0 : index
    %41 = vector.load %arg1[%c0_24, %c1_25, %c1_26, %c0_27] : memref<1x16x16x64xbf16, #tpu.memory_space<vmem>>, vector<1x14x14x64xbf16>
    %42 = vector.shape_cast %41 : vector<1x14x14x64xbf16> to vector<14x14x64xbf16>
    %43 = arith.extf %42 : vector<14x14x64xbf16> to vector<14x14x64xf32>
    %c4 = arith.constant 4 : index
    %c0_28 = arith.constant 0 : index
    %c0_29 = arith.constant 0 : index
    %44 = vector.load %arg3[%c4, %c0_28, %c0_29] : memref<9x1x64xbf16, #tpu.memory_space<vmem>>, vector<1x1x64xbf16>
    %45 = vector.shape_cast %44 : vector<1x1x64xbf16> to vector<1x64xbf16>
    %46 = arith.extf %45 : vector<1x64xbf16> to vector<1x64xf32>
    %47 = vector.shape_cast %46 : vector<1x64xf32> to vector<1x1x64xf32>
    %48 = vector.broadcast %47 : vector<1x1x64xf32> to vector<14x14x64xf32>
    %49 = arith.mulf %43, %48 : vector<14x14x64xf32>
    %50 = arith.addf %40, %49 : vector<14x14x64xf32>
    %c0_30 = arith.constant 0 : index
    %c1_31 = arith.constant 1 : index
    %c2_32 = arith.constant 2 : index
    %c0_33 = arith.constant 0 : index
    %51 = vector.load %arg1[%c0_30, %c1_31, %c2_32, %c0_33] : memref<1x16x16x64xbf16, #tpu.memory_space<vmem>>, vector<1x14x14x64xbf16>
    %52 = vector.shape_cast %51 : vector<1x14x14x64xbf16> to vector<14x14x64xbf16>
    %53 = arith.extf %52 : vector<14x14x64xbf16> to vector<14x14x64xf32>
    %c5 = arith.constant 5 : index
    %c0_34 = arith.constant 0 : index
    %c0_35 = arith.constant 0 : index
    %54 = vector.load %arg3[%c5, %c0_34, %c0_35] : memref<9x1x64xbf16, #tpu.memory_space<vmem>>, vector<1x1x64xbf16>
    %55 = vector.shape_cast %54 : vector<1x1x64xbf16> to vector<1x64xbf16>
    %56 = arith.extf %55 : vector<1x64xbf16> to vector<1x64xf32>
    %57 = vector.shape_cast %56 : vector<1x64xf32> to vector<1x1x64xf32>
    %58 = vector.broadcast %57 : vector<1x1x64xf32> to vector<14x14x64xf32>
    %59 = arith.mulf %53, %58 : vector<14x14x64xf32>
    %60 = arith.addf %50, %59 : vector<14x14x64xf32>
    %c0_36 = arith.constant 0 : index
    %c2_37 = arith.constant 2 : index
    %c0_38 = arith.constant 0 : index
    %c0_39 = arith.constant 0 : index
    %61 = vector.load %arg1[%c0_36, %c2_37, %c0_38, %c0_39] : memref<1x16x16x64xbf16, #tpu.memory_space<vmem>>, vector<1x14x14x64xbf16>
    %62 = vector.shape_cast %61 : vector<1x14x14x64xbf16> to vector<14x14x64xbf16>
    %63 = arith.extf %62 : vector<14x14x64xbf16> to vector<14x14x64xf32>
    %c6 = arith.constant 6 : index
    %c0_40 = arith.constant 0 : index
    %c0_41 = arith.constant 0 : index
    %64 = vector.load %arg3[%c6, %c0_40, %c0_41] : memref<9x1x64xbf16, #tpu.memory_space<vmem>>, vector<1x1x64xbf16>
    %65 = vector.shape_cast %64 : vector<1x1x64xbf16> to vector<1x64xbf16>
    %66 = arith.extf %65 : vector<1x64xbf16> to vector<1x64xf32>
    %67 = vector.shape_cast %66 : vector<1x64xf32> to vector<1x1x64xf32>
    %68 = vector.broadcast %67 : vector<1x1x64xf32> to vector<14x14x64xf32>
    %69 = arith.mulf %63, %68 : vector<14x14x64xf32>
    %70 = arith.addf %60, %69 : vector<14x14x64xf32>
    %c0_42 = arith.constant 0 : index
    %c2_43 = arith.constant 2 : index
    %c1_44 = arith.constant 1 : index
    %c0_45 = arith.constant 0 : index
    %71 = vector.load %arg1[%c0_42, %c2_43, %c1_44, %c0_45] : memref<1x16x16x64xbf16, #tpu.memory_space<vmem>>, vector<1x14x14x64xbf16>
    %72 = vector.shape_cast %71 : vector<1x14x14x64xbf16> to vector<14x14x64xbf16>
    %73 = arith.extf %72 : vector<14x14x64xbf16> to vector<14x14x64xf32>
    %c7 = arith.constant 7 : index
    %c0_46 = arith.constant 0 : index
    %c0_47 = arith.constant 0 : index
    %74 = vector.load %arg3[%c7, %c0_46, %c0_47] : memref<9x1x64xbf16, #tpu.memory_space<vmem>>, vector<1x1x64xbf16>
    %75 = vector.shape_cast %74 : vector<1x1x64xbf16> to vector<1x64xbf16>
    %76 = arith.extf %75 : vector<1x64xbf16> to vector<1x64xf32>
    %77 = vector.shape_cast %76 : vector<1x64xf32> to vector<1x1x64xf32>
    %78 = vector.broadcast %77 : vector<1x1x64xf32> to vector<14x14x64xf32>
    %79 = arith.mulf %73, %78 : vector<14x14x64xf32>
    %80 = arith.addf %70, %79 : vector<14x14x64xf32>
    %c0_48 = arith.constant 0 : index
    %c2_49 = arith.constant 2 : index
    %c2_50 = arith.constant 2 : index
    %c0_51 = arith.constant 0 : index
    %81 = vector.load %arg1[%c0_48, %c2_49, %c2_50, %c0_51] : memref<1x16x16x64xbf16, #tpu.memory_space<vmem>>, vector<1x14x14x64xbf16>
    %82 = vector.shape_cast %81 : vector<1x14x14x64xbf16> to vector<14x14x64xbf16>
    %83 = arith.extf %82 : vector<14x14x64xbf16> to vector<14x14x64xf32>
    %c8 = arith.constant 8 : index
    %c0_52 = arith.constant 0 : index
    %c0_53 = arith.constant 0 : index
    %84 = vector.load %arg3[%c8, %c0_52, %c0_53] : memref<9x1x64xbf16, #tpu.memory_space<vmem>>, vector<1x1x64xbf16>
    %85 = vector.shape_cast %84 : vector<1x1x64xbf16> to vector<1x64xbf16>
    %86 = arith.extf %85 : vector<1x64xbf16> to vector<1x64xf32>
    %87 = vector.shape_cast %86 : vector<1x64xf32> to vector<1x1x64xf32>
    %88 = vector.broadcast %87 : vector<1x1x64xf32> to vector<14x14x64xf32>
    %89 = arith.mulf %83, %88 : vector<14x14x64xf32>
    %90 = arith.addf %80, %89 : vector<14x14x64xf32>
    %c0_54 = arith.constant 0 : index
    %c0_55 = arith.constant 0 : index
    %91 = vector.load %arg4[%c0_54, %c0_55] : memref<1x64xf32, #tpu.memory_space<vmem>>, vector<1x64xf32>
    %92 = vector.shape_cast %91 : vector<1x64xf32> to vector<1x1x64xf32>
    %93 = vector.broadcast %92 : vector<1x1x64xf32> to vector<14x14x64xf32>
    %94 = arith.mulf %90, %93 : vector<14x14x64xf32>
    %c0_56 = arith.constant 0 : index
    %c0_57 = arith.constant 0 : index
    %95 = vector.load %arg5[%c0_56, %c0_57] : memref<1x64xf32, #tpu.memory_space<vmem>>, vector<1x64xf32>
    %96 = vector.shape_cast %95 : vector<1x64xf32> to vector<1x1x64xf32>
    %97 = vector.broadcast %96 : vector<1x1x64xf32> to vector<14x14x64xf32>
    %98 = arith.addf %94, %97 : vector<14x14x64xf32>
    %99 = arith.negf %98 : vector<14x14x64xf32>
    %100 = math.exp %99 : vector<14x14x64xf32>
    %cst_58 = arith.constant 1.000000e+00 : f32
    %101 = vector.broadcast %cst_58 : f32 to vector<14x14x64xf32>
    %102 = arith.addf %101, %100 : vector<14x14x64xf32>
    %103 = arith.divf %101, %102 : vector<14x14x64xf32>
    %104 = arith.mulf %98, %103 : vector<14x14x64xf32>
    %c0_59 = arith.constant 0 : index
    %c0_60 = arith.constant 0 : index
    %c0_61 = arith.constant 0 : index
    %c0_62 = arith.constant 0 : index
    %105 = vector.load %arg2[%c0_59, %c0_60, %c0_61, %c0_62] : memref<1x14x14x64xbf16, #tpu.memory_space<vmem>>, vector<1x14x14x64xbf16>
    %106 = vector.shape_cast %105 : vector<1x14x14x64xbf16> to vector<14x14x64xbf16>
    %107 = arith.extf %106 : vector<14x14x64xbf16> to vector<14x14x64xf32>
    %108 = arith.addf %104, %107 : vector<14x14x64xf32>
    %109 = arith.truncf %108 : vector<14x14x64xf32> to vector<14x14x64xbf16>
    %c0_63 = arith.constant 0 : index
    %c0_64 = arith.constant 0 : index
    %c0_65 = arith.constant 0 : index
    %c0_66 = arith.constant 0 : index
    %110 = vector.load %arg6[%c0_63, %c0_64, %c0_65, %c0_66] : memref<1x14x14x64xbf16, #tpu.memory_space<vmem>>, vector<1x14x14x64xbf16>
    %111 = vector.shape_cast %110 : vector<1x14x14x64xbf16> to vector<14x14x64xbf16>
    %112 = vector.shape_cast %109 : vector<14x14x64xbf16> to vector<1x14x14x64xbf16>
    tpu.vector_store %arg6[%c0_63, %c0_64, %c0_65, %c0_66], %112 {strides = array<i32>} : memref<1x14x14x64xbf16, #tpu.memory_space<vmem>>, vector<1x14x14x64xbf16>,
    return
  }
  func.func @transform_0(%arg0: i32) -> (i32, i32, i32, i32) {
    %c0_i32 = arith.constant 0 : i32
    %c0_i32_0 = arith.constant 0 : i32
    %c0_i32_1 = arith.constant 0 : i32
    %c0_i32_2 = arith.constant 0 : i32
    return %arg0, %c0_i32, %c0_i32_0, %c0_i32_1 : i32, i32, i32, i32
  }
  func.func @transform_1(%arg0: i32) -> (i32, i32, i32, i32) {
    %c0_i32 = arith.constant 0 : i32
    %c0_i32_0 = arith.constant 0 : i32
    %c0_i32_1 = arith.constant 0 : i32
    %c0_i32_2 = arith.constant 0 : i32
    return %arg0, %c0_i32, %c0_i32_0, %c0_i32_1 : i32, i32, i32, i32
  }
  func.func @transform_2(%arg0: i32) -> (i32, i32, i32) {
    %c0_i32 = arith.constant 0 : i32
    %c0_i32_0 = arith.constant 0 : i32
    %c0_i32_1 = arith.constant 0 : i32
    %c0_i32_2 = arith.constant 0 : i32
    return %c0_i32, %c0_i32_0, %c0_i32_1 : i32, i32, i32
  }
  func.func @transform_3(%arg0: i32) -> (i32, i32) {
    %c0_i32 = arith.constant 0 : i32
    %c0_i32_0 = arith.constant 0 : i32
    %c0_i32_1 = arith.constant 0 : i32
    return %c0_i32, %c0_i32_0 : i32, i32
  }
  func.func @transform_4(%arg0: i32) -> (i32, i32) {
    %c0_i32 = arith.constant 0 : i32
    %c0_i32_0 = arith.constant 0 : i32
    %c0_i32_1 = arith.constant 0 : i32
    return %c0_i32, %c0_i32_0 : i32, i32
  }
  func.func @transform_5(%arg0: i32) -> (i32, i32, i32, i32) {
    %c0_i32 = arith.constant 0 : i32
    %c0_i32_0 = arith.constant 0 : i32
    %c0_i32_1 = arith.constant 0 : i32
    %c0_i32_2 = arith.constant 0 : i32
    return %arg0, %c0_i32, %c0_i32_0, %c0_i32_1 : i32, i32, i32, i32
  }
}

</mosaic_0001>

<bundles_post_ra>
// kernel: c2f_irmb_forward.7
= control target key start
LH: loop header
LB: loop body
LE: loop exit
PB: predicated region body
PF: predicated region fallthrough
CT: control target
= control target key end

     0   :  { %v1909_v0 = vmov 0.0   ;;  %vm1910_vm0 = vmmov 0   ;;  %vm198_vm1 = vcmask 130048   ;;  %s2472_s1 = inlined_call_operand.vmem [shape: bf16[16,128], index: 1, kind: input, shape index: {}]   ;;  %s2473_s0 = inlined_call_operand.vmem [shape: bf16[392,16], index: 0, kind: input, shape index: {}]   ;;  %s2474_s2 = inlined_call_operand.vmem [shape: f32[1,128], index: 2, kind: input, shape index: {}]   ;;  %s2475_s3 = inlined_call_operand.vmem [shape: f32[1,128], index: 3, kind: input, shape index: {}]   ;;  %s2476_s4 = inlined_call_operand.vmem [shape: bf16[392,128], index: 4, kind: output, shape index: {}]  }
   0x1   :  { %1580 = vmatprep.subr.bf16.mxu0 %v1909_v0  ;;  %1682 = vmatprep.subr.bf16.mxu1 %v1909_v0  ;;  %v1686_v1 = vld [vmem:[%s2472_s1] sm:$0xff]   ;;  %v1688_v3 = vld [vmem:[%s2473_s0 + $0x68] sm:$0xff]   ;;  %v1690_v5 = vld [vmem:[%s2473_s0 + $0x70] sm:$0xff]  }
   0x2   :  { %1582 = vmatprep.mubr.msk.bf16.mxu0 %vm1910_vm0, %v1909_v0  ;;  %1634 = vmatprep.mubr.msk.bf16.mxu1 %vm1910_vm0, %v1909_v0  ;;  %v1687_v2 = vld [vmem:[%s2473_s0] sm:$0xff]   ;;  %v1689_v4 = vld [vmem:[%s2473_s0 + $0x8] sm:$0xff]   ;;  %v1691_v6 = vld [vmem:[%s2473_s0 + $0x10] sm:$0xff]  }
   0x3   :  { %1581 = vmatpush3.bf16.msra.mxu0 %v1686_v1  ;;  %1683 = vmatpush3.bf16.msra.mxu1 %v1686_v1  ;;  %v1692_v7 = vld [vmem:[%s2473_s0 + $0x78] sm:$0xff]   ;;  %v1694_v9 = vld [vmem:[%s2473_s0 + $0x80] sm:$0xff]   ;;  %v1696_v11 = vld [vmem:[%s2473_s0 + $0x88] sm:$0xff]  }
   0x4   :  { %v1693_v8 = vld [vmem:[%s2473_s0 + $0x18] sm:$0xff]   ;;  %v1695_v10 = vld [vmem:[%s2473_s0 + $0x20] sm:$0xff]   ;;  %v1697_v12 = vld [vmem:[%s2473_s0 + $0x28] sm:$0xff]  }
   0x5   :  { %v1698_v13 = vld [vmem:[%s2473_s0 + $0x90] sm:$0xff]   ;;  %v1700_v15 = vld [vmem:[%s2473_s0 + $0x98] sm:$0xff]   ;;  %v1702_v17 = vld [vmem:[%s2473_s0 + $0xa0] sm:$0xff]  }
   0x6   :  { %1583 = vmatmul.mubr.msk.bf16.vlgmr.msra.gmra.mrb[0].mxu0 %vm198_vm1, %v1687_v2  ;;  %1635 = vmatmul.mubr.msk.bf16.vlgmr.msra.gmra.mrb[0].mxu1 %vm198_vm1, %v1688_v3  ;;  %v1699_v14 = vld [vmem:[%s2473_s0 + $0x30] sm:$0xff]   ;;  %v1701_v16 = vld [vmem:[%s2473_s0 + $0x38] sm:$0xff]   ;;  %v1703_v18 = vld [vmem:[%s2473_s0 + $0x40] sm:$0xff]  }
   0x7   :  { %1586 = vmatprep.mubr.msk.bf16.mxu0 %vm1910_vm0, %v1909_v0  ;;  %1638 = vmatprep.mubr.msk.bf16.mxu1 %vm1910_vm0, %v1909_v0  ;;  %v1704_v19 = vld [vmem:[%s2473_s0 + $0xa8] sm:$0xff]   ;;  %v1706_v21 = vld [vmem:[%s2473_s0 + $0xb0] sm:$0xff]   ;;  %v1708_v23 = vld [vmem:[%s2473_s0 + $0xb8] sm:$0xff]  }
   0x8   :  { %v1705_v20 = vld [vmem:[%s2473_s0 + $0x48] sm:$0xff]   ;;  %v1707_v22 = vld [vmem:[%s2473_s0 + $0x50] sm:$0xff]   ;;  %v1709_v24 = vld [vmem:[%s2473_s0 + $0x58] sm:$0xff]  }
   0x9   :  { %v1710_v25 = vld [vmem:[%s2473_s0 + $0xc0] ss:$0 sps:$4 sm:$0xff]  }
   0xa   :  { %v1711_v26 = vld [vmem:[%s2473_s0 + $0x60] sm:$0xff]  }
   0xb   :  { %v2094_v27 = vld [vmem:[%s2474_s2] ss:$0 sm:$0xff] }
   0xc   :  { %v2099_v29 = vld [vmem:[%s2475_s3] ss:$0 sm:$0xff] }
   0xe   :  { %1587 = vmatmul.mubr.msk.bf16.gmra.mrb[4].mxu0 %vm198_vm1, %v1689_v4  ;;  %1639 = vmatmul.mubr.msk.bf16.gmra.mrb[4].mxu1 %vm198_vm1, %v1690_v5 }
   0xf   :  { %1590 = vmatprep.mubr.msk.bf16.mxu0 %vm1910_vm0, %v1909_v0  ;;  %1642 = vmatprep.mubr.msk.bf16.mxu1 %vm1910_vm0, %v1909_v0 }
  0x16   :  { %1591 = vmatmul.mubr.msk.bf16.gmra.mrb[8].mxu0 %vm198_vm1, %v1691_v6  ;;  %1643 = vmatmul.mubr.msk.bf16.gmra.mrb[8].mxu1 %vm198_vm1, %v1692_v7 }
  0x17   :  { %1594 = vmatprep.mubr.msk.bf16.mxu0 %vm1910_vm0, %v1909_v0  ;;  %1646 = vmatprep.mubr.msk.bf16.mxu1 %vm1910_vm0, %v1909_v0 }
  0x1e   :  { %1595 = vmatmul.mubr.msk.bf16.gmra.mrb[12].mxu0 %vm198_vm1, %v1693_v8  ;;  %1647 = vmatmul.mubr.msk.bf16.gmra.mrb[12].mxu1 %vm198_vm1, %v1694_v9 }
  0x1f   :  { %1598 = vmatprep.mubr.msk.bf16.mxu0 %vm1910_vm0, %v1909_v0  ;;  %1650 = vmatprep.mubr.msk.bf16.mxu1 %vm1910_vm0, %v1909_v0 }
  0x26   :  { %1599 = vmatmul.mubr.msk.bf16.gmra.mrb[16].mxu0 %vm198_vm1, %v1695_v10  ;;  %1651 = vmatmul.mubr.msk.bf16.gmra.mrb[16].mxu1 %vm198_vm1, %v1696_v11 }
  0x27   :  { %1602 = vmatprep.mubr.msk.bf16.mxu0 %vm1910_vm0, %v1909_v0  ;;  %1654 = vmatprep.mubr.msk.bf16.mxu1 %vm1910_vm0, %v1909_v0 }
  0x2e   :  { %1603 = vmatmul.mubr.msk.bf16.gmra.mrb[20].mxu0 %vm198_vm1, %v1697_v12  ;;  %1655 = vmatmul.mubr.msk.bf16.gmra.mrb[20].mxu1 %vm198_vm1, %v1698_v13 }
  0x2f   :  { %1606 = vmatprep.mubr.msk.bf16.mxu0 %vm1910_vm0, %v1909_v0  ;;  %1658 = vmatprep.mubr.msk.bf16.mxu1 %vm1910_vm0, %v1909_v0 }
  0x36   :  { %1607 = vmatmul.mubr.msk.bf16.gmra.mrb[24].mxu0 %vm198_vm1, %v1699_v14  ;;  %1659 = vmatmul.mubr.msk.bf16.gmra.mrb[24].mxu1 %vm198_vm1, %v1700_v15 }
  0x37   :  { %1610 = vmatprep.mubr.msk.bf16.mxu0 %vm1910_vm0, %v1909_v0  ;;  %1662 = vmatprep.mubr.msk.bf16.mxu1 %vm1910_vm0, %v1909_v0 }
  0x3e   :  { %1611 = vmatmul.mubr.msk.bf16.gmra.mrb[28].mxu0 %vm198_vm1, %v1701_v16  ;;  %1663 = vmatmul.mubr.msk.bf16.gmra.mrb[28].mxu1 %vm198_vm1, %v1702_v17 }
  0x3f   :  { %1614 = vmatprep.mubr.msk.bf16.mxu0 %vm1910_vm0, %v1909_v0  ;;  %1666 = vmatprep.mubr.msk.bf16.mxu1 %vm1910_vm0, %v1909_v0 }
  0x46   :  { %1615 = vmatmul.mubr.msk.bf16.gmra.mrb[32].mxu0 %vm198_vm1, %v1703_v18  ;;  %1667 = vmatmul.mubr.msk.bf16.gmra.mrb[32].mxu1 %vm198_vm1, %v1704_v19 }
  0x47   :  { %1618 = vmatprep.mubr.msk.bf16.mxu0 %vm1910_vm0, %v1909_v0  ;;  %1670 = vmatprep.mubr.msk.bf16.mxu1 %vm1910_vm0, %v1909_v0 }
  0x4e   :  { %1619 = vmatmul.mubr.msk.bf16.gmra.mrb[36].mxu0 %vm198_vm1, %v1705_v20  ;;  %1671 = vmatmul.mubr.msk.bf16.gmra.mrb[36].mxu1 %vm198_vm1, %v1706_v21 }
  0x4f   :  { %1622 = vmatprep.mubr.msk.bf16.mxu0 %vm1910_vm0, %v1909_v0  ;;  %1674 = vmatprep.mubr.msk.bf16.mxu1 %vm1910_vm0, %v1909_v0 }
  0x56   :  { %1623 = vmatmul.mubr.msk.bf16.gmra.mrb[40].mxu0 %vm198_vm1, %v1707_v22  ;;  %1675 = vmatmul.mubr.msk.bf16.gmra.mrb[40].mxu1 %vm198_vm1, %v1708_v23 }
  0x57   :  { %1626 = vmatprep.mubr.msk.bf16.mxu0 %vm1910_vm0, %v1909_v0  ;;  %1678 = vmatprep.mubr.msk.bf16.mxu1 %vm1910_vm0, %v1909_v0 }
  0x5e   :  { %1627 = vmatmul.mubr.msk.bf16.gmra.mrb[44].mxu0 %vm198_vm1, %v1709_v24  ;;  %1679 = vmatmul.mubr.msk.bf16.gmra.mrb[44].mxu1 %vm198_vm1, %v1710_v25 }
  0x5f   :  { %1630 = vmatprep.mubr.msk.bf16.mxu0 %vm1910_vm0, %v1909_v0 }
  0x66   :  { %1631 = vmatmul.mubr.msk.bf16.gmra.mrb[48].mxu0 %vm198_vm1, %v1711_v26 }
  0xd9   :  { %v308_v28 = vpop.f32.mrb[0].mxu0  ;;  %v412_v30 = vpop.f32.mrb[0].mxu1 }
  0xda   :  { %v513_v31 = vmul.f32 %v2094_v27, %v308_v28  ;;  %v539_v32 = vmul.f32 %v2094_v27, %v412_v30  ;;  %v1584_v33 = vpop.f32.mrb[1].mxu0  ;;  %v1636_v34 = vpop.f32.mrb[1].mxu1 }
  0xdb   :  { %v311_v35 = vpop.f32.mrb[2].mxu0  ;;  %v415_v36 = vpop.f32.mrb[2].mxu1 }
  0xdc   :  { %v2104_v37 = vadd.f32 %v2099_v29, %v513_v31  ;;  %v2107_v38 = vadd.f32 %v2099_v29, %v539_v32  ;;  %v514_v39 = vmul.f32 %v2094_v27, %v311_v35  ;;  %v540_v40 = vmul.f32 %v2094_v27, %v415_v36  ;;  %v1585_v41 = vpop.f32.mrb[3].mxu0  ;;  %v1637_v42 = vpop.f32.mrb[3].mxu1 }
  0xde   :  { %v1264_v43 = vmul.f32 -1.442695, %v2104_v37  ;;  %v1290_v44 = vmul.f32 -1.442695, %v2107_v38  ;;  %v2114_v45 = vadd.f32 %v2099_v29, %v514_v39  ;;  %v2117_v46 = vadd.f32 %v2099_v29, %v540_v40 }
  0xe0   :  { %1712 = vpow2.f32 %v1264_v43  ;;  %v1265_v47 = vmul.f32 -1.442695, %v2114_v45  ;;  %v1291_v48 = vmul.f32 -1.442695, %v2117_v46 }
  0xe1   :  { %1714 = vpow2.f32 %v1290_v44  ;;  %v316_v49 = vpop.f32.mrb[4].mxu0  ;;  %v420_v50 = vpop.f32.mrb[4].mxu1 }
  0xe2   :  { %1716 = vpow2.f32 %v1265_v47  ;;  %v515_v51 = vmul.f32 %v2094_v27, %v316_v49  ;;  %v541_v52 = vmul.f32 %v2094_v27, %v420_v50  ;;  %v1588_v53 = vpop.f32.mrb[5].mxu0  ;;  %v1640_v54 = vpop.f32.mrb[5].mxu1 }
  0xe3   :  { %1718 = vpow2.f32 %v1291_v48  ;;  %v319_v55 = vpop.f32.mrb[6].mxu0  ;;  %v423_v56 = vpop.f32.mrb[6].mxu1 }
  0xe4   :  { %v2124_v57 = vadd.f32 %v2099_v29, %v515_v51  ;;  %v2127_v58 = vadd.f32 %v2099_v29, %v541_v52  ;;  %v516_v59 = vmul.f32 %v2094_v27, %v319_v55  ;;  %v542_v60 = vmul.f32 %v2094_v27, %v423_v56  ;;  %v1589_v61 = vpop.f32.mrb[7].mxu0  ;;  %v1641_v62 = vpop.f32.mrb[7].mxu1 }
  0xe6   :  { %v1266_v63 = vmul.f32 -1.442695, %v2124_v57  ;;  %v1292_v0 = vmul.f32 -1.442695, %v2127_v58  ;;  %v2134_v1 = vadd.f32 %v2099_v29, %v516_v59  ;;  %v2137_v2 = vadd.f32 %v2099_v29, %v542_v60 }
  0xe8   :  { %1720 = vpow2.f32 %v1266_v63  ;;  %v1267_v3 = vmul.f32 -1.442695, %v2134_v1  ;;  %v1293_v4 = vmul.f32 -1.442695, %v2137_v2 }
  0xe9   :  { %1722 = vpow2.f32 %v1292_v0  ;;  %v324_v5 = vpop.f32.mrb[8].mxu0  ;;  %v428_v6 = vpop.f32.mrb[8].mxu1 }
  0xea   :  { %v1713_v7 = vpop.eup %1712  ;;  %1724 = vpow2.f32 %v1267_v3  ;;  %v517_v8 = vmul.f32 %v2094_v27, %v324_v5  ;;  %v543_v9 = vmul.f32 %v2094_v27, %v428_v6  ;;  %v1592_v10 = vpop.f32.mrb[9].mxu0 }
  0xeb   :  { %v1644_v11 = vpop.f32.mrb[9].mxu1  ;;  %v1715_v12 = vpop.eup %1714  ;;  %v765_v13 = vadd.f32 1.0, %v1713_v7  ;;  %1726 = vpow2.f32 %v1293_v4 }
  0xec   :  { %v327_v14 = vpop.f32.mrb[10].mxu0  ;;  %v431_v15 = vpop.f32.mrb[10].mxu1  ;;  %v791_v17 = vadd.f32 1.0, %v1715_v12  ;;  %v2144_v18 = vadd.f32 %v2099_v29, %v517_v8  ;;  %v2147_v19 = vadd.f32 %v2099_v29, %v543_v9 }
  0xed   :  { %v1717_v16 = vpop.eup %1716  ;;  %v518_v20 = vmul.f32 %v2094_v27, %v327_v14  ;;  %v1593_v21 = vpop.f32.mrb[11].mxu0  ;;  %1728 = vrcp.f32 %v765_v13  ;;  %v544_v25 = vmul.f32 %v2094_v27, %v431_v15 }
  0xee   :  { %v1645_v22 = vpop.f32.mrb[11].mxu1  ;;  %v1719_v23 = vpop.eup %1718  ;;  %v766_v24 = vadd.f32 1.0, %v1717_v16  ;;  %1730 = vrcp.f32 %v791_v17  ;;  %v1268_v28 = vmul.f32 -1.442695, %v2144_v18  ;;  %v1294_v30 = vmul.f32 -1.442695, %v2147_v19 }
  0xef   :  { %v792_v26 = vadd.f32 1.0, %v1719_v23  ;;  %v2154_v31 = vadd.f32 %v2099_v29, %v518_v20  ;;  %v2157_v32 = vadd.f32 %v2099_v29, %v544_v25 }
  0xf0   :  { %1732 = vrcp.f32 %v766_v24 }
  0xf1   :  { %1734 = vrcp.f32 %v792_v26  ;;  %v1269_v33 = vmul.f32 -1.442695, %v2154_v31  ;;  %v1295_v34 = vmul.f32 -1.442695, %v2157_v32  ;;  %v332_v35 = vpop.f32.mrb[12].mxu0  ;;  %v436_v36 = vpop.f32.mrb[12].mxu1 }
  0xf2   :  { %1736 = vpow2.f32 %v1268_v28  ;;  %v1721_v39 = vpop.eup %1720  ;;  %v519_v40 = vmul.f32 %v2094_v27, %v332_v35  ;;  %v545_v41 = vmul.f32 %v2094_v27, %v436_v36  ;;  %v1596_v42 = vpop.f32.mrb[13].mxu0 }
  0xf3   :  { %1738 = vpow2.f32 %v1294_v30  ;;  %v1648_v43 = vpop.f32.mrb[13].mxu1  ;;  %v1723_v44 = vpop.eup %1722  ;;  %v767_v47 = vadd.f32 1.0, %v1721_v39 }
  0xf4   :  { %1740 = vpow2.f32 %v1269_v33  ;;  %v335_v48 = vpop.f32.mrb[14].mxu0  ;;  %v439_v49 = vpop.f32.mrb[14].mxu1  ;;  %v793_v51 = vadd.f32 1.0, %v1723_v44  ;;  %v2164_v52 = vadd.f32 %v2099_v29, %v519_v40  ;;  %v2167_v53 = vadd.f32 %v2099_v29, %v545_v41 }
  0xf5   :  { %v1725_v50 = vpop.eup %1724  ;;  %1742 = vpow2.f32 %v1295_v34  ;;  %v1597_v54 = vpop.f32.mrb[15].mxu0  ;;  %v520_v60 = vmul.f32 %v2094_v27, %v335_v48  ;;  %v546_v61 = vmul.f32 %v2094_v27, %v439_v49 }
  0xf6   :  { %v1649_v55 = vpop.f32.mrb[15].mxu1  ;;  %v1727_v56 = vpop.eup %1726  ;;  %1744 = vrcp.f32 %v767_v47  ;;  %v768_v59 = vadd.f32 1.0, %v1725_v50  ;;  %v1270_v63 = vmul.f32 -1.442695, %v2164_v52  ;;  %v1296_v0 = vmul.f32 -1.442695, %v2167_v53 }
  0xf7   :  { %1746 = vrcp.f32 %v793_v51  ;;  %v794_v62 = vadd.f32 1.0, %v1727_v56  ;;  %v1729_v3 = vpop.eup %1728  ;;  %v2174_v4 = vadd.f32 %v2099_v29, %v520_v60  ;;  %v2177_v5 = vadd.f32 %v2099_v29, %v546_v61 }
  0xf8   :  { %1748 = vrcp.f32 %v768_v59  ;;  %v1731_v6 = vpop.eup %1730  ;;  %v912_v8 = vmul.f32 %v1729_v3, %v2104_v37 }
  0xf9   :  { %1750 = vrcp.f32 %v794_v62  ;;  %v1271_v9 = vmul.f32 -1.442695, %v2174_v4  ;;  %v1297_v10 = vmul.f32 -1.442695, %v2177_v5  ;;  %v340_v11 = vpop.f32.mrb[16].mxu0  ;;  %v444_v12 = vpop.f32.mrb[16].mxu1  ;;  %v938_v37 = vmul.f32 %v1731_v6, %v2107_v38 }
  0xfa   :  { %v1733_v7 = vpop.eup %1732  ;;  %1752 = vpow2.f32 %v1270_v63  ;;  %v521_v15 = vmul.f32 %v2094_v27, %v340_v11  ;;  %v547_v16 = vmul.f32 %v2094_v27, %v444_v12  ;;  %v1600_v17 = vpop.f32.mrb[17].mxu0 }
  0xfb   :  { %v1735_v13 = vpop.eup %1734  ;;  %v913_v14 = vmul.f32 %v1733_v7, %v2114_v45  ;;  %1754 = vpow2.f32 %v1296_v0  ;;  %v1652_v20 = vpop.f32.mrb[17].mxu1 }
  0xfc   :  { %v1737_v21 = vpop.eup %1736  ;;  %v939_v22 = vmul.f32 %v1735_v13, %v2117_v46  ;;  %1756 = vpow2.f32 %v1271_v9  ;;  %v343_v23 = vpop.f32.mrb[18].mxu0  ;;  %v2188_v45 = vadd.f32 %v2099_v29, %v521_v15  ;;  %v2191_v39 = vadd.f32 %v2099_v29, %v547_v16 }
  0xfd   :  { %v447_v24 = vpop.f32.mrb[18].mxu1  ;;  %v1739_v25 = vpop.eup %1738  ;;  %v1414_v26 = vpack.c.bf16 %v913_v14, %v912_v8  ;;  %v769_v28 = vadd.f32 1.0, %v1737_v21  ;;  %1758 = vpow2.f32 %v1297_v10  ;;  %v522_v38 = vmul.f32 %v2094_v27, %v343_v23 }
  0xfe   :  { %v1601_v30 = vpop.f32.mrb[19].mxu0  ;;  %v1653_v33 = vpop.f32.mrb[19].mxu1  ;;  %v1479_v35 = vpack.c.bf16 %v939_v22, %v938_v37  ;;  %v795_v36 = vadd.f32 1.0, %v1739_v25  ;;  %v1272_v41 = vmul.f32 -1.442695, %v2188_v45  ;;  %v548_v42 = vmul.f32 %v2094_v27, %v447_v24 }
  0xff   :  { %v1741_v34 = vpop.eup %1740  ;;  %1415 = vst [vmem:[%s2476_s4] sm:$0xff] %v1414_v26   ;;  %1760 = vrcp.f32 %v769_v28  ;;  %v1298_v47 = vmul.f32 -1.442695, %v2191_v39  ;;  %v2204_v48 = vadd.f32 %v2099_v29, %v522_v38 }
 0x100   :  { %v1743_v46 = vpop.eup %1742  ;;  %v770_v40 = vadd.f32 1.0, %v1741_v34  ;;  %1543 = vst [vmem:[%s2476_s4 + $0x68] sm:$0xff] %v1479_v35   ;;  %1762 = vrcp.f32 %v795_v36  ;;  %v2207_v50 = vadd.f32 %v2099_v29, %v548_v42 }
 0x101   :  { %v1745_v43 = vpop.eup %1744  ;;  %v796_v44 = vadd.f32 1.0, %v1743_v46  ;;  %v1273_v55 = vmul.f32 -1.442695, %v2204_v48  ;;  %v348_v56 = vpop.f32.mrb[20].mxu0 }
 0x102   :  { %v1747_v49 = vpop.eup %1746  ;;  %1764 = vrcp.f32 %v770_v40  ;;  %v914_v54 = vmul.f32 %v1745_v43, %v2124_v57  ;;  %v452_v59 = vpop.f32.mrb[20].mxu1  ;;  %v1299_v62 = vmul.f32 -1.442695, %v2207_v50  ;;  %v523_v63 = vmul.f32 %v2094_v27, %v348_v56 }
 0x103   :  { %v1749_v51 = vpop.eup %1748  ;;  %1766 = vrcp.f32 %v796_v44  ;;  %v1604_v0 = vpop.f32.mrb[21].mxu0  ;;  %v940_v7 = vmul.f32 %v1747_v49, %v2127_v58  ;;  %v549_v8 = vmul.f32 %v2094_v27, %v452_v59 }
 0x104   :  { %v1751_v60 = vpop.eup %1750  ;;  %v915_v61 = vmul.f32 %v1749_v51, %v2134_v1  ;;  %1768 = vpow2.f32 %v1272_v41  ;;  %v1656_v3 = vpop.f32.mrb[21].mxu1  ;;  %v2218_v13 = vadd.f32 %v2099_v29, %v523_v63 }
 0x105   :  { %v1753_v6 = vpop.eup %1752  ;;  %v941_v57 = vmul.f32 %v1751_v60, %v2137_v2  ;;  %1770 = vpow2.f32 %v1298_v47  ;;  %v351_v9 = vpop.f32.mrb[22].mxu0  ;;  %v2221_v58 = vadd.f32 %v2099_v29, %v549_v8 }
 0x106   :  { %v455_v10 = vpop.f32.mrb[22].mxu1  ;;  %v1755_v11 = vpop.eup %1754  ;;  %v1419_v12 = vpack.c.bf16 %v915_v61, %v914_v54  ;;  %v771_v1 = vadd.f32 1.0, %v1753_v6  ;;  %1772 = vpow2.f32 %v1273_v55  ;;  %v1274_v37 = vmul.f32 -1.442695, %v2218_v13 }
 0x107   :  { %v1605_v14 = vpop.f32.mrb[23].mxu0  ;;  %v1657_v15 = vpop.f32.mrb[23].mxu1  ;;  %v1484_v17 = vpack.c.bf16 %v941_v57, %v940_v7  ;;  %v797_v20 = vadd.f32 1.0, %v1755_v11  ;;  %1774 = vpow2.f32 %v1299_v62  ;;  %v524_v22 = vmul.f32 %v2094_v27, %v351_v9 }
 0x108   :  { %v1757_v16 = vpop.eup %1756  ;;  %1531 = vst [vmem:[%s2476_s4 + $0x8] sm:$0xff] %v1419_v12   ;;  %1776 = vrcp.f32 %v771_v1  ;;  %v1300_v24 = vmul.f32 -1.442695, %v2221_v58  ;;  %v550_v25 = vmul.f32 %v2094_v27, %v455_v10 }
 0x109   :  { %v1759_v2 = vpop.eup %1758  ;;  %v772_v21 = vadd.f32 1.0, %v1757_v16  ;;  %1544 = vst [vmem:[%s2476_s4 + $0x70] sm:$0xff] %v1484_v17   ;;  %1778 = vrcp.f32 %v797_v20  ;;  %v2234_v28 = vadd.f32 %v2099_v29, %v524_v22  ;;  %v356_v35 = vpop.f32.mrb[24].mxu0 }
 0x10a   :  { %v798_v23 = vadd.f32 1.0, %v1759_v2  ;;  %v1761_v26 = vpop.eup %1760  ;;  %v2238_v34 = vadd.f32 %v2099_v29, %v550_v25  ;;  %v460_v36 = vpop.f32.mrb[24].mxu1  ;;  %v525_v41 = vmul.f32 %v2094_v27, %v356_v35 }
 0x10b   :  { %1780 = vrcp.f32 %v772_v21  ;;  %v1763_v30 = vpop.eup %1762  ;;  %v916_v33 = vmul.f32 %v1761_v26, %v2144_v18  ;;  %v1275_v40 = vmul.f32 -1.442695, %v2234_v28  ;;  %v1608_v42 = vpop.f32.mrb[25].mxu0  ;;  %v551_v49 = vmul.f32 %v2094_v27, %v460_v36 }
 0x10c   :  { %1782 = vrcp.f32 %v798_v23  ;;  %v1765_v38 = vpop.eup %1764  ;;  %v942_v46 = vmul.f32 %v1763_v30, %v2147_v19  ;;  %v1660_v43 = vpop.f32.mrb[25].mxu1  ;;  %v1301_v18 = vmul.f32 -1.442695, %v2238_v34  ;;  %v2248_v56 = vadd.f32 %v2099_v29, %v525_v41 }
 0x10d   :  { %1784 = vpow2.f32 %v1274_v37  ;;  %v1767_v44 = vpop.eup %1766  ;;  %v917_v47 = vmul.f32 %v1765_v38, %v2154_v31  ;;  %v359_v51 = vpop.f32.mrb[26].mxu0  ;;  %v2252_v0 = vadd.f32 %v2099_v29, %v551_v49 }
 0x10e   :  { %1786 = vpow2.f32 %v1300_v24  ;;  %v463_v54 = vpop.f32.mrb[26].mxu1  ;;  %v1769_v55 = vpop.eup %1768  ;;  %v943_v19 = vmul.f32 %v1767_v44, %v2157_v32  ;;  %v526_v59 = vmul.f32 %v2094_v27, %v359_v51  ;;  %v1276_v9 = vmul.f32 -1.442695, %v2248_v56 }
 0x10f   :  { %1788 = vpow2.f32 %v1275_v40  ;;  %v1609_v60 = vpop.f32.mrb[27].mxu0  ;;  %v1661_v61 = vpop.f32.mrb[27].mxu1  ;;  %v1424_v31 = vpack.c.bf16 %v917_v47, %v916_v33  ;;  %v773_v63 = vadd.f32 1.0, %v1769_v55  ;;  %v552_v10 = vmul.f32 %v2094_v27, %v463_v54 }
 0x110   :  { %v1771_v62 = vpop.eup %1770  ;;  %1790 = vpow2.f32 %v1301_v18  ;;  %v1489_v6 = vpack.c.bf16 %v943_v19, %v942_v46  ;;  %v2255_v32 = vadd.f32 %v2099_v29, %v526_v59  ;;  %v1302_v1 = vmul.f32 -1.442695, %v2252_v0 }
 0x111   :  { %v1773_v3 = vpop.eup %1772  ;;  %v799_v7 = vadd.f32 1.0, %v1771_v62  ;;  %1532 = vst [vmem:[%s2476_s4 + $0x10] sm:$0xff] %v1424_v31   ;;  %1792 = vrcp.f32 %v773_v63  ;;  %v2268_v16 = vadd.f32 %v2099_v29, %v552_v10  ;;  %v364_v17 = vpop.f32.mrb[28].mxu0 }
 0x112   :  { %v1775_v57 = vpop.eup %1774  ;;  %v774_v8 = vadd.f32 1.0, %v1773_v3  ;;  %1545 = vst [vmem:[%s2476_s4 + $0x78] sm:$0xff] %v1489_v6   ;;  %v1277_v15 = vmul.f32 -1.442695, %v2255_v32  ;;  %v468_v20 = vpop.f32.mrb[28].mxu1  ;;  %v527_v37 = vmul.f32 %v2094_v27, %v364_v17 }
 0x113   :  { %v1777_v11 = vpop.eup %1776  ;;  %1794 = vrcp.f32 %v799_v7  ;;  %v800_v12 = vadd.f32 1.0, %v1775_v57  ;;  %v553_v22 = vmul.f32 %v2094_v27, %v468_v20  ;;  %v1612_v23 = vpop.f32.mrb[29].mxu0  ;;  %v1303_v33 = vmul.f32 -1.442695, %v2268_v16 }
 0x114   :  { %v1779_v14 = vpop.eup %1778  ;;  %1796 = vrcp.f32 %v774_v8  ;;  %v918_v21 = vmul.f32 %v1777_v11, %v2164_v52  ;;  %v1664_v24 = vpop.f32.mrb[29].mxu1  ;;  %v2278_v46 = vadd.f32 %v2099_v29, %v527_v37 }
 0x115   :  { %v1781_v2 = vpop.eup %1780  ;;  %1798 = vrcp.f32 %v800_v12  ;;  %v944_v26 = vmul.f32 %v1779_v14, %v2167_v53  ;;  %v367_v35 = vpop.f32.mrb[30].mxu0  ;;  %v2281_v40 = vadd.f32 %v2099_v29, %v553_v22 }
 0x116   :  { %v1783_v25 = vpop.eup %1782  ;;  %v919_v30 = vmul.f32 %v1781_v2, %v2174_v4  ;;  %1800 = vpow2.f32 %v1276_v9  ;;  %v471_v36 = vpop.f32.mrb[30].mxu1  ;;  %v528_v44 = vmul.f32 %v2094_v27, %v367_v35  ;;  %v1278_v54 = vmul.f32 -1.442695, %v2278_v46 }
 0x117   :  { %v1785_v38 = vpop.eup %1784  ;;  %v945_v52 = vmul.f32 %v1783_v25, %v2177_v5  ;;  %1802 = vpow2.f32 %v1302_v1  ;;  %v1613_v41 = vpop.f32.mrb[31].mxu0  ;;  %v1304_v59 = vmul.f32 -1.442695, %v2281_v40  ;;  %v554_v60 = vmul.f32 %v2094_v27, %v471_v36 }
 0x118   :  { %v1665_v42 = vpop.f32.mrb[31].mxu1  ;;  %v1787_v53 = vpop.eup %1786  ;;  %v1429_v43 = vpack.c.bf16 %v919_v30, %v918_v21  ;;  %v775_v4 = vadd.f32 1.0, %v1785_v38  ;;  %1804 = vpow2.f32 %v1277_v15  ;;  %v2289_v55 = vadd.f32 %v2099_v29, %v528_v44 }
 0x119   :  { %v1789_v47 = vpop.eup %1788  ;;  %v1494_v18 = vpack.c.bf16 %v945_v52, %v944_v26  ;;  %v801_v49 = vadd.f32 1.0, %v1787_v53  ;;  %1806 = vpow2.f32 %v1303_v33  ;;  %v372_v31 = vpop.f32.mrb[32].mxu0  ;;  %v2298_v6 = vadd.f32 %v2099_v29, %v554_v60 }
 0x11a   :  { %v1791_v5 = vpop.eup %1790  ;;  %1533 = vst [vmem:[%s2476_s4 + $0x18] sm:$0xff] %v1429_v43   ;;  %1808 = vrcp.f32 %v775_v4  ;;  %v776_v51 = vadd.f32 1.0, %v1789_v47  ;;  %v1279_v62 = vmul.f32 -1.442695, %v2289_v55  ;;  %v476_v63 = vpop.f32.mrb[32].mxu1  ;;  %v529_v7 = vmul.f32 %v2094_v27, %v372_v31 }
 0x11b   :  { %1546 = vst [vmem:[%s2476_s4 + $0x80] sm:$0xff] %v1494_v18   ;;  %1810 = vrcp.f32 %v801_v49  ;;  %v802_v19 = vadd.f32 1.0, %v1791_v5  ;;  %v1793_v61 = vpop.eup %1792  ;;  %v1616_v57 = vpop.f32.mrb[33].mxu0  ;;  %v555_v12 = vmul.f32 %v2094_v27, %v476_v63  ;;  %v1305_v20 = vmul.f32 -1.442695, %v2298_v6 }
 0x11c   :  { %1812 = vrcp.f32 %v776_v51  ;;  %v1668_v8 = vpop.f32.mrb[33].mxu1  ;;  %v920_v10 = vmul.f32 %v1793_v61, %v2188_v45  ;;  %v375_v1 = vpop.f32.mrb[34].mxu0  ;;  %v2307_v2 = vadd.f32 %v2099_v29, %v529_v7 }
 0x11d   :  { %v1795_v3 = vpop.eup %1794  ;;  %1814 = vrcp.f32 %v802_v19  ;;  %v479_v14 = vpop.f32.mrb[34].mxu1  ;;  %v530_v23 = vmul.f32 %v2094_v27, %v375_v1 }
 0x11e   :  { %v1797_v9 = vpop.eup %1796  ;;  %v946_v11 = vmul.f32 %v1795_v3, %v2191_v39  ;;  %1816 = vpow2.f32 %v1278_v54  ;;  %v1617_v21 = vpop.f32.mrb[35].mxu0  ;;  %v2311_v39 = vadd.f32 %v2099_v29, %v555_v12  ;;  %v1280_v38 = vmul.f32 -1.442695, %v2307_v2 }
 0x11f   :  { %v1799_v15 = vpop.eup %1798  ;;  %v921_v17 = vmul.f32 %v1797_v9, %v2204_v48  ;;  %1818 = vpow2.f32 %v1304_v59  ;;  %v1669_v37 = vpop.f32.mrb[35].mxu1  ;;  %v2315_v35 = vadd.f32 %v2099_v29, %v530_v23  ;;  %v556_v52 = vmul.f32 %v2094_v27, %v479_v14 }
 0x120   :  { %v1801_v22 = vpop.eup %1800  ;;  %v947_v45 = vmul.f32 %v1799_v15, %v2207_v50  ;;  %1820 = vpow2.f32 %v1279_v62  ;;  %v1306_v53 = vmul.f32 -1.442695, %v2311_v39 }
 0x121   :  { %v1803_v24 = vpop.eup %1802  ;;  %v1434_v25 = vpack.c.bf16 %v921_v17, %v920_v10  ;;  %v777_v48 = vadd.f32 1.0, %v1801_v22  ;;  %1822 = vpow2.f32 %v1305_v20  ;;  %v380_v43 = vpop.f32.mrb[36].mxu0  ;;  %v1281_v47 = vmul.f32 -1.442695, %v2315_v35 }
 0x122   :  { %v1805_v26 = vpop.eup %1804  ;;  %v1499_v30 = vpack.c.bf16 %v947_v45, %v946_v11  ;;  %v803_v33 = vadd.f32 1.0, %v1803_v24  ;;  %v484_v4 = vpop.f32.mrb[36].mxu1  ;;  %v2328_v18 = vadd.f32 %v2099_v29, %v556_v52  ;;  %v531_v49 = vmul.f32 %v2094_v27, %v380_v43 }
 0x123   :  { %v1807_v36 = vpop.eup %1806  ;;  %1534 = vst [vmem:[%s2476_s4 + $0x20] sm:$0xff] %v1434_v25   ;;  %1824 = vrcp.f32 %v777_v48  ;;  %v778_v50 = vadd.f32 1.0, %v1805_v26  ;;  %v1620_v5 = vpop.f32.mrb[37].mxu0  ;;  %v557_v60 = vmul.f32 %v2094_v27, %v484_v4 }
 0x124   :  { %v1809_v41 = vpop.eup %1808  ;;  %1547 = vst [vmem:[%s2476_s4 + $0x88] sm:$0xff] %v1499_v30   ;;  %1826 = vrcp.f32 %v803_v33  ;;  %v804_v42 = vadd.f32 1.0, %v1807_v36  ;;  %v1672_v51 = vpop.f32.mrb[37].mxu1  ;;  %v1307_v3 = vmul.f32 -1.442695, %v2328_v18  ;;  %v2337_v7 = vadd.f32 %v2099_v29, %v531_v49 }
 0x125   :  { %v1811_v44 = vpop.eup %1810  ;;  %1828 = vrcp.f32 %v778_v50  ;;  %v922_v19 = vmul.f32 %v1809_v41, %v2218_v13  ;;  %v383_v61 = vpop.f32.mrb[38].mxu0 }
 0x126   :  { %v1813_v54 = vpop.eup %1812  ;;  %v948_v59 = vmul.f32 %v1811_v44, %v2221_v58  ;;  %1830 = vrcp.f32 %v804_v42  ;;  %v487_v62 = vpop.f32.mrb[38].mxu1  ;;  %v2341_v58 = vadd.f32 %v2099_v29, %v557_v60  ;;  %v532_v10 = vmul.f32 %v2094_v27, %v383_v61 }
 0x127   :  { %v1815_v31 = vpop.eup %1814  ;;  %v923_v63 = vmul.f32 %v1813_v54, %v2234_v28  ;;  %1832 = vpow2.f32 %v1280_v38  ;;  %v1621_v57 = vpop.f32.mrb[39].mxu0  ;;  %v1282_v17 = vmul.f32 -1.442695, %v2337_v7  ;;  %v558_v37 = vmul.f32 %v2094_v27, %v487_v62 }
 0x128   :  { %v1673_v8 = vpop.f32.mrb[39].mxu1  ;;  %v1817_v9 = vpop.eup %1816  ;;  %v949_v13 = vmul.f32 %v1815_v31, %v2238_v34  ;;  %1834 = vpow2.f32 %v1306_v53  ;;  %v2349_v21 = vadd.f32 %v2099_v29, %v532_v10  ;;  %v1308_v45 = vmul.f32 -1.442695, %v2341_v58 }
 0x129   :  { %v1819_v11 = vpop.eup %1818  ;;  %v1439_v12 = vpack.c.bf16 %v923_v63, %v922_v19  ;;  %v779_v28 = vadd.f32 1.0, %v1817_v9  ;;  %1836 = vpow2.f32 %v1281_v47  ;;  %v388_v23 = vpop.f32.mrb[40].mxu0  ;;  %v2358_v26 = vadd.f32 %v2099_v29, %v558_v37 }
 0x12a   :  { %v1821_v1 = vpop.eup %1820  ;;  %v1504_v14 = vpack.c.bf16 %v949_v13, %v948_v59  ;;  %v805_v15 = vadd.f32 1.0, %v1819_v11  ;;  %1838 = vpow2.f32 %v1307_v3  ;;  %v492_v24 = vpop.f32.mrb[40].mxu1  ;;  %v1283_v48 = vmul.f32 -1.442695, %v2349_v21 }
 0x12b   :  { %v1823_v20 = vpop.eup %1822  ;;  %1535 = vst [vmem:[%s2476_s4 + $0x28] sm:$0xff] %v1439_v12   ;;  %1840 = vrcp.f32 %v779_v28  ;;  %v780_v34 = vadd.f32 1.0, %v1821_v1  ;;  %v533_v30 = vmul.f32 %v2094_v27, %v388_v23  ;;  %v1624_v33 = vpop.f32.mrb[41].mxu0  ;;  %v559_v52 = vmul.f32 %v2094_v27, %v492_v24 }
 0x12c   :  { %1548 = vst [vmem:[%s2476_s4 + $0x90] sm:$0xff] %v1504_v14   ;;  %1842 = vrcp.f32 %v805_v15  ;;  %v806_v22 = vadd.f32 1.0, %v1823_v20  ;;  %v1676_v36 = vpop.f32.mrb[41].mxu1  ;;  %v391_v41 = vpop.f32.mrb[42].mxu0  ;;  %v1309_v4 = vmul.f32 -1.442695, %v2358_v26 }
 0x12d   :  { %v1825_v25 = vpop.eup %1824  ;;  %1844 = vrcp.f32 %v780_v34  ;;  %v495_v42 = vpop.f32.mrb[42].mxu1  ;;  %v2366_v44 = vadd.f32 %v2099_v29, %v533_v30  ;;  %v534_v54 = vmul.f32 %v2094_v27, %v391_v41 }
 0x12e   :  { %v1827_v50 = vpop.eup %1826  ;;  %v924_v38 = vmul.f32 %v1825_v25, %v2248_v56  ;;  %1846 = vrcp.f32 %v806_v22  ;;  %v1625_v47 = vpop.f32.mrb[43].mxu0  ;;  %v2370_v56 = vadd.f32 %v2099_v29, %v559_v52  ;;  %v560_v60 = vmul.f32 %v2094_v27, %v495_v42 }
 0x12f   :  { %v1829_v53 = vpop.eup %1828  ;;  %v950_v43 = vmul.f32 %v1827_v50, %v2252_v0  ;;  %1848 = vpow2.f32 %v1282_v17  ;;  %v1677_v49 = vpop.f32.mrb[43].mxu1  ;;  %v1284_v59 = vmul.f32 -1.442695, %v2366_v44  ;;  %v2377_v57 = vadd.f32 %v2099_v29, %v534_v54 }
 0x130   :  { %v1831_v5 = vpop.eup %1830  ;;  %v925_v51 = vmul.f32 %v1829_v53, %v2255_v32  ;;  %1850 = vpow2.f32 %v1308_v45  ;;  %v1310_v9 = vmul.f32 -1.442695, %v2370_v56  ;;  %v2384_v13 = vadd.f32 %v2099_v29, %v560_v60 }
 0x131   :  { %v1833_v19 = vpop.eup %1832  ;;  %v951_v0 = vmul.f32 %v1831_v5, %v2268_v16  ;;  %1852 = vpow2.f32 %v1283_v48  ;;  %v396_v10 = vpop.f32.mrb[44].mxu0  ;;  %v1285_v1 = vmul.f32 -1.442695, %v2377_v57 }
 0x132   :  { %v1835_v61 = vpop.eup %1834  ;;  %v1444_v62 = vpack.c.bf16 %v925_v51, %v924_v38  ;;  %v781_v31 = vadd.f32 1.0, %v1833_v19  ;;  %1854 = vpow2.f32 %v1309_v4  ;;  %v500_v11 = vpop.f32.mrb[44].mxu1  ;;  %v535_v14 = vmul.f32 %v2094_v27, %v396_v10 }
 0x133   :  { %v1837_v63 = vpop.eup %1836  ;;  %v1509_v32 = vpack.c.bf16 %v951_v0, %v950_v43  ;;  %v807_v3 = vadd.f32 1.0, %v1835_v61  ;;  %1856 = vpow2.f32 %v1284_v59  ;;  %v1628_v15 = vpop.f32.mrb[45].mxu0  ;;  %v1311_v34 = vmul.f32 -1.442695, %v2384_v13 }
 0x134   :  { %v1839_v8 = vpop.eup %1838  ;;  %1536 = vst [vmem:[%s2476_s4 + $0x30] sm:$0xff] %v1444_v62   ;;  %1858 = vrcp.f32 %v781_v31  ;;  %v782_v16 = vadd.f32 1.0, %v1837_v63  ;;  %v1680_v17 = vpop.f32.mrb[45].mxu1  ;;  %v561_v37 = vmul.f32 %v2094_v27, %v500_v11  ;;  %v2394_v24 = vadd.f32 %v2099_v29, %v535_v14 }
 0x135   :  { %v1841_v12 = vpop.eup %1840  ;;  %1549 = vst [vmem:[%s2476_s4 + $0x98] sm:$0xff] %v1509_v32   ;;  %1860 = vrcp.f32 %v807_v3  ;;  %v808_v28 = vadd.f32 1.0, %v1839_v8  ;;  %v399_v22 = vpop.f32.mrb[46].mxu0 }
 0x136   :  { %v1843_v20 = vpop.eup %1842  ;;  %1862 = vrcp.f32 %v782_v16  ;;  %v503_v45 = vpop.f32.mrb[46].mxu1  ;;  %v536_v25 = vmul.f32 %v2094_v27, %v399_v22  ;;  %v926_v36 = vmul.f32 %v1841_v12, %v2278_v46  ;;  %v1286_v42 = vmul.f32 -1.442695, %v2394_v24 }
 0x137   :  { %v1845_v23 = vpop.eup %1844  ;;  %1864 = vrcp.f32 %v808_v28  ;;  %v1629_v48 = vpop.f32.mrb[47].mxu0  ;;  %v952_v50 = vmul.f32 %v1843_v20, %v2281_v40  ;;  %v2403_v53 = vadd.f32 %v2099_v29, %v561_v37 }
 0x138   :  { %v1681_v30 = vpop.f32.mrb[47].mxu1  ;;  %v1847_v33 = vpop.eup %1846  ;;  %v927_v38 = vmul.f32 %v1845_v23, %v2289_v55  ;;  %1866 = vpow2.f32 %v1310_v9  ;;  %v2406_v46 = vadd.f32 %v2099_v29, %v536_v25 }
 0x139   :  { %v1849_v52 = vpop.eup %1848  ;;  %v953_v41 = vmul.f32 %v1847_v33, %v2298_v6  ;;  %1868 = vpow2.f32 %v1285_v1  ;;  %v404_v51 = vpop.f32.mrb[48].mxu0  ;;  %v1312_v0 = vmul.f32 -1.442695, %v2403_v53  ;;  %v1908_v1 = vld [vmem:[%s2475_s3] ss:$0 sm:$0xff] }
 0x13a   :  { %v1851_v43 = vpop.eup %1850  ;;  %v1449_v4 = vpack.c.bf16 %v927_v38, %v926_v36  ;;  %v783_v47 = vadd.f32 1.0, %v1849_v52  ;;  %1870 = vpow2.f32 %v1311_v34  ;;  %v537_v59 = vmul.f32 %v2094_v27, %v404_v51  ;;  %v1632_v60 = vpop.f32.mrb[49].mxu0 }
 0x13b   :  { %v1853_v40 = vpop.eup %1852  ;;  %v1514_v49 = vpack.c.bf16 %v953_v41, %v952_v50  ;;  %v809_v55 = vadd.f32 1.0, %v1851_v43  ;;  %1872 = vpow2.f32 %v1286_v42  ;;  %v1287_v62 = vmul.f32 -1.442695, %v2406_v46  ;;  %v407_v31 = vpop.f32.mrb[50].mxu0 }
 0x13c   :  { %v1855_v5 = vpop.eup %1854  ;;  %1537 = vst [vmem:[%s2476_s4 + $0x38] sm:$0xff] %v1449_v4   ;;  %1874 = vrcp.f32 %v783_v47  ;;  %v784_v6 = vadd.f32 1.0, %v1853_v40  ;;  %v2418_v32 = vadd.f32 %v2099_v29, %v537_v59  ;;  %v538_v3 = vmul.f32 %v2094_v27, %v407_v31  ;;  %v1633_v8 = vpop.f32.mrb[51].mxu0 }
 0x13d   :  { %v1857_v54 = vpop.eup %1856  ;;  %1550 = vst [vmem:[%s2476_s4 + $0xa0] sm:$0xff] %v1514_v49   ;;  %1876 = vrcp.f32 %v809_v55  ;;  %v810_v19 = vadd.f32 1.0, %v1855_v5 }
 0x13e   :  { %v1859_v61 = vpop.eup %1858  ;;  %1878 = vrcp.f32 %v784_v6  ;;  %v785_v10 = vadd.f32 1.0, %v1857_v54  ;;  %v1288_v28 = vmul.f32 -1.442695, %v2418_v32  ;;  %v2427_v14 = vadd.f32 %v1908_v1, %v538_v3 }
 0x13f   :  { %v1861_v63 = vpop.eup %1860  ;;  %1880 = vrcp.f32 %v810_v19  ;;  %v928_v9 = vmul.f32 %v1859_v61, %v2307_v2 }
 0x140   :  { %v1863_v16 = vpop.eup %1862  ;;  %1882 = vpow2.f32 %v1312_v0  ;;  %v954_v27 = vmul.f32 %v1861_v63, %v2311_v39  ;;  %v1289_v39 = vmul.f32 -1.442695, %v2427_v14 }
 0x141   :  { %v1865_v11 = vpop.eup %1864  ;;  %v929_v12 = vmul.f32 %v1863_v16, %v2315_v35  ;;  %1884 = vpow2.f32 %v1287_v62 }
 0x142   :  { %v1867_v29 = vpop.eup %1866  ;;  %v955_v15 = vmul.f32 %v1865_v11, %v2328_v18  ;;  %1886 = vpow2.f32 %v1288_v28 }
 0x143   :  { %v1869_v2 = vpop.eup %1868  ;;  %v1454_v17 = vpack.c.bf16 %v929_v12, %v928_v9  ;;  %v811_v20 = vadd.f32 1.0, %v1867_v29  ;;  %1888 = vrcp.f32 %v785_v10 }
 0x144   :  { %v1871_v35 = vpop.eup %1870  ;;  %v1519_v34 = vpack.c.bf16 %v955_v15, %v954_v27  ;;  %v786_v37 = vadd.f32 1.0, %v1869_v2 }
 0x145   :  { %v1873_v22 = vpop.eup %1872  ;;  %1538 = vst [vmem:[%s2476_s4 + $0x40] sm:$0xff] %v1454_v17   ;;  %1890 = vrcp.f32 %v811_v20  ;;  %v812_v45 = vadd.f32 1.0, %v1871_v35 }
 0x146   :  { %v1875_v23 = vpop.eup %1874  ;;  %1551 = vst [vmem:[%s2476_s4 + $0xa8] sm:$0xff] %v1519_v34   ;;  %1892 = vrcp.f32 %v786_v37  ;;  %v787_v36 = vadd.f32 1.0, %v1873_v22 }
 0x147   :  { %v1877_v18 = vpop.eup %1876  ;;  %1894 = vrcp.f32 %v812_v45  ;;  %v930_v30 = vmul.f32 %v1875_v23, %v2337_v7 }
 0x148   :  { %v1879_v25 = vpop.eup %1878  ;;  %1896 = vpow2.f32 %v1289_v39  ;;  %v956_v50 = vmul.f32 %v1877_v18, %v2341_v58 }
 0x149   :  { %v1881_v48 = vpop.eup %1880  ;;  %v931_v33 = vmul.f32 %v1879_v25, %v2349_v21  ;;  %1898 = vrcp.f32 %v787_v36 }
 0x14a   :  { %v957_v38 = vmul.f32 %v1881_v48, %v2358_v26  ;;  %v1883_v52 = vpop.eup %1882 }
 0x14b   :  { %v1459_v41 = vpack.c.bf16 %v931_v33, %v930_v30  ;;  %v1885_v42 = vpop.eup %1884  ;;  %v813_v4 = vadd.f32 1.0, %v1883_v52 }
 0x14c   :  { %v1524_v43 = vpack.c.bf16 %v957_v38, %v956_v50  ;;  %v1887_v47 = vpop.eup %1886  ;;  %v788_v7 = vadd.f32 1.0, %v1885_v42 }
 0x14d   :  { %1539 = vst [vmem:[%s2476_s4 + $0x48] sm:$0xff] %v1459_v41   ;;  %v1889_v40 = vpop.eup %1888  ;;  %1900 = vrcp.f32 %v813_v4  ;;  %v789_v26 = vadd.f32 1.0, %v1887_v47 }
 0x14e   :  { %1552 = vst [vmem:[%s2476_s4 + $0xb0] sm:$0xff] %v1524_v43   ;;  %1902 = vrcp.f32 %v788_v7  ;;  %v932_v55 = vmul.f32 %v1889_v40, %v2366_v44 }
 0x14f   :  { %v1891_v58 = vpop.eup %1890  ;;  %1904 = vrcp.f32 %v789_v26 }
 0x150   :  { %v1893_v21 = vpop.eup %1892  ;;  %v958_v6 = vmul.f32 %v1891_v58, %v2370_v56 }
 0x151   :  { %v1895_v49 = vpop.eup %1894  ;;  %v933_v5 = vmul.f32 %v1893_v21, %v2377_v57 }
 0x152   :  { %v959_v51 = vmul.f32 %v1895_v49, %v2384_v13  ;;  %v1897_v54 = vpop.eup %1896 }
 0x153   :  { %v1464_v19 = vpack.c.bf16 %v933_v5, %v932_v55  ;;  %v790_v59 = vadd.f32 1.0, %v1897_v54  ;;  %v1899_v44 = vpop.eup %1898 }
 0x154   :  { %v1529_v0 = vpack.c.bf16 %v959_v51, %v958_v6  ;;  %v934_v13 = vmul.f32 %v1899_v44, %v2394_v24 }
 0x155   :  { %1540 = vst [vmem:[%s2476_s4 + $0x50] sm:$0xff] %v1464_v19   ;;  %1906 = vrcp.f32 %v790_v59 }
 0x156   :  { %1553 = vst [vmem:[%s2476_s4 + $0xb8] sm:$0xff] %v1529_v0  }
 0x157   :  { %v1901_v57 = vpop.eup %1900 }
 0x158   :  { %v1903_v60 = vpop.eup %1902  ;;  %v960_v56 = vmul.f32 %v1901_v57, %v2403_v53 }
 0x159   :  { %v935_v61 = vmul.f32 %v1903_v60, %v2406_v46  ;;  %v1905_v63 = vpop.eup %1904 }
 0x15a   :  { %v1410_v62 = vpack.c.bf16 %v960_v56, %v960_v56  ;;  %v936_v8 = vmul.f32 %v1905_v63, %v2418_v32 }
 0x15b   :  { %v1469_v31 = vpack.c.bf16 %v935_v61, %v934_v13 }
 0x15c   :  { %1206 = vst [vmem:[%s2476_s4 + $0xc0] sm:$0xf] %v1410_v62 }
 0x15d   :  { %1541 = vst [vmem:[%s2476_s4 + $0x58] sm:$0xff] %v1469_v31  }
 0x15f   :  { %v1907_v3 = vpop.eup %1906 }
 0x160   :  { %v937_v53 = vmul.f32 %v1907_v3, %v2427_v14 }
 0x162   :  { %v1474_v16 = vpack.c.bf16 %v937_v53, %v936_v8 }
 0x164   :  { %1542 = vst [vmem:[%s2476_s4 + $0x60] sm:$0xff] %v1474_v16  }

// kernel: c2f_irmb_forward.9
= control target key start
LH: loop header
LB: loop body
LE: loop exit
PB: predicated region body
PF: predicated region fallthrough
CT: control target
= control target key end

     0   :  { %v1359_v1 = vmov 0   ;;  %vm247_vm0 = vcmask 523264   ;;  %v74_v34 = vlaneseq  ;;  %vm1101_vm1 = vcmask 1043456   ;;  %s1884_s1 = inlined_call_operand.vmem [shape: bf16[64,192], index: 1, kind: input, shape index: {}]   ;;  %s1885_s0 = inlined_call_operand.vmem [shape: bf16[392,64], index: 0, kind: input, shape index: {}]   ;;  %s1886_s2 = inlined_call_operand.vmem [shape: f32[1,192], index: 2, kind: input, shape index: {}]   ;;  %s1887_s3 = inlined_call_operand.vmem [shape: bf16[392,192], index: 3, kind: output, shape index: {}]  }
   0x1   :  { %v1322_v0 = vld [vmem:[%s1884_s1 + $0x4] ss:$8 sps:$4 sm:$0xff]   ;;  %355 = vmatprep.mubr.bf16.mxu0 %v1359_v1  ;;  %485 = vmatprep.mubr.bf16.mxu1 %v1359_v1  ;;  %v1324_v2 = vld [vmem:[%s1884_s1] ss:$8 sps:$4 sm:$0xff]   ;;  %v1325_v3 = vld [vmem:[%s1884_s1 + $0x14] ss:$8 sps:$4 sm:$0xff]  }
   0x2   :  { %323 = vmatprep.subr.bf16.mxu0 %v1322_v0  ;;  %1313 = vmatprep.subr.bf16.mxu1 %v1322_v0  ;;  %v1327_v4 = vld [vmem:[%s1884_s1 + $0x10] ss:$8 sps:$4 sm:$0xff]   ;;  %v1328_v5 = vld [vmem:[%s1884_s1 + $0x24] ss:$8 sps:$4 sm:$0xff]   ;;  %v1330_v6 = vld [vmem:[%s1884_s1 + $0x20] ss:$8 sps:$4 sm:$0xff]  }
   0x3   :  { %324 = vmatpush1.bf16.msra.mxu0 %v1324_v2  ;;  %1317 = vmatpush1.bf16.msra.mxu1 %v1324_v2  ;;  %v1331_v7 = vld [vmem:[%s1884_s1 + $0x34] ss:$8 sps:$4 sm:$0xff]   ;;  %v1333_v8 = vld [vmem:[%s1884_s1 + $0x30] ss:$8 sps:$4 sm:$0xff]   ;;  %v1334_v9 = vld [vmem:[%s1885_s0] sm:$0xff]   ;;  %v75_v35 = vshrl.u32 %v74_v34, 7 }
   0x4   :  { %325 = vmatprep.subr.bf16.mxu0 %v1325_v3  ;;  %1314 = vmatprep.subr.bf16.mxu1 %v1325_v3  ;;  %v1335_v10 = vld [vmem:[%s1885_s0 + $0x68] sm:$0xff]   ;;  %v1337_v12 = vld [vmem:[%s1885_s0 + $0x70] sm:$0xff]   ;;  %v1339_v14 = vld [vmem:[%s1885_s0 + $0x78] sm:$0xff]   ;;  %vm1102_vm2 = vcmask 523268  }
   0x5   :  { %v1336_v11 = vld [vmem:[%s1885_s0 + $0x8] sm:$0xff]   ;;  %v1338_v13 = vld [vmem:[%s1885_s0 + $0x10] sm:$0xff]   ;;  %v1340_v15 = vld [vmem:[%s1885_s0 + $0x18] sm:$0xff]   ;;  %v80_v36 = vsub.s32 1, %v75_v35  ;;  %v76_v38 = vsub.s32 0, %v75_v35 }
   0x6   :  { %v1341_v16 = vld [vmem:[%s1885_s0 + $0x80] sm:$0xff]   ;;  %v1343_v18 = vld [vmem:[%s1885_s0 + $0x88] sm:$0xff]   ;;  %v1345_v20 = vld [vmem:[%s1885_s0 + $0x90] sm:$0xff]  }
   0x7   :  { %326 = vmatpush1.bf16.msra.mxu0 %v1327_v4  ;;  %1318 = vmatpush1.bf16.msra.mxu1 %v1327_v4  ;;  %v1342_v17 = vld [vmem:[%s1885_s0 + $0x20] sm:$0xff]   ;;  %v1344_v19 = vld [vmem:[%s1885_s0 + $0x28] sm:$0xff]   ;;  %v1346_v21 = vld [vmem:[%s1885_s0 + $0x30] sm:$0xff]  }
   0x8   :  { %327 = vmatprep.subr.bf16.mxu0 %v1328_v5  ;;  %1315 = vmatprep.subr.bf16.mxu1 %v1328_v5  ;;  %v1347_v22 = vld [vmem:[%s1885_s0 + $0x98] sm:$0xff]   ;;  %v1349_v24 = vld [vmem:[%s1885_s0 + $0xa0] sm:$0xff]   ;;  %v1351_v26 = vld [vmem:[%s1885_s0 + $0xa8] sm:$0xff]  }
   0x9   :  { %v1348_v23 = vld [vmem:[%s1885_s0 + $0x38] sm:$0xff]   ;;  %v1350_v25 = vld [vmem:[%s1885_s0 + $0x40] sm:$0xff]   ;;  %v1352_v27 = vld [vmem:[%s1885_s0 + $0x48] sm:$0xff]  }
   0xa   :  { %v1353_v28 = vld [vmem:[%s1885_s0 + $0xb0] sm:$0xff]   ;;  %v1355_v30 = vld [vmem:[%s1885_s0 + $0xb8] sm:$0xff]   ;;  %v1357_v32 = vld [vmem:[%s1885_s0 + $0xc0] ss:$0 sps:$4 sm:$0xff]  }
   0xb   :  { %328 = vmatpush1.bf16.msra.mxu0 %v1330_v6  ;;  %1319 = vmatpush1.bf16.msra.mxu1 %v1330_v6  ;;  %v1354_v29 = vld [vmem:[%s1885_s0 + $0x50] sm:$0xff]   ;;  %v1356_v31 = vld [vmem:[%s1885_s0 + $0x58] sm:$0xff]   ;;  %v1358_v33 = vld [vmem:[%s1885_s0 + $0x60] sm:$0xff]  }
   0xc   :  { %329 = vmatprep.subr.bf16.mxu0 %v1331_v7  ;;  %1316 = vmatprep.subr.bf16.mxu1 %v1331_v7  ;;  %v72_v37 = vld [vmem:[%s1886_s2] sm:$0x3]  ;;  %vm1544_vm3 = vmor %vm1102_vm2, %vm1101_vm1 }
   0xd   :  { %v1532_v39 = vrot.slane %v72_v37, %v80_v36  ;;  %v1534_v40 = vrot.slane %v72_v37, %v76_v38 }
   0xf   :  { %330 = vmatpush1.bf16.msra.mxu0 %v1333_v8  ;;  %1320 = vmatpush1.bf16.msra.mxu1 %v1333_v8 }
  0x12   :  { %1190 = vmatmul.mubr.msk.bf16.vlgmr.msra.gmra.mrb[0].mxu0 %vm247_vm0, %v1334_v9  ;;  %1203 = vmatmul.mubr.msk.bf16.vlgmr.msra.gmra.mrb[0].mxu1 %vm247_vm0, %v1335_v10 }
  0x13   :  { %365 = vmatprep.mubr.bf16.mxu0 %v1359_v1  ;;  %495 = vmatprep.mubr.bf16.mxu1 %v1359_v1 }
  0x1a   :  { %1191 = vmatmul.mubr.msk.bf16.gmra.mrb[4].mxu0 %vm247_vm0, %v1336_v11  ;;  %1204 = vmatmul.mubr.msk.bf16.gmra.mrb[4].mxu1 %vm247_vm0, %v1337_v12 }
  0x1b   :  { %375 = vmatprep.mubr.bf16.mxu0 %v1359_v1  ;;  %505 = vmatprep.mubr.bf16.mxu1 %v1359_v1 }
  0x22   :  { %1192 = vmatmul.mubr.msk.bf16.gmra.mrb[8].mxu0 %vm247_vm0, %v1338_v13  ;;  %1205 = vmatmul.mubr.msk.bf16.gmra.mrb[8].mxu1 %vm247_vm0, %v1339_v14 }
  0x23   :  { %385 = vmatprep.mubr.bf16.mxu0 %v1359_v1  ;;  %515 = vmatprep.mubr.bf16.mxu1 %v1359_v1 }
  0x2a   :  { %1193 = vmatmul.mubr.msk.bf16.gmra.mrb[12].mxu0 %vm247_vm0, %v1340_v15  ;;  %1206 = vmatmul.mubr.msk.bf16.gmra.mrb[12].mxu1 %vm247_vm0, %v1341_v16 }
  0x2b   :  { %395 = vmatprep.mubr.bf16.mxu0 %v1359_v1  ;;  %525 = vmatprep.mubr.bf16.mxu1 %v1359_v1 }
  0x32   :  { %1194 = vmatmul.mubr.msk.bf16.gmra.mrb[16].mxu0 %vm247_vm0, %v1342_v17  ;;  %1207 = vmatmul.mubr.msk.bf16.gmra.mrb[16].mxu1 %vm247_vm0, %v1343_v18 }
  0x33   :  { %405 = vmatprep.mubr.bf16.mxu0 %v1359_v1  ;;  %535 = vmatprep.mubr.bf16.mxu1 %v1359_v1 }
  0x3a   :  { %1195 = vmatmul.mubr.msk.bf16.gmra.mrb[20].mxu0 %vm247_vm0, %v1344_v19  ;;  %1208 = vmatmul.mubr.msk.bf16.gmra.mrb[20].mxu1 %vm247_vm0, %v1345_v20 }
  0x3b   :  { %415 = vmatprep.mubr.bf16.mxu0 %v1359_v1  ;;  %545 = vmatprep.mubr.bf16.mxu1 %v1359_v1 }
  0x42   :  { %1196 = vmatmul.mubr.msk.bf16.gmra.mrb[24].mxu0 %vm247_vm0, %v1346_v21  ;;  %1209 = vmatmul.mubr.msk.bf16.gmra.mrb[24].mxu1 %vm247_vm0, %v1347_v22 }
  0x43   :  { %425 = vmatprep.mubr.bf16.mxu0 %v1359_v1  ;;  %555 = vmatprep.mubr.bf16.mxu1 %v1359_v1 }
  0x4a   :  { %1197 = vmatmul.mubr.msk.bf16.gmra.mrb[28].mxu0 %vm247_vm0, %v1348_v23  ;;  %1210 = vmatmul.mubr.msk.bf16.gmra.mrb[28].mxu1 %vm247_vm0, %v1349_v24 }
  0x4b   :  { %435 = vmatprep.mubr.bf16.mxu0 %v1359_v1  ;;  %565 = vmatprep.mubr.bf16.mxu1 %v1359_v1 }
  0x52   :  { %1198 = vmatmul.mubr.msk.bf16.gmra.mrb[32].mxu0 %vm247_vm0, %v1350_v25  ;;  %1211 = vmatmul.mubr.msk.bf16.gmra.mrb[32].mxu1 %vm247_vm0, %v1351_v26 }
  0x53   :  { %445 = vmatprep.mubr.bf16.mxu0 %v1359_v1  ;;  %575 = vmatprep.mubr.bf16.mxu1 %v1359_v1 }
  0x5a   :  { %1199 = vmatmul.mubr.msk.bf16.gmra.mrb[36].mxu0 %vm247_vm0, %v1352_v27  ;;  %1212 = vmatmul.mubr.msk.bf16.gmra.mrb[36].mxu1 %vm247_vm0, %v1353_v28 }
  0x5b   :  { %455 = vmatprep.mubr.bf16.mxu0 %v1359_v1  ;;  %585 = vmatprep.mubr.bf16.mxu1 %v1359_v1 }
  0x62   :  { %1200 = vmatmul.mubr.msk.bf16.gmra.mrb[40].mxu0 %vm247_vm0, %v1354_v29  ;;  %1213 = vmatmul.mubr.msk.bf16.gmra.mrb[40].mxu1 %vm247_vm0, %v1355_v30 }
  0x63   :  { %465 = vmatprep.mubr.bf16.mxu0 %v1359_v1  ;;  %595 = vmatprep.mubr.bf16.mxu1 %v1359_v1 }
  0x6a   :  { %1201 = vmatmul.mubr.msk.bf16.gmra.mrb[44].mxu0 %vm247_vm0, %v1356_v31  ;;  %1214 = vmatmul.mubr.msk.bf16.gmra.mrb[44].mxu1 %vm247_vm0, %v1357_v32 }
  0x6b   :  { %475 = vmatprep.mubr.bf16.mxu0 %v1359_v1 }
  0x72   :  { %1202 = vmatmul.mubr.msk.bf16.gmra.mrb[48].mxu0 %vm247_vm0, %v1358_v33 }
  0xe5   :  { %v357_v41 = vpop.f32.mrb[0].mxu0  ;;  %v487_v42 = vpop.f32.mrb[0].mxu1 }
  0xe6   :  { %v359_v43 = vpop.f32.mrb[1].mxu0  ;;  %v489_v44 = vpop.f32.mrb[1].mxu1  ;;  %v488_v47 = vadd.f32 %v487_v42, %v1534_v40  ;;  %v358_v50 = vadd.f32 %v357_v41, %v1534_v40 }
  0xe7   :  { %v360_v45 = vadd.f32 %v359_v43, %v1532_v39  ;;  %v361_v46 = vpop.f32.mrb[2].mxu0  ;;  %v490_v48 = vadd.f32 %v489_v44, %v1532_v39  ;;  %v491_v49 = vpop.f32.mrb[2].mxu1 }
  0xe8   :  { %v363_v51 = vpop.f32.mrb[3].mxu0  ;;  %v492_v52 = vadd.f32 %v491_v49, %v1534_v40  ;;  %v493_v53 = vpop.f32.mrb[3].mxu1  ;;  %v362_v59 = vadd.f32 %v361_v46, %v1534_v40 }
  0xe9   :  { %v610_v54 = vmax.f32 %v360_v45, 0.0  ;;  %v364_v55 = vadd.f32 %v363_v51, %v1532_v39  ;;  %v662_v56 = vmax.f32 %v490_v48, 0.0  ;;  %v494_v57 = vadd.f32 %v493_v53, %v1532_v39 }
  0xeb   :  { %v1264_v60 = vpack.c.bf16 %v610_v54, %v358_v50  ;;  %v612_v61 = vmax.f32 %v364_v55, 0.0  ;;  %v1290_v62 = vpack.c.bf16 %v662_v56, %v488_v47  ;;  %v664_v63 = vmax.f32 %v494_v57, 0.0 }
  0xed   :  { %1104 = vst.msk [vmem:[%s1887_s3] sm:$0xff] %vm1544_vm3, %v1264_v60  ;;  %v1265_v0 = vpack.c.bf16 %v612_v61, %v362_v59  ;;  %1130 = vst.msk [vmem:[%s1887_s3 + $0xd0] sm:$0xff] %vm1544_vm3, %v1290_v62  ;;  %v367_v1 = vpop.f32.mrb[4].mxu0  ;;  %v1291_v2 = vpack.c.bf16 %v664_v63, %v492_v52  ;;  %v497_v3 = vpop.f32.mrb[4].mxu1 }
  0xee   :  { %v369_v4 = vpop.f32.mrb[5].mxu0  ;;  %v499_v5 = vpop.f32.mrb[5].mxu1  ;;  %v498_v8 = vadd.f32 %v497_v3, %v1534_v40  ;;  %v368_v11 = vadd.f32 %v367_v1, %v1534_v40 }
  0xef   :  { %1105 = vst.msk [vmem:[%s1887_s3 + $0x8] sm:$0xff] %vm1544_vm3, %v1265_v0  ;;  %1131 = vst.msk [vmem:[%s1887_s3 + $0xd8] sm:$0xff] %vm1544_vm3, %v1291_v2  ;;  %v370_v6 = vadd.f32 %v369_v4, %v1532_v39  ;;  %v371_v7 = vpop.f32.mrb[6].mxu0  ;;  %v500_v9 = vadd.f32 %v499_v5, %v1532_v39  ;;  %v501_v10 = vpop.f32.mrb[6].mxu1 }
  0xf0   :  { %v373_v12 = vpop.f32.mrb[7].mxu0  ;;  %v502_v13 = vadd.f32 %v501_v10, %v1534_v40  ;;  %v503_v14 = vpop.f32.mrb[7].mxu1  ;;  %v372_v19 = vadd.f32 %v371_v7, %v1534_v40 }
  0xf1   :  { %v614_v15 = vmax.f32 %v370_v6, 0.0  ;;  %v374_v16 = vadd.f32 %v373_v12, %v1532_v39  ;;  %v666_v17 = vmax.f32 %v500_v9, 0.0  ;;  %v504_v18 = vadd.f32 %v503_v14, %v1532_v39 }
  0xf3   :  { %v1266_v20 = vpack.c.bf16 %v614_v15, %v368_v11  ;;  %v616_v21 = vmax.f32 %v374_v16, 0.0  ;;  %v1292_v22 = vpack.c.bf16 %v666_v17, %v498_v8  ;;  %v668_v23 = vmax.f32 %v504_v18, 0.0 }
  0xf5   :  { %1106 = vst.msk [vmem:[%s1887_s3 + $0x10] sm:$0xff] %vm1544_vm3, %v1266_v20  ;;  %v1267_v24 = vpack.c.bf16 %v616_v21, %v372_v19  ;;  %1132 = vst.msk [vmem:[%s1887_s3 + $0xe0] sm:$0xff] %vm1544_vm3, %v1292_v22  ;;  %v377_v25 = vpop.f32.mrb[8].mxu0  ;;  %v1293_v26 = vpack.c.bf16 %v668_v23, %v502_v13  ;;  %v507_v27 = vpop.f32.mrb[8].mxu1 }
  0xf6   :  { %v379_v28 = vpop.f32.mrb[9].mxu0  ;;  %v509_v29 = vpop.f32.mrb[9].mxu1  ;;  %v508_v32 = vadd.f32 %v507_v27, %v1534_v40  ;;  %v378_v35 = vadd.f32 %v377_v25, %v1534_v40 }
  0xf7   :  { %1107 = vst.msk [vmem:[%s1887_s3 + $0x18] sm:$0xff] %vm1544_vm3, %v1267_v24  ;;  %1133 = vst.msk [vmem:[%s1887_s3 + $0xe8] sm:$0xff] %vm1544_vm3, %v1293_v26  ;;  %v380_v30 = vadd.f32 %v379_v28, %v1532_v39  ;;  %v381_v31 = vpop.f32.mrb[10].mxu0  ;;  %v510_v33 = vadd.f32 %v509_v29, %v1532_v39  ;;  %v511_v34 = vpop.f32.mrb[10].mxu1 }
  0xf8   :  { %v383_v36 = vpop.f32.mrb[11].mxu0  ;;  %v512_v37 = vadd.f32 %v511_v34, %v1534_v40  ;;  %v513_v38 = vpop.f32.mrb[11].mxu1  ;;  %v382_v45 = vadd.f32 %v381_v31, %v1534_v40 }
  0xf9   :  { %v618_v41 = vmax.f32 %v380_v30, 0.0  ;;  %v384_v42 = vadd.f32 %v383_v36, %v1532_v39  ;;  %v670_v43 = vmax.f32 %v510_v33, 0.0  ;;  %v514_v44 = vadd.f32 %v513_v38, %v1532_v39 }
  0xfb   :  { %v1268_v46 = vpack.c.bf16 %v618_v41, %v378_v35  ;;  %v620_v47 = vmax.f32 %v384_v42, 0.0  ;;  %v1294_v48 = vpack.c.bf16 %v670_v43, %v508_v32  ;;  %v672_v49 = vmax.f32 %v514_v44, 0.0 }
  0xfd   :  { %1108 = vst.msk [vmem:[%s1887_s3 + $0x20] sm:$0xff] %vm1544_vm3, %v1268_v46  ;;  %v1269_v50 = vpack.c.bf16 %v620_v47, %v382_v45  ;;  %1134 = vst.msk [vmem:[%s1887_s3 + $0xf0] sm:$0xff] %vm1544_vm3, %v1294_v48  ;;  %v387_v51 = vpop.f32.mrb[12].mxu0  ;;  %v1295_v52 = vpack.c.bf16 %v672_v49, %v512_v37  ;;  %v517_v53 = vpop.f32.mrb[12].mxu1 }
  0xfe   :  { %v389_v54 = vpop.f32.mrb[13].mxu0  ;;  %v519_v55 = vpop.f32.mrb[13].mxu1  ;;  %v518_v59 = vadd.f32 %v517_v53, %v1534_v40  ;;  %v388_v62 = vadd.f32 %v387_v51, %v1534_v40 }
  0xff   :  { %1109 = vst.msk [vmem:[%s1887_s3 + $0x28] sm:$0xff] %vm1544_vm3, %v1269_v50  ;;  %1135 = vst.msk [vmem:[%s1887_s3 + $0xf8] sm:$0xff] %vm1544_vm3, %v1295_v52  ;;  %v390_v56 = vadd.f32 %v389_v54, %v1532_v39  ;;  %v391_v57 = vpop.f32.mrb[14].mxu0  ;;  %v520_v60 = vadd.f32 %v519_v55, %v1532_v39  ;;  %v521_v61 = vpop.f32.mrb[14].mxu1 }
 0x100   :  { %v393_v63 = vpop.f32.mrb[15].mxu0  ;;  %v522_v0 = vadd.f32 %v521_v61, %v1534_v40  ;;  %v523_v1 = vpop.f32.mrb[15].mxu1  ;;  %v392_v6 = vadd.f32 %v391_v57, %v1534_v40 }
 0x101   :  { %v622_v2 = vmax.f32 %v390_v56, 0.0  ;;  %v394_v3 = vadd.f32 %v393_v63, %v1532_v39  ;;  %v674_v4 = vmax.f32 %v520_v60, 0.0  ;;  %v524_v5 = vadd.f32 %v523_v1, %v1532_v39 }
 0x103   :  { %v1270_v7 = vpack.c.bf16 %v622_v2, %v388_v62  ;;  %v624_v8 = vmax.f32 %v394_v3, 0.0  ;;  %v1296_v9 = vpack.c.bf16 %v674_v4, %v518_v59  ;;  %v676_v10 = vmax.f32 %v524_v5, 0.0 }
 0x105   :  { %1110 = vst.msk [vmem:[%s1887_s3 + $0x30] sm:$0xff] %vm1544_vm3, %v1270_v7  ;;  %v1271_v11 = vpack.c.bf16 %v624_v8, %v392_v6  ;;  %1136 = vst.msk [vmem:[%s1887_s3 + $0x100] sm:$0xff] %vm1544_vm3, %v1296_v9  ;;  %v397_v12 = vpop.f32.mrb[16].mxu0  ;;  %v1297_v13 = vpack.c.bf16 %v676_v10, %v522_v0  ;;  %v527_v14 = vpop.f32.mrb[16].mxu1 }
 0x106   :  { %v399_v15 = vpop.f32.mrb[17].mxu0  ;;  %v529_v16 = vpop.f32.mrb[17].mxu1  ;;  %v528_v19 = vadd.f32 %v527_v14, %v1534_v40  ;;  %v398_v22 = vadd.f32 %v397_v12, %v1534_v40 }
 0x107   :  { %1111 = vst.msk [vmem:[%s1887_s3 + $0x38] sm:$0xff] %vm1544_vm3, %v1271_v11  ;;  %1137 = vst.msk [vmem:[%s1887_s3 + $0x108] sm:$0xff] %vm1544_vm3, %v1297_v13  ;;  %v400_v17 = vadd.f32 %v399_v15, %v1532_v39  ;;  %v401_v18 = vpop.f32.mrb[18].mxu0  ;;  %v530_v20 = vadd.f32 %v529_v16, %v1532_v39  ;;  %v531_v21 = vpop.f32.mrb[18].mxu1 }
 0x108   :  { %v403_v23 = vpop.f32.mrb[19].mxu0  ;;  %v532_v24 = vadd.f32 %v531_v21, %v1534_v40  ;;  %v533_v25 = vpop.f32.mrb[19].mxu1  ;;  %v402_v30 = vadd.f32 %v401_v18, %v1534_v40 }
 0x109   :  { %v626_v26 = vmax.f32 %v400_v17, 0.0  ;;  %v404_v27 = vadd.f32 %v403_v23, %v1532_v39  ;;  %v678_v28 = vmax.f32 %v530_v20, 0.0  ;;  %v534_v29 = vadd.f32 %v533_v25, %v1532_v39 }
 0x10b   :  { %v1272_v31 = vpack.c.bf16 %v626_v26, %v398_v22  ;;  %v628_v32 = vmax.f32 %v404_v27, 0.0  ;;  %v1298_v33 = vpack.c.bf16 %v678_v28, %v528_v19  ;;  %v680_v34 = vmax.f32 %v534_v29, 0.0 }
 0x10d   :  { %1112 = vst.msk [vmem:[%s1887_s3 + $0x40] sm:$0xff] %vm1544_vm3, %v1272_v31  ;;  %v1273_v35 = vpack.c.bf16 %v628_v32, %v402_v30  ;;  %1138 = vst.msk [vmem:[%s1887_s3 + $0x110] sm:$0xff] %vm1544_vm3, %v1298_v33  ;;  %v407_v36 = vpop.f32.mrb[20].mxu0  ;;  %v1299_v37 = vpack.c.bf16 %v680_v34, %v532_v24  ;;  %v537_v38 = vpop.f32.mrb[20].mxu1 }
 0x10e   :  { %v409_v41 = vpop.f32.mrb[21].mxu0  ;;  %v539_v42 = vpop.f32.mrb[21].mxu1  ;;  %v538_v45 = vadd.f32 %v537_v38, %v1534_v40  ;;  %v408_v48 = vadd.f32 %v407_v36, %v1534_v40 }
 0x10f   :  { %1113 = vst.msk [vmem:[%s1887_s3 + $0x48] sm:$0xff] %vm1544_vm3, %v1273_v35  ;;  %1139 = vst.msk [vmem:[%s1887_s3 + $0x118] sm:$0xff] %vm1544_vm3, %v1299_v37  ;;  %v410_v43 = vadd.f32 %v409_v41, %v1532_v39  ;;  %v411_v44 = vpop.f32.mrb[22].mxu0  ;;  %v540_v46 = vadd.f32 %v539_v42, %v1532_v39  ;;  %v541_v47 = vpop.f32.mrb[22].mxu1 }
 0x110   :  { %v413_v49 = vpop.f32.mrb[23].mxu0  ;;  %v542_v50 = vadd.f32 %v541_v47, %v1534_v40  ;;  %v543_v51 = vpop.f32.mrb[23].mxu1  ;;  %v412_v56 = vadd.f32 %v411_v44, %v1534_v40 }
 0x111   :  { %v630_v52 = vmax.f32 %v410_v43, 0.0  ;;  %v414_v53 = vadd.f32 %v413_v49, %v1532_v39  ;;  %v682_v54 = vmax.f32 %v540_v46, 0.0  ;;  %v544_v55 = vadd.f32 %v543_v51, %v1532_v39 }
 0x113   :  { %v1274_v57 = vpack.c.bf16 %v630_v52, %v408_v48  ;;  %v632_v59 = vmax.f32 %v414_v53, 0.0  ;;  %v1300_v60 = vpack.c.bf16 %v682_v54, %v538_v45  ;;  %v684_v61 = vmax.f32 %v544_v55, 0.0 }
 0x115   :  { %1114 = vst.msk [vmem:[%s1887_s3 + $0x50] sm:$0xff] %vm1544_vm3, %v1274_v57  ;;  %v1275_v62 = vpack.c.bf16 %v632_v59, %v412_v56  ;;  %1140 = vst.msk [vmem:[%s1887_s3 + $0x120] sm:$0xff] %vm1544_vm3, %v1300_v60  ;;  %v417_v63 = vpop.f32.mrb[24].mxu0  ;;  %v1301_v0 = vpack.c.bf16 %v684_v61, %v542_v50  ;;  %v547_v1 = vpop.f32.mrb[24].mxu1 }
 0x116   :  { %v419_v2 = vpop.f32.mrb[25].mxu0  ;;  %v549_v3 = vpop.f32.mrb[25].mxu1  ;;  %v548_v6 = vadd.f32 %v547_v1, %v1534_v40  ;;  %v418_v9 = vadd.f32 %v417_v63, %v1534_v40 }
 0x117   :  { %1115 = vst.msk [vmem:[%s1887_s3 + $0x58] sm:$0xff] %vm1544_vm3, %v1275_v62  ;;  %1141 = vst.msk [vmem:[%s1887_s3 + $0x128] sm:$0xff] %vm1544_vm3, %v1301_v0  ;;  %v420_v4 = vadd.f32 %v419_v2, %v1532_v39  ;;  %v421_v5 = vpop.f32.mrb[26].mxu0  ;;  %v550_v7 = vadd.f32 %v549_v3, %v1532_v39  ;;  %v551_v8 = vpop.f32.mrb[26].mxu1 }
 0x118   :  { %v423_v10 = vpop.f32.mrb[27].mxu0  ;;  %v552_v11 = vadd.f32 %v551_v8, %v1534_v40  ;;  %v553_v12 = vpop.f32.mrb[27].mxu1  ;;  %v422_v17 = vadd.f32 %v421_v5, %v1534_v40 }
 0x119   :  { %v634_v13 = vmax.f32 %v420_v4, 0.0  ;;  %v424_v14 = vadd.f32 %v423_v10, %v1532_v39  ;;  %v686_v15 = vmax.f32 %v550_v7, 0.0  ;;  %v554_v16 = vadd.f32 %v553_v12, %v1532_v39 }
 0x11b   :  { %v1276_v18 = vpack.c.bf16 %v634_v13, %v418_v9  ;;  %v636_v19 = vmax.f32 %v424_v14, 0.0  ;;  %v1302_v20 = vpack.c.bf16 %v686_v15, %v548_v6  ;;  %v688_v21 = vmax.f32 %v554_v16, 0.0 }
 0x11d   :  { %1116 = vst.msk [vmem:[%s1887_s3 + $0x60] sm:$0xff] %vm1544_vm3, %v1276_v18  ;;  %v1277_v22 = vpack.c.bf16 %v636_v19, %v422_v17  ;;  %1142 = vst.msk [vmem:[%s1887_s3 + $0x130] sm:$0xff] %vm1544_vm3, %v1302_v20  ;;  %v427_v23 = vpop.f32.mrb[28].mxu0  ;;  %v1303_v24 = vpack.c.bf16 %v688_v21, %v552_v11  ;;  %v557_v25 = vpop.f32.mrb[28].mxu1 }
 0x11e   :  { %v429_v26 = vpop.f32.mrb[29].mxu0  ;;  %v559_v27 = vpop.f32.mrb[29].mxu1  ;;  %v558_v30 = vadd.f32 %v557_v25, %v1534_v40  ;;  %v428_v33 = vadd.f32 %v427_v23, %v1534_v40 }
 0x11f   :  { %1117 = vst.msk [vmem:[%s1887_s3 + $0x68] sm:$0xff] %vm1544_vm3, %v1277_v22  ;;  %1143 = vst.msk [vmem:[%s1887_s3 + $0x138] sm:$0xff] %vm1544_vm3, %v1303_v24  ;;  %v430_v28 = vadd.f32 %v429_v26, %v1532_v39  ;;  %v431_v29 = vpop.f32.mrb[30].mxu0  ;;  %v560_v31 = vadd.f32 %v559_v27, %v1532_v39  ;;  %v561_v32 = vpop.f32.mrb[30].mxu1 }
 0x120   :  { %v433_v34 = vpop.f32.mrb[31].mxu0  ;;  %v562_v35 = vadd.f32 %v561_v32, %v1534_v40  ;;  %v563_v36 = vpop.f32.mrb[31].mxu1  ;;  %v432_v43 = vadd.f32 %v431_v29, %v1534_v40 }
 0x121   :  { %v638_v37 = vmax.f32 %v430_v28, 0.0  ;;  %v434_v38 = vadd.f32 %v433_v34, %v1532_v39  ;;  %v690_v41 = vmax.f32 %v560_v31, 0.0  ;;  %v564_v42 = vadd.f32 %v563_v36, %v1532_v39 }
 0x123   :  { %v1278_v44 = vpack.c.bf16 %v638_v37, %v428_v33  ;;  %v640_v45 = vmax.f32 %v434_v38, 0.0  ;;  %v1304_v46 = vpack.c.bf16 %v690_v41, %v558_v30  ;;  %v692_v47 = vmax.f32 %v564_v42, 0.0 }
 0x125   :  { %1118 = vst.msk [vmem:[%s1887_s3 + $0x70] sm:$0xff] %vm1544_vm3, %v1278_v44  ;;  %v1279_v48 = vpack.c.bf16 %v640_v45, %v432_v43  ;;  %1144 = vst.msk [vmem:[%s1887_s3 + $0x140] sm:$0xff] %vm1544_vm3, %v1304_v46  ;;  %v437_v49 = vpop.f32.mrb[32].mxu0  ;;  %v1305_v50 = vpack.c.bf16 %v692_v47, %v562_v35  ;;  %v567_v51 = vpop.f32.mrb[32].mxu1 }
 0x126   :  { %v439_v52 = vpop.f32.mrb[33].mxu0  ;;  %v569_v53 = vpop.f32.mrb[33].mxu1  ;;  %v568_v56 = vadd.f32 %v567_v51, %v1534_v40  ;;  %v438_v60 = vadd.f32 %v437_v49, %v1534_v40 }
 0x127   :  { %1119 = vst.msk [vmem:[%s1887_s3 + $0x78] sm:$0xff] %vm1544_vm3, %v1279_v48  ;;  %1145 = vst.msk [vmem:[%s1887_s3 + $0x148] sm:$0xff] %vm1544_vm3, %v1305_v50  ;;  %v440_v54 = vadd.f32 %v439_v52, %v1532_v39  ;;  %v441_v55 = vpop.f32.mrb[34].mxu0  ;;  %v570_v57 = vadd.f32 %v569_v53, %v1532_v39  ;;  %v571_v59 = vpop.f32.mrb[34].mxu1 }
 0x128   :  { %v443_v61 = vpop.f32.mrb[35].mxu0  ;;  %v572_v62 = vadd.f32 %v571_v59, %v1534_v40  ;;  %v573_v63 = vpop.f32.mrb[35].mxu1  ;;  %v442_v4 = vadd.f32 %v441_v55, %v1534_v40 }
 0x129   :  { %v642_v0 = vmax.f32 %v440_v54, 0.0  ;;  %v444_v1 = vadd.f32 %v443_v61, %v1532_v39  ;;  %v694_v2 = vmax.f32 %v570_v57, 0.0  ;;  %v574_v3 = vadd.f32 %v573_v63, %v1532_v39 }
 0x12b   :  { %v1280_v5 = vpack.c.bf16 %v642_v0, %v438_v60  ;;  %v644_v6 = vmax.f32 %v444_v1, 0.0  ;;  %v1306_v7 = vpack.c.bf16 %v694_v2, %v568_v56  ;;  %v696_v8 = vmax.f32 %v574_v3, 0.0 }
 0x12d   :  { %1120 = vst.msk [vmem:[%s1887_s3 + $0x80] sm:$0xff] %vm1544_vm3, %v1280_v5  ;;  %v1281_v9 = vpack.c.bf16 %v644_v6, %v442_v4  ;;  %1146 = vst.msk [vmem:[%s1887_s3 + $0x150] sm:$0xff] %vm1544_vm3, %v1306_v7  ;;  %v447_v10 = vpop.f32.mrb[36].mxu0  ;;  %v1307_v11 = vpack.c.bf16 %v696_v8, %v572_v62  ;;  %v577_v12 = vpop.f32.mrb[36].mxu1 }
 0x12e   :  { %v449_v13 = vpop.f32.mrb[37].mxu0  ;;  %v579_v14 = vpop.f32.mrb[37].mxu1  ;;  %v578_v17 = vadd.f32 %v577_v12, %v1534_v40  ;;  %v448_v20 = vadd.f32 %v447_v10, %v1534_v40 }
 0x12f   :  { %1121 = vst.msk [vmem:[%s1887_s3 + $0x88] sm:$0xff] %vm1544_vm3, %v1281_v9  ;;  %1147 = vst.msk [vmem:[%s1887_s3 + $0x158] sm:$0xff] %vm1544_vm3, %v1307_v11  ;;  %v450_v15 = vadd.f32 %v449_v13, %v1532_v39  ;;  %v451_v16 = vpop.f32.mrb[38].mxu0  ;;  %v580_v18 = vadd.f32 %v579_v14, %v1532_v39  ;;  %v581_v19 = vpop.f32.mrb[38].mxu1 }
 0x130   :  { %v453_v21 = vpop.f32.mrb[39].mxu0  ;;  %v582_v22 = vadd.f32 %v581_v19, %v1534_v40  ;;  %v583_v23 = vpop.f32.mrb[39].mxu1  ;;  %v452_v28 = vadd.f32 %v451_v16, %v1534_v40 }
 0x131   :  { %v646_v24 = vmax.f32 %v450_v15, 0.0  ;;  %v454_v25 = vadd.f32 %v453_v21, %v1532_v39  ;;  %v698_v26 = vmax.f32 %v580_v18, 0.0  ;;  %v584_v27 = vadd.f32 %v583_v23, %v1532_v39 }
 0x133   :  { %v1282_v29 = vpack.c.bf16 %v646_v24, %v448_v20  ;;  %v648_v30 = vmax.f32 %v454_v25, 0.0  ;;  %v1308_v31 = vpack.c.bf16 %v698_v26, %v578_v17  ;;  %v700_v32 = vmax.f32 %v584_v27, 0.0 }
 0x135   :  { %1122 = vst.msk [vmem:[%s1887_s3 + $0x90] sm:$0xff] %vm1544_vm3, %v1282_v29  ;;  %v1283_v33 = vpack.c.bf16 %v648_v30, %v452_v28  ;;  %1148 = vst.msk [vmem:[%s1887_s3 + $0x160] sm:$0xff] %vm1544_vm3, %v1308_v31  ;;  %v457_v34 = vpop.f32.mrb[40].mxu0  ;;  %v1309_v35 = vpack.c.bf16 %v700_v32, %v582_v22  ;;  %v587_v36 = vpop.f32.mrb[40].mxu1 }
 0x136   :  { %v459_v37 = vpop.f32.mrb[41].mxu0  ;;  %v589_v38 = vpop.f32.mrb[41].mxu1  ;;  %v588_v43 = vadd.f32 %v587_v36, %v1534_v40  ;;  %v458_v46 = vadd.f32 %v457_v34, %v1534_v40 }
 0x137   :  { %1123 = vst.msk [vmem:[%s1887_s3 + $0x98] sm:$0xff] %vm1544_vm3, %v1283_v33  ;;  %1149 = vst.msk [vmem:[%s1887_s3 + $0x168] sm:$0xff] %vm1544_vm3, %v1309_v35  ;;  %v460_v41 = vadd.f32 %v459_v37, %v1532_v39  ;;  %v461_v42 = vpop.f32.mrb[42].mxu0  ;;  %v590_v44 = vadd.f32 %v589_v38, %v1532_v39  ;;  %v591_v45 = vpop.f32.mrb[42].mxu1 }
 0x138   :  { %v463_v47 = vpop.f32.mrb[43].mxu0  ;;  %v592_v48 = vadd.f32 %v591_v45, %v1534_v40  ;;  %v593_v49 = vpop.f32.mrb[43].mxu1  ;;  %v462_v54 = vadd.f32 %v461_v42, %v1534_v40 }
 0x139   :  { %v650_v50 = vmax.f32 %v460_v41, 0.0  ;;  %v464_v51 = vadd.f32 %v463_v47, %v1532_v39  ;;  %v702_v52 = vmax.f32 %v590_v44, 0.0  ;;  %v594_v53 = vadd.f32 %v593_v49, %v1532_v39 }
 0x13b   :  { %v1284_v55 = vpack.c.bf16 %v650_v50, %v458_v46  ;;  %v652_v56 = vmax.f32 %v464_v51, 0.0  ;;  %v1310_v57 = vpack.c.bf16 %v702_v52, %v588_v43  ;;  %v704_v59 = vmax.f32 %v594_v53, 0.0 }
 0x13d   :  { %1124 = vst.msk [vmem:[%s1887_s3 + $0xa0] sm:$0xff] %vm1544_vm3, %v1284_v55  ;;  %v1285_v60 = vpack.c.bf16 %v652_v56, %v462_v54  ;;  %1150 = vst.msk [vmem:[%s1887_s3 + $0x170] sm:$0xff] %vm1544_vm3, %v1310_v57  ;;  %v467_v61 = vpop.f32.mrb[44].mxu0  ;;  %v1311_v62 = vpack.c.bf16 %v704_v59, %v592_v48  ;;  %v597_v63 = vpop.f32.mrb[44].mxu1 }
 0x13e   :  { %v469_v0 = vpop.f32.mrb[45].mxu0  ;;  %v599_v1 = vpop.f32.mrb[45].mxu1  ;;  %v598_v4 = vadd.f32 %v597_v63, %v1534_v40  ;;  %v468_v9 = vadd.f32 %v467_v61, %v1534_v40 }
 0x13f   :  { %1125 = vst.msk [vmem:[%s1887_s3 + $0xa8] sm:$0xff] %vm1544_vm3, %v1285_v60  ;;  %1151 = vst.msk [vmem:[%s1887_s3 + $0x178] sm:$0xff] %vm1544_vm3, %v1311_v62  ;;  %v470_v2 = vadd.f32 %v469_v0, %v1532_v39  ;;  %v471_v3 = vpop.f32.mrb[46].mxu0  ;;  %v600_v5 = vadd.f32 %v599_v1, %v1532_v39  ;;  %v601_v6 = vpop.f32.mrb[46].mxu1 }
 0x140   :  { %v473_v7 = vpop.f32.mrb[47].mxu0  ;;  %v602_v8 = vpop.f32.mrb[47].mxu1  ;;  %v472_v14 = vadd.f32 %v471_v3, %v1534_v40 }
 0x141   :  { %v654_v10 = vmax.f32 %v470_v2, 0.0  ;;  %v474_v11 = vadd.f32 %v473_v7, %v1532_v39  ;;  %v706_v12 = vmax.f32 %v600_v5, 0.0 }
 0x143   :  { %v1286_v13 = vpack.c.bf16 %v654_v10, %v468_v9  ;;  %v656_v15 = vmax.f32 %v474_v11, 0.0  ;;  %v1312_v16 = vpack.c.bf16 %v706_v12, %v598_v4 }
 0x145   :  { %1126 = vst.msk [vmem:[%s1887_s3 + $0xb0] sm:$0xff] %vm1544_vm3, %v1286_v13  ;;  %v1287_v17 = vpack.c.bf16 %v656_v15, %v472_v14  ;;  %v477_v18 = vpop.f32.mrb[48].mxu0  ;;  %1152 = vst.msk [vmem:[%s1887_s3 + $0x180] sm:$0xff] %vm1544_vm3, %v1312_v16 }
 0x146   :  { %v479_v19 = vpop.f32.mrb[49].mxu0  ;;  %v478_v23 = vadd.f32 %v477_v18, %v1534_v40 }
 0x147   :  { %1127 = vst.msk [vmem:[%s1887_s3 + $0xb8] sm:$0xff] %vm1544_vm3, %v1287_v17  ;;  %v480_v20 = vadd.f32 %v479_v19, %v1532_v39  ;;  %v481_v21 = vpop.f32.mrb[50].mxu0 }
 0x148   :  { %v483_v22 = vpop.f32.mrb[51].mxu0  ;;  %v482_v27 = vadd.f32 %v481_v21, %v1534_v40 }
 0x149   :  { %v658_v24 = vmax.f32 %v480_v20, 0.0  ;;  %v484_v25 = vadd.f32 %v483_v22, %v1532_v39 }
 0x14b   :  { %v1288_v26 = vpack.c.bf16 %v658_v24, %v478_v23  ;;  %v660_v28 = vmax.f32 %v484_v25, 0.0 }
 0x14d   :  { %1128 = vst.msk [vmem:[%s1887_s3 + $0xc0] sm:$0xff] %vm1544_vm3, %v1288_v26  ;;  %v1289_v29 = vpack.c.bf16 %v660_v28, %v482_v27 }
 0x14f   :  { %1129 = vst.msk [vmem:[%s1887_s3 + $0xc8] sm:$0xff] %vm1544_vm3, %v1289_v29 }

// kernel: c2f_irmb_forward.8
= control target key start
LH: loop header
LB: loop body
LE: loop exit
PB: predicated region body
PF: predicated region fallthrough
CT: control target
= control target key end

     0   :  { %v3611_v0 = vmov 0   ;;  %v3612_v40 = vmov 0.0   ;;  %vm3613_vm0 = vmmov 0   ;;  %vm1070_vm1 = vcmask 523264   ;;  %s4883_s1 = inlined_call_operand.vmem [shape: bf16[576,64], index: 1, kind: input, shape index: {}]   ;;  %s4884_s0 = inlined_call_operand.vmem [shape: bf16[392,576], index: 0, kind: input, shape index: {}]   ;;  %s4885_s2 = inlined_call_operand.vmem [shape: f32[1,64], index: 2, kind: input, shape index: {}]   ;;  %s4886_s3 = inlined_call_operand.vmem [shape: f32[1,64], index: 3, kind: input, shape index: {}]   ;;  %s4887_s4 = inlined_call_operand.vmem [shape: bf16[392,64], index: 4, kind: output, shape index: {}]  }
   0x1   :  { %1146 = vmatprep.subr.bf16.mxu1 %v3611_v0  ;;  %1378 = vmatprep.subr.bf16.mxu0 %v3611_v0  ;;  %v3204_v1 = vld [vmem:[%s4883_s1] sm:$0xff]   ;;  %v3206_v3 = vld [vmem:[%s4883_s1 + $0x8] sm:$0xff]   ;;  %v3208_v5 = vld [vmem:[%s4883_s1 + $0x10] sm:$0xff]   ;;  %vm2494_vm2 = vcmask 519168  }
   0x2   :  { %v3647_v2 = vld [vmem:[%s4883_s1 + $0x80] sm:$0xff]   ;;  %1147 = vmatpush1.bf16.msra.mxu1 %v3204_v1  ;;  %v3657_v4 = vld [vmem:[%s4883_s1 + $0x88] sm:$0xff]   ;;  %v3668_v6 = vld [vmem:[%s4883_s1 + $0x90] sm:$0xff]  }
   0x3   :  { %1379 = vmatpush1.bf16.msra.mxu0 %v3647_v2  ;;  %1148 = vmatprep.subr.bf16.mxu1 %v3611_v0  ;;  %v3210_v7 = vld [vmem:[%s4883_s1 + $0x18] sm:$0xff]   ;;  %v3212_v9 = vld [vmem:[%s4883_s1 + $0x20] sm:$0xff]   ;;  %v3214_v11 = vld [vmem:[%s4883_s1 + $0x28] sm:$0xff]  }
   0x4   :  { %1380 = vmatprep.subr.bf16.mxu0 %v3611_v0  ;;  %v3679_v8 = vld [vmem:[%s4883_s1 + $0x98] sm:$0xff]   ;;  %v3690_v10 = vld [vmem:[%s4883_s1 + $0xa0] sm:$0xff]   ;;  %v3701_v12 = vld [vmem:[%s4883_s1 + $0xa8] sm:$0xff]  }
   0x5   :  { %v3216_v13 = vld [vmem:[%s4883_s1 + $0x30] sm:$0xff]   ;;  %v3218_v15 = vld [vmem:[%s4883_s1 + $0x38] sm:$0xff]   ;;  %v3220_v17 = vld [vmem:[%s4883_s1 + $0x40] sm:$0xff]  }
   0x6   :  { %1149 = vmatpush1.bf16.msra.mxu1 %v3206_v3  ;;  %v3712_v14 = vld [vmem:[%s4883_s1 + $0xb0] sm:$0xff]   ;;  %v3723_v16 = vld [vmem:[%s4883_s1 + $0xb8] sm:$0xff]   ;;  %v3734_v18 = vld [vmem:[%s4883_s1 + $0xc0] sm:$0xff]  }
   0x7   :  { %1381 = vmatpush1.bf16.msra.mxu0 %v3657_v4  ;;  %1150 = vmatprep.subr.bf16.mxu1 %v3611_v0  ;;  %v3238_v19 = vld [vmem:[%s4884_s0 + $0x4] ss:$20 sps:$4 sm:$0xff]   ;;  %v3222_v20 = vld [vmem:[%s4883_s1 + $0x48] sm:$0xff]   ;;  %v3224_v23 = vld [vmem:[%s4883_s1 + $0x50] sm:$0xff]  }
   0x8   :  { %1382 = vmatprep.subr.bf16.mxu0 %v3611_v0  ;;  %v3241_v21 = vld [vmem:[%s4884_s0 + $0xc] ss:$20 sps:$4 sm:$0xff]   ;;  %1178 = vmatprep.mubr.bf16.mxu1 %v3238_v19  ;;  %v3762_v24 = vld [vmem:[%s4883_s1 + $0xd0] sm:$0xff]   ;;  %v3226_v25 = vld [vmem:[%s4883_s1 + $0x58] sm:$0xff]  }
   0x9   :  { %v3751_v22 = vld [vmem:[%s4883_s1 + $0xc8] sm:$0xff]   ;;  %1410 = vmatprep.mubr.bf16.mxu0 %v3241_v21  ;;  %v3773_v26 = vld [vmem:[%s4883_s1 + $0xd8] sm:$0xff]   ;;  %v3228_v27 = vld [vmem:[%s4883_s1 + $0x60] sm:$0xff]  }
   0xa   :  { %1151 = vmatpush1.bf16.msra.mxu1 %v3208_v5  ;;  %v3784_v28 = vld [vmem:[%s4883_s1 + $0xe0] sm:$0xff]   ;;  %v3230_v29 = vld [vmem:[%s4883_s1 + $0x68] sm:$0xff]   ;;  %v3232_v31 = vld [vmem:[%s4883_s1 + $0x70] sm:$0xff]  }
   0xb   :  { %1383 = vmatpush1.bf16.msra.mxu0 %v3668_v6  ;;  %1152 = vmatprep.subr.bf16.mxu1 %v3611_v0  ;;  %v3795_v30 = vld [vmem:[%s4883_s1 + $0xe8] sm:$0xff]   ;;  %v3806_v32 = vld [vmem:[%s4883_s1 + $0xf0] sm:$0xff]   ;;  %v3234_v33 = vld [vmem:[%s4883_s1 + $0x78] sm:$0xff]  }
   0xc   :  { %1384 = vmatprep.subr.bf16.mxu0 %v3611_v0  ;;  %v3817_v34 = vld [vmem:[%s4883_s1 + $0xf8] sm:$0xff]   ;;  %v3236_v35 = vld [vmem:[%s4884_s0] ss:$20 sps:$4 sm:$0xff]   ;;  %v3261_v41 = vld [vmem:[%s4883_s1 + $0x108] sm:$0xff]  }
   0xd   :  { %v3239_v36 = vld [vmem:[%s4884_s0 + $0x8] ss:$20 sps:$4 sm:$0xff]   ;;  %v3242_v37 = vld [vmem:[%s4883_s1 + $0x100] sm:$0xff]   ;;  %v3280_v46 = vld [vmem:[%s4883_s1 + $0x110] sm:$0xff]  }
   0xe   :  { %1153 = vmatpush1.bf16.msra.mxu1 %v3210_v7  ;;  %v3243_v38 = vld [vmem:[%s4884_s0 + $0x2c] ss:$20 sps:$4 sm:$0xff]   ;;  %v3245_v39 = vld [vmem:[%s4884_s0 + $0x34] ss:$20 sps:$4 sm:$0xff]   ;;  %v3248_v43 = vld [vmem:[%s4884_s0 + $0x30] ss:$20 sps:$4 sm:$0xff]  }
   0xf   :  { %1385 = vmatpush1.bf16.msra.mxu0 %v3679_v8  ;;  %1154 = vmatprep.subr.bf16.mxu1 %v3611_v0  ;;  %v3247_v42 = vld [vmem:[%s4884_s0 + $0x28] ss:$20 sps:$4 sm:$0xff]   ;;  %v3253_v48 = vld [vmem:[%s4884_s0 + $0x50] ss:$20 sps:$4 sm:$0xff]   ;;  %v3254_v49 = vld [vmem:[%s4884_s0 + $0x58] ss:$20 sps:$4 sm:$0xff]  }
  0x10   :  { %1386 = vmatprep.subr.bf16.mxu0 %v3611_v0  ;;  %v3249_v44 = vld [vmem:[%s4884_s0 + $0x54] ss:$20 sps:$4 sm:$0xff]   ;;  %v3251_v45 = vld [vmem:[%s4884_s0 + $0x5c] ss:$20 sps:$4 sm:$0xff]   ;;  %v3257_v51 = vld [vmem:[%s4884_s0 + $0x84] ss:$20 sps:$4 sm:$0xff]  }
  0x11   :  { %v3303_v47 = vld [vmem:[%s4883_s1 + $0x118] sm:$0xff]   ;;  %v3260_v53 = vld [vmem:[%s4884_s0 + $0x80] ss:$20 sps:$4 sm:$0xff]   ;;  %v3273_v61 = vld [vmem:[%s4884_s0 + $0xd0] ss:$20 sps:$4 sm:$0xff]  }
  0x12   :  { %1155 = vmatpush1.bf16.msra.mxu1 %v3212_v9  ;;  %v3255_v50 = vld [vmem:[%s4884_s0 + $0x7c] ss:$20 sps:$4 sm:$0xff]   ;;  %v3259_v52 = vld [vmem:[%s4884_s0 + $0x78] ss:$20 sps:$4 sm:$0xff]   ;;  %v3266_v56 = vld [vmem:[%s4884_s0 + $0xa0] ss:$20 sps:$4 sm:$0xff]  }
  0x13   :  { %1387 = vmatpush1.bf16.msra.mxu0 %v3690_v10  ;;  %1156 = vmatprep.subr.bf16.mxu1 %v3611_v0  ;;  %v3262_v54 = vld [vmem:[%s4884_s0 + $0xa4] ss:$20 sps:$4 sm:$0xff]   ;;  %v3264_v55 = vld [vmem:[%s4884_s0 + $0xac] ss:$20 sps:$4 sm:$0xff]   ;;  %v3267_v57 = vld [vmem:[%s4884_s0 + $0xa8] ss:$20 sps:$4 sm:$0xff]  }
  0x14   :  { %1388 = vmatprep.subr.bf16.mxu0 %v3611_v0  ;;  %v3268_v58 = vld [vmem:[%s4884_s0 + $0xcc] ss:$20 sps:$4 sm:$0xff]   ;;  %v3270_v59 = vld [vmem:[%s4884_s0 + $0xd4] ss:$20 sps:$4 sm:$0xff]   ;;  %v3276_v63 = vld [vmem:[%s4884_s0 + $0xfc] ss:$20 sps:$4 sm:$0xff]  }
  0x15   :  { %v3272_v60 = vld [vmem:[%s4884_s0 + $0xc8] ss:$20 sps:$4 sm:$0xff]   ;;  %v3278_v1 = vld [vmem:[%s4884_s0 + $0xf0] ss:$20 sps:$4 sm:$0xff]   ;;  %v3285_v5 = vld [vmem:[%s4884_s0 + $0x118] ss:$20 sps:$4 sm:$0xff]  }
  0x16   :  { %1157 = vmatpush1.bf16.msra.mxu1 %v3214_v11  ;;  %v3274_v62 = vld [vmem:[%s4884_s0 + $0xf4] ss:$20 sps:$4 sm:$0xff]   ;;  %v3281_v3 = vld [vmem:[%s4884_s0 + $0x11c] ss:$20 sps:$4 sm:$0xff]   ;;  %v3287_v7 = vld [vmem:[%s4884_s0 + $0x144] ss:$20 sps:$4 sm:$0xff]  }
  0x17   :  { %1389 = vmatpush1.bf16.msra.mxu0 %v3701_v12  ;;  %1158 = vmatprep.subr.bf16.mxu1 %v3611_v0  ;;  %v3291_v9 = vld [vmem:[%s4884_s0 + $0x140] ss:$20 sps:$4 sm:$0xff]   ;;  %v3308_v19 = vld [vmem:[%s4884_s0 + $0x1c4] ss:$20 sps:$4 sm:$0xff]  }
  0x18   :  { %1390 = vmatprep.subr.bf16.mxu0 %v3611_v0  ;;  %v3293_v11 = vld [vmem:[%s4884_s0 + $0x16c] ss:$20 sps:$4 sm:$0xff]  }
  0x19   :  { %v3311_v21 = vld [vmem:[%s4884_s0 + $0x1c0] ss:$20 sps:$4 sm:$0xff]  }
  0x1a   :  { %1159 = vmatpush1.bf16.msra.mxu1 %v3216_v13  ;;  %v3298_v13 = vld [vmem:[%s4884_s0 + $0x170] ss:$20 sps:$4 sm:$0xff]  }
  0x1b   :  { %1391 = vmatpush1.bf16.msra.mxu0 %v3712_v14  ;;  %1160 = vmatprep.subr.bf16.mxu1 %v3611_v0 }
  0x1c   :  { %1392 = vmatprep.subr.bf16.mxu0 %v3611_v0 }
  0x1e   :  { %1161 = vmatpush1.bf16.msra.mxu1 %v3218_v15  ;;  %v3301_v15 = vld [vmem:[%s4884_s0 + $0x19c] ss:$20 sps:$4 sm:$0xff]  }
  0x1f   :  { %1393 = vmatpush1.bf16.msra.mxu0 %v3723_v16  ;;  %1162 = vmatprep.subr.bf16.mxu1 %v3611_v0 }
  0x20   :  { %1394 = vmatprep.subr.bf16.mxu0 %v3611_v0 }
  0x22   :  { %1163 = vmatpush1.bf16.msra.mxu1 %v3220_v17  ;;  %v3305_v17 = vld [vmem:[%s4884_s0 + $0x198] ss:$20 sps:$4 sm:$0xff]  }
  0x23   :  { %1395 = vmatpush1.bf16.msra.mxu0 %v3734_v18  ;;  %1164 = vmatprep.subr.bf16.mxu1 %v3611_v0 }
  0x24   :  { %1396 = vmatprep.subr.bf16.mxu0 %v3611_v0 }
  0x26   :  { %1165 = vmatpush1.bf16.msra.mxu1 %v3222_v20  ;;  %v3310_v20 = vld [vmem:[%s4884_s0 + $0x1b8] ss:$20 sps:$4 sm:$0xff]  }
  0x27   :  { %1397 = vmatpush1.bf16.msra.mxu0 %v3751_v22  ;;  %1166 = vmatprep.subr.bf16.mxu1 %v3611_v0 }
  0x28   :  { %1398 = vmatprep.subr.bf16.mxu0 %v3611_v0 }
  0x2a   :  { %1167 = vmatpush1.bf16.msra.mxu1 %v3224_v23  ;;  %v3314_v23 = vld [vmem:[%s4884_s0 + $0x1ec] ss:$20 sps:$4 sm:$0xff]  }
  0x2b   :  { %1399 = vmatpush1.bf16.msra.mxu0 %v3762_v24  ;;  %1168 = vmatprep.subr.bf16.mxu1 %v3611_v0 }
  0x2c   :  { %1400 = vmatprep.subr.bf16.mxu0 %v3611_v0 }
  0x2e   :  { %1169 = vmatpush1.bf16.msra.mxu1 %v3226_v25  ;;  %v3317_v25 = vld [vmem:[%s4884_s0 + $0x1e8] ss:$20 sps:$4 sm:$0xff]  }
  0x2f   :  { %1401 = vmatpush1.bf16.msra.mxu0 %v3773_v26  ;;  %1170 = vmatprep.subr.bf16.mxu1 %v3611_v0 }
  0x30   :  { %1402 = vmatprep.subr.bf16.mxu0 %v3611_v0 }
  0x32   :  { %1171 = vmatpush1.bf16.msra.mxu1 %v3228_v27  ;;  %v3320_v27 = vld [vmem:[%s4884_s0 + $0x208] ss:$20 sps:$4 sm:$0xff]  }
  0x33   :  { %1403 = vmatpush1.bf16.msra.mxu0 %v3784_v28  ;;  %1172 = vmatprep.subr.bf16.mxu1 %v3611_v0 }
  0x34   :  { %1404 = vmatprep.subr.bf16.mxu0 %v3611_v0 }
  0x36   :  { %1173 = vmatpush1.bf16.msra.mxu1 %v3230_v29  ;;  %v3322_v29 = vld [vmem:[%s4884_s0 + $0x234] ss:$20 sps:$4 sm:$0xff]  }
  0x37   :  { %1405 = vmatpush1.bf16.msra.mxu0 %v3795_v30  ;;  %1174 = vmatprep.subr.bf16.mxu1 %v3611_v0 }
  0x38   :  { %1406 = vmatprep.subr.bf16.mxu0 %v3611_v0 }
  0x3a   :  { %1175 = vmatpush1.bf16.msra.mxu1 %v3232_v31  ;;  %v3325_v31 = vld [vmem:[%s4884_s0 + $0x38] ss:$20 sps:$4 sm:$0xff]  }
  0x3b   :  { %1407 = vmatpush1.bf16.msra.mxu0 %v3806_v32  ;;  %1176 = vmatprep.subr.bf16.mxu1 %v3611_v0 }
  0x3c   :  { %1408 = vmatprep.subr.bf16.mxu0 %v3611_v0 }
  0x3e   :  { %1177 = vmatpush1.bf16.msra.mxu1 %v3234_v33  ;;  %v3328_v33 = vld [vmem:[%s4884_s0 + $0x258] ss:$20 sps:$4 sm:$0xff]  }
  0x3f   :  { %1409 = vmatpush1.bf16.msra.mxu0 %v3817_v34  ;;  %3020 = vmatprep.subr.bf16.mxu1 %v3611_v0 }
  0x40   :  { %2912 = vmatprep.subr.bf16.mxu0 %v3612_v40 }
  0x41   :  { %1179 = vmatmul.mubr.bf16.vlgmr.msra.gmra.mrb[0].mxu1 %v3236_v35  ;;  %v3330_v35 = vld [vmem:[%s4884_s0 + $0x284] ss:$20 sps:$4 sm:$0xff]  }
  0x42   :  { %1411 = vmatmul.mubr.bf16.vlgmr.msra.gmra.mrb[0].mxu0 %v3239_v36  ;;  %1186 = vmatprep.mubr.bf16.mxu1 %v3243_v38  ;;  %v3332_v36 = vld [vmem:[%s4884_s0 + $0x280] ss:$20 sps:$4 sm:$0xff]  }
  0x43   :  { %2913 = vmatpush3.bf16.msra.mxu0 %v3242_v37  ;;  %1418 = vmatprep.mubr.bf16.mxu0 %v3245_v39  ;;  %v3333_v37 = vld [vmem:[%s4884_s0 + $0x88] ss:$20 sps:$4 sm:$0xff]   ;;  %v3334_v38 = vld [vmem:[%s4884_s0 + $0x2ac] ss:$20 sps:$4 sm:$0xff]  }
  0x44   :  { %3036 = vmatpush1.bf16.msra.mxu1 %v3647_v2  ;;  %2914 = vmatprep.subr.bf16.mxu0 %v3612_v40  ;;  %v3279_v2 = vld [vmem:[%s4884_s0 + $0xf8] ss:$20 sps:$4 sm:$0xff]   ;;  %v3336_v39 = vld [vmem:[%s4884_s0 + $0x2a8] ss:$20 sps:$4 sm:$0xff]  }
  0x45   :  { %3021 = vmatprep.subr.bf16.mxu1 %v3611_v0 }
  0x47   :  { %2915 = vmatpush3.bf16.msra.mxu0 %v3261_v41  ;;  %v3337_v41 = vld [vmem:[%s4884_s0 + $0xb0] ss:$20 sps:$4 sm:$0xff]  }
  0x48   :  { %3037 = vmatpush1.bf16.msra.mxu1 %v3657_v4  ;;  %2916 = vmatprep.subr.bf16.mxu0 %v3612_v40  ;;  %v3283_v4 = vld [vmem:[%s4884_s0 + $0x124] ss:$20 sps:$4 sm:$0xff]  }
  0x49   :  { %1187 = vmatmul.mubr.bf16.gmra.mrb[4].mxu1 %v3247_v42  ;;  %3022 = vmatprep.subr.bf16.mxu1 %v3611_v0  ;;  %v3338_v42 = vld [vmem:[%s4884_s0 + $0x2d4] ss:$20 sps:$4 sm:$0xff]  }
  0x4a   :  { %1419 = vmatmul.mubr.bf16.gmra.mrb[4].mxu0 %v3248_v43  ;;  %1194 = vmatprep.mubr.bf16.mxu1 %v3249_v44  ;;  %v3340_v43 = vld [vmem:[%s4884_s0 + $0x2d0] ss:$20 sps:$4 sm:$0xff]   ;;  %v3341_v44 = vld [vmem:[%s4884_s0 + $0xd8] ss:$20 sps:$4 sm:$0xff]  }
  0x4b   :  { %1426 = vmatprep.mubr.bf16.mxu0 %v3251_v45  ;;  %2917 = vmatpush3.bf16.msra.mxu0 %v3280_v46  ;;  %v3342_v45 = vld [vmem:[%s4884_s0 + $0x2fc] ss:$20 sps:$4 sm:$0xff]   ;;  %v3344_v46 = vld [vmem:[%s4884_s0 + $0x2f8] ss:$20 sps:$4 sm:$0xff]  }
  0x4c   :  { %3038 = vmatpush1.bf16.msra.mxu1 %v3668_v6  ;;  %2918 = vmatprep.subr.bf16.mxu0 %v3612_v40  ;;  %v3286_v6 = vld [vmem:[%s4884_s0 + $0x120] ss:$20 sps:$4 sm:$0xff]  }
  0x4d   :  { %3023 = vmatprep.subr.bf16.mxu1 %v3611_v0 }
  0x4f   :  { %2919 = vmatpush3.bf16.msra.mxu0 %v3303_v47  ;;  %v3345_v47 = vld [vmem:[%s4884_s0 + $0x100] ss:$20 sps:$4 sm:$0xff]  }
  0x50   :  { %3039 = vmatpush1.bf16.msra.mxu1 %v3679_v8  ;;  %v3289_v8 = vld [vmem:[%s4884_s0 + $0x14c] ss:$20 sps:$4 sm:$0xff]  }
  0x51   :  { %1195 = vmatmul.mubr.bf16.gmra.mrb[8].mxu1 %v3253_v48  ;;  %3024 = vmatprep.subr.bf16.mxu1 %v3611_v0  ;;  %v3346_v48 = vld [vmem:[%s4884_s0 + $0x324] ss:$20 sps:$4 sm:$0xff]  }
  0x52   :  { %1427 = vmatmul.mubr.bf16.gmra.mrb[8].mxu0 %v3254_v49  ;;  %1202 = vmatprep.mubr.bf16.mxu1 %v3255_v50  ;;  %v3348_v49 = vld [vmem:[%s4884_s0 + $0x320] ss:$20 sps:$4 sm:$0xff]   ;;  %v3349_v50 = vld [vmem:[%s4884_s0 + $0x128] ss:$20 sps:$4 sm:$0xff]  }
  0x53   :  { %1434 = vmatprep.mubr.bf16.mxu0 %v3257_v51  ;;  %v3350_v51 = vld [vmem:[%s4884_s0 + $0x34c] ss:$20 sps:$4 sm:$0xff]  }
  0x54   :  { %3040 = vmatpush1.bf16.msra.mxu1 %v3690_v10  ;;  %v3292_v10 = vld [vmem:[%s4884_s0 + $0x148] ss:$20 sps:$4 sm:$0xff]  }
  0x55   :  { %3025 = vmatprep.subr.bf16.mxu1 %v3611_v0 }
  0x58   :  { %3041 = vmatpush1.bf16.msra.mxu1 %v3701_v12  ;;  %v3295_v12 = vld [vmem:[%s4884_s0 + $0x174] ss:$20 sps:$4 sm:$0xff]  }
  0x59   :  { %1203 = vmatmul.mubr.bf16.gmra.mrb[12].mxu1 %v3259_v52  ;;  %3026 = vmatprep.subr.bf16.mxu1 %v3611_v0  ;;  %v3352_v52 = vld [vmem:[%s4884_s0 + $0x348] ss:$20 sps:$4 sm:$0xff]  }
  0x5a   :  { %1435 = vmatmul.mubr.bf16.gmra.mrb[12].mxu0 %v3260_v53  ;;  %1210 = vmatprep.mubr.bf16.mxu1 %v3262_v54  ;;  %v3353_v53 = vld [vmem:[%s4884_s0 + $0x150] ss:$20 sps:$4 sm:$0xff]   ;;  %v3354_v54 = vld [vmem:[%s4884_s0 + $0x374] ss:$20 sps:$4 sm:$0xff]  }
  0x5b   :  { %1442 = vmatprep.mubr.bf16.mxu0 %v3264_v55  ;;  %v3356_v55 = vld [vmem:[%s4884_s0 + $0x370] ss:$20 sps:$4 sm:$0xff]  }
  0x5c   :  { %3042 = vmatpush1.bf16.msra.mxu1 %v3712_v14  ;;  %v3299_v14 = vld [vmem:[%s4884_s0 + $0x194] ss:$20 sps:$4 sm:$0xff]  }
  0x5d   :  { %3027 = vmatprep.subr.bf16.mxu1 %v3611_v0 }
  0x60   :  { %3043 = vmatpush1.bf16.msra.mxu1 %v3723_v16  ;;  %v3304_v16 = vld [vmem:[%s4884_s0 + $0x190] ss:$20 sps:$4 sm:$0xff]  }
  0x61   :  { %1211 = vmatmul.mubr.bf16.gmra.mrb[16].mxu1 %v3266_v56  ;;  %3028 = vmatprep.subr.bf16.mxu1 %v3611_v0  ;;  %v3357_v56 = vld [vmem:[%s4884_s0 + $0x178] ss:$20 sps:$4 sm:$0xff]  }
  0x62   :  { %1443 = vmatmul.mubr.bf16.gmra.mrb[16].mxu0 %v3267_v57  ;;  %1218 = vmatprep.mubr.bf16.mxu1 %v3268_v58  ;;  %v3358_v57 = vld [vmem:[%s4884_s0 + $0x39c] ss:$20 sps:$4 sm:$0xff]   ;;  %v162_v58 = vld [vmem:[%s4884_s0 + $0x3c0] sm:$0xff] }
  0x63   :  { %1450 = vmatprep.mubr.bf16.mxu0 %v3270_v59  ;;  %v3360_v59 = vld [vmem:[%s4884_s0 + $0x398] ss:$20 sps:$4 sm:$0xff]  }
  0x64   :  { %3044 = vmatpush1.bf16.msra.mxu1 %v3734_v18  ;;  %v3306_v18 = vld [vmem:[%s4884_s0 + $0x1bc] ss:$20 sps:$4 sm:$0xff]  }
  0x65   :  { %3029 = vmatprep.subr.bf16.mxu1 %v3611_v0 }
  0x68   :  { %3045 = vmatpush1.bf16.msra.mxu1 %v3751_v22  ;;  %v3312_v22 = vld [vmem:[%s4884_s0 + $0x1e4] ss:$20 sps:$4 sm:$0xff]  }
  0x69   :  { %1219 = vmatmul.mubr.bf16.gmra.mrb[20].mxu1 %v3272_v60  ;;  %3030 = vmatprep.subr.bf16.mxu1 %v3611_v0  ;;  %v3361_v60 = vld [vmem:[%s4884_s0 + $0x1a0] ss:$20 sps:$4 sm:$0xff]  }
  0x6a   :  { %1451 = vmatmul.mubr.bf16.gmra.mrb[20].mxu0 %v3273_v61  ;;  %1226 = vmatprep.mubr.bf16.mxu1 %v3274_v62  ;;  %v2669_v61 = vcombine.high %v162_v58, %v162_v58  ;;  %v2668_v62 = vcombine.low %v162_v58, %v162_v58  ;;  %v3403_v58 = vld [vmem:[%s4884_s0 + $0x378] ss:$20 sps:$4 sm:$0xff]  }
  0x6b   :  { %1458 = vmatprep.mubr.bf16.mxu0 %v3276_v63  ;;  %v3364_v63 = vld [vmem:[%s4884_s0 + $0x1c8] ss:$20 sps:$4 sm:$0xff]  }
  0x6c   :  { %3046 = vmatpush1.bf16.msra.mxu1 %v3762_v24  ;;  %v3316_v24 = vld [vmem:[%s4884_s0 + $0x1e0] ss:$20 sps:$4 sm:$0xff]  }
  0x6d   :  { %3031 = vmatprep.subr.bf16.mxu1 %v3611_v0 }
  0x70   :  { %3047 = vmatpush1.bf16.msra.mxu1 %v3773_v26  ;;  %v3318_v26 = vld [vmem:[%s4884_s0 + $0x20c] ss:$20 sps:$4 sm:$0xff]  }
  0x71   :  { %1227 = vmatmul.mubr.bf16.gmra.mrb[24].mxu1 %v3278_v1  ;;  %3032 = vmatprep.subr.bf16.mxu1 %v3611_v0  ;;  %v3367_v1 = vld [vmem:[%s4884_s0 + $0x214] ss:$20 sps:$4 sm:$0xff]  }
  0x72   :  { %1459 = vmatmul.mubr.bf16.gmra.mrb[24].mxu0 %v3279_v2  ;;  %1234 = vmatprep.mubr.bf16.mxu1 %v3281_v3  ;;  %v3365_v2 = vld [vmem:[%s4884_s0 + $0x210] ss:$20 sps:$4 sm:$0xff]  }
  0x73   :  { %1466 = vmatprep.mubr.bf16.mxu0 %v3283_v4  ;;  %v3368_v3 = vld [vmem:[%s4884_s0 + $0x1f0] ss:$20 sps:$4 sm:$0xff]  }
  0x74   :  { %3048 = vmatpush1.bf16.msra.mxu1 %v3784_v28  ;;  %v3321_v28 = vld [vmem:[%s4884_s0 + $0x10] ss:$20 sps:$4 sm:$0xff]  }
  0x75   :  { %3033 = vmatprep.subr.bf16.mxu1 %v3611_v0  ;;  %v3369_v4 = vld [vmem:[%s4884_s0 + $0x23c] ss:$20 sps:$4 sm:$0xff]  }
  0x78   :  { %3049 = vmatpush1.bf16.msra.mxu1 %v3795_v30  ;;  %v3324_v30 = vld [vmem:[%s4884_s0 + $0x230] ss:$20 sps:$4 sm:$0xff]  }
  0x79   :  { %1235 = vmatmul.mubr.bf16.gmra.mrb[28].mxu1 %v3285_v5  ;;  %3034 = vmatprep.subr.bf16.mxu1 %v3611_v0  ;;  %v3371_v5 = vld [vmem:[%s4884_s0 + $0x238] ss:$20 sps:$4 sm:$0xff]  }
  0x7a   :  { %1467 = vmatmul.mubr.bf16.gmra.mrb[28].mxu0 %v3286_v6  ;;  %1242 = vmatprep.mubr.bf16.mxu1 %v3287_v7  ;;  %v3372_v6 = vld [vmem:[%s4884_s0 + $0x218] ss:$20 sps:$4 sm:$0xff]  }
  0x7b   :  { %1474 = vmatprep.mubr.bf16.mxu0 %v3289_v8  ;;  %v3373_v7 = vld [vmem:[%s4884_s0 + $0x264] ss:$20 sps:$4 sm:$0xff]  }
  0x7c   :  { %3050 = vmatpush1.bf16.msra.mxu1 %v3806_v32  ;;  %v3326_v32 = vld [vmem:[%s4884_s0 + $0x25c] ss:$20 sps:$4 sm:$0xff]  }
  0x7d   :  { %3035 = vmatprep.subr.bf16.mxu1 %v3611_v0  ;;  %v3297_v0 = vld [vmem:[%s4884_s0 + $0x168] ss:$20 sps:$4 sm:$0xff]  }
  0x80   :  { %3051 = vmatpush1.bf16.msra.mxu1 %v3817_v34  ;;  %v3329_v34 = vld [vmem:[%s4884_s0 + $0x60] ss:$20 sps:$4 sm:$0xff]  }
  0x81   :  { %1243 = vmatmul.mubr.bf16.gmra.mrb[32].mxu1 %v3291_v9  ;;  %v3375_v9 = vld [vmem:[%s4884_s0 + $0x260] ss:$20 sps:$4 sm:$0xff]  }
  0x82   :  { %1475 = vmatmul.mubr.bf16.gmra.mrb[32].mxu0 %v3292_v10  ;;  %1250 = vmatprep.mubr.bf16.mxu1 %v3293_v11  ;;  %v3376_v11 = vld [vmem:[%s4884_s0 + $0x240] ss:$20 sps:$4 sm:$0xff]  }
  0x83   :  { %1482 = vmatprep.mubr.bf16.mxu0 %v3295_v12 }
  0x89   :  { %1251 = vmatmul.mubr.bf16.gmra.mrb[36].mxu1 %v3297_v0  ;;  %v3377_v0 = vld [vmem:[%s4884_s0 + $0x28c] ss:$20 sps:$4 sm:$0xff]  }
  0x8a   :  { %1483 = vmatmul.mubr.bf16.gmra.mrb[36].mxu0 %v3298_v13  ;;  %1258 = vmatprep.mubr.bf16.mxu1 %v3299_v14 }
  0x8b   :  { %1490 = vmatprep.mubr.bf16.mxu0 %v3301_v15  ;;  %v3379_v15 = vld [vmem:[%s4884_s0 + $0x288] ss:$20 sps:$4 sm:$0xff]  }
  0x91   :  { %1259 = vmatmul.mubr.bf16.gmra.mrb[40].mxu1 %v3304_v16 }
  0x92   :  { %1491 = vmatmul.mubr.bf16.gmra.mrb[40].mxu0 %v3305_v17  ;;  %1266 = vmatprep.mubr.bf16.mxu1 %v3306_v18  ;;  %v3380_v17 = vld [vmem:[%s4884_s0 + $0x268] ss:$20 sps:$4 sm:$0xff]  }
  0x93   :  { %1498 = vmatprep.mubr.bf16.mxu0 %v3308_v19  ;;  %v3381_v19 = vld [vmem:[%s4884_s0 + $0x2b4] ss:$20 sps:$4 sm:$0xff]  }
  0x99   :  { %1267 = vmatmul.mubr.bf16.gmra.mrb[44].mxu1 %v3310_v20 }
  0x9a   :  { %1499 = vmatmul.mubr.bf16.gmra.mrb[44].mxu0 %v3311_v21  ;;  %1274 = vmatprep.mubr.bf16.mxu1 %v3312_v22  ;;  %v3383_v22 = vld [vmem:[%s4884_s0 + $0x2b0] ss:$20 sps:$4 sm:$0xff]  }
  0x9b   :  { %1506 = vmatprep.mubr.bf16.mxu0 %v3314_v23 }
  0xa1   :  { %1275 = vmatmul.mubr.bf16.gmra.mrb[48].mxu1 %v3316_v24  ;;  %v3384_v24 = vld [vmem:[%s4884_s0 + $0x290] ss:$20 sps:$4 sm:$0xff]  }
  0xa2   :  { %1507 = vmatmul.mubr.bf16.gmra.mrb[48].mxu0 %v3317_v25  ;;  %1282 = vmatprep.mubr.bf16.mxu1 %v3318_v26  ;;  %v3385_v26 = vld [vmem:[%s4884_s0 + $0x2dc] ss:$20 sps:$4 sm:$0xff]  }
  0xa3   :  { %2920 = vmatprep.mubr.msk.bf16.mxu0 %vm3613_vm0, %v3612_v40 }
  0xa9   :  { %1283 = vmatmul.mubr.bf16.gmra.mrb[52].mxu1 %v3320_v27 }
  0xaa   :  { %2921 = vmatmul.mubr.msk.bf16.vlgmr.msra.gmra.mrb[0].mxu0 %vm1070_vm1, %v3321_v28  ;;  %1290 = vmatprep.mubr.bf16.mxu1 %v3322_v29  ;;  %v3387_v29 = vld [vmem:[%s4884_s0 + $0x2d8] ss:$20 sps:$4 sm:$0xff]  }
  0xab   :  { %2924 = vmatprep.mubr.msk.bf16.mxu0 %vm3613_vm0, %v3612_v40 }
  0xb1   :  { %1291 = vmatmul.mubr.bf16.gmra.mrb[56].mxu1 %v3324_v30 }
  0xb2   :  { %2925 = vmatmul.mubr.msk.bf16.gmra.mrb[4].mxu0 %vm1070_vm1, %v3325_v31  ;;  %1298 = vmatprep.mubr.bf16.mxu1 %v3326_v32  ;;  %v3388_v31 = vld [vmem:[%s4884_s0 + $0x2b8] ss:$20 sps:$4 sm:$0xff]  }
  0xb3   :  { %2928 = vmatprep.mubr.msk.bf16.mxu0 %vm3613_vm0, %v3612_v40 }
  0xb9   :  { %1299 = vmatmul.mubr.bf16.gmra.mrb[60].mxu1 %v3328_v33  ;;  %v3389_v33 = vld [vmem:[%s4884_s0 + $0x304] ss:$20 sps:$4 sm:$0xff]  }
  0xba   :  { %2929 = vmatmul.mubr.msk.bf16.gmra.mrb[8].mxu0 %vm1070_vm1, %v3329_v34  ;;  %1306 = vmatprep.mubr.bf16.mxu1 %v3330_v35 }
  0xbb   :  { %2932 = vmatprep.mubr.msk.bf16.mxu0 %vm3613_vm0, %v3612_v40 }
  0xc1   :  { %1307 = vmatmul.mubr.bf16.gmra.mrb[64].mxu1 %v3332_v36  ;;  %v3391_v36 = vld [vmem:[%s4884_s0 + $0x300] ss:$20 sps:$4 sm:$0xff]  }
  0xc2   :  { %2933 = vmatmul.mubr.msk.bf16.gmra.mrb[12].mxu0 %vm1070_vm1, %v3333_v37  ;;  %1314 = vmatprep.mubr.bf16.mxu1 %v3334_v38  ;;  %v3392_v38 = vld [vmem:[%s4884_s0 + $0x2e0] ss:$20 sps:$4 sm:$0xff]  }
  0xc3   :  { %2936 = vmatprep.mubr.msk.bf16.mxu0 %vm3613_vm0, %v3612_v40 }
  0xc9   :  { %1315 = vmatmul.mubr.bf16.gmra.mrb[68].mxu1 %v3336_v39 }
  0xca   :  { %2937 = vmatmul.mubr.msk.bf16.gmra.mrb[16].mxu0 %vm1070_vm1, %v3337_v41  ;;  %1322 = vmatprep.mubr.bf16.mxu1 %v3338_v42  ;;  %v3393_v41 = vld [vmem:[%s4884_s0 + $0x32c] ss:$20 sps:$4 sm:$0xff]  }
  0xcb   :  { %2940 = vmatprep.mubr.msk.bf16.mxu0 %vm3613_vm0, %v3612_v40 }
  0xd1   :  { %1323 = vmatmul.mubr.bf16.gmra.mrb[72].mxu1 %v3340_v43 }
  0xd2   :  { %2941 = vmatmul.mubr.msk.bf16.gmra.mrb[20].mxu0 %vm1070_vm1, %v3341_v44  ;;  %1330 = vmatprep.mubr.bf16.mxu1 %v3342_v45  ;;  %v3395_v44 = vld [vmem:[%s4884_s0 + $0x328] ss:$20 sps:$4 sm:$0xff]  }
  0xd3   :  { %2944 = vmatprep.mubr.msk.bf16.mxu0 %vm3613_vm0, %v3612_v40 }
  0xd9   :  { %1331 = vmatmul.mubr.bf16.gmra.mrb[76].mxu1 %v3344_v46  ;;  %v3396_v46 = vld [vmem:[%s4884_s0 + $0x308] ss:$20 sps:$4 sm:$0xff]  }
  0xda   :  { %2945 = vmatmul.mubr.msk.bf16.gmra.mrb[24].mxu0 %vm1070_vm1, %v3345_v47  ;;  %1338 = vmatprep.mubr.bf16.mxu1 %v3346_v48  ;;  %v3397_v48 = vld [vmem:[%s4884_s0 + $0x354] ss:$20 sps:$4 sm:$0xff]  }
  0xdb   :  { %2948 = vmatprep.mubr.msk.bf16.mxu0 %vm3613_vm0, %v3612_v40 }
  0xe1   :  { %1339 = vmatmul.mubr.bf16.gmra.mrb[80].mxu1 %v3348_v49 }
  0xe2   :  { %2949 = vmatmul.mubr.msk.bf16.gmra.mrb[28].mxu0 %vm1070_vm1, %v3349_v50  ;;  %1346 = vmatprep.mubr.bf16.mxu1 %v3350_v51  ;;  %v3399_v51 = vld [vmem:[%s4884_s0 + $0x350] ss:$20 sps:$4 sm:$0xff]  }
  0xe3   :  { %2952 = vmatprep.mubr.msk.bf16.mxu0 %vm3613_vm0, %v3612_v40 }
  0xe9   :  { %1347 = vmatmul.mubr.bf16.gmra.mrb[84].mxu1 %v3352_v52 }
  0xea   :  { %2953 = vmatmul.mubr.msk.bf16.gmra.mrb[32].mxu0 %vm1070_vm1, %v3353_v53  ;;  %1354 = vmatprep.mubr.bf16.mxu1 %v3354_v54  ;;  %v3400_v53 = vld [vmem:[%s4884_s0 + $0x330] ss:$20 sps:$4 sm:$0xff]  }
  0xeb   :  { %2956 = vmatprep.mubr.msk.bf16.mxu0 %vm3613_vm0, %v3612_v40 }
  0xf1   :  { %1355 = vmatmul.mubr.bf16.gmra.mrb[88].mxu1 %v3356_v55  ;;  %v3401_v55 = vld [vmem:[%s4884_s0 + $0x37c] ss:$20 sps:$4 sm:$0xff]  }
  0xf2   :  { %2957 = vmatmul.mubr.msk.bf16.gmra.mrb[36].mxu0 %vm1070_vm1, %v3357_v56  ;;  %1362 = vmatprep.mubr.bf16.mxu1 %v3358_v57 }
  0xf3   :  { %2960 = vmatprep.mubr.msk.bf16.mxu0 %vm3613_vm0, %v3612_v40 }
  0xf9   :  { %1363 = vmatmul.mubr.bf16.gmra.mrb[92].mxu1 %v3360_v59 }
  0xfa   :  { %2961 = vmatmul.mubr.msk.bf16.gmra.mrb[40].mxu0 %vm1070_vm1, %v3361_v60  ;;  %1370 = vmatprep.mubr.bf16.mxu1 %v2669_v61  ;;  %v3404_v60 = vld [vmem:[%s4884_s0 + $0x358] ss:$20 sps:$4 sm:$0xff]  }
  0xfb   :  { %2964 = vmatprep.mubr.msk.bf16.mxu0 %vm3613_vm0, %v3612_v40 }
 0x101   :  { %1371 = vmatmul.mubr.bf16.gmra.mrb[96].mxu1 %v2668_v62  ;;  %v3405_v62 = vld [vmem:[%s4884_s0 + $0x3a4] ss:$20 sps:$4 sm:$0xff]  }
 0x102   :  { %2965 = vmatmul.mubr.msk.bf16.gmra.mrb[44].mxu0 %vm1070_vm1, %v3364_v63  ;;  %1514 = vmatprep.mubr.bf16.mxu1 %v3367_v1  ;;  %v163_v1 = vld [vmem:[%s4884_s0 + $0x3c8] sm:$0xff] }
 0x103   :  { %2968 = vmatprep.mubr.msk.bf16.mxu0 %vm3613_vm0, %v3612_v40 }
 0x109   :  { %1515 = vmatmul.mubr.bf16.vlgmr.msra.gmra.mrb[52].mxu1 %v3365_v2 }
 0x10a   :  { %2969 = vmatmul.mubr.msk.bf16.gmra.mrb[48].mxu0 %vm1070_vm1, %v3368_v3  ;;  %1522 = vmatprep.mubr.bf16.mxu1 %v3369_v4  ;;  %v3407_v3 = vld [vmem:[%s4884_s0 + $0x3a0] ss:$20 sps:$4 sm:$0xff]  }
 0x10b   :  { %2972 = vmatprep.mubr.msk.bf16.mxu0 %vm3613_vm0, %v3612_v40 }
 0x111   :  { %1523 = vmatmul.mubr.bf16.gmra.mrb[56].mxu1 %v3371_v5  ;;  %v3408_v5 = vld [vmem:[%s4884_s0 + $0x380] ss:$20 sps:$4 sm:$0xff]  }
 0x112   :  { %2973 = vmatmul.mubr.msk.bf16.gmra.mrb[52].mxu0 %vm1070_vm1, %v3372_v6  ;;  %1530 = vmatprep.mubr.bf16.mxu1 %v3373_v7  ;;  %v2671_v7 = vcombine.high %v163_v1, %v163_v1 }
 0x113   :  { %2976 = vmatprep.mubr.msk.bf16.mxu0 %vm3613_vm0, %v3612_v40 }
 0x114   :  { %v4189_v8 = vpop.f32.mrb[0].mxu1 }
 0x115   :  { %v1182_v10 = vpop.f32.mrb[1].mxu1 }
 0x116   :  { %v4197_v12 = vpop.f32.mrb[2].mxu1 }
 0x117   :  { %v1185_v13 = vpop.f32.mrb[3].mxu1 }
 0x118   :  { %v3411_v13 = vld [vmem:[%s4884_s0 + $0x3a8] ss:$20 sps:$4 sm:$0xff]  }
 0x119   :  { %1531 = vmatmul.mubr.bf16.gmra.mrb[60].mxu1 %v3375_v9 }
 0x11a   :  { %2977 = vmatmul.mubr.msk.bf16.gmra.mrb[56].mxu0 %vm1070_vm1, %v3376_v11  ;;  %1538 = vmatprep.mubr.bf16.mxu1 %v3377_v0  ;;  %v2670_v11 = vcombine.low %v163_v1, %v163_v1 }
 0x11b   :  { %2980 = vmatprep.mubr.msk.bf16.mxu0 %vm3613_vm0, %v3612_v40 }
 0x11c   :  { %v4205_v14 = vpop.f32.mrb[4].mxu1 }
 0x11d   :  { %v1190_v16 = vpop.f32.mrb[5].mxu1 }
 0x11e   :  { %v4213_v18 = vpop.f32.mrb[6].mxu1 }
 0x11f   :  { %v1193_v20 = vpop.f32.mrb[7].mxu1 }
 0x120   :  { %v3412_v20 = vld [vmem:[%s4884_s0 + $0x3d0] ss:$0 sps:$4 sm:$0xff]  }
 0x121   :  { %1539 = vmatmul.mubr.bf16.gmra.mrb[64].mxu1 %v3379_v15 }
 0x122   :  { %2981 = vmatmul.mubr.msk.bf16.gmra.mrb[60].mxu0 %vm1070_vm1, %v3380_v17  ;;  %1546 = vmatprep.mubr.bf16.mxu1 %v3381_v19 }
 0x123   :  { %2984 = vmatprep.mubr.msk.bf16.mxu0 %vm3613_vm0, %v3612_v40 }
 0x124   :  { %v4221_v21 = vpop.f32.mrb[8].mxu1 }
 0x125   :  { %v1198_v23 = vpop.f32.mrb[9].mxu1 }
 0x126   :  { %v4229_v25 = vpop.f32.mrb[10].mxu1 }
 0x127   :  { %v1201_v27 = vpop.f32.mrb[11].mxu1 }
 0x129   :  { %1547 = vmatmul.mubr.bf16.gmra.mrb[68].mxu1 %v3383_v22 }
 0x12a   :  { %2985 = vmatmul.mubr.msk.bf16.gmra.mrb[64].mxu0 %vm1070_vm1, %v3384_v24  ;;  %1554 = vmatprep.mubr.bf16.mxu1 %v3385_v26 }
 0x12b   :  { %2988 = vmatprep.mubr.msk.bf16.mxu0 %vm3613_vm0, %v3612_v40 }
 0x12c   :  { %v4237_v28 = vpop.f32.mrb[12].mxu1 }
 0x12d   :  { %v1206_v30 = vpop.f32.mrb[13].mxu1 }
 0x12e   :  { %v4245_v32 = vpop.f32.mrb[14].mxu1 }
 0x12f   :  { %v1209_v34 = vpop.f32.mrb[15].mxu1 }
 0x131   :  { %1555 = vmatmul.mubr.bf16.gmra.mrb[72].mxu1 %v3387_v29 }
 0x132   :  { %2989 = vmatmul.mubr.msk.bf16.gmra.mrb[68].mxu0 %vm1070_vm1, %v3388_v31  ;;  %1562 = vmatprep.mubr.bf16.mxu1 %v3389_v33 }
 0x133   :  { %2992 = vmatprep.mubr.msk.bf16.mxu0 %vm3613_vm0, %v3612_v40 }
 0x134   :  { %v4253_v35 = vpop.f32.mrb[16].mxu1 }
 0x135   :  { %v1214_v37 = vpop.f32.mrb[17].mxu1 }
 0x136   :  { %v4261_v39 = vpop.f32.mrb[18].mxu1 }
 0x137   :  { %v1217_v42 = vpop.f32.mrb[19].mxu1 }
 0x139   :  { %1563 = vmatmul.mubr.bf16.gmra.mrb[76].mxu1 %v3391_v36  ;;  %v4362_v36 = vld [vmem:[%s4885_s2] ss:$0 sm:$0xff] }
 0x13a   :  { %2993 = vmatmul.mubr.msk.bf16.gmra.mrb[72].mxu0 %vm1070_vm1, %v3392_v38  ;;  %1570 = vmatprep.mubr.bf16.mxu1 %v3393_v41  ;;  %v4368_v41 = vld [vmem:[%s4886_s3] ss:$0 sm:$0xff] }
 0x13b   :  { %2996 = vmatprep.mubr.msk.bf16.mxu0 %vm3613_vm0, %v3612_v40 }
 0x13c   :  { %v4269_v43 = vpop.f32.mrb[20].mxu1 }
 0x13d   :  { %v1222_v45 = vpop.f32.mrb[21].mxu1 }
 0x13e   :  { %v4277_v47 = vpop.f32.mrb[22].mxu1 }
 0x13f   :  { %v1225_v49 = vpop.f32.mrb[23].mxu1 }
 0x141   :  { %1571 = vmatmul.mubr.bf16.gmra.mrb[80].mxu1 %v3395_v44 }
 0x142   :  { %2997 = vmatmul.mubr.msk.bf16.gmra.mrb[76].mxu0 %vm1070_vm1, %v3396_v46  ;;  %1578 = vmatprep.mubr.bf16.mxu1 %v3397_v48 }
 0x143   :  { %3000 = vmatprep.mubr.msk.bf16.mxu0 %vm3613_vm0, %v3612_v40 }
 0x144   :  { %v4285_v50 = vpop.f32.mrb[24].mxu1 }
 0x145   :  { %v1230_v52 = vpop.f32.mrb[25].mxu1 }
 0x146   :  { %v4293_v54 = vpop.f32.mrb[26].mxu1 }
 0x147   :  { %v1233_v56 = vpop.f32.mrb[27].mxu1 }
 0x149   :  { %1579 = vmatmul.mubr.bf16.gmra.mrb[84].mxu1 %v3399_v51 }
 0x14a   :  { %3001 = vmatmul.mubr.msk.bf16.gmra.mrb[80].mxu0 %vm1070_vm1, %v3400_v53  ;;  %1586 = vmatprep.mubr.bf16.mxu1 %v3401_v55 }
 0x14b   :  { %3004 = vmatprep.mubr.msk.bf16.mxu0 %vm3613_vm0, %v3612_v40 }
 0x14c   :  { %v4301_v57 = vpop.f32.mrb[28].mxu1 }
 0x14d   :  { %v1238_v59 = vpop.f32.mrb[29].mxu1 }
 0x14e   :  { %v4309_v61 = vpop.f32.mrb[30].mxu1 }
 0x14f   :  { %v1241_v63 = vpop.f32.mrb[31].mxu1 }
 0x151   :  { %1587 = vmatmul.mubr.bf16.gmra.mrb[88].mxu1 %v3403_v58 }
 0x152   :  { %3005 = vmatmul.mubr.msk.bf16.gmra.mrb[84].mxu0 %vm1070_vm1, %v3404_v60  ;;  %1594 = vmatprep.mubr.bf16.mxu1 %v3405_v62 }
 0x153   :  { %3008 = vmatprep.mubr.msk.bf16.mxu0 %vm3613_vm0, %v3612_v40 }
 0x154   :  { %v4320_v2 = vpop.f32.mrb[32].mxu1 }
 0x155   :  { %v1246_v4 = vpop.f32.mrb[33].mxu1 }
 0x156   :  { %v4328_v6 = vpop.f32.mrb[34].mxu1 }
 0x157   :  { %v1249_v9 = vpop.f32.mrb[35].mxu1 }
 0x159   :  { %1595 = vmatmul.mubr.bf16.gmra.mrb[92].mxu1 %v3407_v3 }
 0x15a   :  { %3009 = vmatmul.mubr.msk.bf16.gmra.mrb[88].mxu0 %vm1070_vm1, %v3408_v5  ;;  %1602 = vmatprep.mubr.bf16.mxu1 %v2671_v7 }
 0x15b   :  { %3012 = vmatprep.mubr.msk.bf16.mxu0 %vm3613_vm0, %v3612_v40 }
 0x15c   :  { %v4333_v10 = vpop.f32.mrb[36].mxu1 }
 0x15d   :  { %v1254_v0 = vpop.f32.mrb[37].mxu1 }
 0x15e   :  { %v4338_v15 = vpop.f32.mrb[38].mxu1 }
 0x15f   :  { %v1257_v16 = vpop.f32.mrb[39].mxu1 }
 0x161   :  { %1603 = vmatmul.mubr.bf16.gmra.mrb[96].mxu1 %v2670_v11 }
 0x162   :  { %3013 = vmatmul.mubr.msk.bf16.gmra.mrb[92].mxu0 %vm1070_vm1, %v3411_v13 }
 0x163   :  { %3016 = vmatprep.mubr.msk.bf16.mxu0 %vm3613_vm0, %v3612_v40 }
 0x164   :  { %v4343_v17 = vpop.f32.mrb[40].mxu1 }
 0x165   :  { %v1262_v19 = vpop.f32.mrb[41].mxu1 }
 0x166   :  { %v4348_v22 = vpop.f32.mrb[42].mxu1 }
 0x167   :  { %v1265_v23 = vpop.f32.mrb[43].mxu1 }
 0x16a   :  { %3017 = vmatmul.mubr.msk.bf16.gmra.mrb[96].mxu0 %vm1070_vm1, %v3412_v20 }
 0x16c   :  { %v4351_v24 = vpop.f32.mrb[44].mxu1 }
 0x16d   :  { %v1270_v26 = vpop.f32.mrb[45].mxu1 }
 0x16e   :  { %v4353_v27 = vpop.f32.mrb[46].mxu1 }
 0x16f   :  { %v1273_v29 = vpop.f32.mrb[47].mxu1 }
 0x174   :  { %v4355_v30 = vpop.f32.mrb[48].mxu1 }
 0x175   :  { %v1278_v40 = vpop.f32.mrb[49].mxu1 }
 0x176   :  { %v4357_v31 = vpop.f32.mrb[50].mxu1 }
 0x177   :  { %v1281_v33 = vpop.f32.mrb[51].mxu1 }
 0x17d   :  { %v1644_v34 = vpop.f32.mrb[0].mxu0 }
 0x17e   :  { %v3052_v37 = vadd.f32 %v1644_v34, %v4189_v8  ;;  %v2922_v38 = vpop.f32.mrb[1].mxu0 }
 0x17f   :  { %v1647_v42 = vpop.f32.mrb[2].mxu0 }
 0x180   :  { %v1849_v44 = vmul.f32 %v3052_v37, %v4362_v36  ;;  %v3053_v45 = vadd.f32 %v1647_v42, %v4197_v12  ;;  %v2923_v46 = vpop.f32.mrb[3].mxu0 }
 0x182   :  { %v1905_v48 = vadd.f32 %v4368_v41, %v1849_v44  ;;  %v1850_v49 = vmul.f32 %v3053_v45, %v4362_v36 }
 0x184   :  { %v2736_v51 = vmul.f32 -1.442695, %v1905_v48  ;;  %v4375_v52 = vadd.f32 %v4368_v41, %v1850_v49 }
 0x185   :  { %v1652_v8 = vpop.f32.mrb[4].mxu0 }
 0x186   :  { %3413 = vpow2.f32 %v2736_v51  ;;  %v2737_v53 = vmul.f32 -1.442695, %v4375_v52  ;;  %v3054_v55 = vadd.f32 %v1652_v8, %v4205_v14  ;;  %v2926_v56 = vpop.f32.mrb[5].mxu0 }
 0x187   :  { %v1655_v58 = vpop.f32.mrb[6].mxu0 }
 0x188   :  { %3415 = vpow2.f32 %v2737_v53  ;;  %v1851_v12 = vmul.f32 %v3054_v55, %v4362_v36  ;;  %v3055_v59 = vadd.f32 %v1655_v58, %v4213_v18  ;;  %v2927_v60 = vpop.f32.mrb[7].mxu0 }
 0x18a   :  { %v4382_v62 = vadd.f32 %v4368_v41, %v1851_v12  ;;  %v1852_v63 = vmul.f32 %v3055_v59, %v4362_v36 }
 0x18c   :  { %v2738_v1 = vmul.f32 -1.442695, %v4382_v62  ;;  %v4387_v3 = vadd.f32 %v4368_v41, %v1852_v63 }
 0x18d   :  { %v1660_v4 = vpop.f32.mrb[8].mxu0 }
 0x18e   :  { %3417 = vpow2.f32 %v2738_v1  ;;  %v2739_v14 = vmul.f32 -1.442695, %v4387_v3  ;;  %v3056_v5 = vadd.f32 %v1660_v4, %v4221_v21  ;;  %v2930_v7 = vpop.f32.mrb[9].mxu0 }
 0x18f   :  { %v1663_v9 = vpop.f32.mrb[10].mxu0 }
 0x190   :  { %v3414_v18 = vpop.eup %3413  ;;  %3419 = vpow2.f32 %v2739_v14  ;;  %v1853_v11 = vmul.f32 %v3056_v5, %v4362_v36  ;;  %v3057_v0 = vadd.f32 %v1663_v9, %v4229_v25  ;;  %v2931_v13 = vpop.f32.mrb[11].mxu0 }
 0x191   :  { %v2101_v16 = vadd.f32 1.0, %v3414_v18 }
 0x192   :  { %v3416_v19 = vpop.eup %3415  ;;  %v4394_v20 = vadd.f32 %v4368_v41, %v1853_v11  ;;  %v1854_v23 = vmul.f32 %v3057_v0, %v4362_v36 }
 0x193   :  { %3421 = vrcp.f32 %v2101_v16  ;;  %v2102_v26 = vadd.f32 1.0, %v3416_v19 }
 0x194   :  { %v2740_v21 = vmul.f32 -1.442695, %v4394_v20  ;;  %v4399_v29 = vadd.f32 %v4368_v41, %v1854_v23 }
 0x195   :  { %3423 = vrcp.f32 %v2102_v26  ;;  %v1668_v40 = vpop.f32.mrb[12].mxu0 }
 0x196   :  { %3425 = vpow2.f32 %v2740_v21  ;;  %v2741_v25 = vmul.f32 -1.442695, %v4399_v29  ;;  %v3058_v33 = vadd.f32 %v1668_v40, %v4237_v28  ;;  %v2934_v34 = vpop.f32.mrb[13].mxu0 }
 0x197   :  { %v1671_v37 = vpop.f32.mrb[14].mxu0 }
 0x198   :  { %v3418_v38 = vpop.eup %3417  ;;  %3427 = vpow2.f32 %v2741_v25  ;;  %v1855_v42 = vmul.f32 %v3058_v33, %v4362_v36  ;;  %v3059_v44 = vadd.f32 %v1671_v37, %v4245_v32  ;;  %v2935_v45 = vpop.f32.mrb[15].mxu0 }
 0x199   :  { %v2103_v46 = vadd.f32 1.0, %v3418_v38 }
 0x19a   :  { %v3420_v49 = vpop.eup %3419  ;;  %v4406_v51 = vadd.f32 %v4368_v41, %v1855_v42  ;;  %v1856_v8 = vmul.f32 %v3059_v44, %v4362_v36 }
 0x19b   :  { %3429 = vrcp.f32 %v2103_v46  ;;  %v2104_v53 = vadd.f32 1.0, %v3420_v49 }
 0x19c   :  { %v2742_v28 = vmul.f32 -1.442695, %v4406_v51  ;;  %v4411_v55 = vadd.f32 %v4368_v41, %v1856_v8 }
 0x19d   :  { %v3422_v56 = vpop.eup %3421  ;;  %3431 = vrcp.f32 %v2104_v53  ;;  %v1676_v58 = vpop.f32.mrb[16].mxu0 }
 0x19e   :  { %v2248_v12 = vmul.f32 %v3422_v56, %v1905_v48  ;;  %3433 = vpow2.f32 %v2742_v28  ;;  %v2743_v32 = vmul.f32 -1.442695, %v4411_v55  ;;  %v3060_v59 = vadd.f32 %v1676_v58, %v4253_v35  ;;  %v2938_v60 = vpop.f32.mrb[17].mxu0 }
 0x19f   :  { %v3424_v63 = vpop.eup %3423  ;;  %v1679_v1 = vpop.f32.mrb[18].mxu0 }
 0x1a0   :  { %v3426_v4 = vpop.eup %3425  ;;  %v2834_v14 = vpack.c.bf16 %v2248_v12, %v2248_v12  ;;  %v2249_v5 = vmul.f32 %v3424_v63, %v4375_v52  ;;  %3435 = vpow2.f32 %v2743_v32  ;;  %v1857_v7 = vmul.f32 %v3060_v59, %v4362_v36  ;;  %v2939_v9 = vpop.f32.mrb[19].mxu0 }
 0x1a1   :  { %v2105_v18 = vadd.f32 1.0, %v3426_v4  ;;  %v3061_v48 = vadd.f32 %v1679_v1, %v4261_v39 }
 0x1a2   :  { %v3428_v11 = vpop.eup %3427  ;;  %2495 = vst.msk [vmem:[%s4887_s4] sm:$0xf] %vm2494_vm2, %v2834_v14  ;;  %v2835_v35 = vpack.c.bf16 %v2249_v5, %v2249_v5  ;;  %v4423_v0 = vadd.f32 %v4368_v41, %v1857_v7 }
 0x1a3   :  { %3437 = vrcp.f32 %v2105_v18  ;;  %v2106_v13 = vadd.f32 1.0, %v3428_v11  ;;  %v1858_v52 = vmul.f32 %v3061_v48, %v4362_v36 }
 0x1a4   :  { %2496 = vst.msk [vmem:[%s4887_s4 + $0x4] sm:$0xf] %vm2494_vm2, %v2835_v35  ;;  %v2744_v39 = vmul.f32 -1.442695, %v4423_v0 }
 0x1a5   :  { %v3430_v16 = vpop.eup %3429  ;;  %3439 = vrcp.f32 %v2106_v13  ;;  %v4432_v19 = vadd.f32 %v4368_v41, %v1858_v52  ;;  %v1684_v23 = vpop.f32.mrb[20].mxu0 }
 0x1a6   :  { %v2250_v26 = vmul.f32 %v3430_v16, %v4382_v62  ;;  %3441 = vpow2.f32 %v2744_v39  ;;  %v3062_v21 = vadd.f32 %v1684_v23, %v4269_v43  ;;  %v2942_v40 = vpop.f32.mrb[21].mxu0 }
 0x1a7   :  { %v3432_v25 = vpop.eup %3431  ;;  %v2745_v33 = vmul.f32 -1.442695, %v4432_v19  ;;  %v1687_v34 = vpop.f32.mrb[22].mxu0 }
 0x1a8   :  { %v3434_v37 = vpop.eup %3433  ;;  %v2836_v38 = vpack.c.bf16 %v2250_v26, %v2250_v26  ;;  %v2251_v42 = vmul.f32 %v3432_v25, %v4387_v3  ;;  %v1859_v44 = vmul.f32 %v3062_v21, %v4362_v36  ;;  %v3063_v45 = vadd.f32 %v1687_v34, %v4277_v47  ;;  %v2943_v46 = vpop.f32.mrb[23].mxu0 }
 0x1a9   :  { %v2107_v49 = vadd.f32 1.0, %v3434_v37  ;;  %3443 = vpow2.f32 %v2745_v33 }
 0x1aa   :  { %v3436_v62 = vpop.eup %3435  ;;  %2497 = vst.msk [vmem:[%s4887_s4 + $0x8] sm:$0xf] %vm2494_vm2, %v2836_v38  ;;  %v2837_v43 = vpack.c.bf16 %v2251_v42, %v2251_v42  ;;  %v4445_v8 = vadd.f32 %v4368_v41, %v1859_v44  ;;  %v1860_v53 = vmul.f32 %v3063_v45, %v4362_v36 }
 0x1ab   :  { %3445 = vrcp.f32 %v2107_v49  ;;  %v2108_v3 = vadd.f32 1.0, %v3436_v62 }
 0x1ac   :  { %2498 = vst.msk [vmem:[%s4887_s4 + $0xc] sm:$0xf] %vm2494_vm2, %v2837_v43  ;;  %v2746_v47 = vmul.f32 -1.442695, %v4445_v8  ;;  %v4454_v28 = vadd.f32 %v4368_v41, %v1860_v53 }
 0x1ad   :  { %v3438_v56 = vpop.eup %3437  ;;  %3447 = vrcp.f32 %v2108_v3  ;;  %v1692_v58 = vpop.f32.mrb[24].mxu0 }
 0x1ae   :  { %v2252_v12 = vmul.f32 %v3438_v56, %v4394_v20  ;;  %3449 = vpow2.f32 %v2746_v47  ;;  %v2747_v32 = vmul.f32 -1.442695, %v4454_v28  ;;  %v3064_v59 = vadd.f32 %v1692_v58, %v4285_v50  ;;  %v2946_v60 = vpop.f32.mrb[25].mxu0 }
 0x1af   :  { %v3440_v63 = vpop.eup %3439  ;;  %v1695_v1 = vpop.f32.mrb[26].mxu0 }
 0x1b0   :  { %v3442_v4 = vpop.eup %3441  ;;  %v2838_v14 = vpack.c.bf16 %v2252_v12, %v2252_v12  ;;  %v2253_v5 = vmul.f32 %v3440_v63, %v4399_v29  ;;  %3451 = vpow2.f32 %v2747_v32  ;;  %v1861_v7 = vmul.f32 %v3064_v59, %v4362_v36  ;;  %v2947_v9 = vpop.f32.mrb[27].mxu0 }
 0x1b1   :  { %v2109_v18 = vadd.f32 1.0, %v3442_v4  ;;  %v3065_v48 = vadd.f32 %v1695_v1, %v4293_v54 }
 0x1b2   :  { %2499 = vst.msk [vmem:[%s4887_s4 + $0x10] sm:$0xf] %vm2494_vm2, %v2838_v14  ;;  %v2839_v50 = vpack.c.bf16 %v2253_v5, %v2253_v5  ;;  %v4467_v20 = vadd.f32 %v4368_v41, %v1861_v7 }
 0x1b3   :  { %v3444_v11 = vpop.eup %3443  ;;  %3453 = vrcp.f32 %v2109_v18  ;;  %v1862_v29 = vmul.f32 %v3065_v48, %v4362_v36 }
 0x1b4   :  { %2500 = vst.msk [vmem:[%s4887_s4 + $0x14] sm:$0xf] %vm2494_vm2, %v2839_v50  ;;  %v2110_v35 = vadd.f32 1.0, %v3444_v11  ;;  %v2748_v54 = vmul.f32 -1.442695, %v4467_v20 }
 0x1b5   :  { %v3446_v13 = vpop.eup %3445  ;;  %v4476_v52 = vadd.f32 %v4368_v41, %v1862_v29  ;;  %v1700_v39 = vpop.f32.mrb[28].mxu0 }
 0x1b6   :  { %v2254_v16 = vmul.f32 %v3446_v13, %v4406_v51  ;;  %3455 = vrcp.f32 %v2110_v35  ;;  %v3066_v23 = vadd.f32 %v1700_v39, %v4301_v57  ;;  %v2950_v26 = vpop.f32.mrb[29].mxu0 }
 0x1b7   :  { %v3448_v21 = vpop.eup %3447  ;;  %3457 = vpow2.f32 %v2748_v54  ;;  %v2749_v40 = vmul.f32 -1.442695, %v4476_v52  ;;  %v1703_v25 = vpop.f32.mrb[30].mxu0 }
 0x1b8   :  { %v3450_v33 = vpop.eup %3449  ;;  %v2840_v34 = vpack.c.bf16 %v2254_v16, %v2254_v16  ;;  %v2255_v37 = vmul.f32 %v3448_v21, %v4411_v55  ;;  %v1863_v38 = vmul.f32 %v3066_v23, %v4362_v36  ;;  %v3067_v42 = vadd.f32 %v1703_v25, %v4309_v61  ;;  %v2951_v44 = vpop.f32.mrb[31].mxu0 }
 0x1b9   :  { %v2111_v45 = vadd.f32 1.0, %v3450_v33  ;;  %3459 = vpow2.f32 %v2749_v40 }
 0x1ba   :  { %v3452_v51 = vpop.eup %3451  ;;  %2501 = vst.msk [vmem:[%s4887_s4 + $0x18] sm:$0xf] %vm2494_vm2, %v2840_v34  ;;  %v2841_v57 = vpack.c.bf16 %v2255_v37, %v2255_v37  ;;  %v4489_v46 = vadd.f32 %v4368_v41, %v1863_v38  ;;  %v1864_v49 = vmul.f32 %v3067_v42, %v4362_v36 }
 0x1bb   :  { %3461 = vrcp.f32 %v2111_v45  ;;  %v2112_v55 = vadd.f32 1.0, %v3452_v51 }
 0x1bc   :  { %2502 = vst.msk [vmem:[%s4887_s4 + $0x1c] sm:$0xf] %vm2494_vm2, %v2841_v57  ;;  %v2750_v61 = vmul.f32 -1.442695, %v4489_v46  ;;  %v4498_v62 = vadd.f32 %v4368_v41, %v1864_v49 }
 0x1bd   :  { %v3454_v43 = vpop.eup %3453  ;;  %3463 = vrcp.f32 %v2112_v55  ;;  %v1708_v53 = vpop.f32.mrb[32].mxu0 }
 0x1be   :  { %v2256_v3 = vmul.f32 %v3454_v43, %v4423_v0  ;;  %3465 = vpow2.f32 %v2750_v61  ;;  %v2751_v47 = vmul.f32 -1.442695, %v4498_v62  ;;  %v3068_v56 = vadd.f32 %v1708_v53, %v4320_v2  ;;  %v2954_v58 = vpop.f32.mrb[33].mxu0 }
 0x1bf   :  { %v1711_v12 = vpop.f32.mrb[34].mxu0 }
 0x1c0   :  { %v3456_v32 = vpop.eup %3455  ;;  %v2842_v59 = vpack.c.bf16 %v2256_v3, %v2256_v3  ;;  %3467 = vpow2.f32 %v2751_v47  ;;  %v1865_v60 = vmul.f32 %v3068_v56, %v4362_v36  ;;  %v3069_v63 = vadd.f32 %v1711_v12, %v4328_v6  ;;  %v2955_v1 = vpop.f32.mrb[35].mxu0 }
 0x1c1   :  { %v3458_v4 = vpop.eup %3457  ;;  %v2257_v14 = vmul.f32 %v3456_v32, %v4432_v19 }
 0x1c2   :  { %2503 = vst.msk [vmem:[%s4887_s4 + $0x20] sm:$0xf] %vm2494_vm2, %v2842_v59  ;;  %v2113_v0 = vadd.f32 1.0, %v3458_v4  ;;  %v4511_v2 = vadd.f32 %v4368_v41, %v1865_v60  ;;  %v1866_v5 = vmul.f32 %v3069_v63, %v4362_v36 }
 0x1c3   :  { %v3460_v7 = vpop.eup %3459  ;;  %v2843_v9 = vpack.c.bf16 %v2257_v14, %v2257_v14 }
 0x1c4   :  { %3469 = vrcp.f32 %v2113_v0  ;;  %v2114_v18 = vadd.f32 1.0, %v3460_v7  ;;  %v2752_v6 = vmul.f32 -1.442695, %v4511_v2  ;;  %v4516_v48 = vadd.f32 %v4368_v41, %v1866_v5 }
 0x1c5   :  { %v3462_v19 = vpop.eup %3461  ;;  %2504 = vst.msk [vmem:[%s4887_s4 + $0x24] sm:$0xf] %vm2494_vm2, %v2843_v9  ;;  %v1716_v50 = vpop.f32.mrb[36].mxu0 }
 0x1c6   :  { %v2258_v11 = vmul.f32 %v3462_v19, %v4445_v8  ;;  %3471 = vrcp.f32 %v2114_v18  ;;  %v2753_v29 = vmul.f32 -1.442695, %v4516_v48  ;;  %v3070_v35 = vadd.f32 %v1716_v50, %v4333_v10  ;;  %v2958_v54 = vpop.f32.mrb[37].mxu0 }
 0x1c7   :  { %v3464_v13 = vpop.eup %3463  ;;  %3473 = vpow2.f32 %v2752_v6  ;;  %v1719_v39 = vpop.f32.mrb[38].mxu0 }
 0x1c8   :  { %v3466_v16 = vpop.eup %3465  ;;  %v2844_v23 = vpack.c.bf16 %v2258_v11, %v2258_v11  ;;  %v2259_v26 = vmul.f32 %v3464_v13, %v4454_v28  ;;  %3475 = vpow2.f32 %v2753_v29  ;;  %v1867_v21 = vmul.f32 %v3070_v35, %v4362_v36  ;;  %v2959_v40 = vpop.f32.mrb[39].mxu0 }
 0x1c9   :  { %v2115_v25 = vadd.f32 1.0, %v3466_v16  ;;  %v3071_v8 = vadd.f32 %v1719_v39, %v4338_v15 }
 0x1ca   :  { %v3468_v33 = vpop.eup %3467  ;;  %2505 = vst.msk [vmem:[%s4887_s4 + $0x28] sm:$0xf] %vm2494_vm2, %v2844_v23  ;;  %v2845_v10 = vpack.c.bf16 %v2259_v26, %v2259_v26  ;;  %v4533_v34 = vadd.f32 %v4368_v41, %v1867_v21 }
 0x1cb   :  { %3477 = vrcp.f32 %v2115_v25  ;;  %v2116_v37 = vadd.f32 1.0, %v3468_v33  ;;  %v1868_v28 = vmul.f32 %v3071_v8, %v4362_v36 }
 0x1cc   :  { %2506 = vst.msk [vmem:[%s4887_s4 + $0x2c] sm:$0xf] %vm2494_vm2, %v2845_v10  ;;  %v2754_v15 = vmul.f32 -1.442695, %v4533_v34 }
 0x1cd   :  { %3479 = vrcp.f32 %v2116_v37  ;;  %v4542_v38 = vadd.f32 %v4368_v41, %v1868_v28  ;;  %v1724_v42 = vpop.f32.mrb[40].mxu0 }
 0x1ce   :  { %v3470_v44 = vpop.eup %3469  ;;  %3481 = vpow2.f32 %v2754_v15  ;;  %v3072_v45 = vadd.f32 %v1724_v42, %v4343_v17  ;;  %v2962_v51 = vpop.f32.mrb[41].mxu0 }
 0x1cf   :  { %v2260_v57 = vmul.f32 %v3470_v44, %v4467_v20  ;;  %v2755_v49 = vmul.f32 -1.442695, %v4542_v38  ;;  %v1727_v55 = vpop.f32.mrb[42].mxu0 }
 0x1d0   :  { %v3472_v61 = vpop.eup %3471  ;;  %v1869_v43 = vmul.f32 %v3072_v45, %v4362_v36  ;;  %v3073_v53 = vadd.f32 %v1727_v55, %v4348_v22  ;;  %v2963_v3 = vpop.f32.mrb[43].mxu0 }
 0x1d1   :  { %v3474_v47 = vpop.eup %3473  ;;  %v2846_v56 = vpack.c.bf16 %v2260_v57, %v2260_v57  ;;  %v2261_v58 = vmul.f32 %v3472_v61, %v4476_v52  ;;  %3483 = vpow2.f32 %v2755_v49 }
 0x1d2   :  { %v3476_v12 = vpop.eup %3475  ;;  %v2117_v32 = vadd.f32 1.0, %v3474_v47  ;;  %v4551_v17 = vadd.f32 %v4368_v41, %v1869_v43  ;;  %v1870_v20 = vmul.f32 %v3073_v53, %v4362_v36 }
 0x1d3   :  { %2507 = vst.msk [vmem:[%s4887_s4 + $0x30] sm:$0xf] %vm2494_vm2, %v2846_v56  ;;  %v2847_v59 = vpack.c.bf16 %v2261_v58, %v2261_v58  ;;  %v2118_v22 = vadd.f32 1.0, %v3476_v12 }
 0x1d4   :  { %3485 = vrcp.f32 %v2117_v32  ;;  %v2756_v60 = vmul.f32 -1.442695, %v4551_v17  ;;  %v4560_v52 = vadd.f32 %v4368_v41, %v1870_v20 }
 0x1d5   :  { %v3478_v63 = vpop.eup %3477  ;;  %2508 = vst.msk [vmem:[%s4887_s4 + $0x34] sm:$0xf] %vm2494_vm2, %v2847_v59  ;;  %3487 = vrcp.f32 %v2118_v22  ;;  %v1732_v1 = vpop.f32.mrb[44].mxu0 }
 0x1d6   :  { %v2262_v4 = vmul.f32 %v3478_v63, %v4489_v46  ;;  %3489 = vpow2.f32 %v2756_v60  ;;  %v2757_v14 = vmul.f32 -1.442695, %v4560_v52  ;;  %v3074_v0 = vadd.f32 %v1732_v1, %v4351_v24  ;;  %v2966_v5 = vpop.f32.mrb[45].mxu0 }
 0x1d7   :  { %v3480_v7 = vpop.eup %3479  ;;  %v1735_v9 = vpop.f32.mrb[46].mxu0 }
 0x1d8   :  { %v3482_v18 = vpop.eup %3481  ;;  %v2848_v6 = vpack.c.bf16 %v2262_v4, %v2262_v4  ;;  %v2263_v19 = vmul.f32 %v3480_v7, %v4498_v62  ;;  %3491 = vpow2.f32 %v2757_v14  ;;  %v1871_v50 = vmul.f32 %v3074_v0, %v4362_v36  ;;  %v2967_v11 = vpop.f32.mrb[47].mxu0 }
 0x1d9   :  { %v2119_v29 = vadd.f32 1.0, %v3482_v18  ;;  %v3075_v35 = vadd.f32 %v1735_v9, %v4353_v27 }
 0x1da   :  { %2509 = vst.msk [vmem:[%s4887_s4 + $0x38] sm:$0xf] %vm2494_vm2, %v2848_v6  ;;  %v2849_v24 = vpack.c.bf16 %v2263_v19, %v2263_v19  ;;  %v4577_v46 = vadd.f32 %v4368_v41, %v1871_v50 }
 0x1db   :  { %v3484_v54 = vpop.eup %3483  ;;  %3493 = vrcp.f32 %v2119_v29  ;;  %v1872_v62 = vmul.f32 %v3075_v35, %v4362_v36 }
 0x1dc   :  { %2510 = vst.msk [vmem:[%s4887_s4 + $0x3c] sm:$0xf] %vm2494_vm2, %v2849_v24  ;;  %v2120_v13 = vadd.f32 1.0, %v3484_v54  ;;  %v2758_v27 = vmul.f32 -1.442695, %v4577_v46  ;;  %v1516_v39 = vpop.f32.mrb[52].mxu1 }
 0x1dd   :  { %v4586_v16 = vadd.f32 %v4368_v41, %v1872_v62  ;;  %v1740_v23 = vpop.f32.mrb[48].mxu0  ;;  %v1518_v26 = vpop.f32.mrb[53].mxu1 }
 0x1de   :  { %v3486_v21 = vpop.eup %3485  ;;  %3495 = vrcp.f32 %v2120_v13  ;;  %v3076_v40 = vadd.f32 %v1740_v23, %v4355_v30  ;;  %v2970_v25 = vpop.f32.mrb[49].mxu0 }
 0x1df   :  { %v1519_v8 = vpop.f32.mrb[54].mxu1  ;;  %v3488_v33 = vpop.eup %3487  ;;  %v2264_v10 = vmul.f32 %v3486_v21, %v4511_v2  ;;  %3497 = vpow2.f32 %v2758_v27  ;;  %v2759_v37 = vmul.f32 -1.442695, %v4586_v16 }
 0x1e0   :  { %v1743_v28 = vpop.f32.mrb[50].mxu0  ;;  %v1521_v15 = vpop.f32.mrb[55].mxu1  ;;  %v2265_v44 = vmul.f32 %v3488_v33, %v4516_v48  ;;  %v1873_v45 = vmul.f32 %v3076_v40, %v4362_v36 }
 0x1e1   :  { %v3490_v42 = vpop.eup %3489  ;;  %v3077_v51 = vadd.f32 %v1743_v28, %v4357_v31  ;;  %v2971_v57 = vpop.f32.mrb[51].mxu0  ;;  %v2850_v49 = vpack.c.bf16 %v2264_v10, %v2264_v10  ;;  %3499 = vpow2.f32 %v2759_v37 }
 0x1e2   :  { %v2121_v30 = vadd.f32 1.0, %v3490_v42  ;;  %v3492_v55 = vpop.eup %3491  ;;  %v2851_v61 = vpack.c.bf16 %v2265_v44, %v2265_v44  ;;  %v4595_v2 = vadd.f32 %v4368_v41, %v1873_v45 }
 0x1e3   :  { %v1874_v43 = vmul.f32 %v3077_v51, %v4362_v36  ;;  %2511 = vst.msk [vmem:[%s4887_s4 + $0x40] sm:$0xf] %vm2494_vm2, %v2850_v49  ;;  %v2122_v48 = vadd.f32 1.0, %v3492_v55 }
 0x1e4   :  { %3501 = vrcp.f32 %v2121_v30  ;;  %2512 = vst.msk [vmem:[%s4887_s4 + $0x44] sm:$0xf] %vm2494_vm2, %v2851_v61  ;;  %v2760_v31 = vmul.f32 -1.442695, %v4595_v2  ;;  %v1524_v3 = vpop.f32.mrb[56].mxu1 }
 0x1e5   :  { %v4608_v53 = vadd.f32 %v4368_v41, %v1874_v43  ;;  %v3494_v47 = vpop.eup %3493  ;;  %3503 = vrcp.f32 %v2122_v48  ;;  %v1748_v56 = vpop.f32.mrb[52].mxu0 }
 0x1e6   :  { %v1526_v58 = vpop.f32.mrb[57].mxu1  ;;  %v2266_v12 = vmul.f32 %v3494_v47, %v4533_v34  ;;  %3505 = vpow2.f32 %v2760_v31  ;;  %v3078_v20 = vadd.f32 %v1748_v56, %v1516_v39  ;;  %v2974_v59 = vpop.f32.mrb[53].mxu0 }
 0x1e7   :  { %v2761_v32 = vmul.f32 -1.442695, %v4608_v53  ;;  %v1527_v22 = vpop.f32.mrb[58].mxu1  ;;  %v1751_v60 = vpop.f32.mrb[54].mxu0 }
 0x1e8   :  { %v1529_v63 = vpop.f32.mrb[59].mxu1  ;;  %v3496_v1 = vpop.eup %3495  ;;  %v2852_v4 = vpack.c.bf16 %v2266_v12, %v2266_v12  ;;  %v1875_v14 = vmul.f32 %v3078_v20, %v4362_v36  ;;  %v3079_v0 = vadd.f32 %v1751_v60, %v1519_v8 }
 0x1e9   :  { %3507 = vpow2.f32 %v2761_v32  ;;  %v2975_v5 = vpop.f32.mrb[55].mxu0  ;;  %v3498_v7 = vpop.eup %3497  ;;  %v2267_v9 = vmul.f32 %v3496_v1, %v4542_v38 }
 0x1ea   :  { %2513 = vst.msk [vmem:[%s4887_s4 + $0x48] sm:$0xf] %vm2494_vm2, %v2852_v4  ;;  %v2123_v34 = vadd.f32 1.0, %v3498_v7  ;;  %v4619_v18 = vadd.f32 %v4368_v41, %v1875_v14  ;;  %v1876_v6 = vmul.f32 %v3079_v0, %v4362_v36 }
 0x1eb   :  { %v3500_v19 = vpop.eup %3499  ;;  %v2853_v50 = vpack.c.bf16 %v2267_v9, %v2267_v9 }
 0x1ec   :  { %3509 = vrcp.f32 %v2123_v34  ;;  %v2124_v11 = vadd.f32 1.0, %v3500_v19  ;;  %v2762_v29 = vmul.f32 -1.442695, %v4619_v18  ;;  %v4624_v35 = vadd.f32 %v4368_v41, %v1876_v6  ;;  %v1532_v38 = vpop.f32.mrb[60].mxu1 }
 0x1ed   :  { %2514 = vst.msk [vmem:[%s4887_s4 + $0x4c] sm:$0xf] %vm2494_vm2, %v2853_v50  ;;  %v1756_v54 = vpop.f32.mrb[56].mxu0  ;;  %v1534_v62 = vpop.f32.mrb[61].mxu1 }
 0x1ee   :  { %v3502_v24 = vpop.eup %3501  ;;  %3511 = vrcp.f32 %v2124_v11  ;;  %v2763_v27 = vmul.f32 -1.442695, %v4624_v35  ;;  %v3080_v39 = vadd.f32 %v1756_v54, %v1524_v3  ;;  %v2978_v23 = vpop.f32.mrb[57].mxu0 }
 0x1ef   :  { %v2268_v13 = vmul.f32 %v3502_v24, %v4551_v17  ;;  %v1535_v26 = vpop.f32.mrb[62].mxu1  ;;  %v3504_v21 = vpop.eup %3503  ;;  %3513 = vpow2.f32 %v2762_v29 }
 0x1f0   :  { %v1759_v40 = vpop.f32.mrb[58].mxu0  ;;  %v1537_v25 = vpop.f32.mrb[63].mxu1  ;;  %v2269_v10 = vmul.f32 %v3504_v21, %v4560_v52  ;;  %3515 = vpow2.f32 %v2763_v27  ;;  %v1877_v37 = vmul.f32 %v3080_v39, %v4362_v36 }
 0x1f1   :  { %v3506_v8 = vpop.eup %3505  ;;  %v2854_v33 = vpack.c.bf16 %v2268_v13, %v2268_v13  ;;  %v2979_v28 = vpop.f32.mrb[59].mxu0  ;;  %v3081_v17 = vadd.f32 %v1759_v40, %v1527_v22 }
 0x1f2   :  { %v2125_v15 = vadd.f32 1.0, %v3506_v8  ;;  %v2855_v44 = vpack.c.bf16 %v2269_v10, %v2269_v10  ;;  %v4639_v45 = vadd.f32 %v4368_v41, %v1877_v37 }
 0x1f3   :  { %v3508_v42 = vpop.eup %3507  ;;  %2515 = vst.msk [vmem:[%s4887_s4 + $0x50] sm:$0xf] %vm2494_vm2, %v2854_v33  ;;  %v1878_v52 = vmul.f32 %v3081_v17, %v4362_v36 }
 0x1f4   :  { %3517 = vrcp.f32 %v2125_v15  ;;  %v2126_v51 = vadd.f32 1.0, %v3508_v42  ;;  %2516 = vst.msk [vmem:[%s4887_s4 + $0x54] sm:$0xf] %vm2494_vm2, %v2855_v44  ;;  %v2764_v57 = vmul.f32 -1.442695, %v4639_v45  ;;  %v1540_v49 = vpop.f32.mrb[64].mxu1 }
 0x1f5   :  { %v4648_v30 = vadd.f32 %v4368_v41, %v1878_v52  ;;  %v1764_v55 = vpop.f32.mrb[60].mxu0  ;;  %v1542_v61 = vpop.f32.mrb[65].mxu1 }
 0x1f6   :  { %3519 = vrcp.f32 %v2126_v51  ;;  %v3510_v43 = vpop.eup %3509  ;;  %v3082_v48 = vadd.f32 %v1764_v55, %v1532_v38  ;;  %v2982_v31 = vpop.f32.mrb[61].mxu0 }
 0x1f7   :  { %3521 = vpow2.f32 %v2764_v57  ;;  %v1543_v3 = vpop.f32.mrb[66].mxu1  ;;  %v2270_v47 = vmul.f32 %v3510_v43, %v4577_v46  ;;  %v2765_v56 = vmul.f32 -1.442695, %v4648_v30  ;;  %v1767_v58 = vpop.f32.mrb[62].mxu0 }
 0x1f8   :  { %v1545_v12 = vpop.f32.mrb[67].mxu1  ;;  %v3512_v32 = vpop.eup %3511  ;;  %v1879_v20 = vmul.f32 %v3082_v48, %v4362_v36  ;;  %v3083_v59 = vadd.f32 %v1767_v58, %v1535_v26 }
 0x1f9   :  { %v2983_v22 = vpop.f32.mrb[63].mxu0  ;;  %v3514_v60 = vpop.eup %3513  ;;  %v2856_v63 = vpack.c.bf16 %v2270_v47, %v2270_v47  ;;  %v2271_v1 = vmul.f32 %v3512_v32, %v4586_v16  ;;  %3523 = vpow2.f32 %v2765_v56 }
 0x1fa   :  { %v3516_v4 = vpop.eup %3515  ;;  %v2127_v14 = vadd.f32 1.0, %v3514_v60  ;;  %v4655_v0 = vadd.f32 %v4368_v41, %v1879_v20  ;;  %v1880_v46 = vmul.f32 %v3083_v59, %v4362_v36 }
 0x1fb   :  { %2517 = vst.msk [vmem:[%s4887_s4 + $0x58] sm:$0xf] %vm2494_vm2, %v2856_v63  ;;  %v2857_v5 = vpack.c.bf16 %v2271_v1, %v2271_v1  ;;  %v2128_v7 = vadd.f32 1.0, %v3516_v4 }
 0x1fc   :  { %3525 = vrcp.f32 %v2127_v14  ;;  %v2766_v9 = vmul.f32 -1.442695, %v4655_v0  ;;  %v4664_v16 = vadd.f32 %v4368_v41, %v1880_v46  ;;  %v1548_v34 = vpop.f32.mrb[68].mxu1 }
 0x1fd   :  { %2518 = vst.msk [vmem:[%s4887_s4 + $0x5c] sm:$0xf] %vm2494_vm2, %v2857_v5  ;;  %3527 = vrcp.f32 %v2128_v7  ;;  %v1772_v19 = vpop.f32.mrb[64].mxu0  ;;  %v1550_v50 = vpop.f32.mrb[69].mxu1 }
 0x1fe   :  { %v3518_v6 = vpop.eup %3517  ;;  %3529 = vpow2.f32 %v2766_v9  ;;  %v2767_v29 = vmul.f32 -1.442695, %v4664_v16  ;;  %v3084_v38 = vadd.f32 %v1772_v19, %v1540_v49  ;;  %v2986_v24 = vpop.f32.mrb[65].mxu0 }
 0x1ff   :  { %v2272_v11 = vmul.f32 %v3518_v6, %v4595_v2  ;;  %v1551_v54 = vpop.f32.mrb[70].mxu1  ;;  %v1775_v13 = vpop.f32.mrb[66].mxu0 }
 0x200   :  { %v3520_v62 = vpop.eup %3519  ;;  %v1553_v27 = vpop.f32.mrb[71].mxu1  ;;  %3531 = vpow2.f32 %v2767_v29  ;;  %v1881_v21 = vmul.f32 %v3084_v38, %v4362_v36  ;;  %v3085_v8 = vadd.f32 %v1775_v13, %v1543_v3 }
 0x201   :  { %v3522_v39 = vpop.eup %3521  ;;  %v2858_v23 = vpack.c.bf16 %v2272_v11, %v2272_v11  ;;  %v2273_v26 = vmul.f32 %v3520_v62, %v4608_v53  ;;  %v2987_v40 = vpop.f32.mrb[67].mxu0 }
 0x202   :  { %v2129_v25 = vadd.f32 1.0, %v3522_v39  ;;  %v4679_v33 = vadd.f32 %v4368_v41, %v1881_v21  ;;  %v1882_v37 = vmul.f32 %v3085_v8, %v4362_v36 }
 0x203   :  { %2519 = vst.msk [vmem:[%s4887_s4 + $0x60] sm:$0xf] %vm2494_vm2, %v2858_v23  ;;  %v2859_v2 = vpack.c.bf16 %v2273_v26, %v2273_v26  ;;  %v3524_v10 = vpop.eup %3523 }
 0x204   :  { %3533 = vrcp.f32 %v2129_v25  ;;  %v2130_v53 = vadd.f32 1.0, %v3524_v10  ;;  %v2768_v28 = vmul.f32 -1.442695, %v4679_v33  ;;  %v1556_v15 = vpop.f32.mrb[72].mxu1  ;;  %v4688_v17 = vadd.f32 %v4368_v41, %v1882_v37 }
 0x205   :  { %2520 = vst.msk [vmem:[%s4887_s4 + $0x64] sm:$0xf] %vm2494_vm2, %v2859_v2  ;;  %v1780_v42 = vpop.f32.mrb[68].mxu0  ;;  %v1558_v44 = vpop.f32.mrb[73].mxu1 }
 0x206   :  { %v3526_v51 = vpop.eup %3525  ;;  %3535 = vrcp.f32 %v2130_v53  ;;  %v3086_v52 = vadd.f32 %v1780_v42, %v1548_v34  ;;  %v2990_v57 = vpop.f32.mrb[69].mxu0  ;;  %v2769_v43 = vmul.f32 -1.442695, %v4688_v17 }
 0x207   :  { %v1559_v49 = vpop.f32.mrb[74].mxu1  ;;  %v3528_v55 = vpop.eup %3527  ;;  %v2274_v61 = vmul.f32 %v3526_v51, %v4619_v18  ;;  %3537 = vpow2.f32 %v2768_v28 }
 0x208   :  { %v1783_v48 = vpop.f32.mrb[70].mxu0  ;;  %v1561_v31 = vpop.f32.mrb[75].mxu1  ;;  %v2275_v47 = vmul.f32 %v3528_v55, %v4624_v35  ;;  %v1883_v56 = vmul.f32 %v3086_v52, %v4362_v36  ;;  %3539 = vpow2.f32 %v2769_v43  ;;  %v4736_v55 = vld [vmem:[%s4885_s2] ss:$0 sm:$0xff] }
 0x209   :  { %v3530_v3 = vpop.eup %3529  ;;  %v3087_v58 = vadd.f32 %v1783_v48, %v1551_v54  ;;  %v2991_v12 = vpop.f32.mrb[71].mxu0  ;;  %v2860_v32 = vpack.c.bf16 %v2274_v61, %v2274_v61 }
 0x20a   :  { %v2131_v20 = vadd.f32 1.0, %v3530_v3  ;;  %v3532_v59 = vpop.eup %3531  ;;  %v2861_v22 = vpack.c.bf16 %v2275_v47, %v2275_v47  ;;  %v4695_v60 = vadd.f32 %v4368_v41, %v1883_v56 }
 0x20b   :  { %v1884_v18 = vmul.f32 %v3087_v58, %v4362_v36  ;;  %2521 = vst.msk [vmem:[%s4887_s4 + $0x68] sm:$0xf] %vm2494_vm2, %v2860_v32  ;;  %v2132_v35 = vadd.f32 1.0, %v3532_v59 }
 0x20c   :  { %3541 = vrcp.f32 %v2131_v20  ;;  %2522 = vst.msk [vmem:[%s4887_s4 + $0x6c] sm:$0xf] %vm2494_vm2, %v2861_v22  ;;  %v2770_v63 = vmul.f32 -1.442695, %v4695_v60  ;;  %v1564_v4 = vpop.f32.mrb[76].mxu1 }
 0x20d   :  { %v4708_v1 = vadd.f32 %v4368_v41, %v1884_v18  ;;  %3543 = vrcp.f32 %v2132_v35  ;;  %v1788_v46 = vpop.f32.mrb[72].mxu0  ;;  %v1566_v5 = vpop.f32.mrb[77].mxu1 }
 0x20e   :  { %v3534_v14 = vpop.eup %3533  ;;  %3545 = vpow2.f32 %v2770_v63  ;;  %v3088_v34 = vadd.f32 %v1788_v46, %v1556_v15  ;;  %v2994_v6 = vpop.f32.mrb[73].mxu0 }
 0x20f   :  { %v2276_v7 = vmul.f32 %v3534_v14, %v4639_v45  ;;  %v2771_v9 = vmul.f32 -1.442695, %v4708_v1  ;;  %v1567_v19 = vpop.f32.mrb[78].mxu1  ;;  %v1791_v50 = vpop.f32.mrb[74].mxu0 }
 0x210   :  { %v1569_v11 = vpop.f32.mrb[79].mxu1  ;;  %v3536_v29 = vpop.eup %3535  ;;  %v1885_v24 = vmul.f32 %v3088_v34, %v4362_v36  ;;  %v3089_v54 = vadd.f32 %v1791_v50, %v1559_v49 }
 0x211   :  { %v2862_v38 = vpack.c.bf16 %v2276_v7, %v2276_v7  ;;  %3547 = vpow2.f32 %v2771_v9  ;;  %v2995_v62 = vpop.f32.mrb[75].mxu0  ;;  %v3538_v13 = vpop.eup %3537  ;;  %v2277_v27 = vmul.f32 %v3536_v29, %v4648_v30 }
 0x212   :  { %v2133_v45 = vadd.f32 1.0, %v3538_v13  ;;  %v4719_v39 = vadd.f32 %v4368_v41, %v1885_v24  ;;  %v1886_v23 = vmul.f32 %v3089_v54, %v4362_v36  ;;  %v3540_v26 = vpop.eup %3539 }
 0x213   :  { %2523 = vst.msk [vmem:[%s4887_s4 + $0x70] sm:$0xf] %vm2494_vm2, %v2862_v38  ;;  %v2863_v21 = vpack.c.bf16 %v2277_v27, %v2277_v27  ;;  %v2134_v40 = vadd.f32 1.0, %v3540_v26 }
 0x214   :  { %3549 = vrcp.f32 %v2133_v45  ;;  %v2772_v25 = vmul.f32 -1.442695, %v4719_v39  ;;  %v4724_v8 = vadd.f32 %v4368_v41, %v1886_v23  ;;  %v1572_v30 = vpop.f32.mrb[80].mxu1 }
 0x215   :  { %2524 = vst.msk [vmem:[%s4887_s4 + $0x74] sm:$0xf] %vm2494_vm2, %v2863_v21  ;;  %v1796_v10 = vpop.f32.mrb[76].mxu0  ;;  %v1574_v37 = vpop.f32.mrb[81].mxu1  ;;  %3551 = vrcp.f32 %v2134_v40 }
 0x216   :  { %v3542_v2 = vpop.eup %3541  ;;  %v2773_v53 = vmul.f32 -1.442695, %v4724_v8  ;;  %v3090_v28 = vadd.f32 %v1796_v10, %v1564_v4  ;;  %v2998_v15 = vpop.f32.mrb[77].mxu0  ;;  %3553 = vpow2.f32 %v2772_v25 }
 0x217   :  { %v2278_v36 = vmul.f32 %v3542_v2, %v4655_v0  ;;  %v1575_v42 = vpop.f32.mrb[82].mxu1  ;;  %v3544_v44 = vpop.eup %3543 }
 0x218   :  { %v1799_v41 = vpop.f32.mrb[78].mxu0  ;;  %v1577_v51 = vpop.f32.mrb[83].mxu1  ;;  %v2279_v49 = vmul.f32 %v3544_v44, %v4664_v16  ;;  %3555 = vpow2.f32 %v2773_v53  ;;  %v1887_v0 = vmul.f32 %v4736_v55, %v3090_v28  ;;  %v4746_v16 = vld [vmem:[%s4886_s3] ss:$0 sm:$0xff] }
 0x219   :  { %v3546_v52 = vpop.eup %3545  ;;  %v2864_v57 = vpack.c.bf16 %v2278_v36, %v2278_v36  ;;  %v2999_v61 = vpop.f32.mrb[79].mxu0  ;;  %v3091_v48 = vadd.f32 %v1799_v41, %v1567_v19 }
 0x21a   :  { %v2135_v43 = vadd.f32 1.0, %v3546_v52  ;;  %v2865_v3 = vpack.c.bf16 %v2279_v49, %v2279_v49  ;;  %v4749_v47 = vadd.f32 %v4746_v16, %v1887_v0 }
 0x21b   :  { %v3548_v31 = vpop.eup %3547  ;;  %2525 = vst.msk [vmem:[%s4887_s4 + $0x78] sm:$0xf] %vm2494_vm2, %v2864_v57  ;;  %v1888_v58 = vmul.f32 %v4736_v55, %v3091_v48 }
 0x21c   :  { %3557 = vrcp.f32 %v2135_v43  ;;  %v2136_v56 = vadd.f32 1.0, %v3548_v31  ;;  %2526 = vst.msk [vmem:[%s4887_s4 + $0x7c] sm:$0xf] %vm2494_vm2, %v2865_v3  ;;  %v2774_v12 = vmul.f32 -1.442695, %v4749_v47  ;;  %v1580_v32 = vpop.f32.mrb[84].mxu1 }
 0x21d   :  { %v4758_v20 = vadd.f32 %v4746_v16, %v1888_v58  ;;  %v1804_v59 = vpop.f32.mrb[80].mxu0  ;;  %v1582_v22 = vpop.f32.mrb[85].mxu1 }
 0x21e   :  { %3559 = vrcp.f32 %v2136_v56  ;;  %v3550_v18 = vpop.eup %3549  ;;  %v3092_v35 = vadd.f32 %v1804_v59, %v1572_v30  ;;  %v3002_v63 = vpop.f32.mrb[81].mxu0 }
 0x21f   :  { %3561 = vpow2.f32 %v2774_v12  ;;  %v1583_v4 = vpop.f32.mrb[86].mxu1  ;;  %v2280_v14 = vmul.f32 %v3550_v18, %v4679_v33  ;;  %v2775_v46 = vmul.f32 -1.442695, %v4758_v20  ;;  %v1807_v5 = vpop.f32.mrb[82].mxu0 }
 0x220   :  { %v1585_v7 = vpop.f32.mrb[87].mxu1  ;;  %v3552_v9 = vpop.eup %3551  ;;  %v1889_v34 = vmul.f32 %v4736_v55, %v3092_v35  ;;  %v3093_v6 = vadd.f32 %v1807_v5, %v1575_v42 }
 0x221   :  { %v3003_v19 = vpop.f32.mrb[83].mxu0  ;;  %v3554_v50 = vpop.eup %3553  ;;  %v2866_v11 = vpack.c.bf16 %v2280_v14, %v2280_v14  ;;  %v2281_v29 = vmul.f32 %v3552_v9, %v4688_v17  ;;  %3563 = vpow2.f32 %v2775_v46 }
 0x222   :  { %v3556_v38 = vpop.eup %3555  ;;  %v2137_v24 = vadd.f32 1.0, %v3554_v50  ;;  %v4765_v54 = vadd.f32 %v4746_v16, %v1889_v34  ;;  %v1890_v33 = vmul.f32 %v4736_v55, %v3093_v6 }
 0x223   :  { %2527 = vst.msk [vmem:[%s4887_s4 + $0x80] sm:$0xf] %vm2494_vm2, %v2866_v11  ;;  %v2867_v62 = vpack.c.bf16 %v2281_v29, %v2281_v29  ;;  %v2138_v13 = vadd.f32 1.0, %v3556_v38 }
 0x224   :  { %3565 = vrcp.f32 %v2137_v24  ;;  %v2776_v27 = vmul.f32 -1.442695, %v4765_v54  ;;  %v4774_v17 = vadd.f32 %v4746_v16, %v1890_v33  ;;  %v1588_v45 = vpop.f32.mrb[88].mxu1 }
 0x225   :  { %2528 = vst.msk [vmem:[%s4887_s4 + $0x84] sm:$0xf] %vm2494_vm2, %v2867_v62  ;;  %3567 = vrcp.f32 %v2138_v13  ;;  %v1812_v26 = vpop.f32.mrb[84].mxu0  ;;  %v1590_v21 = vpop.f32.mrb[89].mxu1 }
 0x226   :  { %v3558_v23 = vpop.eup %3557  ;;  %3569 = vpow2.f32 %v2776_v27  ;;  %v2777_v25 = vmul.f32 -1.442695, %v4774_v17  ;;  %v3094_v30 = vadd.f32 %v1812_v26, %v1580_v32  ;;  %v3006_v2 = vpop.f32.mrb[85].mxu0 }
 0x227   :  { %v2282_v40 = vmul.f32 %v3558_v23, %v4695_v60  ;;  %v1591_v10 = vpop.f32.mrb[90].mxu1  ;;  %v1815_v36 = vpop.f32.mrb[86].mxu0 }
 0x228   :  { %v3560_v37 = vpop.eup %3559  ;;  %v1593_v53 = vpop.f32.mrb[91].mxu1  ;;  %3571 = vpow2.f32 %v2777_v25  ;;  %v1891_v44 = vmul.f32 %v4736_v55, %v3094_v30  ;;  %v3095_v52 = vadd.f32 %v1815_v36, %v1583_v4 }
 0x229   :  { %v3562_v28 = vpop.eup %3561  ;;  %v2868_v15 = vpack.c.bf16 %v2282_v40, %v2282_v40  ;;  %v2283_v42 = vmul.f32 %v3560_v37, %v4708_v1  ;;  %v3007_v41 = vpop.f32.mrb[87].mxu0 }
 0x22a   :  { %v2139_v51 = vadd.f32 1.0, %v3562_v28  ;;  %v4789_v57 = vadd.f32 %v4746_v16, %v1891_v44  ;;  %v1892_v0 = vmul.f32 %v4736_v55, %v3095_v52 }
 0x22b   :  { %2529 = vst.msk [vmem:[%s4887_s4 + $0x88] sm:$0xf] %vm2494_vm2, %v2868_v15  ;;  %v2869_v60 = vpack.c.bf16 %v2283_v42, %v2283_v42  ;;  %v3564_v49 = vpop.eup %3563 }
 0x22c   :  { %3573 = vrcp.f32 %v2139_v51  ;;  %v2140_v1 = vadd.f32 1.0, %v3564_v49  ;;  %v2778_v61 = vmul.f32 -1.442695, %v4789_v57  ;;  %v1596_v43 = vpop.f32.mrb[92].mxu1  ;;  %v4798_v48 = vadd.f32 %v4746_v16, %v1892_v0 }
 0x22d   :  { %2530 = vst.msk [vmem:[%s4887_s4 + $0x8c] sm:$0xf] %vm2494_vm2, %v2869_v60  ;;  %v1820_v31 = vpop.f32.mrb[88].mxu0  ;;  %v1598_v3 = vpop.f32.mrb[93].mxu1 }
 0x22e   :  { %v3566_v56 = vpop.eup %3565  ;;  %3575 = vrcp.f32 %v2140_v1  ;;  %v3096_v58 = vadd.f32 %v1820_v31, %v1588_v45  ;;  %v3010_v12 = vpop.f32.mrb[89].mxu0  ;;  %v2779_v18 = vmul.f32 -1.442695, %v4798_v48 }
 0x22f   :  { %v1599_v32 = vpop.f32.mrb[94].mxu1  ;;  %v3568_v59 = vpop.eup %3567  ;;  %v2284_v22 = vmul.f32 %v3566_v56, %v4719_v39  ;;  %3577 = vpow2.f32 %v2778_v61 }
 0x230   :  { %v1823_v35 = vpop.f32.mrb[90].mxu0  ;;  %v1601_v63 = vpop.f32.mrb[95].mxu1  ;;  %v2285_v14 = vmul.f32 %v3568_v59, %v4724_v8  ;;  %v1893_v46 = vmul.f32 %v4736_v55, %v3096_v58  ;;  %3579 = vpow2.f32 %v2779_v18 }
 0x231   :  { %v3570_v4 = vpop.eup %3569  ;;  %v3097_v5 = vadd.f32 %v1823_v35, %v1591_v10  ;;  %v3011_v7 = vpop.f32.mrb[91].mxu0  ;;  %v2870_v9 = vpack.c.bf16 %v2284_v22, %v2284_v22 }
 0x232   :  { %v2141_v34 = vadd.f32 1.0, %v3570_v4  ;;  %v3572_v6 = vpop.eup %3571  ;;  %v2871_v19 = vpack.c.bf16 %v2285_v14, %v2285_v14  ;;  %v4805_v50 = vadd.f32 %v4746_v16, %v1893_v46 }
 0x233   :  { %v1894_v39 = vmul.f32 %v4736_v55, %v3097_v5  ;;  %2531 = vst.msk [vmem:[%s4887_s4 + $0x90] sm:$0xf] %vm2494_vm2, %v2870_v9  ;;  %v2142_v8 = vadd.f32 1.0, %v3572_v6 }
 0x234   :  { %3581 = vrcp.f32 %v2141_v34  ;;  %2532 = vst.msk [vmem:[%s4887_s4 + $0x94] sm:$0xf] %vm2494_vm2, %v2871_v19  ;;  %v2780_v11 = vmul.f32 -1.442695, %v4805_v50  ;;  %v1604_v38 = vpop.f32.mrb[96].mxu1 }
 0x235   :  { %v4818_v29 = vadd.f32 %v4746_v16, %v1894_v39  ;;  %3583 = vrcp.f32 %v2142_v8  ;;  %v1828_v33 = vpop.f32.mrb[92].mxu0  ;;  %v1606_v62 = vpop.f32.mrb[97].mxu1 }
 0x236   :  { %v3574_v24 = vpop.eup %3573  ;;  %3585 = vpow2.f32 %v2780_v11  ;;  %v3098_v45 = vadd.f32 %v1828_v33, %v1596_v43  ;;  %v3014_v23 = vpop.f32.mrb[93].mxu0 }
 0x237   :  { %v2286_v13 = vmul.f32 %v3574_v24, %v4749_v47  ;;  %v2781_v27 = vmul.f32 -1.442695, %v4818_v29  ;;  %v1607_v26 = vpop.f32.mrb[98].mxu1  ;;  %v1831_v21 = vpop.f32.mrb[94].mxu0 }
 0x238   :  { %v1608_v40 = vpop.f32.mrb[99].mxu1  ;;  %v3576_v25 = vpop.eup %3575  ;;  %v1895_v2 = vmul.f32 %v4736_v55, %v3098_v45  ;;  %v3099_v10 = vadd.f32 %v1831_v21, %v1599_v32 }
 0x239   :  { %v2872_v30 = vpack.c.bf16 %v2286_v13, %v2286_v13  ;;  %3587 = vpow2.f32 %v2781_v27  ;;  %v3015_v37 = vpop.f32.mrb[95].mxu0  ;;  %v3578_v36 = vpop.eup %3577  ;;  %v2287_v53 = vmul.f32 %v3576_v25, %v4758_v20 }
 0x23a   :  { %v2143_v47 = vadd.f32 1.0, %v3578_v36  ;;  %v4829_v28 = vadd.f32 %v4746_v16, %v1895_v2  ;;  %v1896_v15 = vmul.f32 %v4736_v55, %v3099_v10  ;;  %v3580_v42 = vpop.eup %3579 }
 0x23b   :  { %2533 = vst.msk [vmem:[%s4887_s4 + $0x98] sm:$0xf] %vm2494_vm2, %v2872_v30  ;;  %v2873_v44 = vpack.c.bf16 %v2287_v53, %v2287_v53  ;;  %v2144_v41 = vadd.f32 1.0, %v3580_v42 }
 0x23c   :  { %3589 = vrcp.f32 %v2143_v47  ;;  %v2782_v51 = vmul.f32 -1.442695, %v4829_v28  ;;  %v1952_v52 = vadd.f32 %v4746_v16, %v1896_v15 }
 0x23d   :  { %2534 = vst.msk [vmem:[%s4887_s4 + $0x9c] sm:$0xf] %vm2494_vm2, %v2873_v44  ;;  %v1836_v60 = vpop.f32.mrb[96].mxu0  ;;  %3591 = vrcp.f32 %v2144_v41 }
 0x23e   :  { %v3582_v20 = vpop.eup %3581  ;;  %v2783_v0 = vmul.f32 -1.442695, %v1952_v52  ;;  %v3100_v1 = vadd.f32 %v1836_v60, %v1604_v38  ;;  %v3018_v61 = vpop.f32.mrb[97].mxu0  ;;  %3593 = vpow2.f32 %v2782_v51 }
 0x23f   :  { %v2288_v49 = vmul.f32 %v3582_v20, %v4765_v54  ;;  %v3584_v43 = vpop.eup %3583  ;;  %v1839_v31 = vpop.f32.mrb[98].mxu0 }
 0x240   :  { %v3586_v3 = vpop.eup %3585  ;;  %v2289_v58 = vmul.f32 %v3584_v43, %v4774_v17  ;;  %3595 = vpow2.f32 %v2783_v0  ;;  %v1897_v12 = vmul.f32 %v4736_v55, %v3100_v1  ;;  %v3019_v32 = vpop.f32.mrb[99].mxu0 }
 0x241   :  { %v2874_v56 = vpack.c.bf16 %v2288_v49, %v2288_v49  ;;  %v2145_v59 = vadd.f32 1.0, %v3586_v3 }
 0x242   :  { %v2875_v54 = vpack.c.bf16 %v2289_v58, %v2289_v58  ;;  %v1953_v18 = vadd.f32 %v4746_v16, %v1897_v12 }
 0x243   :  { %v3588_v22 = vpop.eup %3587  ;;  %2535 = vst.msk [vmem:[%s4887_s4 + $0xa0] sm:$0xf] %vm2494_vm2, %v2874_v56  ;;  %3597 = vrcp.f32 %v2145_v59 }
 0x244   :  { %v2146_v35 = vadd.f32 1.0, %v3588_v22  ;;  %2536 = vst.msk [vmem:[%s4887_s4 + $0xa4] sm:$0xf] %vm2494_vm2, %v2875_v54  ;;  %v2784_v17 = vmul.f32 -1.442695, %v1953_v18 }
 0x246   :  { %3599 = vrcp.f32 %v2146_v35  ;;  %v3590_v55 = vpop.eup %3589 }
 0x247   :  { %3601 = vpow2.f32 %v2784_v17  ;;  %v2290_v63 = vmul.f32 %v3590_v55, %v4789_v57  ;;  %v3592_v4 = vpop.eup %3591 }
 0x248   :  { %v3594_v14 = vpop.eup %3593  ;;  %v2291_v5 = vmul.f32 %v3592_v4, %v4798_v48 }
 0x249   :  { %v2876_v46 = vpack.c.bf16 %v2290_v63, %v2290_v63  ;;  %v2147_v16 = vadd.f32 1.0, %v3594_v14 }
 0x24a   :  { %v3596_v7 = vpop.eup %3595  ;;  %v2877_v9 = vpack.c.bf16 %v2291_v5, %v2291_v5 }
 0x24b   :  { %2537 = vst.msk [vmem:[%s4887_s4 + $0xa8] sm:$0xf] %vm2494_vm2, %v2876_v46  ;;  %v2148_v34 = vadd.f32 1.0, %v3596_v7  ;;  %3603 = vrcp.f32 %v2147_v16 }
 0x24c   :  { %2538 = vst.msk [vmem:[%s4887_s4 + $0xac] sm:$0xf] %vm2494_vm2, %v2877_v9 }
 0x24d   :  { %v3598_v6 = vpop.eup %3597  ;;  %3605 = vrcp.f32 %v2148_v34 }
 0x24e   :  { %v2292_v57 = vmul.f32 %v3598_v6, %v4805_v50 }
 0x250   :  { %v3600_v48 = vpop.eup %3599  ;;  %v2878_v39 = vpack.c.bf16 %v2292_v57, %v2292_v57 }
 0x251   :  { %v3602_v19 = vpop.eup %3601  ;;  %v2293_v8 = vmul.f32 %v3600_v48, %v4818_v29 }
 0x252   :  { %v2149_v11 = vadd.f32 1.0, %v3602_v19  ;;  %2539 = vst.msk [vmem:[%s4887_s4 + $0xb0] sm:$0xf] %vm2494_vm2, %v2878_v39 }
 0x253   :  { %v2879_v38 = vpack.c.bf16 %v2293_v8, %v2293_v8 }
 0x254   :  { %3607 = vrcp.f32 %v2149_v11 }
 0x255   :  { %2540 = vst.msk [vmem:[%s4887_s4 + $0xb4] sm:$0xf] %vm2494_vm2, %v2879_v38  ;;  %v3604_v24 = vpop.eup %3603 }
 0x256   :  { %v2294_v33 = vmul.f32 %v3604_v24, %v4829_v28 }
 0x257   :  { %v3606_v50 = vpop.eup %3605 }
 0x258   :  { %v2295_v62 = vmul.f32 %v3606_v50, %v1952_v52  ;;  %v2880_v13 = vpack.c.bf16 %v2294_v33, %v2294_v33 }
 0x25a   :  { %v2881_v29 = vpack.c.bf16 %v2295_v62, %v2295_v62  ;;  %2541 = vst.msk [vmem:[%s4887_s4 + $0xb8] sm:$0xf] %vm2494_vm2, %v2880_v13 }
 0x25c   :  { %2542 = vst.msk [vmem:[%s4887_s4 + $0xbc] sm:$0xf] %vm2494_vm2, %v2881_v29 }
 0x25e   :  { %v3608_v27 = vpop.eup %3607 }
 0x25f   :  { %v2296_v45 = vmul.f32 %v3608_v27, %v1953_v18 }
 0x261   :  { %v2882_v23 = vpack.c.bf16 %v2296_v45, %v2296_v45 }
 0x263   :  { %2543 = vst.msk [vmem:[%s4887_s4 + $0xc0] sm:$0xf] %vm2494_vm2, %v2882_v23 }

// kernel: c2f_irmb_forward.10
= control target key start
LH: loop header
LB: loop body
LE: loop exit
PB: predicated region body
PF: predicated region fallthrough
CT: control target
= control target key end

     0   :  { %s2336_s12 = smov 0   ;;  %s2845_s0 = inlined_call_operand.vmem [shape: bf16[8,49,64], index: 0, kind: input, shape index: {}]   ;;  %s2846_s1 = inlined_call_operand.vmem [shape: bf16[8,49,64], index: 1, kind: input, shape index: {}]   ;;  %s2847_s2 = inlined_call_operand.vmem [shape: bf16[8,49,64], index: 2, kind: input, shape index: {}]   ;;  %s2848_s3 = inlined_call_operand.vmem [shape: bf16[8,49,64], index: 3, kind: output, shape index: {}]  }
   0x1 LB: > { %s1778_s13 = sadd.s32 4294967295, %s2313_s12   ;;  %p1782_p0 = scmp.ge.s32.totalorder %s2313_s12, 1  ;;  %s2313_s12 = sphi %s2336_s12, %s13_s12  }
   0x2   : > { %p163_p1 = scmp.lt.s32.totalorder %s2313_s12, 3 }
   0x4   : > { %p164_p2 = pnand %p1782_p0, %p163_p1 }
   0x5   : > { %s1783_s14 = sshll.u32 (!%p164_p2), %s1778_s13, 2  ;;  %vm322_vm0 = vcmask (!%p164_p2), 523264   ;;  %vm783_vm1 = vcmask (!%p164_p2), 400384   ;;  %vm802_vm2 = vcmask (!%p164_p2), 393216   ;;  %vm1170_vm3 = vcmask (!%p164_p2), 1040384  }
   0x6   : > { %167 = sbr.rel (%p164_p2) target bundleno = 854 (0x356), region = 32  ;;  %p202_p3 = scmp.lt.s32.totalorder (!%p164_p2), %s1783_s14, 7  ;;  %vm1656_vm4 = vcmask (!%p164_p2), 519168   ;;  %vm1663_vm5 = vcmask (!%p164_p2), 516096   ;;  %vm1664_vm6 = vsmask.f32 (!%p164_p2), 256 }
   0x7   : > { %vm2790_vm7 = vmand (!%p164_p2), %vm1663_vm5, %vm1664_vm6 }
   0xd   : > { %s2852_s14 = smov (!%p202_p3, %s1783_s14), 7 }
   0xe   : > { %s2344_s15 = smul.u32 28, %s2852_s14 }
  0x10   : > { %s2350_s18 = scalar_lea.vmem %s2846_s1, %s2344_s15  ;;  %s2366_s21 = scalar_lea.vmem %s2845_s0, %s2344_s15 }
  0x11   : > { %v2147_v0 = vld [vmem:[%s2350_s18] sm:$0xff]   ;;  %v2149_v3 = vld [vmem:[%s2350_s18 + $0x8] sm:$0xff]   ;;  %v2151_v6 = vld [vmem:[%s2350_s18 + $0x10] sm:$0xff]   ;;  %s2627_s24 = scalar_lea.vmem %s2847_s2, %s2344_s15  ;;  %s2772_s27 = scalar_lea.vmem %s2848_s3, %s2344_s15 }
  0x12   : > { %v2148_v1 = vld [vmem:[%s2350_s18 + $0x1c] sm:$0xff]   ;;  %2121 = vmatprep.subr.msk.bf16.mxu0 %vm322_vm0, %v2147_v0  ;;  %v336_v2 = vsel %vm322_vm0, %v2147_v0, 0  ;;  %v2150_v5 = vld [vmem:[%s2350_s18 + $0x24] sm:$0xff]   ;;  %v339_v7 = vsel %vm322_vm0, %v2149_v3, 0  ;;  %v2152_v10 = vld [vmem:[%s2350_s18 + $0x2c] sm:$0xff]   ;;  %v342_v14 = vsel %vm322_vm0, %v2151_v6, 0 }
  0x13   : > { %1994 = vmatpush3.bf16.xpose.msra.mxu0 %v336_v2  ;;  %2125 = vmatprep.subr.msk.bf16.mxu1 %vm322_vm0, %v2148_v1  ;;  %v460_v4 = vsel %vm322_vm0, %v2148_v1, 0  ;;  %v2155_v8 = vld [vmem:[%s2366_s21] sm:$0xff]   ;;  %v463_v9 = vsel %vm322_vm0, %v2150_v5, 0  ;;  %v2153_v12 = vld [vmem:[%s2350_s18 + $0x18] ss:$0 sps:$4 sm:$0x11]  }
  0x14   : > { %2010 = vmatpush3.bf16.xpose.msra.mxu1 %v460_v4  ;;  %2122 = vmatprep.subr.msk.bf16.mxu0 %vm322_vm0, %v2149_v3  ;;  %v2158_v11 = vld [vmem:[%s2366_s21 + $0x1c] sm:$0xff]   ;;  %v2154_v13 = vld [vmem:[%s2350_s18 + $0x34] ss:$0 sps:$4 sm:$0x11]   ;;  %v466_v15 = vsel %vm322_vm0, %v2152_v10, 0  ;;  %v345_v16 = vsel %vm322_vm0, %v2153_v12, 0 }
  0x15   : > { %2126 = vmatprep.subr.msk.bf16.mxu1 %vm322_vm0, %v2150_v5  ;;  %2001 = vmatprep.mubr.msk.bf16.mxu0 %vm322_vm0, %v2155_v8  ;;  %v2157_v17 = vld [vmem:[%s2350_s18 + $0x38] sm:$0xff]   ;;  %v469_v18 = vsel %vm322_vm0, %v2154_v13, 0  ;;  %v2156_v20 = vld [vmem:[%s2366_s21 + $0x8] sm:$0xff]   ;;  %v2161_v23 = vld [vmem:[%s2350_s18 + $0x40] sm:$0xff]  }
  0x16   : > { %2017 = vmatprep.mubr.msk.bf16.mxu1 %vm322_vm0, %v2158_v11  ;;  %v2159_v19 = vld [vmem:[%s2350_s18 + $0x54] sm:$0xff]   ;;  %v2160_v21 = vld [vmem:[%s2366_s21 + $0x24] sm:$0xff]   ;;  %v584_v22 = vsel %vm322_vm0, %v2157_v17, 0  ;;  %v2162_v25 = vld [vmem:[%s2350_s18 + $0x5c] sm:$0xff]   ;;  %v587_v30 = vsel %vm322_vm0, %v2161_v23, 0 }
  0x17   : > { %v708_v24 = vsel %vm322_vm0, %v2159_v19, 0  ;;  %v2163_v26 = vld [vmem:[%s2366_s21 + $0x2c] sm:$0xff]   ;;  %v2167_v28 = vld [vmem:[%s2366_s21 + $0x18] ss:$0 sps:$4 sm:$0x11]   ;;  %v711_v32 = vsel %vm322_vm0, %v2162_v25, 0 }
  0x18   : > { %v2164_v27 = vld [vmem:[%s2366_s21 + $0x10] sm:$0xff]   ;;  %v2166_v31 = vld [vmem:[%s2350_s18 + $0x48] sm:$0xff]   ;;  %v2171_v34 = vld [vmem:[%s2366_s21 + $0x38] sm:$0xff]  }
  0x19   : > { %v2165_v29 = vld [vmem:[%s2366_s21 + $0x34] ss:$0 sps:$4 sm:$0x11]   ;;  %v2168_v33 = vld [vmem:[%s2350_s18 + $0x64] sm:$0xff]   ;;  %v590_v36 = vsel %vm322_vm0, %v2166_v31, 0  ;;  %v2174_v43 = vld [vmem:[%s2366_s21 + $0x5c] sm:$0xff]  }
  0x1a   : > { %v2173_v35 = vld [vmem:[%s2366_s21 + $0x54] sm:$0xff]   ;;  %v2169_v37 = vld [vmem:[%s2350_s18 + $0x50] ss:$0 sps:$4 sm:$0x11]   ;;  %v714_v38 = vsel %vm322_vm0, %v2168_v33, 0  ;;  %v2172_v42 = vld [vmem:[%s2366_s21 + $0x40] sm:$0xff]  }
  0x1b   : > { %1996 = vmatpush3.bf16.xpose.msra.mxu0 %v339_v7  ;;  %v2170_v39 = vld [vmem:[%s2350_s18 + $0x6c] ss:$0 sps:$4 sm:$0x11]   ;;  %v593_v40 = vsel %vm322_vm0, %v2169_v37, 0  ;;  %v2177_v45 = vld [vmem:[%s2366_s21 + $0x64] sm:$0xff]  }
  0x1c   : > { %2012 = vmatpush3.bf16.xpose.msra.mxu1 %v463_v9  ;;  %2123 = vmatprep.subr.msk.bf16.mxu0 %vm322_vm0, %v2151_v6  ;;  %v717_v41 = vsel %vm322_vm0, %v2170_v39, 0  ;;  %v2175_v44 = vld [vmem:[%s2366_s21 + $0x48] sm:$0xff]   ;;  %v2176_v46 = vld [vmem:[%s2366_s21 + $0x50] ss:$0 sps:$4 sm:$0x11]  }
  0x1d   : > { %2127 = vmatprep.subr.msk.bf16.mxu1 %vm322_vm0, %v2152_v10  ;;  %v2178_v47 = vld [vmem:[%s2366_s21 + $0x6c] ss:$0 sps:$4 sm:$0x11]  }
  0x23   : > { %1998 = vmatpush3.bf16.xpose.msra.mxu0 %v342_v14 }
  0x24   : > { %2014 = vmatpush3.bf16.xpose.msra.mxu1 %v466_v15  ;;  %2124 = vmatprep.subr.msk.bf16.mxu0 %vm322_vm0, %v2153_v12 }
  0x25   : > { %2128 = vmatprep.subr.msk.bf16.mxu1 %vm322_vm0, %v2154_v13 }
  0x2b   : > { %2000 = vmatpush3.bf16.xpose.msra.mxu0 %v345_v16 }
  0x2c   : > { %2016 = vmatpush3.bf16.xpose.msra.mxu1 %v469_v18  ;;  %2129 = vmatprep.subr.msk.bf16.mxu0 %vm322_vm0, %v2157_v17 }
  0x2d   : > { %2133 = vmatprep.subr.msk.bf16.mxu1 %vm322_vm0, %v2159_v19 }
  0x32   : > { %2002 = vmatmul.mubr.msk.bf16.vlgmr.msra.gmra.mrb[0].mxu0 %vm322_vm0, %v2156_v20 }
  0x33   : > { %2026 = vmatpush3.bf16.xpose.msra.mxu0 %v584_v22  ;;  %2018 = vmatmul.mubr.msk.bf16.vlgmr.msra.gmra.mrb[0].mxu1 %vm322_vm0, %v2160_v21 }
  0x34   : > { %2042 = vmatpush3.bf16.xpose.msra.mxu1 %v708_v24  ;;  %2130 = vmatprep.subr.msk.bf16.mxu0 %vm322_vm0, %v2161_v23 }
  0x35   : > { %2134 = vmatprep.subr.msk.bf16.mxu1 %vm322_vm0, %v2162_v25  ;;  %2021 = vmatprep.mubr.msk.bf16.mxu1 %vm322_vm0, %v2163_v26 }
  0x36   : > { %2005 = vmatprep.mubr.msk.bf16.mxu0 %vm322_vm0, %v2164_v27 }
  0x3a   : > { %2006 = vmatmul.mubr.msk.bf16.gmra.mrb[4].mxu0 %vm322_vm0, %v2167_v28 }
  0x3b   : > { %2028 = vmatpush3.bf16.xpose.msra.mxu0 %v587_v30  ;;  %2022 = vmatmul.mubr.msk.bf16.gmra.mrb[4].mxu1 %vm322_vm0, %v2165_v29 }
  0x3c   : > { %2044 = vmatpush3.bf16.xpose.msra.mxu1 %v711_v32  ;;  %2131 = vmatprep.subr.msk.bf16.mxu0 %vm322_vm0, %v2166_v31 }
  0x3d   : > { %2135 = vmatprep.subr.msk.bf16.mxu1 %vm322_vm0, %v2168_v33  ;;  %2033 = vmatprep.mubr.msk.bf16.mxu0 %vm322_vm0, %v2171_v34 }
  0x3e   : > { %2049 = vmatprep.mubr.msk.bf16.mxu1 %vm322_vm0, %v2173_v35 }
  0x43   : > { %2030 = vmatpush3.bf16.xpose.msra.mxu0 %v590_v36 }
  0x44   : > { %2046 = vmatpush3.bf16.xpose.msra.mxu1 %v714_v38  ;;  %2132 = vmatprep.subr.msk.bf16.mxu0 %vm322_vm0, %v2169_v37 }
  0x45   : > { %2136 = vmatprep.subr.msk.bf16.mxu1 %vm322_vm0, %v2170_v39 }
  0x4b   : > { %2032 = vmatpush3.bf16.xpose.msra.mxu0 %v593_v40 }
  0x4c   : > { %2048 = vmatpush3.bf16.xpose.msra.mxu1 %v717_v41 }
  0x52   : > { %2034 = vmatmul.mubr.msk.bf16.vlgmr.msra.gmra.mrb[8].mxu0 %vm322_vm0, %v2172_v42 }
  0x53   : > { %2050 = vmatmul.mubr.msk.bf16.vlgmr.msra.gmra.mrb[8].mxu1 %vm322_vm0, %v2174_v43  ;;  %2037 = vmatprep.mubr.msk.bf16.mxu0 %vm322_vm0, %v2175_v44 }
  0x54   : > { %2053 = vmatprep.mubr.msk.bf16.mxu1 %vm322_vm0, %v2177_v45 }
  0x5a   : > { %2038 = vmatmul.mubr.msk.bf16.gmra.mrb[12].mxu0 %vm322_vm0, %v2176_v46 }
  0x5b   : > { %2054 = vmatmul.mubr.msk.bf16.gmra.mrb[12].mxu1 %vm322_vm0, %v2178_v47 }
 0x105   : > { %v2438_v48 = vpop.f32.mrb[0].mxu0 }
 0x106   : > { %v2440_v49 = vpop.f32.mrb[1].mxu0  ;;  %v2442_v50 = vpop.f32.mrb[0].mxu1  ;;  %v790_v51 = vsel %vm783_vm1, %v2438_v48, -inf }
 0x107   : > { %791 = vmax.xlane.f32.xlu1 %v790_v51  ;;  %v2446_v52 = vpop.f32.mrb[2].mxu0  ;;  %v2448_v53 = vpop.f32.mrb[1].mxu1  ;;  %v784_v54 = vsel %vm783_vm1, %v2440_v49, -inf  ;;  %v812_v57 = vsel %vm783_vm1, %v2442_v50, -inf }
 0x108   : > { %785 = vmax.xlane.f32.xlu0 %v784_v54  ;;  %v2452_v55 = vpop.f32.mrb[3].mxu0  ;;  %v2454_v56 = vpop.f32.mrb[2].mxu1  ;;  %v806_v61 = vsel %vm783_vm1, %v2448_v53, -inf  ;;  %v793_v6 = vsel %vm783_vm1, %v2446_v52, -inf }
 0x109   : > { %v2458_v58 = vpop.f32.mrb[3].mxu1  ;;  %v815_v59 = vsel %vm783_vm1, %v2454_v56, -inf  ;;  %v787_v0 = vsel %vm783_vm1, %v2452_v55, -inf }
 0x10a   : > { %v809_v7 = vsel %vm783_vm1, %v2458_v58, -inf }
 0x10b   : > { %813 = vmax.xlane.f32.xlu1 %v812_v57 }
 0x10c   : > { %816 = vmax.xlane.f32.xlu0 %v815_v59 }
 0x10d   : > { %v2462_v60 = vpop.f32.mrb[4].mxu0 }
 0x10e   : > { %v2466_v62 = vpop.f32.mrb[4].mxu1  ;;  %v2468_v63 = vpop.f32.mrb[5].mxu0  ;;  %v803_v9 = vsel %vm802_vm2, %v2462_v60, -inf }
 0x10f   : > { %807 = vmax.xlane.f32.xlu1 %v806_v61  ;;  %v2008_v1 = vpop.f32.mrb[6].mxu0  ;;  %v2472_v2 = vpop.f32.mrb[5].mxu1  ;;  %v824_v8 = vsel %vm802_vm2, %v2466_v62, -inf  ;;  %v796_v11 = vsel %vm783_vm1, %v2468_v63, -inf }
 0x110   : > { %788 = vmax.xlane.f32.xlu0 %v787_v0  ;;  %v2474_v3 = vpop.f32.mrb[7].mxu0  ;;  %v2024_v4 = vpop.f32.mrb[6].mxu1  ;;  %v818_v10 = vsel %vm783_vm1, %v2472_v2, -inf }
 0x111   : > { %v2476_v5 = vpop.f32.mrb[7].mxu1  ;;  %v799_v12 = vsel %vm783_vm1, %v2474_v3, -inf }
 0x112   : > { %v821_v13 = vsel %vm783_vm1, %v2476_v5, -inf }
 0x113   : > { %794 = vmax.xlane.f32.xlu1 %v793_v6 }
 0x114   : > { %810 = vmax.xlane.f32.xlu0 %v809_v7 }
 0x117   : > { %825 = vmax.xlane.f32.xlu1 %v824_v8 }
 0x118   : > { %804 = vmax.xlane.f32.xlu0 %v803_v9 }
 0x11b   : > { %819 = vmax.xlane.f32.xlu1 %v818_v10 }
 0x11c   : > { %797 = vmax.xlane.f32.xlu0 %v796_v11 }
 0x11f   : > { %800 = vmax.xlane.f32.xlu1 %v799_v12 }
 0x120   : > { %822 = vmax.xlane.f32.xlu0 %v821_v13 }
 0x125   : > { %v2494_v14 = vpop.f32.mrb[8].mxu0 }
 0x126   : > { %v2496_v15 = vpop.f32.mrb[9].mxu0  ;;  %v2498_v16 = vpop.f32.mrb[8].mxu1  ;;  %v833_v17 = vsel %vm783_vm1, %v2494_v14, -inf }
 0x127   : > { %v2502_v18 = vpop.f32.mrb[9].mxu1  ;;  %834 = vmax.xlane.f32.xlu0 %v833_v17  ;;  %v2504_v19 = vpop.f32.mrb[10].mxu0  ;;  %v854_v23 = vsel %vm783_vm1, %v2498_v16, -inf  ;;  %v827_v27 = vsel %vm783_vm1, %v2496_v15, -inf }
 0x128   : > { %v2506_v20 = vpop.f32.mrb[11].mxu0  ;;  %v2508_v21 = vpop.f32.mrb[10].mxu1  ;;  %v836_v22 = vsel %vm783_vm1, %v2504_v19, -inf  ;;  %v848_v36 = vsel %vm783_vm1, %v2502_v18, -inf }
 0x129   : > { %v2514_v24 = vpop.f32.mrb[11].mxu1  ;;  %837 = vmax.xlane.f32.xlu1 %v836_v22  ;;  %v857_v25 = vsel %vm783_vm1, %v2508_v21, -inf  ;;  %v830_v32 = vsel %vm783_vm1, %v2506_v20, -inf }
 0x12a   : > { %v851_v37 = vsel %vm783_vm1, %v2514_v24, -inf }
 0x12b   : > { %855 = vmax.xlane.f32.xlu0 %v854_v23 }
 0x12d   : > { %858 = vmax.xlane.f32.xlu1 %v857_v25  ;;  %v2518_v26 = vpop.f32.mrb[12].mxu0 }
 0x12e   : > { %v2522_v28 = vpop.f32.mrb[13].mxu0  ;;  %v2524_v29 = vpop.f32.mrb[12].mxu1  ;;  %v845_v40 = vsel %vm802_vm2, %v2518_v26, -inf }
 0x12f   : > { %828 = vmax.xlane.f32.xlu0 %v827_v27  ;;  %v2040_v30 = vpop.f32.mrb[14].mxu0  ;;  %v2526_v31 = vpop.f32.mrb[13].mxu1  ;;  %v839_v38 = vsel %vm783_vm1, %v2522_v28, -inf  ;;  %v866_v43 = vsel %vm802_vm2, %v2524_v29, -inf }
 0x130   : > { %v2530_v33 = vpop.f32.mrb[15].mxu0  ;;  %v2056_v34 = vpop.f32.mrb[14].mxu1  ;;  %v860_v41 = vsel %vm783_vm1, %v2526_v31, -inf }
 0x131   : > { %831 = vmax.xlane.f32.xlu1 %v830_v32  ;;  %v2532_v35 = vpop.f32.mrb[15].mxu1  ;;  %v842_v39 = vsel %vm783_vm1, %v2530_v33, -inf }
 0x132   : > { %v863_v42 = vsel %vm783_vm1, %v2532_v35, -inf }
 0x133   : > { %849 = vmax.xlane.f32.xlu0 %v848_v36 }
 0x135   : > { %852 = vmax.xlane.f32.xlu1 %v851_v37 }
 0x137   : > { %840 = vmax.xlane.f32.xlu0 %v839_v38 }
 0x139   : > { %843 = vmax.xlane.f32.xlu1 %v842_v39 }
 0x13b   : > { %846 = vmax.xlane.f32.xlu0 %v845_v40 }
 0x13d   : > { %861 = vmax.xlane.f32.xlu1 %v860_v41 }
 0x13f   : > { %864 = vmax.xlane.f32.xlu0 %v863_v42 }
 0x141   : > { %867 = vmax.xlane.f32.xlu1 %v866_v43 }
 0x194   : > { %v792_v44 = vpop.xlane.xlu1 %791 }
 0x195   : > { %v871_v45 = vsub.f32 %v2438_v48, %v792_v44  ;;  %v786_v46 = vpop.xlane.xlu0 %785 }
 0x196   : > { %v869_v47 = vsub.f32 %v2440_v49, %v786_v46 }
 0x197   : > { %v901_v51 = vmul.f32 1.442695, %v871_v45 }
 0x198   : > { %v897_v54 = vmul.f32 1.442695, %v869_v47  ;;  %v814_v57 = vpop.xlane.xlu1 %813 }
 0x199   : > { %2195 = vpow2.f32 %v901_v51  ;;  %v878_v59 = vsub.f32 %v2442_v50, %v814_v57  ;;  %v817_v61 = vpop.xlane.xlu0 %816 }
 0x19a   : > { %v879_v0 = vsub.f32 %v2454_v56, %v817_v61  ;;  %2197 = vpow2.f32 %v897_v54 }
 0x19b   : > { %v915_v1 = vmul.f32 1.442695, %v878_v59 }
 0x19c   : > { %v917_v4 = vmul.f32 1.442695, %v879_v0  ;;  %v808_v6 = vpop.xlane.xlu1 %807 }
 0x19d   : > { %2199 = vpow2.f32 %v915_v1  ;;  %v876_v7 = vsub.f32 %v2448_v53, %v808_v6  ;;  %v789_v48 = vpop.xlane.xlu0 %788 }
 0x19e   : > { %2201 = vpow2.f32 %v917_v4  ;;  %v870_v49 = vsub.f32 %v2452_v55, %v789_v48 }
 0x19f   : > { %v911_v8 = vmul.f32 1.442695, %v876_v7 }
 0x1a0   : > { %v795_v9 = vpop.xlane.xlu1 %794  ;;  %v899_v12 = vmul.f32 1.442695, %v870_v49 }
 0x1a1   : > { %2203 = vpow2.f32 %v911_v8  ;;  %v872_v10 = vsub.f32 %v2446_v52, %v795_v9  ;;  %v811_v50 = vpop.xlane.xlu0 %810 }
 0x1a2   : > { %v877_v11 = vsub.f32 %v2458_v58, %v811_v50 }
 0x1a3   : > { %v2558_v56 = vpop.eup %2195  ;;  %v903_v13 = vmul.f32 1.442695, %v872_v10 }
 0x1a4   : > { %v913_v17 = vmul.f32 1.442695, %v877_v11  ;;  %v826_v22 = vpop.xlane.xlu1 %825  ;;  %v959_v53 = vsel %vm783_vm1, %v2558_v56, 0.0  ;;  %v2562_v23 = vpop.eup %2197 }
 0x1a5   : > { %2205 = vpow2.f32 %v903_v13  ;;  %v882_v55 = vsub.f32 %v2466_v62, %v826_v22  ;;  %v805_v25 = vpop.xlane.xlu0 %804  ;;  %960 = vadd.xlane.f32.xlu0 %v959_v53  ;;  %v953_v34 = vsel %vm783_vm1, %v2562_v23, 0.0 }
 0x1a6   : > { %2207 = vpow2.f32 %v913_v17  ;;  %v875_v52 = vsub.f32 %v2462_v60, %v805_v25 }
 0x1a7   : > { %v2566_v58 = vpop.eup %2199  ;;  %2209 = vpow2.f32 %v899_v12  ;;  %v923_v27 = vmul.f32 1.442695, %v882_v55 }
 0x1a8   : > { %v909_v30 = vmul.f32 1.442695, %v875_v52  ;;  %v820_v32 = vpop.xlane.xlu1 %819  ;;  %v980_v36 = vsel %vm783_vm1, %v2566_v58, 0.0  ;;  %v2572_v37 = vpop.eup %2201 }
 0x1a9   : > { %v880_v62 = vsub.f32 %v2472_v2, %v820_v32  ;;  %v798_v38 = vpop.xlane.xlu0 %797  ;;  %954 = vadd.xlane.f32.xlu0 %v953_v34  ;;  %981 = vadd.xlane.f32.xlu1 %v980_v36  ;;  %v983_v43 = vsel %vm783_vm1, %v2572_v37, 0.0  ;;  %v2179_v36 = vld [vmem:[%s2627_s24 + $0x1c] sm:$0xff]  }
 0x1aa   : > { %2211 = vpow2.f32 %v909_v30  ;;  %v873_v60 = vsub.f32 %v2468_v63, %v798_v38  ;;  %2073 = vmatprep.subr.bf16.mxu1 %v2179_v36 }
 0x1ab   : > { %v2576_v39 = vpop.eup %2203  ;;  %2213 = vpow2.f32 %v923_v27  ;;  %v919_v40 = vmul.f32 1.442695, %v880_v62  ;;  %2074 = vmatpush3.bf16.msra.mxu1 %v2179_v36 }
 0x1ac   : > { %v905_v41 = vmul.f32 1.442695, %v873_v60  ;;  %v801_v42 = vpop.xlane.xlu1 %800  ;;  %v974_v44 = vsel %vm783_vm1, %v2576_v39, 0.0 }
 0x1ad   : > { %v874_v2 = vsub.f32 %v2474_v3, %v801_v42  ;;  %v823_v45 = vpop.xlane.xlu0 %822  ;;  %984 = vadd.xlane.f32.xlu0 %v983_v43  ;;  %975 = vadd.xlane.f32.xlu1 %v974_v44  ;;  %v2181_v43 = vld [vmem:[%s2627_s24 + $0x24] sm:$0xff]  }
 0x1ae   : > { %2215 = vpow2.f32 %v905_v41  ;;  %v881_v63 = vsub.f32 %v2476_v5, %v823_v45  ;;  %2075 = vmatprep.subr.bf16.mxu1 %v2181_v43 }
 0x1af   : > { %v2584_v46 = vpop.eup %2205  ;;  %2217 = vpow2.f32 %v919_v40  ;;  %v907_v47 = vmul.f32 1.442695, %v874_v2  ;;  %v2180_v40 = vld [vmem:[%s2627_s24] sm:$0xff]   ;;  %2076 = vmatpush3.bf16.msra.mxu1 %v2181_v43 }
 0x1b0   : > { %v2586_v51 = vpop.eup %2207  ;;  %v921_v54 = vmul.f32 1.442695, %v881_v63  ;;  %v962_v57 = vsel %vm783_vm1, %v2584_v46, 0.0  ;;  %2057 = vmatprep.subr.bf16.mxu0 %v2180_v40 }
 0x1b1   : > { %v2590_v59 = vpop.eup %2209  ;;  %963 = vadd.xlane.f32.xlu1 %v962_v57  ;;  %v977_v3 = vsel %vm783_vm1, %v2586_v51, 0.0  ;;  %2058 = vmatpush3.bf16.msra.mxu0 %v2180_v40 }
 0x1b2   : > { %2219 = vpow2.f32 %v921_v54  ;;  %978 = vadd.xlane.f32.xlu0 %v977_v3  ;;  %v956_v0 = vsel %vm783_vm1, %v2590_v59, 0.0  ;;  %v2182_v54 = vld [vmem:[%s2627_s24 + $0x8] sm:$0xff]  }
 0x1b3   : > { %2221 = vpow2.f32 %v907_v47  ;;  %2059 = vmatprep.subr.bf16.mxu0 %v2182_v54 }
 0x1b4   : > { %v2594_v5 = vpop.eup %2211  ;;  %v835_v61 = vpop.xlane.xlu0 %834 }
 0x1b5   : > { %v2598_v1 = vpop.eup %2213  ;;  %v885_v4 = vsub.f32 %v2494_v14, %v835_v61  ;;  %957 = vadd.xlane.f32.xlu1 %v956_v0  ;;  %v971_v6 = vsel %vm802_vm2, %v2594_v5, 0.0  ;;  %v2183_v0 = vld [vmem:[%s2627_s24 + $0x2c] sm:$0xff]   ;;  %2060 = vmatpush3.bf16.msra.mxu0 %v2182_v54 }
 0x1b6   : > { %v838_v7 = vpop.xlane.xlu1 %837  ;;  %972 = vadd.xlane.f32.xlu0 %v971_v6  ;;  %v992_v10 = vsel %vm802_vm2, %v2598_v1, 0.0  ;;  %2077 = vmatprep.subr.bf16.mxu1 %v2183_v0 }
 0x1b7   : > { %v929_v48 = vmul.f32 1.442695, %v885_v4  ;;  %v886_v8 = vsub.f32 %v2504_v19, %v838_v7  ;;  %2078 = vmatpush3.bf16.msra.mxu1 %v2183_v0 }
 0x1b8   : > { %v2604_v49 = vpop.eup %2215  ;;  %v856_v9 = vpop.xlane.xlu0 %855 }
 0x1b9   : > { %v2608_v50 = vpop.eup %2217  ;;  %2223 = vpow2.f32 %v929_v48  ;;  %v931_v11 = vmul.f32 1.442695, %v886_v8  ;;  %v892_v14 = vsub.f32 %v2498_v16, %v856_v9  ;;  %993 = vadd.xlane.f32.xlu1 %v992_v10  ;;  %v965_v12 = vsel %vm783_vm1, %v2604_v49, 0.0  ;;  %v2185_v8 = vld [vmem:[%s2627_s24 + $0x34] ss:$0 sps:$4 sm:$0x11]  }
 0x1ba   : > { %v859_v13 = vpop.xlane.xlu1 %858  ;;  %966 = vadd.xlane.f32.xlu0 %v965_v12  ;;  %v986_v55 = vsel %vm783_vm1, %v2608_v50, 0.0  ;;  %v2184_v10 = vld [vmem:[%s2627_s24 + $0x10] sm:$0xff]  }
 0x1bb   : > { %2225 = vpow2.f32 %v931_v11  ;;  %v943_v19 = vmul.f32 1.442695, %v892_v14  ;;  %v893_v17 = vsub.f32 %v2508_v21, %v859_v13  ;;  %2061 = vmatprep.subr.bf16.mxu0 %v2184_v10 }
 0x1bc   : > { %v2614_v22 = vpop.eup %2219  ;;  %v829_v53 = vpop.xlane.xlu0 %828  ;;  %2062 = vmatpush3.bf16.msra.mxu0 %v2184_v10 }
 0x1bd   : > { %v2618_v25 = vpop.eup %2221  ;;  %2227 = vpow2.f32 %v943_v19  ;;  %v945_v16 = vmul.f32 1.442695, %v893_v17  ;;  %v883_v52 = vsub.f32 %v2496_v15, %v829_v53  ;;  %987 = vadd.xlane.f32.xlu1 %v986_v55  ;;  %v989_v27 = vsel %vm783_vm1, %v2614_v22, 0.0  ;;  %v2186_v55 = vld [vmem:[%s2627_s24 + $0x18] ss:$0 sps:$4 sm:$0x11]  }
 0x1be   : > { %v832_v30 = vpop.xlane.xlu1 %831  ;;  %990 = vadd.xlane.f32.xlu0 %v989_v27  ;;  %v968_v15 = vsel %vm783_vm1, %v2618_v25, 0.0 }
 0x1bf   : > { %2229 = vpow2.f32 %v945_v16  ;;  %v925_v21 = vmul.f32 1.442695, %v883_v52  ;;  %v884_v32 = vsub.f32 %v2506_v20, %v832_v30 }
 0x1c0   : > { %v850_v34 = vpop.xlane.xlu0 %849 }
 0x1c1   : > { %2231 = vpow2.f32 %v925_v21  ;;  %v927_v62 = vmul.f32 1.442695, %v884_v32  ;;  %v890_v38 = vsub.f32 %v2502_v18, %v850_v34  ;;  %969 = vadd.xlane.f32.xlu1 %v968_v15 }
 0x1c2   : > { %v853_v60 = vpop.xlane.xlu1 %852 }
 0x1c3   : > { %v2635_v41 = vpop.eup %2223  ;;  %2233 = vpow2.f32 %v927_v62  ;;  %v939_v42 = vmul.f32 1.442695, %v890_v38  ;;  %v891_v20 = vsub.f32 %v2514_v24, %v853_v60 }
 0x1c4   : > { %v841_v44 = vpop.xlane.xlu0 %840  ;;  %v1001_v2 = vsel %vm783_vm1, %v2635_v41, 0.0 }
 0x1c5   : > { %v2641_v45 = vpop.eup %2225  ;;  %2235 = vpow2.f32 %v939_v42  ;;  %v941_v18 = vmul.f32 1.442695, %v891_v20  ;;  %v887_v63 = vsub.f32 %v2522_v28, %v841_v44  ;;  %1002 = vadd.xlane.f32.xlu0 %v1001_v2 }
 0x1c6   : > { %v844_v47 = vpop.xlane.xlu1 %843  ;;  %v1004_v24 = vsel %vm783_vm1, %v2641_v45, 0.0 }
 0x1c7   : > { %v2647_v57 = vpop.eup %2227  ;;  %2237 = vpow2.f32 %v941_v18  ;;  %v933_v3 = vmul.f32 1.442695, %v887_v63  ;;  %v888_v61 = vsub.f32 %v2530_v33, %v844_v47  ;;  %1005 = vadd.xlane.f32.xlu1 %v1004_v24  ;;  %v2701_v47 = vld [vmem:[%s2627_s24 + $0x38] sm:$0xff]  }
 0x1c8   : > { %v847_v28 = vpop.xlane.xlu0 %846  ;;  %v1022_v4 = vsel %vm783_vm1, %v2647_v57, 0.0 }
 0x1c9   : > { %v2653_v6 = vpop.eup %2229  ;;  %2239 = vpow2.f32 %v933_v3  ;;  %v935_v7 = vmul.f32 1.442695, %v888_v61  ;;  %v889_v48 = vsub.f32 %v2518_v26, %v847_v28  ;;  %1023 = vadd.xlane.f32.xlu0 %v1022_v4  ;;  %v2315_v26 = vmov 0   ;;  %v2189_v3 = vld [vmem:[%s2627_s24 + $0x54] sm:$0xff]  }
 0x1ca   : > { %v862_v33 = vpop.xlane.xlu1 %861  ;;  %v1025_v9 = vsel %vm783_vm1, %v2653_v6, 0.0  ;;  %v1172_v13 = vsel %vm1170_vm3, 65535, %v2315_v26  ;;  %v2192_v61 = vld [vmem:[%s2627_s24 + $0x50] ss:$0 sps:$4 sm:$0x11]  }
 0x1cb   : > { %v2660_v11 = vpop.eup %2231  ;;  %2241 = vpow2.f32 %v935_v7  ;;  %v937_v14 = vmul.f32 1.442695, %v889_v48  ;;  %v894_v12 = vsub.f32 %v2526_v31, %v862_v33  ;;  %1026 = vadd.xlane.f32.xlu1 %v1025_v9  ;;  %v1274_v53 = vand.u32 %v2185_v8, %v1172_v13  ;;  %v2194_v28 = vld [vmem:[%s2627_s24 + $0x6c] ss:$0 sps:$4 sm:$0x11]  }
 0x1cc   : > { %v865_v19 = vpop.xlane.xlu0 %864  ;;  %v995_v17 = vsel %vm783_vm1, %v2660_v11, 0.0  ;;  %v1174_v21 = vand.u32 %v2186_v55, %v1172_v13  ;;  %v2710_v0 = vand.u32 %v2192_v61, %v1172_v13  ;;  %v2713_v4 = vand.u32 %v2194_v28, %v1172_v13  ;;  %v2188_v61 = vld [vmem:[%s2627_s24 + $0x40] sm:$0xff]  }
 0x1cd   : > { %v2666_v16 = vpop.eup %2233  ;;  %2243 = vpow2.f32 %v937_v14  ;;  %v947_v52 = vmul.f32 1.442695, %v894_v12  ;;  %v895_v27 = vsub.f32 %v2532_v35, %v865_v19  ;;  %996 = vadd.xlane.f32.xlu0 %v995_v17  ;;  %2079 = vmatprep.subr.bf16.mxu1 %v1274_v53 }
 0x1ce   : > { %v868_v31 = vpop.xlane.xlu1 %867  ;;  %v998_v30 = vsel %vm783_vm1, %v2666_v16, 0.0  ;;  %2080 = vmatpush3.bf16.msra.mxu1 %v1274_v53  ;;  %2063 = vmatprep.subr.bf16.mxu0 %v1174_v21 }
 0x1cf   : > { %v2671_v32 = vpop.eup %2235  ;;  %2245 = vpow2.f32 %v947_v52  ;;  %v949_v34 = vmul.f32 1.442695, %v895_v27  ;;  %v896_v15 = vsub.f32 %v2524_v29, %v868_v31  ;;  %999 = vadd.xlane.f32.xlu1 %v998_v30  ;;  %2064 = vmatpush3.bf16.msra.mxu0 %v1174_v21 }
 0x1d0   : > { %v1016_v36 = vsel %vm783_vm1, %v2671_v32, 0.0  ;;  %2089 = vmatprep.subr.bf16.mxu0 %v2701_v47  ;;  %2105 = vmatprep.subr.bf16.mxu1 %v2189_v3 }
 0x1d1   : > { %v2676_v35 = vpop.eup %2237  ;;  %2247 = vpow2.f32 %v949_v34  ;;  %v951_v62 = vmul.f32 1.442695, %v896_v15  ;;  %1017 = vadd.xlane.f32.xlu0 %v1016_v36 }
 0x1d2   : > { %v1019_v38 = vsel %vm783_vm1, %v2676_v35, 0.0 }
 0x1d3   : > { %v2680_v60 = vpop.eup %2239  ;;  %2249 = vpow2.f32 %v951_v62  ;;  %1020 = vadd.xlane.f32.xlu1 %v1019_v38 }
 0x1d4   : > { %v1007_v29 = vsel %vm783_vm1, %v2680_v60, 0.0 }
 0x1d5   : > { %v2684_v40 = vpop.eup %2241  ;;  %1008 = vadd.xlane.f32.xlu0 %v1007_v29 }
 0x1d6   : > { %v1010_v42 = vsel %vm783_vm1, %v2684_v40, 0.0 }
 0x1d7   : > { %v2688_v20 = vpop.eup %2243  ;;  %1011 = vadd.xlane.f32.xlu1 %v1010_v42 }
 0x1d8   : > { %v1013_v43 = vsel %vm802_vm2, %v2688_v20, 0.0 }
 0x1d9   : > { %v2692_v44 = vpop.eup %2245  ;;  %1014 = vadd.xlane.f32.xlu0 %v1013_v43 }
 0x1da   : > { %v1028_v2 = vsel %vm783_vm1, %v2692_v44, 0.0 }
 0x1db   : > { %v2696_v18 = vpop.eup %2247  ;;  %1029 = vadd.xlane.f32.xlu1 %v1028_v2 }
 0x1dc   : > { %v1031_v63 = vsel %vm783_vm1, %v2696_v18, 0.0 }
 0x1dd   : > { %v2703_v24 = vpop.eup %2249  ;;  %1032 = vadd.xlane.f32.xlu0 %v1031_v63 }
 0x1de   : > { %v1034_v54 = vsel %vm802_vm2, %v2703_v24, 0.0 }
 0x1df   : > { %1035 = vadd.xlane.f32.xlu1 %v1034_v54 }
 0x232   : > { %v961_v7 = vpop.xlane.xlu0 %960 }
 0x236   : > { %v955_v48 = vpop.xlane.xlu0 %954  ;;  %v982_v8 = vpop.xlane.xlu1 %981 }
 0x237   : > { %2251 = vrcp.f32 %v982_v8  ;;  %v2190_v8 = vld [vmem:[%s2627_s24 + $0x48] sm:$0xff]  }
 0x23a   : > { %v985_v33 = vpop.xlane.xlu0 %984  ;;  %v976_v9 = vpop.xlane.xlu1 %975 }
 0x23b   : > { %2253 = vrcp.f32 %v985_v33 }
 0x23c   : > { %2255 = vrcp.f32 %v976_v9 }
 0x23e   : > { %v964_v10 = vpop.xlane.xlu1 %963 }
 0x23f   : > { %2257 = vrcp.f32 %v964_v10  ;;  %v979_v14 = vpop.xlane.xlu0 %978 }
 0x240   : > { %2259 = vrcp.f32 %v979_v14 }
 0x241   : > { %2261 = vrcp.f32 %v955_v48  ;;  %v2252_v19 = vpop.eup %2251 }
 0x242   : > { %2263 = vrcp.f32 %v961_v7  ;;  %v958_v12 = vpop.xlane.xlu1 %957  ;;  %v1074_v38 = vmul.f32 %v2252_v19, %v2566_v58 }
 0x243   : > { %2265 = vrcp.f32 %v958_v12  ;;  %v973_v26 = vpop.xlane.xlu0 %972 }
 0x245   : > { %v2254_v17 = vpop.eup %2253 }
 0x246   : > { %v994_v13 = vpop.xlane.xlu1 %993  ;;  %v2256_v55 = vpop.eup %2255  ;;  %v1075_v31 = vmul.f32 %v2254_v17, %v2572_v37 }
 0x247   : > { %v967_v53 = vpop.xlane.xlu0 %966  ;;  %2267 = vrcp.f32 %v994_v13  ;;  %v1072_v15 = vmul.f32 %v2256_v55, %v2576_v39  ;;  %v2191_v39 = vld [vmem:[%s2627_s24 + $0x5c] sm:$0xff]  }
 0x248   : > { %2269 = vrcp.f32 %v973_v26  ;;  %v1098_v43 = vpack.c.bf16 %v1075_v31, %v1074_v38 }
 0x249   : > { %v2258_v52 = vpop.eup %2257 }
 0x24a   : > { %v2260_v27 = vpop.eup %2259  ;;  %v988_v30 = vpop.xlane.xlu1 %987  ;;  %v1068_v42 = vmul.f32 %v2258_v52, %v2584_v46 }
 0x24b   : > { %v2262_v21 = vpop.eup %2261  ;;  %2271 = vrcp.f32 %v988_v30  ;;  %v991_v34 = vpop.xlane.xlu0 %990  ;;  %v1073_v36 = vmul.f32 %v2260_v27, %v2586_v51 }
 0x24c   : > { %v2264_v62 = vpop.eup %2263  ;;  %2273 = vrcp.f32 %v991_v34  ;;  %v1065_v63 = vmul.f32 %v2262_v21, %v2562_v23  ;;  %v2193_v23 = vld [vmem:[%s2627_s24 + $0x64] sm:$0xff]  }
 0x24d   : > { %v2266_v29 = vpop.eup %2265  ;;  %2275 = vrcp.f32 %v967_v53  ;;  %v1097_v37 = vpack.c.bf16 %v1073_v36, %v1072_v15  ;;  %v1067_v51 = vmul.f32 %v2264_v62, %v2558_v56 }
 0x24e   : > { %v970_v2 = vpop.xlane.xlu1 %969  ;;  %v1066_v54 = vmul.f32 %v2266_v29, %v2590_v59 }
 0x24f   : > { %2277 = vrcp.f32 %v970_v2  ;;  %2081 = vmatprep.mubr.msk.bf16.mxu1 %vm783_vm1, %v1097_v37  ;;  %v1094_v46 = vpack.c.bf16 %v1068_v42, %v1067_v51 }
 0x250   : > { %2082 = vmatmul.mubr.msk.bf16.vlgmr.msra.gmra.mrb[16].mxu1 %vm783_vm1, %v1098_v43  ;;  %v1093_v58 = vpack.c.bf16 %v1066_v54, %v1065_v63 }
 0x251   : > { %2106 = vmatpush3.bf16.msra.mxu1 %v2189_v3  ;;  %v2268_v7 = vpop.eup %2267 }
 0x252   : > { %v1003_v28 = vpop.xlane.xlu0 %1002  ;;  %2065 = vmatprep.mubr.msk.bf16.mxu0 %vm783_vm1, %v1093_v58  ;;  %2107 = vmatprep.subr.bf16.mxu1 %v2191_v39  ;;  %v2270_v59 = vpop.eup %2269  ;;  %v1078_v10 = vmul.f32 %v2268_v7, %v2598_v1 }
 0x253   : > { %2066 = vmatmul.mubr.msk.bf16.vlgmr.msra.gmra.mrb[16].mxu0 %vm783_vm1, %v1094_v46 }
 0x254   : > { %v1006_v56 = vpop.xlane.xlu1 %1005  ;;  %2090 = vmatpush3.bf16.msra.mxu0 %v2701_v47  ;;  %v1071_v47 = vmul.f32 %v2270_v59, %v2594_v5  ;;  %v1100_v53 = vpack.c.bf16 %v1078_v10, %v1078_v10 }
 0x255   : > { %v2272_v48 = vpop.eup %2271  ;;  %2091 = vmatprep.subr.bf16.mxu0 %v2188_v61  ;;  %2108 = vmatpush3.bf16.msra.mxu1 %v2191_v39  ;;  %2279 = vrcp.f32 %v1006_v56 }
 0x256   : > { %v2274_v33 = vpop.eup %2273  ;;  %v1024_v9 = vpop.xlane.xlu0 %1023  ;;  %v1076_v3 = vmul.f32 %v2272_v48, %v2608_v50  ;;  %2109 = vmatprep.subr.bf16.mxu1 %v2193_v23  ;;  %v1096_v5 = vpack.c.bf16 %v1071_v47, %v1071_v47 }
 0x257   : > { %v2276_v14 = vpop.eup %2275  ;;  %v1077_v12 = vmul.f32 %v2274_v33, %v2614_v22 }
 0x258   : > { %v1027_v26 = vpop.xlane.xlu1 %1026  ;;  %2092 = vmatpush3.bf16.msra.mxu0 %v2188_v61  ;;  %v1069_v55 = vmul.f32 %v2276_v14, %v2604_v49 }
 0x259   : > { %v2278_v19 = vpop.eup %2277  ;;  %v1099_v13 = vpack.c.bf16 %v1077_v12, %v1076_v3  ;;  %2093 = vmatprep.subr.bf16.mxu0 %v2190_v8  ;;  %2110 = vmatpush3.bf16.msra.mxu1 %v2193_v23 }
 0x25a   : > { %v997_v17 = vpop.xlane.xlu0 %996  ;;  %v1070_v50 = vmul.f32 %v2278_v19, %v2618_v25  ;;  %2111 = vmatprep.subr.bf16.mxu1 %v2713_v4 }
 0x25b   : > { %2281 = vrcp.f32 %v997_v17  ;;  %2085 = vmatprep.mubr.msk.bf16.mxu1 %vm783_vm1, %v1099_v13 }
 0x25c   : > { %2283 = vrcp.f32 %v1003_v28  ;;  %2086 = vmatmul.mubr.msk.bf16.gmra.mrb[20].mxu1 %vm783_vm1, %v1100_v53  ;;  %v1000_v1 = vpop.xlane.xlu1 %999  ;;  %v1095_v22 = vpack.c.bf16 %v1070_v50, %v1069_v55  ;;  %2094 = vmatpush3.bf16.msra.mxu0 %v2190_v8 }
 0x25d   : > { %2285 = vrcp.f32 %v1000_v1  ;;  %2095 = vmatprep.subr.bf16.mxu0 %v2710_v0  ;;  %2112 = vmatpush3.bf16.msra.mxu1 %v2713_v4 }
 0x25e   : > { %2287 = vrcp.f32 %v1027_v26  ;;  %v1018_v49 = vpop.xlane.xlu0 %1017  ;;  %2069 = vmatprep.mubr.msk.bf16.mxu0 %vm783_vm1, %v1095_v22 }
 0x25f   : > { %2289 = vrcp.f32 %v1018_v49  ;;  %2070 = vmatmul.mubr.msk.bf16.gmra.mrb[20].mxu0 %vm783_vm1, %v1096_v5  ;;  %v2280_v27 = vpop.eup %2279 }
 0x260   : > { %2291 = vrcp.f32 %v1024_v9  ;;  %v1021_v25 = vpop.xlane.xlu1 %1020  ;;  %2096 = vmatpush3.bf16.msra.mxu0 %v2710_v0  ;;  %v1082_v15 = vmul.f32 %v2280_v27, %v2641_v45 }
 0x261   : > { %2293 = vrcp.f32 %v1021_v25  ;;  %v1666_v25 = vld [vmem:[%s2772_s27 + $0x18] sm:$0x1] }
 0x262   : > { %v1009_v52 = vpop.xlane.xlu0 %1008 }
 0x263   : > { %2295 = vrcp.f32 %v1009_v52 }
 0x264   : > { %v1012_v31 = vpop.xlane.xlu1 %1011 }
 0x265   : > { %v2282_v30 = vpop.eup %2281  ;;  %2297 = vrcp.f32 %v1012_v31 }
 0x266   : > { %v2284_v21 = vpop.eup %2283  ;;  %v1015_v4 = vpop.xlane.xlu0 %1014  ;;  %v1079_v38 = vmul.f32 %v2282_v30, %v2660_v11 }
 0x267   : > { %v2286_v34 = vpop.eup %2285  ;;  %2299 = vrcp.f32 %v1015_v4  ;;  %v1081_v42 = vmul.f32 %v2284_v21, %v2635_v41 }
 0x268   : > { %v2288_v36 = vpop.eup %2287  ;;  %v1030_v62 = vpop.xlane.xlu1 %1029  ;;  %v1080_v29 = vmul.f32 %v2286_v34, %v2666_v16 }
 0x269   : > { %v2290_v0 = vpop.eup %2289  ;;  %2301 = vrcp.f32 %v1030_v62  ;;  %v1102_v54 = vpack.c.bf16 %v1082_v15, %v1081_v42  ;;  %v1089_v39 = vmul.f32 %v2288_v36, %v2653_v6 }
 0x26a   : > { %v2292_v37 = vpop.eup %2291  ;;  %v1033_v43 = vpop.xlane.xlu0 %1032  ;;  %v1101_v2 = vpack.c.bf16 %v1080_v29, %v1079_v38  ;;  %v1086_v51 = vmul.f32 %v2290_v0, %v2671_v32  ;;  %v1675_v29 = vld [vmem:[%s2772_s27 + $0x34] sm:$0x1] }
 0x26b   : > { %v2294_v63 = vpop.eup %2293  ;;  %2303 = vrcp.f32 %v1033_v43  ;;  %v1088_v58 = vmul.f32 %v2292_v37, %v2647_v57 }
 0x26c   : > { %2097 = vmatprep.mubr.msk.bf16.mxu0 %vm783_vm1, %v1101_v2  ;;  %v1036_v45 = vpop.xlane.xlu1 %1035  ;;  %v1087_v11 = vmul.f32 %v2294_v63, %v2676_v35 }
 0x26d   : > { %v2296_v16 = vpop.eup %2295  ;;  %2305 = vrcp.f32 %v1036_v45  ;;  %2098 = vmatmul.mubr.msk.bf16.vlgmr.msra.gmra.mrb[24].mxu0 %vm783_vm1, %v1102_v54  ;;  %v1106_v61 = vpack.c.bf16 %v1089_v39, %v1088_v58 }
 0x26e   : > { %v1105_v41 = vpack.c.bf16 %v1087_v11, %v1086_v51  ;;  %v1083_v6 = vmul.f32 %v2296_v16, %v2680_v60 }
 0x26f   : > { %v2298_v46 = vpop.eup %2297 }
 0x270   : > { %2113 = vmatprep.mubr.msk.bf16.mxu1 %vm783_vm1, %v1105_v41  ;;  %v1084_v28 = vmul.f32 %v2298_v46, %v2684_v40 }
 0x271   : > { %v2300_v23 = vpop.eup %2299  ;;  %2114 = vmatmul.mubr.msk.bf16.vlgmr.msra.gmra.mrb[24].mxu1 %vm783_vm1, %v1106_v61 }
 0x272   : > { %v1103_v32 = vpack.c.bf16 %v1084_v28, %v1083_v6  ;;  %v1085_v35 = vmul.f32 %v2300_v23, %v2688_v20 }
 0x273   : > { %v2302_v7 = vpop.eup %2301 }
 0x274   : > { %2101 = vmatprep.mubr.msk.bf16.mxu0 %vm783_vm1, %v1103_v32  ;;  %v1104_v57 = vpack.c.bf16 %v1085_v35, %v1085_v35  ;;  %v1090_v56 = vmul.f32 %v2302_v7, %v2692_v44  ;;  %v1684_v35 = vld [vmem:[%s2772_s27 + $0x50] sm:$0x1] }
 0x275   : > { %v2304_v59 = vpop.eup %2303 }
 0x276   : > { %2102 = vmatmul.mubr.msk.bf16.gmra.mrb[28].mxu0 %vm783_vm1, %v1104_v57  ;;  %v1091_v60 = vmul.f32 %v2304_v59, %v2696_v18 }
 0x277   : > { %v2306_v48 = vpop.eup %2305 }
 0x278   : > { %v1107_v40 = vpack.c.bf16 %v1091_v60, %v1090_v56  ;;  %v1092_v8 = vmul.f32 %v2306_v48, %v2703_v24 }
 0x27a   : > { %2117 = vmatprep.mubr.msk.bf16.mxu1 %vm783_vm1, %v1107_v40  ;;  %v1108_v33 = vpack.c.bf16 %v1092_v8, %v1092_v8 }
 0x27c   : > { %2118 = vmatmul.mubr.msk.bf16.gmra.mrb[28].mxu1 %vm783_vm1, %v1108_v33 }
 0x323   : > { %v2083_v20 = vpop.f32.mrb[16].mxu1 }
 0x324   : > { %v1310_v9 = vpop.f32.mrb[17].mxu1  ;;  %v1910_v14 = vpack.c.bf16 %v2083_v20, %v2083_v20 }
 0x325   : > { %v2084_v3 = vpop.f32.mrb[18].mxu1  ;;  %v1908_v19 = vpack.c.bf16 %v1310_v9, %v1310_v9 }
 0x326   : > { %v2067_v44 = vpop.f32.mrb[16].mxu0  ;;  %v1313_v18 = vpop.f32.mrb[19].mxu1  ;;  %v1911_v17 = vpack.c.bf16 %v2084_v3, %v2084_v3  ;;  %1671 = vst.msk [vmem:[%s2772_s27 + $0x24] sm:$0xf] %vm1656_vm4, %v1910_v14 }
 0x327   : > { %v1903_v24 = vpack.c.bf16 %v2067_v44, %v2067_v44  ;;  %v1210_v10 = vpop.f32.mrb[17].mxu0  ;;  %v1909_v55 = vpack.c.bf16 %v1313_v18, %v1313_v18  ;;  %1669 = vst.msk [vmem:[%s2772_s27 + $0x1c] sm:$0xf] %vm1656_vm4, %v1908_v19  ;;  %v1693_v44 = vld [vmem:[%s2772_s27 + $0x6c] sm:$0x1] }
 0x328   : > { %v1901_v12 = vpack.c.bf16 %v1210_v10, %v1210_v10  ;;  %v2068_v26 = vpop.f32.mrb[18].mxu0  ;;  %1672 = vst.msk [vmem:[%s2772_s27 + $0x28] sm:$0xf] %vm1656_vm4, %v1911_v17 }
 0x329   : > { %1659 = vst.msk [vmem:[%s2772_s27 + $0x8] sm:$0xf] %vm1656_vm4, %v1903_v24  ;;  %v1904_v13 = vpack.c.bf16 %v2068_v26, %v2068_v26  ;;  %v1213_v47 = vpop.f32.mrb[19].mxu0  ;;  %1670 = vst.msk [vmem:[%s2772_s27 + $0x20] sm:$0xf] %vm1656_vm4, %v1909_v55 }
 0x32a   : > { %1657 = vst.msk [vmem:[%s2772_s27] sm:$0xf] %vm1656_vm4, %v1901_v12  ;;  %v1902_v53 = vpack.c.bf16 %v1213_v47, %v1213_v47 }
 0x32b   : > { %1660 = vst.msk [vmem:[%s2772_s27 + $0xc] sm:$0xf] %vm1656_vm4, %v1904_v13 }
 0x32c   : > { %1658 = vst.msk [vmem:[%s2772_s27 + $0x4] sm:$0xf] %vm1656_vm4, %v1902_v53 }
 0x32f   : > { %v2087_v50 = vpop.f32.mrb[20].mxu1 }
 0x330   : > { %v1326_v1 = vpop.f32.mrb[21].mxu1  ;;  %v1914_v38 = vpack.c.bf16 %v2087_v50, %v2087_v50 }
 0x331   : > { %v2088_v22 = vpop.f32.mrb[22].mxu1  ;;  %v1912_v4 = vpack.c.bf16 %v1326_v1, %v1326_v1 }
 0x332   : > { %v2071_v5 = vpop.f32.mrb[20].mxu0  ;;  %v1329_v52 = vpop.f32.mrb[23].mxu1  ;;  %v1676_v0 = vsel %vm2790_vm7, %v1914_v38, %v1675_v29 }
 0x333   : > { %v1907_v27 = vpack.c.bf16 %v2071_v5, %v2071_v5  ;;  %v1226_v31 = vpop.f32.mrb[21].mxu0  ;;  %v1913_v62 = vpack.c.bf16 %v1329_v52, %v1329_v52  ;;  %1673 = vst.msk [vmem:[%s2772_s27 + $0x2c] sm:$0xf] %vm1656_vm4, %v1912_v4  ;;  %1677 = vst [vmem:[%s2772_s27 + $0x34] sm:$0x1] %v1676_v0 }
 0x334   : > { %v1905_v30 = vpack.c.bf16 %v1226_v31, %v1226_v31  ;;  %v2072_v21 = vpop.f32.mrb[22].mxu0 }
 0x335   : > { %v1667_v34 = vsel %vm2790_vm7, %v1907_v27, %v1666_v25  ;;  %v1229_v15 = vpop.f32.mrb[23].mxu0  ;;  %1674 = vst.msk [vmem:[%s2772_s27 + $0x30] sm:$0xf] %vm1656_vm4, %v1913_v62 }
 0x336   : > { %1668 = vst [vmem:[%s2772_s27 + $0x18] sm:$0x1] %v1667_v34  ;;  %1661 = vst.msk [vmem:[%s2772_s27 + $0x10] sm:$0xf] %vm1656_vm4, %v1905_v30  ;;  %v1906_v36 = vpack.c.bf16 %v1229_v15, %v1229_v15 }
 0x338   : > { %1662 = vst.msk [vmem:[%s2772_s27 + $0x14] sm:$0xf] %vm1656_vm4, %v1906_v36 }
 0x340   : > { %v2099_v42 = vpop.f32.mrb[24].mxu0 }
 0x341   : > { %v1917_v37 = vpack.c.bf16 %v2099_v42, %v2099_v42  ;;  %v1410_v43 = vpop.f32.mrb[25].mxu0 }
 0x342   : > { %v1915_v2 = vpack.c.bf16 %v1410_v43, %v1410_v43  ;;  %v2100_v63 = vpop.f32.mrb[26].mxu0 }
 0x343   : > { %1680 = vst.msk [vmem:[%s2772_s27 + $0x40] sm:$0xf] %vm1656_vm4, %v1917_v37  ;;  %v1918_v54 = vpack.c.bf16 %v2100_v63, %v2100_v63  ;;  %v1413_v39 = vpop.f32.mrb[27].mxu0 }
 0x344   : > { %1678 = vst.msk [vmem:[%s2772_s27 + $0x38] sm:$0xf] %vm1656_vm4, %v1915_v2  ;;  %v1916_v45 = vpack.c.bf16 %v1413_v39, %v1413_v39  ;;  %v2115_v51 = vpop.f32.mrb[24].mxu1 }
 0x345   : > { %1681 = vst.msk [vmem:[%s2772_s27 + $0x44] sm:$0xf] %vm1656_vm4, %v1918_v54  ;;  %v1924_v11 = vpack.c.bf16 %v2115_v51, %v2115_v51  ;;  %v1510_v16 = vpop.f32.mrb[25].mxu1 }
 0x346   : > { %1679 = vst.msk [vmem:[%s2772_s27 + $0x3c] sm:$0xf] %vm1656_vm4, %v1916_v45  ;;  %v1922_v58 = vpack.c.bf16 %v1510_v16, %v1510_v16  ;;  %v2116_v41 = vpop.f32.mrb[26].mxu1 }
 0x347   : > { %1689 = vst.msk [vmem:[%s2772_s27 + $0x5c] sm:$0xf] %vm1656_vm4, %v1924_v11  ;;  %v1925_v46 = vpack.c.bf16 %v2116_v41, %v2116_v41  ;;  %v1513_v61 = vpop.f32.mrb[27].mxu1 }
 0x348   : > { %1687 = vst.msk [vmem:[%s2772_s27 + $0x54] sm:$0xf] %vm1656_vm4, %v1922_v58  ;;  %v1923_v6 = vpack.c.bf16 %v1513_v61, %v1513_v61 }
 0x349   : > { %1690 = vst.msk [vmem:[%s2772_s27 + $0x60] sm:$0xf] %vm1656_vm4, %v1925_v46  ;;  %v2103_v28 = vpop.f32.mrb[28].mxu0 }
 0x34a   : > { %1688 = vst.msk [vmem:[%s2772_s27 + $0x58] sm:$0xf] %vm1656_vm4, %v1923_v6  ;;  %v1921_v23 = vpack.c.bf16 %v2103_v28, %v2103_v28  ;;  %v1426_v32 = vpop.f32.mrb[29].mxu0 }
 0x34b   : > { %v1919_v7 = vpack.c.bf16 %v1426_v32, %v1426_v32  ;;  %v2104_v57 = vpop.f32.mrb[30].mxu0 }
 0x34c   : > { %v1685_v59 = vsel %vm2790_vm7, %v1921_v23, %v1684_v35  ;;  %v1429_v56 = vpop.f32.mrb[31].mxu0 }
 0x34d   : > { %1686 = vst [vmem:[%s2772_s27 + $0x50] sm:$0x1] %v1685_v59  ;;  %1682 = vst.msk [vmem:[%s2772_s27 + $0x48] sm:$0xf] %vm1656_vm4, %v1919_v7  ;;  %v1920_v60 = vpack.c.bf16 %v1429_v56, %v1429_v56 }
 0x34f   : > { %1683 = vst.msk [vmem:[%s2772_s27 + $0x4c] sm:$0xf] %vm1656_vm4, %v1920_v60  ;;  %v2119_v48 = vpop.f32.mrb[28].mxu1 }
 0x350   : > { %v1526_v40 = vpop.f32.mrb[29].mxu1  ;;  %v1928_v9 = vpack.c.bf16 %v2119_v48, %v2119_v48 }
 0x351   : > { %v1926_v8 = vpack.c.bf16 %v1526_v40, %v1526_v40  ;;  %v2120_v33 = vpop.f32.mrb[30].mxu1 }
 0x352   : > { %v1529_v20 = vpop.f32.mrb[31].mxu1  ;;  %v1694_v18 = vsel %vm2790_vm7, %v1928_v9, %v1693_v44 }
 0x353   : > { %1691 = vst.msk [vmem:[%s2772_s27 + $0x64] sm:$0xf] %vm1656_vm4, %v1926_v8  ;;  %v1927_v3 = vpack.c.bf16 %v1529_v20, %v1529_v20  ;;  %1695 = vst [vmem:[%s2772_s27 + $0x6c] sm:$0x1] %v1694_v18 }
 0x355   : > { %1692 = vst.msk [vmem:[%s2772_s27 + $0x68] sm:$0xf] %vm1656_vm4, %v1927_v3 }
 0x356 PF: > { %s13_s12 = sadd.s32 1, %s2313_s12  }
 0x357   : > { %p10_p4 = scmp.ge.s32.totalorder %s13_s12, 4  }
 0x359   :  { %12 = sbr.rel (!%p10_p4) target bundleno = 1 (0x1), region = 68 }

// kernel: c2f_irmb_forward.12
= control target key start
LH: loop header
LB: loop body
LE: loop exit
PB: predicated region body
PF: predicated region fallthrough
CT: control target
= control target key end

     0   :  { %v1323_v0 = vmov 0.0   ;;  %vm1324_vm0 = vmmov 0   ;;  %vm317_vm1 = vcmask 523264   ;;  %vm822_vm2 = vcmask 519168   ;;  %s1786_s2 = inlined_call_operand.vmem [shape: bf16[64,64], index: 2, kind: input, shape index: {}]   ;;  %s1787_s0 = inlined_call_operand.vmem [shape: bf16[392,64], index: 0, kind: input, shape index: {}]   ;;  %s1788_s1 = inlined_call_operand.vmem [shape: bf16[392,64], index: 1, kind: input, shape index: {}]   ;;  %s1789_s3 = inlined_call_operand.vmem [shape: bf16[392,64], index: 3, kind: output, shape index: {}]  }
   0x1   :  { %1176 = vmatprep.subr.bf16.mxu0 %v1323_v0  ;;  %v1294_v1 = vld [vmem:[%s1786_s2] sm:$0xff]   ;;  %1284 = vmatprep.subr.bf16.mxu1 %v1323_v0  ;;  %v1295_v2 = vld [vmem:[%s1786_s2 + $0x8] sm:$0xff]   ;;  %v1296_v3 = vld [vmem:[%s1786_s2 + $0x10] sm:$0xff]  }
   0x2   :  { %1184 = vmatprep.mubr.msk.bf16.mxu0 %vm1324_vm0, %v1323_v0  ;;  %1236 = vmatprep.mubr.msk.bf16.mxu1 %vm1324_vm0, %v1323_v0  ;;  %v1297_v4 = vld [vmem:[%s1786_s2 + $0x18] sm:$0xff]   ;;  %v1298_v5 = vld [vmem:[%s1787_s0] sm:$0xff]   ;;  %v1299_v6 = vld [vmem:[%s1787_s0 + $0x68] sm:$0xff]  }
   0x3   :  { %1177 = vmatpush3.bf16.msra.mxu0 %v1294_v1  ;;  %1288 = vmatpush3.bf16.msra.mxu1 %v1294_v1  ;;  %v1300_v7 = vld [vmem:[%s1787_s0 + $0x8] sm:$0xff]   ;;  %v1301_v8 = vld [vmem:[%s1787_s0 + $0x70] sm:$0xff]   ;;  %v1303_v10 = vld [vmem:[%s1787_s0 + $0x78] sm:$0xff]  }
   0x4   :  { %1178 = vmatprep.subr.bf16.mxu0 %v1323_v0  ;;  %1285 = vmatprep.subr.bf16.mxu1 %v1323_v0  ;;  %v1302_v9 = vld [vmem:[%s1787_s0 + $0x10] sm:$0xff]   ;;  %v1304_v11 = vld [vmem:[%s1787_s0 + $0x18] sm:$0xff]   ;;  %v1305_v12 = vld [vmem:[%s1787_s0 + $0x80] sm:$0xff]  }
   0x5   :  { %v1306_v13 = vld [vmem:[%s1787_s0 + $0x20] sm:$0xff]   ;;  %v1307_v14 = vld [vmem:[%s1787_s0 + $0x88] sm:$0xff]   ;;  %v1309_v16 = vld [vmem:[%s1787_s0 + $0x90] sm:$0xff]  }
   0x6   :  { %v1308_v15 = vld [vmem:[%s1787_s0 + $0x28] sm:$0xff]   ;;  %v1310_v17 = vld [vmem:[%s1787_s0 + $0x30] sm:$0xff]   ;;  %v1311_v18 = vld [vmem:[%s1787_s0 + $0x98] sm:$0xff]  }
   0x7   :  { %1179 = vmatpush3.bf16.msra.mxu0 %v1295_v2  ;;  %1289 = vmatpush3.bf16.msra.mxu1 %v1295_v2  ;;  %v1312_v19 = vld [vmem:[%s1787_s0 + $0x38] sm:$0xff]   ;;  %v1313_v20 = vld [vmem:[%s1787_s0 + $0xa0] sm:$0xff]   ;;  %v1315_v22 = vld [vmem:[%s1787_s0 + $0xa8] sm:$0xff]  }
   0x8   :  { %1180 = vmatprep.subr.bf16.mxu0 %v1323_v0  ;;  %1286 = vmatprep.subr.bf16.mxu1 %v1323_v0  ;;  %v1314_v21 = vld [vmem:[%s1787_s0 + $0x40] sm:$0xff]   ;;  %v1316_v23 = vld [vmem:[%s1787_s0 + $0x48] sm:$0xff]   ;;  %v1317_v24 = vld [vmem:[%s1787_s0 + $0xb0] sm:$0xff]  }
   0x9   :  { %v1318_v25 = vld [vmem:[%s1787_s0 + $0x50] sm:$0xff]   ;;  %v1319_v26 = vld [vmem:[%s1787_s0 + $0xb8] sm:$0xff]   ;;  %v1321_v28 = vld [vmem:[%s1787_s0 + $0xc0] ss:$0 sps:$4 sm:$0xff]  }
   0xa   :  { %v1320_v27 = vld [vmem:[%s1787_s0 + $0x58] sm:$0xff]   ;;  %v1322_v29 = vld [vmem:[%s1787_s0 + $0x60] sm:$0xff]   ;;  %v1136_v31 = vld [vmem:[%s1788_s1 + $0x68] sm:$0xff]  }
   0xb   :  { %1181 = vmatpush3.bf16.msra.mxu0 %v1296_v3  ;;  %1290 = vmatpush3.bf16.msra.mxu1 %v1296_v3  ;;  %v1029_v30 = vld [vmem:[%s1788_s1] sm:$0xff]   ;;  %v1082_v33 = vunpack.c.l.bf16 %v1136_v31  ;;  %v1083_v35 = vunpack.c.h.bf16 %v1136_v31  ;;  %v1124_v43 = vld [vmem:[%s1788_s1 + $0x8] sm:$0xff]   ;;  %v1137_v45 = vld [vmem:[%s1788_s1 + $0x70] sm:$0xff]  }
   0xc   :  { %1182 = vmatprep.subr.bf16.mxu0 %v1323_v0  ;;  %1287 = vmatprep.subr.bf16.mxu1 %v1323_v0  ;;  %v1030_v32 = vunpack.c.l.bf16 %v1029_v30  ;;  %v1031_v34 = vunpack.c.h.bf16 %v1029_v30  ;;  %v1034_v53 = vunpack.c.l.bf16 %v1124_v43  ;;  %v1086_v55 = vunpack.c.l.bf16 %v1137_v45  ;;  %v1125_v1 = vld [vmem:[%s1788_s1 + $0x10] sm:$0xff]   ;;  %v1138_v3 = vld [vmem:[%s1788_s1 + $0x78] sm:$0xff]  }
   0xd   :  { %v1035_v56 = vunpack.c.h.bf16 %v1124_v43  ;;  %v1087_v57 = vunpack.c.h.bf16 %v1137_v45  ;;  %v1127_v45 = vld [vmem:[%s1788_s1 + $0x20] sm:$0xff]  }
   0xf   :  { %1183 = vmatpush3.bf16.msra.mxu0 %v1297_v4  ;;  %1291 = vmatpush3.bf16.msra.mxu1 %v1297_v4 }
  0x12   :  { %1185 = vmatmul.mubr.msk.bf16.vlgmr.msra.gmra.mrb[0].mxu0 %vm317_vm1, %v1298_v5  ;;  %1237 = vmatmul.mubr.msk.bf16.vlgmr.msra.gmra.mrb[0].mxu1 %vm317_vm1, %v1299_v6 }
  0x13   :  { %1188 = vmatprep.mubr.msk.bf16.mxu0 %vm1324_vm0, %v1323_v0  ;;  %1240 = vmatprep.mubr.msk.bf16.mxu1 %vm1324_vm0, %v1323_v0 }
  0x1a   :  { %1189 = vmatmul.mubr.msk.bf16.gmra.mrb[4].mxu0 %vm317_vm1, %v1300_v7  ;;  %1241 = vmatmul.mubr.msk.bf16.gmra.mrb[4].mxu1 %vm317_vm1, %v1301_v8 }
  0x1b   :  { %1192 = vmatprep.mubr.msk.bf16.mxu0 %vm1324_vm0, %v1323_v0  ;;  %1244 = vmatprep.mubr.msk.bf16.mxu1 %vm1324_vm0, %v1323_v0 }
  0x22   :  { %1193 = vmatmul.mubr.msk.bf16.gmra.mrb[8].mxu0 %vm317_vm1, %v1302_v9  ;;  %1245 = vmatmul.mubr.msk.bf16.gmra.mrb[8].mxu1 %vm317_vm1, %v1303_v10 }
  0x23   :  { %1196 = vmatprep.mubr.msk.bf16.mxu0 %vm1324_vm0, %v1323_v0  ;;  %1248 = vmatprep.mubr.msk.bf16.mxu1 %vm1324_vm0, %v1323_v0 }
  0x2a   :  { %1197 = vmatmul.mubr.msk.bf16.gmra.mrb[12].mxu0 %vm317_vm1, %v1304_v11  ;;  %1249 = vmatmul.mubr.msk.bf16.gmra.mrb[12].mxu1 %vm317_vm1, %v1305_v12  ;;  %v1038_v11 = vunpack.c.l.bf16 %v1125_v1 }
  0x2b   :  { %1200 = vmatprep.mubr.msk.bf16.mxu0 %vm1324_vm0, %v1323_v0  ;;  %1252 = vmatprep.mubr.msk.bf16.mxu1 %vm1324_vm0, %v1323_v0 }
  0x32   :  { %1201 = vmatmul.mubr.msk.bf16.gmra.mrb[16].mxu0 %vm317_vm1, %v1306_v13  ;;  %1253 = vmatmul.mubr.msk.bf16.gmra.mrb[16].mxu1 %vm317_vm1, %v1307_v14  ;;  %v1090_v13 = vunpack.c.l.bf16 %v1138_v3  ;;  %v1039_v14 = vunpack.c.h.bf16 %v1125_v1 }
  0x33   :  { %1204 = vmatprep.mubr.msk.bf16.mxu0 %vm1324_vm0, %v1323_v0  ;;  %1256 = vmatprep.mubr.msk.bf16.mxu1 %vm1324_vm0, %v1323_v0 }
  0x3a   :  { %1205 = vmatmul.mubr.msk.bf16.gmra.mrb[20].mxu0 %vm317_vm1, %v1308_v15  ;;  %1257 = vmatmul.mubr.msk.bf16.gmra.mrb[20].mxu1 %vm317_vm1, %v1309_v16  ;;  %v1091_v15 = vunpack.c.h.bf16 %v1138_v3  ;;  %v1128_v3 = vld [vmem:[%s1788_s1 + $0x28] sm:$0xff]  }
  0x3b   :  { %1208 = vmatprep.mubr.msk.bf16.mxu0 %vm1324_vm0, %v1323_v0  ;;  %1260 = vmatprep.mubr.msk.bf16.mxu1 %vm1324_vm0, %v1323_v0 }
  0x42   :  { %1209 = vmatmul.mubr.msk.bf16.gmra.mrb[24].mxu0 %vm317_vm1, %v1310_v17  ;;  %1261 = vmatmul.mubr.msk.bf16.gmra.mrb[24].mxu1 %vm317_vm1, %v1311_v18 }
  0x43   :  { %1212 = vmatprep.mubr.msk.bf16.mxu0 %vm1324_vm0, %v1323_v0  ;;  %1264 = vmatprep.mubr.msk.bf16.mxu1 %vm1324_vm0, %v1323_v0 }
  0x4a   :  { %1213 = vmatmul.mubr.msk.bf16.gmra.mrb[28].mxu0 %vm317_vm1, %v1312_v19  ;;  %1265 = vmatmul.mubr.msk.bf16.gmra.mrb[28].mxu1 %vm317_vm1, %v1313_v20 }
  0x4b   :  { %1216 = vmatprep.mubr.msk.bf16.mxu0 %vm1324_vm0, %v1323_v0  ;;  %1268 = vmatprep.mubr.msk.bf16.mxu1 %vm1324_vm0, %v1323_v0 }
  0x52   :  { %1217 = vmatmul.mubr.msk.bf16.gmra.mrb[32].mxu0 %vm317_vm1, %v1314_v21  ;;  %1269 = vmatmul.mubr.msk.bf16.gmra.mrb[32].mxu1 %vm317_vm1, %v1315_v22 }
  0x53   :  { %1220 = vmatprep.mubr.msk.bf16.mxu0 %vm1324_vm0, %v1323_v0  ;;  %1272 = vmatprep.mubr.msk.bf16.mxu1 %vm1324_vm0, %v1323_v0 }
  0x5a   :  { %1221 = vmatmul.mubr.msk.bf16.gmra.mrb[36].mxu0 %vm317_vm1, %v1316_v23  ;;  %1273 = vmatmul.mubr.msk.bf16.gmra.mrb[36].mxu1 %vm317_vm1, %v1317_v24  ;;  %v1126_v23 = vld [vmem:[%s1788_s1 + $0x18] sm:$0xff]  }
  0x5b   :  { %1224 = vmatprep.mubr.msk.bf16.mxu0 %vm1324_vm0, %v1323_v0  ;;  %1276 = vmatprep.mubr.msk.bf16.mxu1 %vm1324_vm0, %v1323_v0 }
  0x62   :  { %1225 = vmatmul.mubr.msk.bf16.gmra.mrb[40].mxu0 %vm317_vm1, %v1318_v25  ;;  %1277 = vmatmul.mubr.msk.bf16.gmra.mrb[40].mxu1 %vm317_vm1, %v1319_v26  ;;  %v1139_v25 = vld [vmem:[%s1788_s1 + $0x80] sm:$0xff]  }
  0x63   :  { %1228 = vmatprep.mubr.msk.bf16.mxu0 %vm1324_vm0, %v1323_v0  ;;  %1280 = vmatprep.mubr.msk.bf16.mxu1 %vm1324_vm0, %v1323_v0 }
  0x6a   :  { %1229 = vmatmul.mubr.msk.bf16.gmra.mrb[44].mxu0 %vm317_vm1, %v1320_v27  ;;  %1281 = vmatmul.mubr.msk.bf16.gmra.mrb[44].mxu1 %vm317_vm1, %v1321_v28 }
  0x6b   :  { %1232 = vmatprep.mubr.msk.bf16.mxu0 %vm1324_vm0, %v1323_v0 }
  0x72   :  { %1233 = vmatmul.mubr.msk.bf16.gmra.mrb[48].mxu0 %vm317_vm1, %v1322_v29 }
  0xe5   :  { %v427_v36 = vpop.f32.mrb[0].mxu0  ;;  %v531_v37 = vpop.f32.mrb[0].mxu1 }
  0xe6   :  { %v428_v38 = vadd.f32 %v1030_v32, %v427_v36  ;;  %v1186_v39 = vpop.f32.mrb[1].mxu0  ;;  %v532_v40 = vadd.f32 %v1082_v33, %v531_v37  ;;  %v1238_v41 = vpop.f32.mrb[1].mxu1  ;;  %v1042_v33 = vunpack.c.l.bf16 %v1126_v23  ;;  %v1043_v36 = vunpack.c.h.bf16 %v1126_v23 }
  0xe7   :  { %v430_v42 = vpop.f32.mrb[2].mxu0  ;;  %v534_v44 = vpop.f32.mrb[2].mxu1  ;;  %v1095_v37 = vunpack.c.h.bf16 %v1139_v25 }
  0xe8   :  { %v979_v46 = vpack.c.bf16 %v428_v38, %v428_v38  ;;  %v431_v47 = vadd.f32 %v1031_v34, %v430_v42  ;;  %v1187_v48 = vpop.f32.mrb[3].mxu0  ;;  %v1005_v49 = vpack.c.bf16 %v532_v40, %v532_v40  ;;  %v535_v50 = vadd.f32 %v1083_v35, %v534_v44  ;;  %v1239_v51 = vpop.f32.mrb[3].mxu1 }
  0xe9   :  { %v1094_v35 = vunpack.c.l.bf16 %v1139_v25  ;;  %v1129_v25 = vld [vmem:[%s1788_s1 + $0x30] sm:$0xff]  }
  0xea   :  { %823 = vst.msk [vmem:[%s1789_s3] sm:$0xf] %vm822_vm2, %v979_v46  ;;  %v980_v52 = vpack.c.bf16 %v431_v47, %v431_v47  ;;  %849 = vst.msk [vmem:[%s1789_s3 + $0x68] sm:$0xf] %vm822_vm2, %v1005_v49  ;;  %v1006_v54 = vpack.c.bf16 %v535_v50, %v535_v50  ;;  %v1140_v47 = vld [vmem:[%s1788_s1 + $0x88] sm:$0xff]  }
  0xec   :  { %824 = vst.msk [vmem:[%s1789_s3 + $0x4] sm:$0xf] %vm822_vm2, %v980_v52  ;;  %850 = vst.msk [vmem:[%s1789_s3 + $0x6c] sm:$0xf] %vm822_vm2, %v1006_v54 }
  0xed   :  { %v435_v58 = vpop.f32.mrb[4].mxu0  ;;  %v539_v59 = vpop.f32.mrb[4].mxu1 }
  0xee   :  { %v436_v60 = vadd.f32 %v1034_v53, %v435_v58  ;;  %v1190_v61 = vpop.f32.mrb[5].mxu0  ;;  %v540_v62 = vadd.f32 %v1086_v55, %v539_v59  ;;  %v1242_v63 = vpop.f32.mrb[5].mxu1  ;;  %v1046_v55 = vunpack.c.l.bf16 %v1127_v45  ;;  %v1047_v58 = vunpack.c.h.bf16 %v1127_v45 }
  0xef   :  { %v438_v0 = vpop.f32.mrb[6].mxu0  ;;  %v542_v2 = vpop.f32.mrb[6].mxu1  ;;  %v1099_v59 = vunpack.c.h.bf16 %v1140_v47 }
  0xf0   :  { %v981_v4 = vpack.c.bf16 %v436_v60, %v436_v60  ;;  %v439_v5 = vadd.f32 %v1035_v56, %v438_v0  ;;  %v1191_v6 = vpop.f32.mrb[7].mxu0  ;;  %v1007_v7 = vpack.c.bf16 %v540_v62, %v540_v62  ;;  %v543_v8 = vadd.f32 %v1087_v57, %v542_v2  ;;  %v1243_v9 = vpop.f32.mrb[7].mxu1 }
  0xf1   :  { %v1098_v57 = vunpack.c.l.bf16 %v1140_v47  ;;  %v1130_v47 = vld [vmem:[%s1788_s1 + $0x38] sm:$0xff]  }
  0xf2   :  { %825 = vst.msk [vmem:[%s1789_s3 + $0x8] sm:$0xf] %vm822_vm2, %v981_v4  ;;  %v982_v10 = vpack.c.bf16 %v439_v5, %v439_v5  ;;  %851 = vst.msk [vmem:[%s1789_s3 + $0x70] sm:$0xf] %vm822_vm2, %v1007_v7  ;;  %v1008_v12 = vpack.c.bf16 %v543_v8, %v543_v8  ;;  %v1141_v5 = vld [vmem:[%s1788_s1 + $0x90] sm:$0xff]  }
  0xf4   :  { %826 = vst.msk [vmem:[%s1789_s3 + $0xc] sm:$0xf] %vm822_vm2, %v982_v10  ;;  %852 = vst.msk [vmem:[%s1789_s3 + $0x74] sm:$0xf] %vm822_vm2, %v1008_v12 }
  0xf5   :  { %v443_v16 = vpop.f32.mrb[8].mxu0  ;;  %v547_v17 = vpop.f32.mrb[8].mxu1 }
  0xf6   :  { %v444_v18 = vadd.f32 %v1038_v11, %v443_v16  ;;  %v1194_v19 = vpop.f32.mrb[9].mxu0  ;;  %v548_v20 = vadd.f32 %v1090_v13, %v547_v17  ;;  %v1246_v21 = vpop.f32.mrb[9].mxu1  ;;  %v1050_v13 = vunpack.c.l.bf16 %v1128_v3  ;;  %v1051_v16 = vunpack.c.h.bf16 %v1128_v3 }
  0xf7   :  { %v446_v22 = vpop.f32.mrb[10].mxu0  ;;  %v550_v24 = vpop.f32.mrb[10].mxu1  ;;  %v1103_v17 = vunpack.c.h.bf16 %v1141_v5 }
  0xf8   :  { %v983_v26 = vpack.c.bf16 %v444_v18, %v444_v18  ;;  %v447_v27 = vadd.f32 %v1039_v14, %v446_v22  ;;  %v1195_v28 = vpop.f32.mrb[11].mxu0  ;;  %v1009_v29 = vpack.c.bf16 %v548_v20, %v548_v20  ;;  %v551_v30 = vadd.f32 %v1091_v15, %v550_v24  ;;  %v1247_v31 = vpop.f32.mrb[11].mxu1 }
  0xf9   :  { %v1102_v15 = vunpack.c.l.bf16 %v1141_v5  ;;  %v1131_v5 = vld [vmem:[%s1788_s1 + $0x40] sm:$0xff]  }
  0xfa   :  { %827 = vst.msk [vmem:[%s1789_s3 + $0x10] sm:$0xf] %vm822_vm2, %v983_v26  ;;  %v984_v32 = vpack.c.bf16 %v447_v27, %v447_v27  ;;  %853 = vst.msk [vmem:[%s1789_s3 + $0x78] sm:$0xf] %vm822_vm2, %v1009_v29  ;;  %v1010_v34 = vpack.c.bf16 %v551_v30, %v551_v30  ;;  %v1142_v27 = vld [vmem:[%s1788_s1 + $0x98] sm:$0xff]  }
  0xfc   :  { %828 = vst.msk [vmem:[%s1789_s3 + $0x14] sm:$0xf] %vm822_vm2, %v984_v32  ;;  %854 = vst.msk [vmem:[%s1789_s3 + $0x7c] sm:$0xf] %vm822_vm2, %v1010_v34 }
  0xfd   :  { %v451_v38 = vpop.f32.mrb[12].mxu0  ;;  %v555_v39 = vpop.f32.mrb[12].mxu1 }
  0xfe   :  { %v452_v40 = vadd.f32 %v1042_v33, %v451_v38  ;;  %v1198_v41 = vpop.f32.mrb[13].mxu0  ;;  %v556_v42 = vadd.f32 %v1094_v35, %v555_v39  ;;  %v1250_v43 = vpop.f32.mrb[13].mxu1  ;;  %v1054_v35 = vunpack.c.l.bf16 %v1129_v25  ;;  %v1055_v38 = vunpack.c.h.bf16 %v1129_v25 }
  0xff   :  { %v454_v44 = vpop.f32.mrb[14].mxu0  ;;  %v558_v46 = vpop.f32.mrb[14].mxu1  ;;  %v1107_v39 = vunpack.c.h.bf16 %v1142_v27 }
 0x100   :  { %v985_v48 = vpack.c.bf16 %v452_v40, %v452_v40  ;;  %v455_v49 = vadd.f32 %v1043_v36, %v454_v44  ;;  %v1199_v50 = vpop.f32.mrb[15].mxu0  ;;  %v1011_v51 = vpack.c.bf16 %v556_v42, %v556_v42  ;;  %v559_v52 = vadd.f32 %v1095_v37, %v558_v46  ;;  %v1251_v53 = vpop.f32.mrb[15].mxu1 }
 0x101   :  { %v1106_v37 = vunpack.c.l.bf16 %v1142_v27  ;;  %v1132_v27 = vld [vmem:[%s1788_s1 + $0x48] sm:$0xff]  }
 0x102   :  { %829 = vst.msk [vmem:[%s1789_s3 + $0x18] sm:$0xf] %vm822_vm2, %v985_v48  ;;  %v986_v54 = vpack.c.bf16 %v455_v49, %v455_v49  ;;  %855 = vst.msk [vmem:[%s1789_s3 + $0x80] sm:$0xf] %vm822_vm2, %v1011_v51  ;;  %v1012_v56 = vpack.c.bf16 %v559_v52, %v559_v52  ;;  %v1143_v49 = vld [vmem:[%s1788_s1 + $0xa0] sm:$0xff]  }
 0x104   :  { %830 = vst.msk [vmem:[%s1789_s3 + $0x1c] sm:$0xf] %vm822_vm2, %v986_v54  ;;  %856 = vst.msk [vmem:[%s1789_s3 + $0x84] sm:$0xf] %vm822_vm2, %v1012_v56 }
 0x105   :  { %v459_v60 = vpop.f32.mrb[16].mxu0  ;;  %v563_v61 = vpop.f32.mrb[16].mxu1 }
 0x106   :  { %v460_v62 = vadd.f32 %v1046_v55, %v459_v60  ;;  %v1202_v63 = vpop.f32.mrb[17].mxu0  ;;  %v564_v0 = vadd.f32 %v1098_v57, %v563_v61  ;;  %v1254_v1 = vpop.f32.mrb[17].mxu1  ;;  %v1058_v57 = vunpack.c.l.bf16 %v1130_v47  ;;  %v1059_v60 = vunpack.c.h.bf16 %v1130_v47 }
 0x107   :  { %v462_v2 = vpop.f32.mrb[18].mxu0  ;;  %v566_v4 = vpop.f32.mrb[18].mxu1  ;;  %v1111_v61 = vunpack.c.h.bf16 %v1143_v49 }
 0x108   :  { %v987_v6 = vpack.c.bf16 %v460_v62, %v460_v62  ;;  %v463_v7 = vadd.f32 %v1047_v58, %v462_v2  ;;  %v1203_v8 = vpop.f32.mrb[19].mxu0  ;;  %v1013_v9 = vpack.c.bf16 %v564_v0, %v564_v0  ;;  %v567_v10 = vadd.f32 %v1099_v59, %v566_v4  ;;  %v1255_v11 = vpop.f32.mrb[19].mxu1 }
 0x109   :  { %v1110_v59 = vunpack.c.l.bf16 %v1143_v49  ;;  %v1133_v49 = vld [vmem:[%s1788_s1 + $0x50] sm:$0xff]  }
 0x10a   :  { %831 = vst.msk [vmem:[%s1789_s3 + $0x20] sm:$0xf] %vm822_vm2, %v987_v6  ;;  %v988_v12 = vpack.c.bf16 %v463_v7, %v463_v7  ;;  %857 = vst.msk [vmem:[%s1789_s3 + $0x88] sm:$0xf] %vm822_vm2, %v1013_v9  ;;  %v1014_v14 = vpack.c.bf16 %v567_v10, %v567_v10  ;;  %v1144_v7 = vld [vmem:[%s1788_s1 + $0xa8] sm:$0xff]  }
 0x10c   :  { %832 = vst.msk [vmem:[%s1789_s3 + $0x24] sm:$0xf] %vm822_vm2, %v988_v12  ;;  %858 = vst.msk [vmem:[%s1789_s3 + $0x8c] sm:$0xf] %vm822_vm2, %v1014_v14 }
 0x10d   :  { %v467_v18 = vpop.f32.mrb[20].mxu0  ;;  %v571_v19 = vpop.f32.mrb[20].mxu1 }
 0x10e   :  { %v468_v20 = vadd.f32 %v1050_v13, %v467_v18  ;;  %v1206_v21 = vpop.f32.mrb[21].mxu0  ;;  %v572_v22 = vadd.f32 %v1102_v15, %v571_v19  ;;  %v1258_v23 = vpop.f32.mrb[21].mxu1  ;;  %v1062_v15 = vunpack.c.l.bf16 %v1131_v5  ;;  %v1063_v18 = vunpack.c.h.bf16 %v1131_v5 }
 0x10f   :  { %v470_v24 = vpop.f32.mrb[22].mxu0  ;;  %v574_v26 = vpop.f32.mrb[22].mxu1  ;;  %v1115_v19 = vunpack.c.h.bf16 %v1144_v7 }
 0x110   :  { %v989_v28 = vpack.c.bf16 %v468_v20, %v468_v20  ;;  %v471_v29 = vadd.f32 %v1051_v16, %v470_v24  ;;  %v1207_v30 = vpop.f32.mrb[23].mxu0  ;;  %v1015_v31 = vpack.c.bf16 %v572_v22, %v572_v22  ;;  %v575_v32 = vadd.f32 %v1103_v17, %v574_v26  ;;  %v1259_v33 = vpop.f32.mrb[23].mxu1 }
 0x111   :  { %v1114_v17 = vunpack.c.l.bf16 %v1144_v7  ;;  %v1134_v7 = vld [vmem:[%s1788_s1 + $0x58] sm:$0xff]  }
 0x112   :  { %833 = vst.msk [vmem:[%s1789_s3 + $0x28] sm:$0xf] %vm822_vm2, %v989_v28  ;;  %v990_v34 = vpack.c.bf16 %v471_v29, %v471_v29  ;;  %859 = vst.msk [vmem:[%s1789_s3 + $0x90] sm:$0xf] %vm822_vm2, %v1015_v31  ;;  %v1016_v36 = vpack.c.bf16 %v575_v32, %v575_v32  ;;  %v1145_v29 = vld [vmem:[%s1788_s1 + $0xb0] sm:$0xff]  }
 0x114   :  { %834 = vst.msk [vmem:[%s1789_s3 + $0x2c] sm:$0xf] %vm822_vm2, %v990_v34  ;;  %860 = vst.msk [vmem:[%s1789_s3 + $0x94] sm:$0xf] %vm822_vm2, %v1016_v36 }
 0x115   :  { %v475_v40 = vpop.f32.mrb[24].mxu0  ;;  %v579_v41 = vpop.f32.mrb[24].mxu1 }
 0x116   :  { %v476_v42 = vadd.f32 %v1054_v35, %v475_v40  ;;  %v1210_v43 = vpop.f32.mrb[25].mxu0  ;;  %v580_v44 = vadd.f32 %v1106_v37, %v579_v41  ;;  %v1262_v45 = vpop.f32.mrb[25].mxu1  ;;  %v1066_v37 = vunpack.c.l.bf16 %v1132_v27  ;;  %v1067_v40 = vunpack.c.h.bf16 %v1132_v27 }
 0x117   :  { %v478_v46 = vpop.f32.mrb[26].mxu0  ;;  %v582_v48 = vpop.f32.mrb[26].mxu1  ;;  %v1119_v41 = vunpack.c.h.bf16 %v1145_v29 }
 0x118   :  { %v991_v50 = vpack.c.bf16 %v476_v42, %v476_v42  ;;  %v479_v51 = vadd.f32 %v1055_v38, %v478_v46  ;;  %v1211_v52 = vpop.f32.mrb[27].mxu0  ;;  %v1017_v53 = vpack.c.bf16 %v580_v44, %v580_v44  ;;  %v583_v54 = vadd.f32 %v1107_v39, %v582_v48  ;;  %v1263_v55 = vpop.f32.mrb[27].mxu1 }
 0x119   :  { %v1118_v39 = vunpack.c.l.bf16 %v1145_v29 }
 0x11a   :  { %835 = vst.msk [vmem:[%s1789_s3 + $0x30] sm:$0xf] %vm822_vm2, %v991_v50  ;;  %v992_v56 = vpack.c.bf16 %v479_v51, %v479_v51  ;;  %861 = vst.msk [vmem:[%s1789_s3 + $0x98] sm:$0xf] %vm822_vm2, %v1017_v53  ;;  %v1018_v58 = vpack.c.bf16 %v583_v54, %v583_v54  ;;  %v1146_v51 = vld [vmem:[%s1788_s1 + $0xb8] sm:$0xff]  }
 0x11c   :  { %836 = vst.msk [vmem:[%s1789_s3 + $0x34] sm:$0xf] %vm822_vm2, %v992_v56  ;;  %862 = vst.msk [vmem:[%s1789_s3 + $0x9c] sm:$0xf] %vm822_vm2, %v1018_v58 }
 0x11d   :  { %v483_v62 = vpop.f32.mrb[28].mxu0  ;;  %v587_v63 = vpop.f32.mrb[28].mxu1 }
 0x11e   :  { %v484_v0 = vadd.f32 %v1058_v57, %v483_v62  ;;  %v1214_v1 = vpop.f32.mrb[29].mxu0  ;;  %v588_v2 = vadd.f32 %v1110_v59, %v587_v63  ;;  %v1266_v3 = vpop.f32.mrb[29].mxu1  ;;  %v1070_v59 = vunpack.c.l.bf16 %v1133_v49  ;;  %v1071_v62 = vunpack.c.h.bf16 %v1133_v49 }
 0x11f   :  { %v486_v4 = vpop.f32.mrb[30].mxu0  ;;  %v590_v6 = vpop.f32.mrb[30].mxu1  ;;  %v1123_v63 = vunpack.c.h.bf16 %v1146_v51 }
 0x120   :  { %v993_v8 = vpack.c.bf16 %v484_v0, %v484_v0  ;;  %v487_v9 = vadd.f32 %v1059_v60, %v486_v4  ;;  %v1215_v10 = vpop.f32.mrb[31].mxu0  ;;  %v1019_v11 = vpack.c.bf16 %v588_v2, %v588_v2  ;;  %v591_v12 = vadd.f32 %v1111_v61, %v590_v6  ;;  %v1267_v13 = vpop.f32.mrb[31].mxu1 }
 0x121   :  { %v1122_v61 = vunpack.c.l.bf16 %v1146_v51 }
 0x122   :  { %837 = vst.msk [vmem:[%s1789_s3 + $0x38] sm:$0xf] %vm822_vm2, %v993_v8  ;;  %v994_v14 = vpack.c.bf16 %v487_v9, %v487_v9  ;;  %863 = vst.msk [vmem:[%s1789_s3 + $0xa0] sm:$0xf] %vm822_vm2, %v1019_v11  ;;  %v1020_v16 = vpack.c.bf16 %v591_v12, %v591_v12  ;;  %v120_v9 = vld [vmem:[%s1788_s1 + $0xc0] sm:$0xf] }
 0x124   :  { %838 = vst.msk [vmem:[%s1789_s3 + $0x3c] sm:$0xf] %vm822_vm2, %v994_v14  ;;  %864 = vst.msk [vmem:[%s1789_s3 + $0xa4] sm:$0xf] %vm822_vm2, %v1020_v16 }
 0x125   :  { %v491_v20 = vpop.f32.mrb[32].mxu0  ;;  %v595_v21 = vpop.f32.mrb[32].mxu1 }
 0x126   :  { %v492_v22 = vadd.f32 %v1062_v15, %v491_v20  ;;  %v1218_v23 = vpop.f32.mrb[33].mxu0  ;;  %v596_v24 = vadd.f32 %v1114_v17, %v595_v21  ;;  %v1270_v25 = vpop.f32.mrb[33].mxu1  ;;  %v1074_v17 = vunpack.c.l.bf16 %v1134_v7  ;;  %v1075_v20 = vunpack.c.h.bf16 %v1134_v7 }
 0x127   :  { %v494_v26 = vpop.f32.mrb[34].mxu0  ;;  %v598_v28 = vpop.f32.mrb[34].mxu1 }
 0x128   :  { %v995_v30 = vpack.c.bf16 %v492_v22, %v492_v22  ;;  %v495_v31 = vadd.f32 %v1063_v18, %v494_v26  ;;  %v1219_v32 = vpop.f32.mrb[35].mxu0  ;;  %v1021_v33 = vpack.c.bf16 %v596_v24, %v596_v24  ;;  %v599_v34 = vadd.f32 %v1115_v19, %v598_v28  ;;  %v1271_v35 = vpop.f32.mrb[35].mxu1  ;;  %v1135_v28 = vld [vmem:[%s1788_s1 + $0x60] sm:$0xff]  }
 0x129   :  { %v169_v19 = vunpack.c.l.bf16 %v120_v9 }
 0x12a   :  { %839 = vst.msk [vmem:[%s1789_s3 + $0x40] sm:$0xf] %vm822_vm2, %v995_v30  ;;  %v996_v36 = vpack.c.bf16 %v495_v31, %v495_v31  ;;  %865 = vst.msk [vmem:[%s1789_s3 + $0xa8] sm:$0xf] %vm822_vm2, %v1021_v33  ;;  %v1022_v38 = vpack.c.bf16 %v599_v34, %v599_v34 }
 0x12c   :  { %840 = vst.msk [vmem:[%s1789_s3 + $0x44] sm:$0xf] %vm822_vm2, %v996_v36  ;;  %866 = vst.msk [vmem:[%s1789_s3 + $0xac] sm:$0xf] %vm822_vm2, %v1022_v38  ;;  %v1078_v36 = vunpack.c.l.bf16 %v1135_v28 }
 0x12d   :  { %v499_v42 = vpop.f32.mrb[36].mxu0  ;;  %v603_v43 = vpop.f32.mrb[36].mxu1 }
 0x12e   :  { %v500_v44 = vadd.f32 %v1066_v37, %v499_v42  ;;  %v1222_v45 = vpop.f32.mrb[37].mxu0  ;;  %v604_v46 = vadd.f32 %v1118_v39, %v603_v43  ;;  %v1274_v47 = vpop.f32.mrb[37].mxu1  ;;  %v1079_v37 = vunpack.c.h.bf16 %v1135_v28 }
 0x12f   :  { %v502_v48 = vpop.f32.mrb[38].mxu0  ;;  %v606_v50 = vpop.f32.mrb[38].mxu1 }
 0x130   :  { %v997_v52 = vpack.c.bf16 %v500_v44, %v500_v44  ;;  %v503_v53 = vadd.f32 %v1067_v40, %v502_v48  ;;  %v1223_v54 = vpop.f32.mrb[39].mxu0  ;;  %v1023_v55 = vpack.c.bf16 %v604_v46, %v604_v46  ;;  %v607_v56 = vadd.f32 %v1119_v41, %v606_v50  ;;  %v1275_v57 = vpop.f32.mrb[39].mxu1 }
 0x132   :  { %841 = vst.msk [vmem:[%s1789_s3 + $0x48] sm:$0xf] %vm822_vm2, %v997_v52  ;;  %v998_v58 = vpack.c.bf16 %v503_v53, %v503_v53  ;;  %867 = vst.msk [vmem:[%s1789_s3 + $0xb0] sm:$0xf] %vm822_vm2, %v1023_v55  ;;  %v1024_v60 = vpack.c.bf16 %v607_v56, %v607_v56 }
 0x134   :  { %842 = vst.msk [vmem:[%s1789_s3 + $0x4c] sm:$0xf] %vm822_vm2, %v998_v58  ;;  %868 = vst.msk [vmem:[%s1789_s3 + $0xb4] sm:$0xf] %vm822_vm2, %v1024_v60 }
 0x135   :  { %v507_v0 = vpop.f32.mrb[40].mxu0  ;;  %v611_v1 = vpop.f32.mrb[40].mxu1 }
 0x136   :  { %v508_v2 = vadd.f32 %v1070_v59, %v507_v0  ;;  %v1226_v3 = vpop.f32.mrb[41].mxu0  ;;  %v612_v4 = vadd.f32 %v1122_v61, %v611_v1  ;;  %v1278_v5 = vpop.f32.mrb[41].mxu1 }
 0x137   :  { %v510_v6 = vpop.f32.mrb[42].mxu0  ;;  %v614_v8 = vpop.f32.mrb[42].mxu1 }
 0x138   :  { %v999_v10 = vpack.c.bf16 %v508_v2, %v508_v2  ;;  %v511_v11 = vadd.f32 %v1071_v62, %v510_v6  ;;  %v1227_v12 = vpop.f32.mrb[43].mxu0  ;;  %v1025_v13 = vpack.c.bf16 %v612_v4, %v612_v4  ;;  %v615_v14 = vadd.f32 %v1123_v63, %v614_v8  ;;  %v1279_v15 = vpop.f32.mrb[43].mxu1 }
 0x13a   :  { %843 = vst.msk [vmem:[%s1789_s3 + $0x50] sm:$0xf] %vm822_vm2, %v999_v10  ;;  %v1000_v16 = vpack.c.bf16 %v511_v11, %v511_v11  ;;  %869 = vst.msk [vmem:[%s1789_s3 + $0xb8] sm:$0xf] %vm822_vm2, %v1025_v13  ;;  %v1026_v18 = vpack.c.bf16 %v615_v14, %v615_v14 }
 0x13c   :  { %844 = vst.msk [vmem:[%s1789_s3 + $0x54] sm:$0xf] %vm822_vm2, %v1000_v16  ;;  %870 = vst.msk [vmem:[%s1789_s3 + $0xbc] sm:$0xf] %vm822_vm2, %v1026_v18 }
 0x13d   :  { %v515_v21 = vpop.f32.mrb[44].mxu0  ;;  %v619_v22 = vpop.f32.mrb[44].mxu1 }
 0x13e   :  { %v516_v23 = vadd.f32 %v1074_v17, %v515_v21  ;;  %v1230_v24 = vpop.f32.mrb[45].mxu0  ;;  %v620_v25 = vadd.f32 %v619_v22, %v169_v19  ;;  %v1282_v26 = vpop.f32.mrb[45].mxu1 }
 0x13f   :  { %v518_v27 = vpop.f32.mrb[46].mxu0  ;;  %v622_v29 = vpop.f32.mrb[46].mxu1 }
 0x140   :  { %v1001_v30 = vpack.c.bf16 %v516_v23, %v516_v23  ;;  %v519_v31 = vadd.f32 %v1075_v20, %v518_v27  ;;  %v1231_v32 = vpop.f32.mrb[47].mxu0  ;;  %v1027_v33 = vpack.c.bf16 %v620_v25, %v620_v25  ;;  %v1283_v34 = vpop.f32.mrb[47].mxu1 }
 0x142   :  { %845 = vst.msk [vmem:[%s1789_s3 + $0x58] sm:$0xf] %vm822_vm2, %v1001_v30  ;;  %v1002_v35 = vpack.c.bf16 %v519_v31, %v519_v31  ;;  %871 = vst.msk [vmem:[%s1789_s3 + $0xc0] sm:$0xf] %vm822_vm2, %v1027_v33 }
 0x144   :  { %846 = vst.msk [vmem:[%s1789_s3 + $0x5c] sm:$0xf] %vm822_vm2, %v1002_v35 }
 0x145   :  { %v523_v38 = vpop.f32.mrb[48].mxu0 }
 0x146   :  { %v524_v39 = vadd.f32 %v1078_v36, %v523_v38  ;;  %v1234_v40 = vpop.f32.mrb[49].mxu0 }
 0x147   :  { %v526_v41 = vpop.f32.mrb[50].mxu0 }
 0x148   :  { %v1003_v42 = vpack.c.bf16 %v524_v39, %v524_v39  ;;  %v527_v43 = vadd.f32 %v1079_v37, %v526_v41  ;;  %v1235_v44 = vpop.f32.mrb[51].mxu0 }
 0x14a   :  { %847 = vst.msk [vmem:[%s1789_s3 + $0x60] sm:$0xf] %vm822_vm2, %v1003_v42  ;;  %v1004_v45 = vpack.c.bf16 %v527_v43, %v527_v43 }
 0x14c   :  { %848 = vst.msk [vmem:[%s1789_s3 + $0x64] sm:$0xf] %vm822_vm2, %v1004_v45 }

// kernel: c2f_irmb_forward.13
= control target key start
LH: loop header
LB: loop body
LE: loop exit
PB: predicated region body
PF: predicated region fallthrough
CT: control target
= control target key end

     0   :  { %v2290_v0 = vmov 0.0   ;;  %vm2291_vm0 = vmmov 0   ;;  %vm293_vm1 = vcmask 523264   ;;  %s3107_s3 = inlined_call_operand.vmem [shape: bf16[64,128], index: 3, kind: input, shape index: {}]   ;;  %s3108_s2 = inlined_call_operand.vmem [shape: bf16[128,128], index: 2, kind: input, shape index: {}]   ;;  %s3109_s1 = inlined_call_operand.vmem [shape: bf16[392,64], index: 1, kind: input, shape index: {}]   ;;  %s3110_s0 = inlined_call_operand.vmem [shape: bf16[392,128], index: 0, kind: input, shape index: {}]   ;;  %s3111_s4 = inlined_call_operand.vmem [shape: f32[1,128], index: 4, kind: input, shape index: {}]   ;;  %s3112_s5 = inlined_call_operand.vmem [shape: f32[1,128], index: 5, kind: input, shape index: {}]   ;;  %s3113_s6 = inlined_call_operand.vmem [shape: f32[392,128], index: 6, kind: output, shape index: {}]  }
   0x1   :  { %1737 = vmatprep.subr.bf16.mxu0 %v2290_v0  ;;  %1961 = vmatprep.subr.bf16.mxu1 %v2290_v0  ;;  %v2030_v1 = vld [vmem:[%s3107_s3] sm:$0xff]   ;;  %v2032_v3 = vld [vmem:[%s3107_s3 + $0x8] sm:$0xff]   ;;  %v2034_v5 = vld [vmem:[%s3107_s3 + $0x10] sm:$0xff]  }
   0x2   :  { %v2031_v2 = vld [vmem:[%s3108_s2] sm:$0xff]   ;;  %1745 = vmatprep.mubr.msk.bf16.mxu0 %vm2291_vm0, %v2290_v0  ;;  %1865 = vmatprep.mubr.msk.bf16.mxu1 %vm2291_vm0, %v2290_v0  ;;  %v2033_v4 = vld [vmem:[%s3108_s2 + $0x8] sm:$0xff]   ;;  %v2035_v6 = vld [vmem:[%s3108_s2 + $0x10] sm:$0xff]  }
   0x3   :  { %1738 = vmatpush3.bf16.msra.mxu0 %v2030_v1  ;;  %1969 = vmatpush3.bf16.msra.mxu1 %v2031_v2  ;;  %v2036_v7 = vld [vmem:[%s3107_s3 + $0x18] sm:$0xff]   ;;  %v2038_v9 = vld [vmem:[%s3109_s1] sm:$0xff]   ;;  %v2040_v11 = vld [vmem:[%s3108_s2 + $0x28] sm:$0xff]  }
   0x4   :  { %1739 = vmatprep.subr.bf16.mxu0 %v2290_v0  ;;  %1962 = vmatprep.subr.bf16.mxu1 %v2290_v0  ;;  %v2037_v8 = vld [vmem:[%s3108_s2 + $0x18] sm:$0xff]   ;;  %v2039_v10 = vld [vmem:[%s3108_s2 + $0x20] sm:$0xff]   ;;  %v2041_v12 = vld [vmem:[%s3109_s1 + $0x8] sm:$0xff]  }
   0x5   :  { %v2042_v13 = vld [vmem:[%s3108_s2 + $0x30] sm:$0xff]   ;;  %v2043_v14 = vld [vmem:[%s3108_s2 + $0x38] sm:$0xff]   ;;  %v2045_v16 = vld [vmem:[%s3110_s0 + $0x8] sm:$0xff]  }
   0x6   :  { %v2044_v15 = vld [vmem:[%s3109_s1 + $0x10] sm:$0xff]   ;;  %v2046_v17 = vld [vmem:[%s3109_s1 + $0x18] sm:$0xff]   ;;  %v2048_v19 = vld [vmem:[%s3109_s1 + $0x20] sm:$0xff]  }
   0x7   :  { %1740 = vmatpush3.bf16.msra.mxu0 %v2032_v3  ;;  %1970 = vmatpush3.bf16.msra.mxu1 %v2033_v4  ;;  %v2047_v18 = vld [vmem:[%s3110_s0 + $0x10] sm:$0xff]   ;;  %v2049_v20 = vld [vmem:[%s3110_s0 + $0x18] sm:$0xff]   ;;  %v2050_v21 = vld [vmem:[%s3109_s1 + $0x28] sm:$0xff]  }
   0x8   :  { %1741 = vmatprep.subr.bf16.mxu0 %v2290_v0  ;;  %1963 = vmatprep.subr.bf16.mxu1 %v2290_v0  ;;  %v2051_v22 = vld [vmem:[%s3110_s0 + $0x20] sm:$0xff]   ;;  %v2052_v23 = vld [vmem:[%s3109_s1 + $0x30] sm:$0xff]   ;;  %v2053_v24 = vld [vmem:[%s3110_s0 + $0x28] sm:$0xff]  }
   0x9   :  { %v2054_v25 = vld [vmem:[%s3109_s1 + $0x38] sm:$0xff]   ;;  %v2055_v26 = vld [vmem:[%s3110_s0 + $0x30] sm:$0xff]   ;;  %v2056_v27 = vld [vmem:[%s3109_s1 + $0x40] sm:$0xff]  }
   0xa   :  { %v2057_v28 = vld [vmem:[%s3110_s0 + $0x38] sm:$0xff]   ;;  %v2058_v29 = vld [vmem:[%s3109_s1 + $0x48] sm:$0xff]   ;;  %v2059_v30 = vld [vmem:[%s3110_s0 + $0x40] sm:$0xff]  }
   0xb   :  { %1742 = vmatpush3.bf16.msra.mxu0 %v2034_v5  ;;  %1971 = vmatpush3.bf16.msra.mxu1 %v2035_v6  ;;  %v2060_v31 = vld [vmem:[%s3109_s1 + $0x50] sm:$0xff]   ;;  %v2061_v32 = vld [vmem:[%s3110_s0 + $0x48] sm:$0xff]   ;;  %v2062_v33 = vld [vmem:[%s3109_s1 + $0x58] sm:$0xff]  }
   0xc   :  { %1743 = vmatprep.subr.bf16.mxu0 %v2290_v0  ;;  %1964 = vmatprep.subr.bf16.mxu1 %v2290_v0  ;;  %v2063_v34 = vld [vmem:[%s3110_s0 + $0x50] sm:$0xff]   ;;  %v2064_v35 = vld [vmem:[%s3109_s1 + $0x60] sm:$0xff]   ;;  %v2065_v36 = vld [vmem:[%s3110_s0 + $0x58] sm:$0xff]  }
   0xd   :  { %v2066_v37 = vld [vmem:[%s3109_s1 + $0x68] sm:$0xff]   ;;  %v2067_v38 = vld [vmem:[%s3110_s0 + $0x60] sm:$0xff]   ;;  %v2068_v39 = vld [vmem:[%s3109_s1 + $0x70] sm:$0xff]  }
   0xe   :  { %v2069_v40 = vld [vmem:[%s3110_s0 + $0x68] sm:$0xff]   ;;  %v2070_v41 = vld [vmem:[%s3109_s1 + $0x78] sm:$0xff]   ;;  %v2071_v42 = vld [vmem:[%s3110_s0 + $0x70] sm:$0xff]  }
   0xf   :  { %1744 = vmatpush3.bf16.msra.mxu0 %v2036_v7  ;;  %1972 = vmatpush3.bf16.msra.mxu1 %v2037_v8  ;;  %v2072_v43 = vld [vmem:[%s3109_s1 + $0x80] sm:$0xff]   ;;  %v2073_v44 = vld [vmem:[%s3110_s0 + $0x78] sm:$0xff]   ;;  %v2074_v45 = vld [vmem:[%s3109_s1 + $0x88] sm:$0xff]  }
  0x10   :  { %1845 = vmatprep.subr.bf16.mxu0 %v2290_v0  ;;  %1965 = vmatprep.subr.bf16.mxu1 %v2290_v0  ;;  %v2075_v46 = vld [vmem:[%s3110_s0 + $0x80] sm:$0xff]   ;;  %v2076_v47 = vld [vmem:[%s3109_s1 + $0x90] sm:$0xff]   ;;  %v2077_v48 = vld [vmem:[%s3110_s0 + $0x88] sm:$0xff]  }
  0x11   :  { %v2078_v49 = vld [vmem:[%s3109_s1 + $0x98] sm:$0xff]   ;;  %v2079_v50 = vld [vmem:[%s3110_s0 + $0x90] sm:$0xff]   ;;  %v2080_v51 = vld [vmem:[%s3109_s1 + $0xa0] sm:$0xff]  }
  0x12   :  { %1746 = vmatmul.mubr.msk.bf16.vlgmr.msra.gmra.mrb[0].mxu0 %vm293_vm1, %v2038_v9  ;;  %v2081_v52 = vld [vmem:[%s3110_s0 + $0x98] sm:$0xff]   ;;  %v2082_v53 = vld [vmem:[%s3109_s1 + $0xa8] sm:$0xff]   ;;  %v2083_v54 = vld [vmem:[%s3110_s0 + $0xa0] sm:$0xff]  }
  0x13   :  { %1846 = vmatpush3.bf16.msra.mxu0 %v2031_v2  ;;  %1749 = vmatprep.mubr.msk.bf16.mxu0 %vm2291_vm0, %v2290_v0  ;;  %v2084_v55 = vld [vmem:[%s3109_s1 + $0xb0] sm:$0xff]   ;;  %v2085_v56 = vld [vmem:[%s3110_s0 + $0xa8] sm:$0xff]   ;;  %v2086_v57 = vld [vmem:[%s3109_s1 + $0xb8] sm:$0xff]  }
  0x14   :  { %1973 = vmatpush3.bf16.msra.mxu1 %v2039_v10  ;;  %1847 = vmatprep.subr.bf16.mxu0 %v2290_v0  ;;  %v2087_v58 = vld [vmem:[%s3110_s0 + $0xb0] sm:$0xff]   ;;  %v2088_v59 = vld [vmem:[%s3109_s1 + $0xc0] ss:$0 sps:$4 sm:$0xff]   ;;  %v2089_v60 = vld [vmem:[%s3110_s0 + $0xb8] sm:$0xff]  }
  0x15   :  { %1966 = vmatprep.subr.bf16.mxu1 %v2290_v0  ;;  %v2090_v61 = vld [vmem:[%s3110_s0] sm:$0xff]  }
  0x16   :  { %v2091_v62 = vld [vmem:[%s3110_s0 + $0xc0] ss:$0 sps:$4 sm:$0xff]  }
  0x17   :  { %1848 = vmatpush3.bf16.msra.mxu0 %v2033_v4 }
  0x18   :  { %1974 = vmatpush3.bf16.msra.mxu1 %v2040_v11  ;;  %1849 = vmatprep.subr.bf16.mxu0 %v2290_v0 }
  0x19   :  { %1967 = vmatprep.subr.bf16.mxu1 %v2290_v0 }
  0x1a   :  { %1750 = vmatmul.mubr.msk.bf16.gmra.mrb[4].mxu0 %vm293_vm1, %v2041_v12 }
  0x1b   :  { %1753 = vmatprep.mubr.msk.bf16.mxu0 %vm2291_vm0, %v2290_v0  ;;  %1850 = vmatpush3.bf16.msra.mxu0 %v2035_v6 }
  0x1c   :  { %1975 = vmatpush3.bf16.msra.mxu1 %v2042_v13  ;;  %1851 = vmatprep.subr.bf16.mxu0 %v2290_v0 }
  0x1d   :  { %1968 = vmatprep.subr.bf16.mxu1 %v2290_v0 }
  0x1f   :  { %1852 = vmatpush3.bf16.msra.mxu0 %v2037_v8 }
  0x20   :  { %1976 = vmatpush3.bf16.msra.mxu1 %v2043_v14  ;;  %1853 = vmatprep.subr.bf16.mxu0 %v2290_v0 }
  0x22   :  { %1754 = vmatmul.mubr.msk.bf16.gmra.mrb[8].mxu0 %vm293_vm1, %v2044_v15 }
  0x23   :  { %1866 = vmatmul.mubr.bf16.vlgmr.msra.gmra.mrb[0].mxu1 %v2045_v16  ;;  %1757 = vmatprep.mubr.msk.bf16.mxu0 %vm2291_vm0, %v2290_v0 }
  0x24   :  { %1869 = vmatprep.mubr.msk.bf16.mxu1 %vm2291_vm0, %v2290_v0  ;;  %1854 = vmatpush3.bf16.msra.mxu0 %v2039_v10  ;;  %v2666_v10 = vld [vmem:[%s3112_s5] ss:$0 sm:$0xff] }
  0x25   :  { %1855 = vmatprep.subr.bf16.mxu0 %v2290_v0 }
  0x28   :  { %1856 = vmatpush3.bf16.msra.mxu0 %v2040_v11 }
  0x29   :  { %1857 = vmatprep.subr.bf16.mxu0 %v2290_v0 }
  0x2a   :  { %1758 = vmatmul.mubr.msk.bf16.gmra.mrb[12].mxu0 %vm293_vm1, %v2046_v17 }
  0x2b   :  { %1870 = vmatmul.mubr.bf16.gmra.mrb[4].mxu1 %v2047_v18  ;;  %1761 = vmatprep.mubr.msk.bf16.mxu0 %vm2291_vm0, %v2290_v0 }
  0x2c   :  { %1873 = vmatprep.mubr.msk.bf16.mxu1 %vm2291_vm0, %v2290_v0  ;;  %1858 = vmatpush3.bf16.msra.mxu0 %v2042_v13 }
  0x2d   :  { %1859 = vmatprep.subr.bf16.mxu0 %v2290_v0 }
  0x30   :  { %1860 = vmatpush3.bf16.msra.mxu0 %v2043_v14 }
  0x32   :  { %1762 = vmatmul.mubr.msk.bf16.gmra.mrb[16].mxu0 %vm293_vm1, %v2048_v19 }
  0x33   :  { %1874 = vmatmul.mubr.bf16.gmra.mrb[8].mxu1 %v2049_v20  ;;  %1765 = vmatprep.mubr.msk.bf16.mxu0 %vm2291_vm0, %v2290_v0 }
  0x34   :  { %1877 = vmatprep.mubr.msk.bf16.mxu1 %vm2291_vm0, %v2290_v0 }
  0x3a   :  { %1766 = vmatmul.mubr.msk.bf16.gmra.mrb[20].mxu0 %vm293_vm1, %v2050_v21 }
  0x3b   :  { %1878 = vmatmul.mubr.bf16.gmra.mrb[12].mxu1 %v2051_v22  ;;  %1769 = vmatprep.mubr.msk.bf16.mxu0 %vm2291_vm0, %v2290_v0 }
  0x3c   :  { %1881 = vmatprep.mubr.msk.bf16.mxu1 %vm2291_vm0, %v2290_v0 }
  0x42   :  { %1770 = vmatmul.mubr.msk.bf16.gmra.mrb[24].mxu0 %vm293_vm1, %v2052_v23 }
  0x43   :  { %1882 = vmatmul.mubr.bf16.gmra.mrb[16].mxu1 %v2053_v24  ;;  %1773 = vmatprep.mubr.msk.bf16.mxu0 %vm2291_vm0, %v2290_v0 }
  0x44   :  { %1885 = vmatprep.mubr.msk.bf16.mxu1 %vm2291_vm0, %v2290_v0 }
  0x4a   :  { %1774 = vmatmul.mubr.msk.bf16.gmra.mrb[28].mxu0 %vm293_vm1, %v2054_v25 }
  0x4b   :  { %1886 = vmatmul.mubr.bf16.gmra.mrb[20].mxu1 %v2055_v26  ;;  %1777 = vmatprep.mubr.msk.bf16.mxu0 %vm2291_vm0, %v2290_v0 }
  0x4c   :  { %1889 = vmatprep.mubr.msk.bf16.mxu1 %vm2291_vm0, %v2290_v0 }
  0x52   :  { %1778 = vmatmul.mubr.msk.bf16.gmra.mrb[32].mxu0 %vm293_vm1, %v2056_v27 }
  0x53   :  { %1890 = vmatmul.mubr.bf16.gmra.mrb[24].mxu1 %v2057_v28  ;;  %1781 = vmatprep.mubr.msk.bf16.mxu0 %vm2291_vm0, %v2290_v0 }
  0x54   :  { %1893 = vmatprep.mubr.msk.bf16.mxu1 %vm2291_vm0, %v2290_v0 }
  0x5a   :  { %1782 = vmatmul.mubr.msk.bf16.gmra.mrb[36].mxu0 %vm293_vm1, %v2058_v29 }
  0x5b   :  { %1894 = vmatmul.mubr.bf16.gmra.mrb[28].mxu1 %v2059_v30  ;;  %1785 = vmatprep.mubr.msk.bf16.mxu0 %vm2291_vm0, %v2290_v0 }
  0x5c   :  { %1897 = vmatprep.mubr.msk.bf16.mxu1 %vm2291_vm0, %v2290_v0 }
  0x62   :  { %1786 = vmatmul.mubr.msk.bf16.gmra.mrb[40].mxu0 %vm293_vm1, %v2060_v31 }
  0x63   :  { %1898 = vmatmul.mubr.bf16.gmra.mrb[32].mxu1 %v2061_v32  ;;  %1789 = vmatprep.mubr.msk.bf16.mxu0 %vm2291_vm0, %v2290_v0 }
  0x64   :  { %1901 = vmatprep.mubr.msk.bf16.mxu1 %vm2291_vm0, %v2290_v0 }
  0x6a   :  { %1790 = vmatmul.mubr.msk.bf16.gmra.mrb[44].mxu0 %vm293_vm1, %v2062_v33 }
  0x6b   :  { %1902 = vmatmul.mubr.bf16.gmra.mrb[36].mxu1 %v2063_v34  ;;  %1793 = vmatprep.mubr.msk.bf16.mxu0 %vm2291_vm0, %v2290_v0 }
  0x6c   :  { %1905 = vmatprep.mubr.msk.bf16.mxu1 %vm2291_vm0, %v2290_v0 }
  0x72   :  { %1794 = vmatmul.mubr.msk.bf16.gmra.mrb[48].mxu0 %vm293_vm1, %v2064_v35 }
  0x73   :  { %1906 = vmatmul.mubr.bf16.gmra.mrb[40].mxu1 %v2065_v36  ;;  %1797 = vmatprep.mubr.msk.bf16.mxu0 %vm2291_vm0, %v2290_v0 }
  0x74   :  { %1909 = vmatprep.mubr.msk.bf16.mxu1 %vm2291_vm0, %v2290_v0 }
  0x7a   :  { %1798 = vmatmul.mubr.msk.bf16.gmra.mrb[52].mxu0 %vm293_vm1, %v2066_v37 }
  0x7b   :  { %1910 = vmatmul.mubr.bf16.gmra.mrb[44].mxu1 %v2067_v38  ;;  %1801 = vmatprep.mubr.msk.bf16.mxu0 %vm2291_vm0, %v2290_v0 }
  0x7c   :  { %1913 = vmatprep.mubr.msk.bf16.mxu1 %vm2291_vm0, %v2290_v0 }
  0x82   :  { %1802 = vmatmul.mubr.msk.bf16.gmra.mrb[56].mxu0 %vm293_vm1, %v2068_v39 }
  0x83   :  { %1914 = vmatmul.mubr.bf16.gmra.mrb[48].mxu1 %v2069_v40  ;;  %1805 = vmatprep.mubr.msk.bf16.mxu0 %vm2291_vm0, %v2290_v0 }
  0x84   :  { %1917 = vmatprep.mubr.msk.bf16.mxu1 %vm2291_vm0, %v2290_v0 }
  0x8a   :  { %1806 = vmatmul.mubr.msk.bf16.gmra.mrb[60].mxu0 %vm293_vm1, %v2070_v41 }
  0x8b   :  { %1918 = vmatmul.mubr.bf16.gmra.mrb[52].mxu1 %v2071_v42  ;;  %1809 = vmatprep.mubr.msk.bf16.mxu0 %vm2291_vm0, %v2290_v0 }
  0x8c   :  { %1921 = vmatprep.mubr.msk.bf16.mxu1 %vm2291_vm0, %v2290_v0 }
  0x92   :  { %1810 = vmatmul.mubr.msk.bf16.gmra.mrb[64].mxu0 %vm293_vm1, %v2072_v43 }
  0x93   :  { %1922 = vmatmul.mubr.bf16.gmra.mrb[56].mxu1 %v2073_v44  ;;  %1813 = vmatprep.mubr.msk.bf16.mxu0 %vm2291_vm0, %v2290_v0 }
  0x94   :  { %1925 = vmatprep.mubr.msk.bf16.mxu1 %vm2291_vm0, %v2290_v0 }
  0x9a   :  { %1814 = vmatmul.mubr.msk.bf16.gmra.mrb[68].mxu0 %vm293_vm1, %v2074_v45 }
  0x9b   :  { %1926 = vmatmul.mubr.bf16.gmra.mrb[60].mxu1 %v2075_v46  ;;  %1817 = vmatprep.mubr.msk.bf16.mxu0 %vm2291_vm0, %v2290_v0 }
  0x9c   :  { %1929 = vmatprep.mubr.msk.bf16.mxu1 %vm2291_vm0, %v2290_v0 }
  0xa2   :  { %1818 = vmatmul.mubr.msk.bf16.gmra.mrb[72].mxu0 %vm293_vm1, %v2076_v47 }
  0xa3   :  { %1930 = vmatmul.mubr.bf16.gmra.mrb[64].mxu1 %v2077_v48  ;;  %1821 = vmatprep.mubr.msk.bf16.mxu0 %vm2291_vm0, %v2290_v0 }
  0xa4   :  { %1933 = vmatprep.mubr.msk.bf16.mxu1 %vm2291_vm0, %v2290_v0 }
  0xaa   :  { %1822 = vmatmul.mubr.msk.bf16.gmra.mrb[76].mxu0 %vm293_vm1, %v2078_v49 }
  0xab   :  { %1934 = vmatmul.mubr.bf16.gmra.mrb[68].mxu1 %v2079_v50  ;;  %1825 = vmatprep.mubr.msk.bf16.mxu0 %vm2291_vm0, %v2290_v0 }
  0xac   :  { %1937 = vmatprep.mubr.msk.bf16.mxu1 %vm2291_vm0, %v2290_v0 }
  0xb2   :  { %1826 = vmatmul.mubr.msk.bf16.gmra.mrb[80].mxu0 %vm293_vm1, %v2080_v51 }
  0xb3   :  { %1938 = vmatmul.mubr.bf16.gmra.mrb[72].mxu1 %v2081_v52  ;;  %1829 = vmatprep.mubr.msk.bf16.mxu0 %vm2291_vm0, %v2290_v0 }
  0xb4   :  { %1941 = vmatprep.mubr.msk.bf16.mxu1 %vm2291_vm0, %v2290_v0 }
  0xba   :  { %1830 = vmatmul.mubr.msk.bf16.gmra.mrb[84].mxu0 %vm293_vm1, %v2082_v53 }
  0xbb   :  { %1942 = vmatmul.mubr.bf16.gmra.mrb[76].mxu1 %v2083_v54  ;;  %1833 = vmatprep.mubr.msk.bf16.mxu0 %vm2291_vm0, %v2290_v0 }
  0xbc   :  { %1945 = vmatprep.mubr.msk.bf16.mxu1 %vm2291_vm0, %v2290_v0 }
  0xc2   :  { %1834 = vmatmul.mubr.msk.bf16.gmra.mrb[88].mxu0 %vm293_vm1, %v2084_v55 }
  0xc3   :  { %1946 = vmatmul.mubr.bf16.gmra.mrb[80].mxu1 %v2085_v56  ;;  %1837 = vmatprep.mubr.msk.bf16.mxu0 %vm2291_vm0, %v2290_v0 }
  0xc4   :  { %1949 = vmatprep.mubr.msk.bf16.mxu1 %vm2291_vm0, %v2290_v0 }
  0xca   :  { %1838 = vmatmul.mubr.msk.bf16.gmra.mrb[92].mxu0 %vm293_vm1, %v2086_v57 }
  0xcb   :  { %1950 = vmatmul.mubr.bf16.gmra.mrb[84].mxu1 %v2087_v58  ;;  %1841 = vmatprep.mubr.msk.bf16.mxu0 %vm2291_vm0, %v2290_v0 }
  0xcc   :  { %1953 = vmatprep.mubr.msk.bf16.mxu1 %vm2291_vm0, %v2290_v0 }
  0xd2   :  { %1842 = vmatmul.mubr.msk.bf16.gmra.mrb[96].mxu0 %vm293_vm1, %v2088_v59 }
  0xd3   :  { %1954 = vmatmul.mubr.bf16.gmra.mrb[88].mxu1 %v2089_v60  ;;  %1861 = vmatprep.mubr.msk.bf16.mxu0 %vm2291_vm0, %v2290_v0 }
  0xd4   :  { %1957 = vmatprep.mubr.msk.bf16.mxu1 %vm2291_vm0, %v2290_v0  ;;  %v2661_v0 = vld [vmem:[%s3111_s4] ss:$0 sm:$0xff] }
  0xda   :  { %1862 = vmatmul.mubr.bf16.vlgmr.msra.gmra.mrb[0].mxu0 %v2090_v61 }
  0xdb   :  { %1958 = vmatmul.mubr.bf16.gmra.mrb[92].mxu1 %v2091_v62 }
  0xed   :  { %v411_v63 = vpop.f32.mrb[4].mxu0 }
  0xee   :  { %v1751_v1 = vpop.f32.mrb[5].mxu0 }
  0xef   :  { %v414_v2 = vpop.f32.mrb[6].mxu0 }
  0xf0   :  { %v1752_v3 = vpop.f32.mrb[7].mxu0 }
  0xf5   :  { %v419_v4 = vpop.f32.mrb[8].mxu0 }
  0xf6   :  { %v839_v5 = vpop.f32.mrb[0].mxu1  ;;  %v1755_v6 = vpop.f32.mrb[9].mxu0 }
  0xf7   :  { %v840_v7 = vadd.f32 %v839_v5, %v411_v63  ;;  %v1867_v8 = vpop.f32.mrb[1].mxu1  ;;  %v422_v9 = vpop.f32.mrb[10].mxu0 }
  0xf8   :  { %v842_v11 = vpop.f32.mrb[2].mxu1  ;;  %v1756_v12 = vpop.f32.mrb[11].mxu0 }
  0xf9   :  { %v1038_v13 = vmul.f32 %v2661_v0, %v840_v7  ;;  %v843_v14 = vadd.f32 %v842_v11, %v414_v2  ;;  %v1868_v15 = vpop.f32.mrb[3].mxu1 }
  0xfb   :  { %v2670_v16 = vadd.f32 %v2666_v10, %v1038_v13  ;;  %v1039_v17 = vmul.f32 %v2661_v0, %v843_v14 }
  0xfd   :  { %v1628_v18 = vmul.f32 -1.442695, %v2670_v16  ;;  %v2675_v19 = vadd.f32 %v2666_v10, %v1039_v17  ;;  %v427_v20 = vpop.f32.mrb[12].mxu0 }
  0xfe   :  { %v847_v21 = vpop.f32.mrb[4].mxu1  ;;  %v1759_v22 = vpop.f32.mrb[13].mxu0 }
  0xff   :  { %2092 = vpow2.f32 %v1628_v18  ;;  %v1629_v23 = vmul.f32 -1.442695, %v2675_v19  ;;  %v848_v24 = vadd.f32 %v847_v21, %v419_v4  ;;  %v1871_v25 = vpop.f32.mrb[5].mxu1  ;;  %v430_v26 = vpop.f32.mrb[14].mxu0 }
 0x100   :  { %v850_v27 = vpop.f32.mrb[6].mxu1  ;;  %v1760_v28 = vpop.f32.mrb[15].mxu0 }
 0x101   :  { %2094 = vpow2.f32 %v1629_v23  ;;  %v1040_v29 = vmul.f32 %v2661_v0, %v848_v24  ;;  %v851_v30 = vadd.f32 %v850_v27, %v422_v9  ;;  %v1872_v31 = vpop.f32.mrb[7].mxu1 }
 0x103   :  { %v2680_v32 = vadd.f32 %v2666_v10, %v1040_v29  ;;  %v1041_v33 = vmul.f32 %v2661_v0, %v851_v30 }
 0x105   :  { %v1630_v34 = vmul.f32 -1.442695, %v2680_v32  ;;  %v2685_v35 = vadd.f32 %v2666_v10, %v1041_v33  ;;  %v435_v36 = vpop.f32.mrb[16].mxu0 }
 0x106   :  { %v855_v37 = vpop.f32.mrb[8].mxu1  ;;  %v1763_v38 = vpop.f32.mrb[17].mxu0 }
 0x107   :  { %2096 = vpow2.f32 %v1630_v34  ;;  %v1631_v39 = vmul.f32 -1.442695, %v2685_v35  ;;  %v856_v40 = vadd.f32 %v855_v37, %v427_v20  ;;  %v1875_v41 = vpop.f32.mrb[9].mxu1  ;;  %v438_v42 = vpop.f32.mrb[18].mxu0 }
 0x108   :  { %v858_v43 = vpop.f32.mrb[10].mxu1  ;;  %v1764_v44 = vpop.f32.mrb[19].mxu0 }
 0x109   :  { %v2093_v45 = vpop.eup %2092  ;;  %2098 = vpow2.f32 %v1631_v39  ;;  %v1042_v46 = vmul.f32 %v2661_v0, %v856_v40  ;;  %v859_v47 = vadd.f32 %v858_v43, %v430_v26  ;;  %v1876_v48 = vpop.f32.mrb[11].mxu1 }
 0x10a   :  { %v1290_v49 = vadd.f32 1.0, %v2093_v45 }
 0x10b   :  { %v2095_v50 = vpop.eup %2094  ;;  %v2690_v51 = vadd.f32 %v2666_v10, %v1042_v46  ;;  %v1043_v52 = vmul.f32 %v2661_v0, %v859_v47 }
 0x10c   :  { %2100 = vrcp.f32 %v1290_v49  ;;  %v1291_v53 = vadd.f32 1.0, %v2095_v50 }
 0x10d   :  { %v1632_v54 = vmul.f32 -1.442695, %v2690_v51  ;;  %v2695_v55 = vadd.f32 %v2666_v10, %v1043_v52  ;;  %v443_v56 = vpop.f32.mrb[20].mxu0 }
 0x10e   :  { %2102 = vrcp.f32 %v1291_v53  ;;  %v863_v57 = vpop.f32.mrb[12].mxu1  ;;  %v1767_v58 = vpop.f32.mrb[21].mxu0 }
 0x10f   :  { %2104 = vpow2.f32 %v1632_v54  ;;  %v1633_v59 = vmul.f32 -1.442695, %v2695_v55  ;;  %v864_v60 = vadd.f32 %v863_v57, %v435_v36  ;;  %v1879_v61 = vpop.f32.mrb[13].mxu1  ;;  %v446_v62 = vpop.f32.mrb[22].mxu0 }
 0x110   :  { %v866_v63 = vpop.f32.mrb[14].mxu1  ;;  %v1768_v1 = vpop.f32.mrb[23].mxu0 }
 0x111   :  { %v2097_v2 = vpop.eup %2096  ;;  %2106 = vpow2.f32 %v1633_v59  ;;  %v1044_v3 = vmul.f32 %v2661_v0, %v864_v60  ;;  %v867_v4 = vadd.f32 %v866_v63, %v438_v42  ;;  %v1880_v5 = vpop.f32.mrb[15].mxu1 }
 0x112   :  { %v1292_v6 = vadd.f32 1.0, %v2097_v2 }
 0x113   :  { %v2099_v7 = vpop.eup %2098  ;;  %v2700_v8 = vadd.f32 %v2666_v10, %v1044_v3  ;;  %v1045_v9 = vmul.f32 %v2661_v0, %v867_v4 }
 0x114   :  { %2108 = vrcp.f32 %v1292_v6  ;;  %v1293_v11 = vadd.f32 1.0, %v2099_v7 }
 0x115   :  { %v1634_v12 = vmul.f32 -1.442695, %v2700_v8  ;;  %v2705_v13 = vadd.f32 %v2666_v10, %v1045_v9  ;;  %v451_v14 = vpop.f32.mrb[24].mxu0 }
 0x116   :  { %v2101_v15 = vpop.eup %2100  ;;  %2110 = vrcp.f32 %v1293_v11  ;;  %v871_v17 = vpop.f32.mrb[16].mxu1 }
 0x117   :  { %v1771_v18 = vpop.f32.mrb[25].mxu0  ;;  %v1437_v20 = vmul.f32 %v2101_v15, %v2670_v16  ;;  %2112 = vpow2.f32 %v1634_v12  ;;  %v1635_v21 = vmul.f32 -1.442695, %v2705_v13  ;;  %v872_v22 = vadd.f32 %v871_v17, %v443_v56  ;;  %v1883_v23 = vpop.f32.mrb[17].mxu1 }
 0x118   :  { %v454_v24 = vpop.f32.mrb[26].mxu0  ;;  %v2103_v25 = vpop.eup %2102 }
 0x119   :  { %v874_v26 = vpop.f32.mrb[18].mxu1  ;;  %v1772_v27 = vpop.f32.mrb[27].mxu0  ;;  %1486 = vst [vmem:[%s3113_s6 + $0x10] sm:$0xff] %v1437_v20  ;;  %v1438_v29 = vmul.f32 %v2103_v25, %v2675_v19  ;;  %2114 = vpow2.f32 %v1635_v21  ;;  %v1046_v30 = vmul.f32 %v2661_v0, %v872_v22 }
 0x11a   :  { %v2105_v28 = vpop.eup %2104  ;;  %v875_v16 = vadd.f32 %v874_v26, %v446_v62  ;;  %v1884_v31 = vpop.f32.mrb[19].mxu1 }
 0x11b   :  { %v1294_v33 = vadd.f32 1.0, %v2105_v28  ;;  %v2107_v34 = vpop.eup %2106  ;;  %1487 = vst [vmem:[%s3113_s6 + $0x18] sm:$0xff] %v1438_v29  ;;  %v2718_v36 = vadd.f32 %v2666_v10, %v1046_v30 }
 0x11c   :  { %v1047_v37 = vmul.f32 %v2661_v0, %v875_v16  ;;  %v1295_v38 = vadd.f32 1.0, %v2107_v34 }
 0x11d   :  { %2116 = vrcp.f32 %v1294_v33  ;;  %v1636_v19 = vmul.f32 -1.442695, %v2718_v36  ;;  %v459_v40 = vpop.f32.mrb[28].mxu0 }
 0x11e   :  { %v2723_v39 = vadd.f32 %v2666_v10, %v1047_v37  ;;  %v2109_v41 = vpop.eup %2108  ;;  %2118 = vrcp.f32 %v1295_v38  ;;  %v879_v42 = vpop.f32.mrb[20].mxu1 }
 0x11f   :  { %v1775_v43 = vpop.f32.mrb[29].mxu0  ;;  %v1439_v44 = vmul.f32 %v2109_v41, %v2680_v32  ;;  %2120 = vpow2.f32 %v1636_v19  ;;  %v880_v46 = vadd.f32 %v879_v42, %v451_v14  ;;  %v1887_v47 = vpop.f32.mrb[21].mxu1 }
 0x120   :  { %v1637_v45 = vmul.f32 -1.442695, %v2723_v39  ;;  %v462_v48 = vpop.f32.mrb[30].mxu0  ;;  %v2111_v49 = vpop.eup %2110 }
 0x121   :  { %v882_v50 = vpop.f32.mrb[22].mxu1  ;;  %v1776_v52 = vpop.f32.mrb[31].mxu0  ;;  %1488 = vst [vmem:[%s3113_s6 + $0x20] sm:$0xff] %v1439_v44  ;;  %v1440_v54 = vmul.f32 %v2111_v49, %v2685_v35  ;;  %v1048_v56 = vmul.f32 %v2661_v0, %v880_v46 }
 0x122   :  { %v2113_v53 = vpop.eup %2112  ;;  %2122 = vpow2.f32 %v1637_v45  ;;  %v883_v32 = vadd.f32 %v882_v50, %v454_v24  ;;  %v1888_v57 = vpop.f32.mrb[23].mxu1 }
 0x123   :  { %v1296_v58 = vadd.f32 1.0, %v2113_v53  ;;  %v2115_v59 = vpop.eup %2114  ;;  %1489 = vst [vmem:[%s3113_s6 + $0x28] sm:$0xff] %v1440_v54  ;;  %v2736_v60 = vadd.f32 %v2666_v10, %v1048_v56 }
 0x124   :  { %v1049_v61 = vmul.f32 %v2661_v0, %v883_v32  ;;  %v1297_v62 = vadd.f32 1.0, %v2115_v59 }
 0x125   :  { %2124 = vrcp.f32 %v1296_v58  ;;  %v1638_v35 = vmul.f32 -1.442695, %v2736_v60  ;;  %v467_v1 = vpop.f32.mrb[32].mxu0 }
 0x126   :  { %v2741_v63 = vadd.f32 %v2666_v10, %v1049_v61  ;;  %2126 = vrcp.f32 %v1297_v62  ;;  %v887_v3 = vpop.f32.mrb[24].mxu1  ;;  %v1779_v4 = vpop.f32.mrb[33].mxu0 }
 0x127   :  { %v2117_v2 = vpop.eup %2116  ;;  %2128 = vpow2.f32 %v1638_v35  ;;  %v888_v7 = vadd.f32 %v887_v3, %v459_v40  ;;  %v1891_v9 = vpop.f32.mrb[25].mxu1 }
 0x128   :  { %v1441_v5 = vmul.f32 %v2117_v2, %v2690_v51  ;;  %v1639_v6 = vmul.f32 -1.442695, %v2741_v63  ;;  %v470_v11 = vpop.f32.mrb[34].mxu0  ;;  %v2119_v12 = vpop.eup %2118 }
 0x129   :  { %v890_v14 = vpop.f32.mrb[26].mxu1  ;;  %v1780_v15 = vpop.f32.mrb[35].mxu0  ;;  %v1442_v18 = vmul.f32 %v2119_v12, %v2695_v55  ;;  %v1050_v20 = vmul.f32 %v2661_v0, %v888_v7 }
 0x12a   :  { %v2121_v17 = vpop.eup %2120  ;;  %1490 = vst [vmem:[%s3113_s6 + $0x30] sm:$0xff] %v1441_v5  ;;  %2130 = vpow2.f32 %v1639_v6  ;;  %v891_v51 = vadd.f32 %v890_v14, %v462_v48  ;;  %v1892_v21 = vpop.f32.mrb[27].mxu1 }
 0x12b   :  { %v1298_v22 = vadd.f32 1.0, %v2121_v17  ;;  %1491 = vst [vmem:[%s3113_s6 + $0x38] sm:$0xff] %v1442_v18  ;;  %v2754_v24 = vadd.f32 %v2666_v10, %v1050_v20 }
 0x12c   :  { %v2123_v23 = vpop.eup %2122  ;;  %v1051_v25 = vmul.f32 %v2661_v0, %v891_v51 }
 0x12d   :  { %2132 = vrcp.f32 %v1298_v22  ;;  %v1299_v26 = vadd.f32 1.0, %v2123_v23  ;;  %v1640_v55 = vmul.f32 -1.442695, %v2754_v24  ;;  %v475_v28 = vpop.f32.mrb[36].mxu0 }
 0x12e   :  { %v2759_v27 = vadd.f32 %v2666_v10, %v1051_v25  ;;  %v895_v30 = vpop.f32.mrb[28].mxu1  ;;  %v1783_v16 = vpop.f32.mrb[37].mxu0 }
 0x12f   :  { %v2125_v29 = vpop.eup %2124  ;;  %2134 = vrcp.f32 %v1299_v26  ;;  %v896_v34 = vadd.f32 %v895_v30, %v467_v1  ;;  %v1895_v37 = vpop.f32.mrb[29].mxu1 }
 0x130   :  { %v1443_v31 = vmul.f32 %v2125_v29, %v2700_v8  ;;  %2136 = vpow2.f32 %v1640_v55  ;;  %v1641_v33 = vmul.f32 -1.442695, %v2759_v27  ;;  %v478_v38 = vpop.f32.mrb[38].mxu0  ;;  %v2127_v19 = vpop.eup %2126 }
 0x131   :  { %v898_v40 = vpop.f32.mrb[30].mxu1  ;;  %v1784_v41 = vpop.f32.mrb[39].mxu0  ;;  %v1444_v43 = vmul.f32 %v2127_v19, %v2705_v13  ;;  %v1052_v44 = vmul.f32 %v2661_v0, %v896_v34 }
 0x132   :  { %v2129_v42 = vpop.eup %2128  ;;  %1492 = vst [vmem:[%s3113_s6 + $0x40] sm:$0xff] %v1443_v31  ;;  %2138 = vpow2.f32 %v1641_v33  ;;  %v899_v8 = vadd.f32 %v898_v40, %v470_v11  ;;  %v1896_v45 = vpop.f32.mrb[31].mxu1 }
 0x133   :  { %v1300_v46 = vadd.f32 1.0, %v2129_v42  ;;  %1493 = vst [vmem:[%s3113_s6 + $0x48] sm:$0xff] %v1444_v43  ;;  %v2772_v48 = vadd.f32 %v2666_v10, %v1052_v44 }
 0x134   :  { %v2131_v47 = vpop.eup %2130  ;;  %v1053_v49 = vmul.f32 %v2661_v0, %v899_v8 }
 0x135   :  { %2140 = vrcp.f32 %v1300_v46  ;;  %v1301_v50 = vadd.f32 1.0, %v2131_v47  ;;  %v1642_v13 = vmul.f32 -1.442695, %v2772_v48  ;;  %v483_v53 = vpop.f32.mrb[40].mxu0 }
 0x136   :  { %v2777_v52 = vadd.f32 %v2666_v10, %v1053_v49  ;;  %v903_v56 = vpop.f32.mrb[32].mxu1  ;;  %v1787_v32 = vpop.f32.mrb[41].mxu0 }
 0x137   :  { %v2133_v54 = vpop.eup %2132  ;;  %2142 = vrcp.f32 %v1301_v50  ;;  %v904_v59 = vadd.f32 %v903_v56, %v475_v28  ;;  %v1899_v61 = vpop.f32.mrb[33].mxu1 }
 0x138   :  { %v1445_v57 = vmul.f32 %v2133_v54, %v2718_v36  ;;  %2144 = vpow2.f32 %v1642_v13  ;;  %v1643_v58 = vmul.f32 -1.442695, %v2777_v52  ;;  %v486_v62 = vpop.f32.mrb[42].mxu0  ;;  %v906_v1 = vpop.f32.mrb[34].mxu1 }
 0x139   :  { %v2135_v35 = vpop.eup %2134  ;;  %v1788_v2 = vpop.f32.mrb[43].mxu0  ;;  %v1054_v5 = vmul.f32 %v2661_v0, %v904_v59  ;;  %v907_v36 = vadd.f32 %v906_v1, %v478_v38 }
 0x13a   :  { %v2137_v3 = vpop.eup %2136  ;;  %1494 = vst [vmem:[%s3113_s6 + $0x50] sm:$0xff] %v1445_v57  ;;  %v1446_v4 = vmul.f32 %v2135_v35, %v2723_v39  ;;  %2146 = vpow2.f32 %v1643_v58  ;;  %v1900_v6 = vpop.f32.mrb[35].mxu1 }
 0x13b   :  { %v1302_v7 = vadd.f32 1.0, %v2137_v3  ;;  %v2790_v11 = vadd.f32 %v2666_v10, %v1054_v5  ;;  %v1055_v12 = vmul.f32 %v2661_v0, %v907_v36 }
 0x13c   :  { %v2139_v9 = vpop.eup %2138  ;;  %1495 = vst [vmem:[%s3113_s6 + $0x58] sm:$0xff] %v1446_v4 }
 0x13d   :  { %2148 = vrcp.f32 %v1302_v7  ;;  %v1303_v14 = vadd.f32 1.0, %v2139_v9  ;;  %v1644_v39 = vmul.f32 -1.442695, %v2790_v11  ;;  %v2795_v15 = vadd.f32 %v2666_v10, %v1055_v12  ;;  %v491_v17 = vpop.f32.mrb[44].mxu0 }
 0x13e   :  { %v911_v20 = vpop.f32.mrb[36].mxu1  ;;  %v1791_v51 = vpop.f32.mrb[45].mxu0 }
 0x13f   :  { %v2141_v18 = vpop.eup %2140  ;;  %2150 = vrcp.f32 %v1303_v14  ;;  %v1645_v22 = vmul.f32 -1.442695, %v2795_v15  ;;  %v912_v23 = vadd.f32 %v911_v20, %v483_v53  ;;  %v1903_v25 = vpop.f32.mrb[37].mxu1 }
 0x140   :  { %v1447_v21 = vmul.f32 %v2141_v18, %v2736_v60  ;;  %2152 = vpow2.f32 %v1644_v39  ;;  %v494_v26 = vpop.f32.mrb[46].mxu0  ;;  %v914_v28 = vpop.f32.mrb[38].mxu1 }
 0x141   :  { %v2143_v55 = vpop.eup %2142  ;;  %v1792_v29 = vpop.f32.mrb[47].mxu0  ;;  %2154 = vpow2.f32 %v1645_v22  ;;  %v1056_v31 = vmul.f32 %v2661_v0, %v912_v23  ;;  %v915_v60 = vadd.f32 %v914_v28, %v486_v62 }
 0x142   :  { %v2145_v30 = vpop.eup %2144  ;;  %1496 = vst [vmem:[%s3113_s6 + $0x60] sm:$0xff] %v1447_v21  ;;  %v1448_v16 = vmul.f32 %v2143_v55, %v2741_v63  ;;  %v1904_v33 = vpop.f32.mrb[39].mxu1 }
 0x143   :  { %v1304_v34 = vadd.f32 1.0, %v2145_v30  ;;  %v2808_v38 = vadd.f32 %v2666_v10, %v1056_v31  ;;  %v1057_v19 = vmul.f32 %v2661_v0, %v915_v60 }
 0x144   :  { %v2147_v37 = vpop.eup %2146  ;;  %1497 = vst [vmem:[%s3113_s6 + $0x68] sm:$0xff] %v1448_v16 }
 0x145   :  { %2156 = vrcp.f32 %v1304_v34  ;;  %v1305_v40 = vadd.f32 1.0, %v2147_v37  ;;  %v1646_v63 = vmul.f32 -1.442695, %v2808_v38  ;;  %v2813_v41 = vadd.f32 %v2666_v10, %v1057_v19  ;;  %v499_v42 = vpop.f32.mrb[48].mxu0 }
 0x146   :  { %v919_v44 = vpop.f32.mrb[40].mxu1  ;;  %v1795_v8 = vpop.f32.mrb[49].mxu0 }
 0x147   :  { %v2149_v43 = vpop.eup %2148  ;;  %2158 = vrcp.f32 %v1305_v40  ;;  %v1647_v46 = vmul.f32 -1.442695, %v2813_v41  ;;  %v920_v47 = vadd.f32 %v919_v44, %v491_v17  ;;  %v1907_v49 = vpop.f32.mrb[41].mxu1 }
 0x148   :  { %v1449_v45 = vmul.f32 %v2149_v43, %v2754_v24  ;;  %2160 = vpow2.f32 %v1646_v63  ;;  %v502_v50 = vpop.f32.mrb[50].mxu0  ;;  %v922_v53 = vpop.f32.mrb[42].mxu1 }
 0x149   :  { %v2151_v13 = vpop.eup %2150  ;;  %v1796_v54 = vpop.f32.mrb[51].mxu0  ;;  %2162 = vpow2.f32 %v1647_v46  ;;  %v1058_v57 = vmul.f32 %v2661_v0, %v920_v47  ;;  %v923_v24 = vadd.f32 %v922_v53, %v494_v26 }
 0x14a   :  { %v2153_v56 = vpop.eup %2152  ;;  %1498 = vst [vmem:[%s3113_s6 + $0x70] sm:$0xff] %v1449_v45  ;;  %v1450_v32 = vmul.f32 %v2151_v13, %v2759_v27  ;;  %v1908_v58 = vpop.f32.mrb[43].mxu1 }
 0x14b   :  { %v1306_v59 = vadd.f32 1.0, %v2153_v56  ;;  %v2155_v61 = vpop.eup %2154  ;;  %v2826_v62 = vadd.f32 %v2666_v10, %v1058_v57  ;;  %v1059_v35 = vmul.f32 %v2661_v0, %v923_v24 }
 0x14c   :  { %1499 = vst [vmem:[%s3113_s6 + $0x78] sm:$0xff] %v1450_v32  ;;  %v1307_v1 = vadd.f32 1.0, %v2155_v61 }
 0x14d   :  { %2164 = vrcp.f32 %v1306_v59  ;;  %v1648_v27 = vmul.f32 -1.442695, %v2826_v62  ;;  %v2831_v2 = vadd.f32 %v2666_v10, %v1059_v35  ;;  %v507_v3 = vpop.f32.mrb[52].mxu0 }
 0x14e   :  { %2166 = vrcp.f32 %v1307_v1  ;;  %v927_v5 = vpop.f32.mrb[44].mxu1  ;;  %v1799_v36 = vpop.f32.mrb[53].mxu0 }
 0x14f   :  { %v2157_v4 = vpop.eup %2156  ;;  %2168 = vpow2.f32 %v1648_v27  ;;  %v1649_v7 = vmul.f32 -1.442695, %v2831_v2  ;;  %v928_v9 = vadd.f32 %v927_v5, %v499_v42  ;;  %v1911_v12 = vpop.f32.mrb[45].mxu1 }
 0x150   :  { %v1451_v6 = vmul.f32 %v2157_v4, %v2772_v48  ;;  %v510_v14 = vpop.f32.mrb[54].mxu0  ;;  %v930_v17 = vpop.f32.mrb[46].mxu1 }
 0x151   :  { %v2159_v39 = vpop.eup %2158  ;;  %v1800_v18 = vpop.f32.mrb[55].mxu0  ;;  %2170 = vpow2.f32 %v1649_v7  ;;  %v1060_v21 = vmul.f32 %v2661_v0, %v928_v9  ;;  %v931_v48 = vadd.f32 %v930_v17, %v502_v50 }
 0x152   :  { %v2161_v20 = vpop.eup %2160  ;;  %1500 = vst [vmem:[%s3113_s6 + $0x80] sm:$0xff] %v1451_v6  ;;  %v1452_v51 = vmul.f32 %v2159_v39, %v2777_v52  ;;  %v1912_v22 = vpop.f32.mrb[47].mxu1 }
 0x153   :  { %v1308_v23 = vadd.f32 1.0, %v2161_v20  ;;  %v2163_v25 = vpop.eup %2162  ;;  %v2844_v26 = vadd.f32 %v2666_v10, %v1060_v21  ;;  %v1061_v55 = vmul.f32 %v2661_v0, %v931_v48 }
 0x154   :  { %1501 = vst [vmem:[%s3113_s6 + $0x88] sm:$0xff] %v1452_v51  ;;  %v1309_v28 = vadd.f32 1.0, %v2163_v25 }
 0x155   :  { %2172 = vrcp.f32 %v1308_v23  ;;  %v1650_v52 = vmul.f32 -1.442695, %v2844_v26  ;;  %v2849_v29 = vadd.f32 %v2666_v10, %v1061_v55  ;;  %v515_v30 = vpop.f32.mrb[56].mxu0 }
 0x156   :  { %2174 = vrcp.f32 %v1309_v28  ;;  %v935_v31 = vpop.f32.mrb[48].mxu1  ;;  %v1803_v60 = vpop.f32.mrb[57].mxu0 }
 0x157   :  { %v2165_v16 = vpop.eup %2164  ;;  %2176 = vpow2.f32 %v1650_v52  ;;  %v1651_v34 = vmul.f32 -1.442695, %v2849_v29  ;;  %v936_v37 = vadd.f32 %v935_v31, %v507_v3  ;;  %v1915_v19 = vpop.f32.mrb[49].mxu1 }
 0x158   :  { %v1453_v33 = vmul.f32 %v2165_v16, %v2790_v11  ;;  %v518_v40 = vpop.f32.mrb[58].mxu0  ;;  %v2167_v63 = vpop.eup %2166 }
 0x159   :  { %v938_v42 = vpop.f32.mrb[50].mxu1  ;;  %v1804_v43 = vpop.f32.mrb[59].mxu0  ;;  %v1454_v8 = vmul.f32 %v2167_v63, %v2795_v15  ;;  %2178 = vpow2.f32 %v1651_v34  ;;  %v1062_v45 = vmul.f32 %v2661_v0, %v936_v37 }
 0x15a   :  { %v2169_v44 = vpop.eup %2168  ;;  %1502 = vst [vmem:[%s3113_s6 + $0x90] sm:$0xff] %v1453_v33  ;;  %v939_v11 = vadd.f32 %v938_v42, %v510_v14  ;;  %v1916_v46 = vpop.f32.mrb[51].mxu1 }
 0x15b   :  { %v1310_v47 = vadd.f32 1.0, %v2169_v44  ;;  %v2171_v49 = vpop.eup %2170  ;;  %1503 = vst [vmem:[%s3113_s6 + $0x98] sm:$0xff] %v1454_v8  ;;  %v2862_v50 = vadd.f32 %v2666_v10, %v1062_v45 }
 0x15c   :  { %v1063_v13 = vmul.f32 %v2661_v0, %v939_v11  ;;  %v1311_v53 = vadd.f32 1.0, %v2171_v49 }
 0x15d   :  { %2180 = vrcp.f32 %v1310_v47  ;;  %v1652_v15 = vmul.f32 -1.442695, %v2862_v50  ;;  %v523_v56 = vpop.f32.mrb[60].mxu0 }
 0x15e   :  { %v2867_v54 = vadd.f32 %v2666_v10, %v1063_v13  ;;  %2182 = vrcp.f32 %v1311_v53  ;;  %v943_v57 = vpop.f32.mrb[52].mxu1  ;;  %v1807_v24 = vpop.f32.mrb[61].mxu0 }
 0x15f   :  { %v2173_v32 = vpop.eup %2172  ;;  %2184 = vpow2.f32 %v1652_v15  ;;  %v944_v61 = vadd.f32 %v943_v57, %v515_v30  ;;  %v1919_v35 = vpop.f32.mrb[53].mxu1 }
 0x160   :  { %v1455_v58 = vmul.f32 %v2173_v32, %v2808_v38  ;;  %v1653_v59 = vmul.f32 -1.442695, %v2867_v54  ;;  %v526_v1 = vpop.f32.mrb[62].mxu0  ;;  %v2175_v27 = vpop.eup %2174 }
 0x161   :  { %v946_v3 = vpop.f32.mrb[54].mxu1  ;;  %v1808_v4 = vpop.f32.mrb[63].mxu0  ;;  %v1456_v36 = vmul.f32 %v2175_v27, %v2813_v41  ;;  %v1064_v6 = vmul.f32 %v2661_v0, %v944_v61 }
 0x162   :  { %v2177_v5 = vpop.eup %2176  ;;  %1504 = vst [vmem:[%s3113_s6 + $0xa0] sm:$0xff] %v1455_v58  ;;  %2186 = vpow2.f32 %v1653_v59  ;;  %v947_v38 = vadd.f32 %v946_v3, %v518_v40  ;;  %v1920_v7 = vpop.f32.mrb[55].mxu1 }
 0x163   :  { %v1312_v9 = vadd.f32 1.0, %v2177_v5  ;;  %v2179_v12 = vpop.eup %2178  ;;  %1505 = vst [vmem:[%s3113_s6 + $0xa8] sm:$0xff] %v1456_v36  ;;  %v2880_v14 = vadd.f32 %v2666_v10, %v1064_v6 }
 0x164   :  { %v1065_v39 = vmul.f32 %v2661_v0, %v947_v38  ;;  %v1313_v17 = vadd.f32 1.0, %v2179_v12 }
 0x165   :  { %2188 = vrcp.f32 %v1312_v9  ;;  %v1654_v41 = vmul.f32 -1.442695, %v2880_v14  ;;  %v531_v20 = vpop.f32.mrb[64].mxu0 }
 0x166   :  { %v2885_v18 = vadd.f32 %v2666_v10, %v1065_v39  ;;  %2190 = vrcp.f32 %v1313_v17  ;;  %v951_v21 = vpop.f32.mrb[56].mxu1  ;;  %v1811_v48 = vpop.f32.mrb[65].mxu0 }
 0x167   :  { %v2181_v51 = vpop.eup %2180  ;;  %2192 = vpow2.f32 %v1654_v41  ;;  %v952_v25 = vadd.f32 %v951_v21, %v523_v56  ;;  %v1923_v55 = vpop.f32.mrb[57].mxu1 }
 0x168   :  { %v1457_v22 = vmul.f32 %v2181_v51, %v2826_v62  ;;  %v1655_v23 = vmul.f32 -1.442695, %v2885_v18  ;;  %v534_v28 = vpop.f32.mrb[66].mxu0  ;;  %v2183_v52 = vpop.eup %2182 }
 0x169   :  { %v954_v30 = vpop.f32.mrb[58].mxu1  ;;  %v1812_v16 = vpop.f32.mrb[67].mxu0  ;;  %v1458_v60 = vmul.f32 %v2183_v52, %v2831_v2  ;;  %v1066_v33 = vmul.f32 %v2661_v0, %v952_v25 }
 0x16a   :  { %v2185_v31 = vpop.eup %2184  ;;  %1506 = vst [vmem:[%s3113_s6 + $0xb0] sm:$0xff] %v1457_v22  ;;  %2194 = vpow2.f32 %v1655_v23  ;;  %v955_v62 = vadd.f32 %v954_v30, %v526_v1  ;;  %v1924_v34 = vpop.f32.mrb[59].mxu1 }
 0x16b   :  { %v1314_v37 = vadd.f32 1.0, %v2185_v31  ;;  %1507 = vst [vmem:[%s3113_s6 + $0xb8] sm:$0xff] %v1458_v60  ;;  %v2898_v40 = vadd.f32 %v2666_v10, %v1066_v33 }
 0x16c   :  { %v2187_v19 = vpop.eup %2186  ;;  %v1067_v63 = vmul.f32 %v2661_v0, %v955_v62 }
 0x16d   :  { %2196 = vrcp.f32 %v1314_v37  ;;  %v1315_v42 = vadd.f32 1.0, %v2187_v19  ;;  %v1656_v2 = vmul.f32 -1.442695, %v2898_v40  ;;  %v539_v44 = vpop.f32.mrb[68].mxu0 }
 0x16e   :  { %v2903_v43 = vadd.f32 %v2666_v10, %v1067_v63  ;;  %v959_v45 = vpop.f32.mrb[60].mxu1  ;;  %v1815_v11 = vpop.f32.mrb[69].mxu0 }
 0x16f   :  { %v2189_v8 = vpop.eup %2188  ;;  %2198 = vrcp.f32 %v1315_v42  ;;  %v960_v49 = vadd.f32 %v959_v45, %v531_v20  ;;  %v1927_v13 = vpop.f32.mrb[61].mxu1 }
 0x170   :  { %v1459_v46 = vmul.f32 %v2189_v8, %v2844_v26  ;;  %2200 = vpow2.f32 %v1656_v2  ;;  %v1657_v47 = vmul.f32 -1.442695, %v2903_v43  ;;  %v542_v53 = vpop.f32.mrb[70].mxu0  ;;  %v2191_v15 = vpop.eup %2190 }
 0x171   :  { %v962_v56 = vpop.f32.mrb[62].mxu1  ;;  %v1816_v32 = vpop.f32.mrb[71].mxu0  ;;  %v1460_v24 = vmul.f32 %v2191_v15, %v2849_v29  ;;  %v1068_v58 = vmul.f32 %v2661_v0, %v960_v49 }
 0x172   :  { %v2193_v57 = vpop.eup %2192  ;;  %1508 = vst [vmem:[%s3113_s6 + $0xc0] sm:$0xff] %v1459_v46  ;;  %2202 = vpow2.f32 %v1657_v47  ;;  %v963_v26 = vadd.f32 %v962_v56, %v534_v28  ;;  %v1928_v59 = vpop.f32.mrb[63].mxu1 }
 0x173   :  { %v1316_v61 = vadd.f32 1.0, %v2193_v57  ;;  %1509 = vst [vmem:[%s3113_s6 + $0xc8] sm:$0xff] %v1460_v24  ;;  %v2916_v1 = vadd.f32 %v2666_v10, %v1068_v58 }
 0x174   :  { %v2195_v35 = vpop.eup %2194  ;;  %v1069_v27 = vmul.f32 %v2661_v0, %v963_v26 }
 0x175   :  { %2204 = vrcp.f32 %v1316_v61  ;;  %v1317_v3 = vadd.f32 1.0, %v2195_v35  ;;  %v1658_v29 = vmul.f32 -1.442695, %v2916_v1  ;;  %v547_v5 = vpop.f32.mrb[72].mxu0 }
 0x176   :  { %v2921_v4 = vadd.f32 %v2666_v10, %v1069_v27  ;;  %v967_v6 = vpop.f32.mrb[64].mxu1  ;;  %v1819_v38 = vpop.f32.mrb[73].mxu0 }
 0x177   :  { %v2197_v36 = vpop.eup %2196  ;;  %2206 = vrcp.f32 %v1317_v3  ;;  %v968_v12 = vadd.f32 %v967_v6, %v539_v44  ;;  %v1931_v39 = vpop.f32.mrb[65].mxu1 }
 0x178   :  { %v1461_v7 = vmul.f32 %v2197_v36, %v2862_v50  ;;  %2208 = vpow2.f32 %v1658_v29  ;;  %v1659_v9 = vmul.f32 -1.442695, %v2921_v4  ;;  %v550_v17 = vpop.f32.mrb[74].mxu0  ;;  %v970_v20 = vpop.f32.mrb[66].mxu1 }
 0x179   :  { %v2199_v41 = vpop.eup %2198  ;;  %v1820_v51 = vpop.f32.mrb[75].mxu0  ;;  %v1070_v22 = vmul.f32 %v2661_v0, %v968_v12  ;;  %v971_v50 = vadd.f32 %v970_v20, %v542_v53 }
 0x17a   :  { %v2201_v21 = vpop.eup %2200  ;;  %1510 = vst [vmem:[%s3113_s6 + $0xd0] sm:$0xff] %v1461_v7  ;;  %v1462_v48 = vmul.f32 %v2199_v41, %v2867_v54  ;;  %2210 = vpow2.f32 %v1659_v9  ;;  %v1932_v23 = vpop.f32.mrb[67].mxu1 }
 0x17b   :  { %v1318_v25 = vadd.f32 1.0, %v2201_v21  ;;  %v2934_v28 = vadd.f32 %v2666_v10, %v1070_v22  ;;  %v1071_v52 = vmul.f32 %v2661_v0, %v971_v50 }
 0x17c   :  { %v2203_v55 = vpop.eup %2202  ;;  %1511 = vst [vmem:[%s3113_s6 + $0xd8] sm:$0xff] %v1462_v48 }
 0x17d   :  { %2212 = vrcp.f32 %v1318_v25  ;;  %v1319_v30 = vadd.f32 1.0, %v2203_v55  ;;  %v1660_v54 = vmul.f32 -1.442695, %v2934_v28  ;;  %v2939_v16 = vadd.f32 %v2666_v10, %v1071_v52  ;;  %v555_v31 = vpop.f32.mrb[76].mxu0 }
 0x17e   :  { %v975_v33 = vpop.f32.mrb[68].mxu1  ;;  %v1823_v62 = vpop.f32.mrb[77].mxu0 }
 0x17f   :  { %v2205_v60 = vpop.eup %2204  ;;  %2214 = vrcp.f32 %v1319_v30  ;;  %v1661_v37 = vmul.f32 -1.442695, %v2939_v16  ;;  %v976_v19 = vadd.f32 %v975_v33, %v547_v5  ;;  %v1935_v63 = vpop.f32.mrb[69].mxu1 }
 0x180   :  { %v1463_v34 = vmul.f32 %v2205_v60, %v2880_v14  ;;  %2216 = vpow2.f32 %v1660_v54  ;;  %v558_v42 = vpop.f32.mrb[78].mxu0  ;;  %v978_v44 = vpop.f32.mrb[70].mxu1 }
 0x181   :  { %v2207_v2 = vpop.eup %2206  ;;  %v1824_v8 = vpop.f32.mrb[79].mxu0  ;;  %2218 = vpow2.f32 %v1661_v37  ;;  %v1072_v46 = vmul.f32 %v2661_v0, %v976_v19  ;;  %v979_v14 = vadd.f32 %v978_v44, %v550_v17 }
 0x182   :  { %v2209_v45 = vpop.eup %2208  ;;  %1512 = vst [vmem:[%s3113_s6 + $0xe0] sm:$0xff] %v1463_v34  ;;  %v1464_v11 = vmul.f32 %v2207_v2, %v2885_v18  ;;  %v1936_v47 = vpop.f32.mrb[71].mxu1 }
 0x183   :  { %v1320_v49 = vadd.f32 1.0, %v2209_v45  ;;  %v2952_v53 = vadd.f32 %v2666_v10, %v1072_v46  ;;  %v1073_v15 = vmul.f32 %v2661_v0, %v979_v14 }
 0x184   :  { %v2211_v13 = vpop.eup %2210  ;;  %1513 = vst [vmem:[%s3113_s6 + $0xe8] sm:$0xff] %v1464_v11 }
 0x185   :  { %2220 = vrcp.f32 %v1320_v49  ;;  %v1321_v56 = vadd.f32 1.0, %v2211_v13  ;;  %v1662_v18 = vmul.f32 -1.442695, %v2952_v53  ;;  %v2957_v32 = vadd.f32 %v2666_v10, %v1073_v15  ;;  %v563_v57 = vpop.f32.mrb[80].mxu0 }
 0x186   :  { %v983_v58 = vpop.f32.mrb[72].mxu1  ;;  %v1827_v26 = vpop.f32.mrb[81].mxu0 }
 0x187   :  { %v2213_v24 = vpop.eup %2212  ;;  %2222 = vrcp.f32 %v1321_v56  ;;  %v1663_v61 = vmul.f32 -1.442695, %v2957_v32  ;;  %v984_v35 = vadd.f32 %v983_v58, %v555_v31  ;;  %v1939_v27 = vpop.f32.mrb[73].mxu1 }
 0x188   :  { %v1465_v59 = vmul.f32 %v2213_v24, %v2898_v40  ;;  %2224 = vpow2.f32 %v1662_v18  ;;  %v566_v0 = vpop.f32.mrb[82].mxu0  ;;  %v986_v29 = vpop.f32.mrb[74].mxu1  ;;  %v2968_v40 = vld [vmem:[%s3111_s4] ss:$0 sm:$0xff] }
 0x189   :  { %v2215_v3 = vpop.eup %2214  ;;  %v1828_v5 = vpop.f32.mrb[83].mxu0  ;;  %2226 = vpow2.f32 %v1663_v61  ;;  %v1074_v6 = vmul.f32 %v2968_v40, %v984_v35  ;;  %v987_v38 = vadd.f32 %v986_v29, %v558_v42 }
 0x18a   :  { %v2217_v36 = vpop.eup %2216  ;;  %1514 = vst [vmem:[%s3113_s6 + $0xf0] sm:$0xff] %v1465_v59  ;;  %v1466_v10 = vmul.f32 %v2215_v3, %v2903_v43  ;;  %v1940_v7 = vpop.f32.mrb[75].mxu1  ;;  %v2977_v43 = vld [vmem:[%s3112_s5] ss:$0 sm:$0xff] }
 0x18b   :  { %v1322_v9 = vadd.f32 1.0, %v2217_v36  ;;  %v2219_v12 = vpop.eup %2218  ;;  %v2980_v39 = vadd.f32 %v2977_v43, %v1074_v6  ;;  %v1075_v17 = vmul.f32 %v2968_v40, %v987_v38 }
 0x18c   :  { %1515 = vst [vmem:[%s3113_s6 + $0xf8] sm:$0xff] %v1466_v10  ;;  %v1323_v41 = vadd.f32 1.0, %v2219_v12 }
 0x18d   :  { %2228 = vrcp.f32 %v1322_v9  ;;  %v1664_v20 = vmul.f32 -1.442695, %v2980_v39  ;;  %v2985_v51 = vadd.f32 %v2977_v43, %v1075_v17  ;;  %v571_v21 = vpop.f32.mrb[84].mxu0 }
 0x18e   :  { %2230 = vrcp.f32 %v1323_v41  ;;  %v991_v22 = vpop.f32.mrb[76].mxu1  ;;  %v1831_v50 = vpop.f32.mrb[85].mxu0 }
 0x18f   :  { %v2221_v48 = vpop.eup %2220  ;;  %2232 = vpow2.f32 %v1664_v20  ;;  %v1665_v25 = vmul.f32 -1.442695, %v2985_v51  ;;  %v992_v55 = vadd.f32 %v991_v22, %v563_v57  ;;  %v1943_v52 = vpop.f32.mrb[77].mxu1 }
 0x190   :  { %v1467_v23 = vmul.f32 %v2221_v48, %v2916_v1  ;;  %v574_v30 = vpop.f32.mrb[86].mxu0  ;;  %v994_v31 = vpop.f32.mrb[78].mxu1 }
 0x191   :  { %v2223_v54 = vpop.eup %2222  ;;  %v1832_v60 = vpop.f32.mrb[87].mxu0  ;;  %2234 = vpow2.f32 %v1665_v25  ;;  %v1076_v34 = vmul.f32 %v2968_v40, %v992_v55  ;;  %v995_v1 = vadd.f32 %v994_v31, %v566_v0 }
 0x192   :  { %v2225_v33 = vpop.eup %2224  ;;  %1516 = vst [vmem:[%s3113_s6 + $0x100] sm:$0xff] %v1467_v23  ;;  %v1468_v62 = vmul.f32 %v2223_v54, %v2921_v4  ;;  %v1944_v37 = vpop.f32.mrb[79].mxu1 }
 0x193   :  { %v1324_v19 = vadd.f32 1.0, %v2225_v33  ;;  %v2227_v63 = vpop.eup %2226  ;;  %v2998_v42 = vadd.f32 %v2977_v43, %v1076_v34  ;;  %v1077_v2 = vmul.f32 %v2968_v40, %v995_v1 }
 0x194   :  { %1517 = vst [vmem:[%s3113_s6 + $0x108] sm:$0xff] %v1468_v62  ;;  %v1325_v44 = vadd.f32 1.0, %v2227_v63 }
 0x195   :  { %2236 = vrcp.f32 %v1324_v19  ;;  %v1666_v4 = vmul.f32 -1.442695, %v2998_v42  ;;  %v3003_v8 = vadd.f32 %v2977_v43, %v1077_v2  ;;  %v579_v45 = vpop.f32.mrb[88].mxu0 }
 0x196   :  { %2238 = vrcp.f32 %v1325_v44  ;;  %v999_v46 = vpop.f32.mrb[80].mxu1  ;;  %v1835_v14 = vpop.f32.mrb[89].mxu0 }
 0x197   :  { %v2229_v11 = vpop.eup %2228  ;;  %2240 = vpow2.f32 %v1666_v4  ;;  %v1667_v49 = vmul.f32 -1.442695, %v3003_v8  ;;  %v1000_v13 = vadd.f32 %v999_v46, %v571_v21  ;;  %v1947_v15 = vpop.f32.mrb[81].mxu1 }
 0x198   :  { %v1469_v47 = vmul.f32 %v2229_v11, %v2934_v28  ;;  %v582_v56 = vpop.f32.mrb[90].mxu0  ;;  %v2231_v18 = vpop.eup %2230 }
 0x199   :  { %v1002_v57 = vpop.f32.mrb[82].mxu1  ;;  %v1836_v24 = vpop.f32.mrb[91].mxu0  ;;  %v1470_v26 = vmul.f32 %v2231_v18, %v2939_v16  ;;  %2242 = vpow2.f32 %v1667_v49  ;;  %v1078_v59 = vmul.f32 %v2968_v40, %v1000_v13 }
 0x19a   :  { %v2233_v58 = vpop.eup %2232  ;;  %1518 = vst [vmem:[%s3113_s6 + $0x110] sm:$0xff] %v1469_v47  ;;  %v1003_v28 = vadd.f32 %v1002_v57, %v574_v30  ;;  %v1948_v61 = vpop.f32.mrb[83].mxu1 }
 0x19b   :  { %v1326_v35 = vadd.f32 1.0, %v2233_v58  ;;  %v2235_v27 = vpop.eup %2234  ;;  %1519 = vst [vmem:[%s3113_s6 + $0x118] sm:$0xff] %v1470_v26  ;;  %v3016_v0 = vadd.f32 %v2977_v43, %v1078_v59 }
 0x19c   :  { %v1079_v3 = vmul.f32 %v2968_v40, %v1003_v28  ;;  %v1327_v29 = vadd.f32 1.0, %v2235_v27 }
 0x19d   :  { %2244 = vrcp.f32 %v1326_v35  ;;  %v1668_v16 = vmul.f32 -1.442695, %v3016_v0  ;;  %v587_v36 = vpop.f32.mrb[92].mxu0 }
 0x19e   :  { %v3021_v5 = vadd.f32 %v2977_v43, %v1079_v3  ;;  %2246 = vrcp.f32 %v1327_v29  ;;  %v1007_v6 = vpop.f32.mrb[84].mxu1  ;;  %v1839_v38 = vpop.f32.mrb[93].mxu0 }
 0x19f   :  { %v2237_v10 = vpop.eup %2236  ;;  %2248 = vpow2.f32 %v1668_v16  ;;  %v1008_v12 = vadd.f32 %v1007_v6, %v579_v45  ;;  %v1951_v17 = vpop.f32.mrb[85].mxu1 }
 0x1a0   :  { %v1471_v7 = vmul.f32 %v2237_v10, %v2952_v53  ;;  %v1669_v9 = vmul.f32 -1.442695, %v3021_v5  ;;  %v590_v41 = vpop.f32.mrb[94].mxu0  ;;  %v2239_v20 = vpop.eup %2238 }
 0x1a1   :  { %v1010_v21 = vpop.f32.mrb[86].mxu1  ;;  %v1840_v48 = vpop.f32.mrb[95].mxu0  ;;  %v1472_v50 = vmul.f32 %v2239_v20, %v2957_v32  ;;  %v1080_v23 = vmul.f32 %v2968_v40, %v1008_v12 }
 0x1a2   :  { %v2241_v22 = vpop.eup %2240  ;;  %1520 = vst [vmem:[%s3113_s6 + $0x120] sm:$0xff] %v1471_v7  ;;  %2250 = vpow2.f32 %v1669_v9  ;;  %v1011_v53 = vadd.f32 %v1010_v21, %v582_v56  ;;  %v1952_v25 = vpop.f32.mrb[87].mxu1 }
 0x1a3   :  { %v1328_v55 = vadd.f32 1.0, %v2241_v22  ;;  %v2243_v52 = vpop.eup %2242  ;;  %1521 = vst [vmem:[%s3113_s6 + $0x128] sm:$0xff] %v1472_v50  ;;  %v3034_v30 = vadd.f32 %v2977_v43, %v1080_v23 }
 0x1a4   :  { %v1081_v54 = vmul.f32 %v2968_v40, %v1011_v53  ;;  %v1329_v31 = vadd.f32 1.0, %v2243_v52 }
 0x1a5   :  { %2252 = vrcp.f32 %v1328_v55  ;;  %v1670_v32 = vmul.f32 -1.442695, %v3034_v30  ;;  %v595_v33 = vpop.f32.mrb[96].mxu0 }
 0x1a6   :  { %v3039_v60 = vadd.f32 %v2977_v43, %v1081_v54  ;;  %2254 = vrcp.f32 %v1329_v31  ;;  %v1015_v34 = vpop.f32.mrb[88].mxu1  ;;  %v1843_v1 = vpop.f32.mrb[97].mxu0 }
 0x1a7   :  { %v2245_v62 = vpop.eup %2244  ;;  %2256 = vpow2.f32 %v1670_v32  ;;  %v1016_v63 = vadd.f32 %v1015_v34, %v587_v36  ;;  %v1955_v2 = vpop.f32.mrb[89].mxu1 }
 0x1a8   :  { %v1473_v37 = vmul.f32 %v2245_v62, %v2980_v39  ;;  %v1671_v19 = vmul.f32 -1.442695, %v3039_v60  ;;  %v598_v44 = vpop.f32.mrb[98].mxu0  ;;  %v2247_v4 = vpop.eup %2246 }
 0x1a9   :  { %v1018_v45 = vpop.f32.mrb[90].mxu1  ;;  %v1844_v11 = vpop.f32.mrb[99].mxu0  ;;  %v1474_v14 = vmul.f32 %v2247_v4, %v2985_v51  ;;  %v1082_v47 = vmul.f32 %v2968_v40, %v1016_v63 }
 0x1aa   :  { %v2249_v46 = vpop.eup %2248  ;;  %1522 = vst [vmem:[%s3113_s6 + $0x130] sm:$0xff] %v1473_v37  ;;  %2258 = vpow2.f32 %v1671_v19  ;;  %v1019_v39 = vadd.f32 %v1018_v45, %v590_v41  ;;  %v1956_v49 = vpop.f32.mrb[91].mxu1 }
 0x1ab   :  { %v1330_v13 = vadd.f32 1.0, %v2249_v46  ;;  %1523 = vst [vmem:[%s3113_s6 + $0x138] sm:$0xff] %v1474_v14  ;;  %v3052_v56 = vadd.f32 %v2977_v43, %v1082_v47 }
 0x1ac   :  { %v2251_v15 = vpop.eup %2250  ;;  %v1083_v18 = vmul.f32 %v2968_v40, %v1019_v39 }
 0x1ad   :  { %2260 = vrcp.f32 %v1330_v13  ;;  %v1331_v57 = vadd.f32 1.0, %v2251_v15  ;;  %v1672_v51 = vmul.f32 -1.442695, %v3052_v56  ;;  %v831_v58 = vpop.f32.mrb[0].mxu0 }
 0x1ae   :  { %v3057_v24 = vadd.f32 %v2977_v43, %v1083_v18  ;;  %v1036_v59 = vmul.f32 %v2968_v40, %v831_v58  ;;  %v1023_v28 = vpop.f32.mrb[92].mxu1  ;;  %v1863_v61 = vpop.f32.mrb[1].mxu0 }
 0x1af   :  { %v2253_v26 = vpop.eup %2252  ;;  %2262 = vrcp.f32 %v1331_v57  ;;  %v1024_v3 = vadd.f32 %v1023_v28, %v595_v33  ;;  %v1959_v29 = vpop.f32.mrb[93].mxu1 }
 0x1b0   :  { %v1475_v35 = vmul.f32 %v2253_v26, %v2998_v42  ;;  %2264 = vpow2.f32 %v1672_v51  ;;  %v1673_v27 = vmul.f32 -1.442695, %v3057_v24  ;;  %v834_v16 = vpop.f32.mrb[2].mxu0  ;;  %v2255_v36 = vpop.eup %2254  ;;  %v1092_v10 = vadd.f32 %v2977_v43, %v1036_v59 }
 0x1b1   :  { %v1037_v6 = vmul.f32 %v2968_v40, %v834_v16  ;;  %v1026_v38 = vpop.f32.mrb[94].mxu1  ;;  %v1864_v7 = vpop.f32.mrb[3].mxu0  ;;  %v1476_v42 = vmul.f32 %v2255_v36, %v3003_v8  ;;  %v1084_v12 = vmul.f32 %v2968_v40, %v1024_v3 }
 0x1b2   :  { %v2257_v9 = vpop.eup %2256  ;;  %1524 = vst [vmem:[%s3113_s6 + $0x140] sm:$0xff] %v1475_v35  ;;  %2266 = vpow2.f32 %v1673_v27  ;;  %v1960_v17 = vpop.f32.mrb[95].mxu1  ;;  %v1626_v20 = vmul.f32 -1.442695, %v1092_v10 }
 0x1b3   :  { %v1332_v41 = vadd.f32 1.0, %v2257_v9  ;;  %v1093_v21 = vadd.f32 %v2977_v43, %v1037_v6  ;;  %1525 = vst [vmem:[%s3113_s6 + $0x148] sm:$0xff] %v1476_v42  ;;  %v1140_v22 = vadd.f32 %v2977_v43, %v1084_v12 }
 0x1b4   :  { %v2259_v48 = vpop.eup %2258 }
 0x1b5   :  { %2268 = vrcp.f32 %v1332_v41  ;;  %v1333_v50 = vadd.f32 1.0, %v2259_v48  ;;  %v1627_v23 = vmul.f32 -1.442695, %v1093_v21  ;;  %v1674_v8 = vmul.f32 -1.442695, %v1140_v22 }
 0x1b6   :  { %2270 = vpow2.f32 %v1626_v20 }
 0x1b7   :  { %v2261_v53 = vpop.eup %2260  ;;  %2272 = vrcp.f32 %v1333_v50 }
 0x1b8   :  { %v1477_v40 = vmul.f32 %v2261_v53, %v3016_v0  ;;  %2274 = vpow2.f32 %v1674_v8 }
 0x1b9   :  { %v2263_v25 = vpop.eup %2262  ;;  %2276 = vpow2.f32 %v1627_v23 }
 0x1ba   :  { %v2265_v55 = vpop.eup %2264  ;;  %1526 = vst [vmem:[%s3113_s6 + $0x150] sm:$0xff] %v1477_v40  ;;  %v1478_v52 = vmul.f32 %v2263_v25, %v3021_v5 }
 0x1bb   :  { %v1334_v43 = vadd.f32 1.0, %v2265_v55 }
 0x1bc   :  { %v2267_v54 = vpop.eup %2266  ;;  %1527 = vst [vmem:[%s3113_s6 + $0x158] sm:$0xff] %v1478_v52 }
 0x1bd   :  { %2278 = vrcp.f32 %v1334_v43  ;;  %v1335_v31 = vadd.f32 1.0, %v2267_v54 }
 0x1bf   :  { %v2269_v32 = vpop.eup %2268  ;;  %2280 = vrcp.f32 %v1335_v31 }
 0x1c0   :  { %v2271_v0 = vpop.eup %2270  ;;  %v1479_v33 = vmul.f32 %v2269_v32, %v3034_v30 }
 0x1c1   :  { %v2273_v62 = vpop.eup %2272  ;;  %v1288_v34 = vadd.f32 1.0, %v2271_v0 }
 0x1c2   :  { %v2275_v1 = vpop.eup %2274  ;;  %1528 = vst [vmem:[%s3113_s6 + $0x160] sm:$0xff] %v1479_v33  ;;  %v1480_v5 = vmul.f32 %v2273_v62, %v3039_v60 }
 0x1c3   :  { %v2277_v37 = vpop.eup %2276  ;;  %2282 = vrcp.f32 %v1288_v34  ;;  %v1336_v19 = vadd.f32 1.0, %v2275_v1 }
 0x1c4   :  { %1529 = vst [vmem:[%s3113_s6 + $0x168] sm:$0xff] %v1480_v5  ;;  %v1289_v63 = vadd.f32 1.0, %v2277_v37 }
 0x1c5   :  { %2284 = vrcp.f32 %v1336_v19 }
 0x1c6   :  { %2286 = vrcp.f32 %v1289_v63 }
 0x1c7   :  { %v2279_v30 = vpop.eup %2278 }
 0x1c8   :  { %v1481_v2 = vmul.f32 %v2279_v30, %v3052_v56 }
 0x1c9   :  { %v2281_v44 = vpop.eup %2280 }
 0x1ca   :  { %1530 = vst [vmem:[%s3113_s6 + $0x170] sm:$0xff] %v1481_v2  ;;  %v1482_v60 = vmul.f32 %v2281_v44, %v3057_v24 }
 0x1cc   :  { %1531 = vst [vmem:[%s3113_s6 + $0x178] sm:$0xff] %v1482_v60 }
 0x1cd   :  { %v2283_v4 = vpop.eup %2282 }
 0x1ce   :  { %v1435_v45 = vmul.f32 %v2283_v4, %v1092_v10 }
 0x1cf   :  { %v2285_v11 = vpop.eup %2284 }
 0x1d0   :  { %v2287_v46 = vpop.eup %2286  ;;  %1484 = vst [vmem:[%s3113_s6] sm:$0xff] %v1435_v45  ;;  %v1483_v14 = vmul.f32 %v2285_v11, %v1140_v22 }
 0x1d1   :  { %v1436_v47 = vmul.f32 %v2287_v46, %v1093_v21 }
 0x1d2   :  { %1532 = vst [vmem:[%s3113_s6 + $0x180] sm:$0xff] %v1483_v14 }
 0x1d3   :  { %1485 = vst [vmem:[%s3113_s6 + $0x8] sm:$0xff] %v1436_v47 }

// kernel: c2f_irmb_forward.11
= control target key start
LH: loop header
LB: loop body
LE: loop exit
PB: predicated region body
PF: predicated region fallthrough
CT: control target
= control target key end

     0   :  { %s2679_s18 = smov 0   ;;  %s4123_s0 = inlined_call_operand.vmem [shape: bf16[2,16,16,64], index: 0, kind: input, shape index: {}]   ;;  %s4124_s1 = inlined_call_operand.vmem [shape: bf16[2,14,14,64], index: 1, kind: input, shape index: {}]   ;;  %s4125_s2 = inlined_call_operand.vmem [shape: bf16[9,1,64], index: 2, kind: input, shape index: {}]   ;;  %s4126_s3 = inlined_call_operand.vmem [shape: f32[1,64], index: 3, kind: input, shape index: {}]   ;;  %s4127_s4 = inlined_call_operand.vmem [shape: f32[1,64], index: 4, kind: input, shape index: {}]   ;;  %s4128_s5 = inlined_call_operand.vmem [shape: bf16[2,14,14,64], index: 5, kind: output, shape index: {}]  }
   0x1 LB: > { %s2298_s19 = sadd.s32 4294967295, %s2647_s18   ;;  %p2302_p0 = scmp.ge.s32.totalorder %s2647_s18, 1  ;;  %s2647_s18 = sphi %s2679_s18, %s15_s18  }
   0x2   : > { %p197_p1 = scmp.lt.s32.totalorder %s2647_s18, 3 }
   0x4   : > { %p198_p2 = pnand %p2302_p0, %p197_p1 }
   0x5   : > { %p230_p3 = scmp.lt.s32.totalorder (!%p198_p2), %s2298_s19, 1  ;;  %v301_v0 = vld [vmem:[%s4125_s2] sm:$0x1] (!%p198_p2)  ;;  %v303_v1 = vlaneseq (!%p198_p2)  ;;  %v2307_v2 = vld [vmem:[%s4125_s2 + $0x1] sm:$0x1] (!%p198_p2)  ;;  %vm454_vm0 = vcmask (!%p198_p2), 1046528  }
   0x6   : > { %201 = sbr.rel (%p198_p2) target bundleno = 354 (0x162), region = 40  ;;  %v2308_v3 = vld [vmem:[%s4125_s2 + $0x2] sm:$0x1] (!%p198_p2)  ;;  %v2337_v4 = vld [vmem:[%s4125_s2 + $0x3] sm:$0x1] (!%p198_p2)  ;;  %v302_v5 = vunpack.c.l.bf16 (!%p198_p2), %v301_v0  ;;  %v393_v7 = vunpack.c.l.bf16 (!%p198_p2), %v2307_v2  ;;  %vm644_vm1 = vcmask (!%p198_p2), 1045504  }
   0x7   : > { %v304_v6 = vshrl.u32 (!%p198_p2), %v303_v1, 7  ;;  %v583_v8 = vunpack.c.l.bf16 (!%p198_p2), %v2308_v3  ;;  %v2352_v9 = vld [vmem:[%s4125_s2 + $0x4] sm:$0x1] (!%p198_p2)  ;;  %v2367_v10 = vld [vmem:[%s4125_s2 + $0x5] sm:$0x1] (!%p198_p2)  ;;  %v802_v17 = vunpack.c.l.bf16 (!%p198_p2), %v2337_v4  ;;  %vm2201_vm2 = vcmask (!%p198_p2), 519168  }
   0x8   : > { %v2396_v11 = vld [vmem:[%s4125_s2 + $0x6] sm:$0x1] (!%p198_p2)  ;;  %v2411_v12 = vld [vmem:[%s4125_s2 + $0x7] sm:$0x1] (!%p198_p2)  ;;  %v2716_v13 = vld [vmem:[%s4125_s2 + $0x8] sm:$0x1] (!%p198_p2)  ;;  %v893_v15 = vunpack.c.l.bf16 (!%p198_p2), %v2352_v9  ;;  %v1082_v16 = vunpack.c.l.bf16 (!%p198_p2), %v2367_v10 }
   0x9   : > { %v305_v14 = vsub.s32 (!%p198_p2), 0, %v304_v6  ;;  %v1300_v18 = vunpack.c.l.bf16 (!%p198_p2), %v2396_v11  ;;  %v1391_v19 = vunpack.c.l.bf16 (!%p198_p2), %v2411_v12  ;;  %v1580_v26 = vunpack.c.l.bf16 (!%p198_p2), %v2716_v13 }
   0xa   : > { %vm2203_vm3 = vcmask (!%p198_p2), 518144  }
   0xb   : > { %v2725_v21 = vrot.slane (!%p198_p2), %v302_v5, %v305_v14  ;;  %v2727_v22 = vrot.slane (!%p198_p2), %v393_v7, %v305_v14  ;;  %v2730_v24 = vrot.slane (!%p198_p2), %v583_v8, %v305_v14  ;;  %v2735_v33 = vrot.slane (!%p198_p2), %v893_v15, %v305_v14 }
   0xc   : > { %v2737_v35 = vrot.slane (!%p198_p2), %v1082_v16, %v305_v14  ;;  %v2742_v39 = vrot.slane (!%p198_p2), %v802_v17, %v305_v14  ;;  %v2758_v56 = vrot.slane (!%p198_p2), %v1300_v18, %v305_v14  ;;  %v2765_v1 = vrot.slane (!%p198_p2), %v1391_v19, %v305_v14 }
   0xd   : > { %s4130_s19 = smov (!%p230_p3, %s2298_s19), 1  ;;  %v2772_v7 = vrot.slane %v1580_v26, %v305_v14 }
   0xe   : > { %s2487_s13 = sshll.u32 %s4130_s19, 7  ;;  %s2516_s17 = smul.u32 112, %s4130_s19 }
   0xf   : > { %s2722_s16 = scalar_lea.vmem %s4123_s0, %s2487_s13 }
  0x10   : > { %v245_v20 = vld [vmem:[%s2722_s16] sm:$0xff]   ;;  %v2309_v25 = vld [vmem:[%s2722_s16 + $0x8] sm:$0xff]   ;;  %v2368_v44 = vld [vmem:[%s2722_s16 + $0x10] sm:$0xff]   ;;  %s2851_s26 = scalar_lea.vmem %s4124_s1, %s2516_s17  ;;  %s3006_s29 = scalar_lea.vmem %s4128_s5, %s2516_s17 }
  0x11   : > { %v553_v23 = vld [vmem:[%s2722_s16] sm:$0xe]  ;;  %v273_v27 = vunpack.c.l.bf16 %v245_v20  ;;  %v377_v28 = vunpack.c.h.bf16 %v245_v20  ;;  %v772_v30 = vunpack.c.l.bf16 %v2309_v25  ;;  %v2353_v31 = vld [vmem:[%s2722_s16 + $0x8] sm:$0xe]  ;;  %v877_v32 = vunpack.c.h.bf16 %v2309_v25  ;;  %v2412_v53 = vld [vmem:[%s2722_s16 + $0x10] sm:$0xe] }
  0x12   : > { %v567_v29 = vunpack.c.l.bf16 %v553_v23  ;;  %v1066_v34 = vunpack.c.l.bf16 %v2353_v31  ;;  %v1270_v55 = vunpack.c.l.bf16 %v2368_v44  ;;  %v246_v61 = vld [vmem:[%s2722_s16 + $0x4] sm:$0x7]  ;;  %v2310_v62 = vld [vmem:[%s2722_s16 + $0xc] sm:$0x7]  ;;  %v1375_v0 = vunpack.c.h.bf16 %v2368_v44  ;;  %v2369_v3 = vld [vmem:[%s2722_s16 + $0x14] sm:$0x7] }
  0x13   : > { %v398_v36 = vmul.f32 %v2727_v22, %v273_v27  ;;  %v399_v37 = vmul.f32 %v2727_v22, %v377_v28  ;;  %v307_v40 = vmul.f32 %v2725_v21, %v273_v27  ;;  %v589_v41 = vmul.f32 %v2730_v24, %v377_v28  ;;  %v247_v17 = vld [vmem:[%s2722_s16 + $0x8] sm:$0xff]  }
  0x14   : > { %v588_v38 = vmul.f32 %v2730_v24, %v567_v29  ;;  %v898_v42 = vmul.f32 %v2735_v33, %v772_v30  ;;  %v2748_v43 = vmul.f32 %v2735_v33, %v877_v32  ;;  %v1087_v48 = vmul.f32 %v2737_v35, %v1066_v34  ;;  %v554_v23 = vld [vmem:[%s2722_s16 + $0x8] sm:$0xe]  ;;  %v2311_v29 = vld [vmem:[%s2722_s16 + $0x10] sm:$0xff]  }
  0x15   : > { %v455_v45 = vrot.slane %v398_v36, 1  ;;  %v456_v46 = vrot.slane %v399_v37, 1  ;;  %v646_v49 = vrot.slane %v589_v41, 2  ;;  %v2754_v52 = vmul.f32 %v2737_v35, %v877_v32 }
  0x16   : > { %v645_v47 = vrot.slane %v588_v38, 2  ;;  %v954_v50 = vrot.slane %v898_v42, 1  ;;  %v955_v51 = vrot.slane %v2748_v43, 1  ;;  %v807_v59 = vmul.f32 %v2742_v39, %v772_v30 }
  0x17   : > { %v457_v54 = vsel %vm454_vm0, %v455_v45, %v456_v46  ;;  %v1143_v60 = vrot.slane %v1087_v48, 2  ;;  %v1144_v63 = vrot.slane %v2754_v52, 2  ;;  %v1564_v2 = vunpack.c.l.bf16 %v2412_v53  ;;  %v2354_v53 = vld [vmem:[%s2722_s16 + $0x10] sm:$0xe] }
  0x18   : > { %v525_v57 = vadd.f32 %v457_v54, %v307_v40  ;;  %v647_v58 = vsel %vm644_vm1, %v645_v47, %v646_v49  ;;  %v956_v5 = vsel %vm454_vm0, %v954_v50, %v955_v51  ;;  %v1305_v6 = vmul.f32 %v2758_v56, %v1270_v55 }
  0x19   : > { %v1396_v8 = vmul.f32 %v2765_v1, %v1270_v55  ;;  %v2776_v9 = vmul.f32 %v2765_v1, %v1375_v0  ;;  %v274_v10 = vunpack.c.l.bf16 %v246_v61  ;;  %v773_v11 = vunpack.c.l.bf16 %v2310_v62  ;;  %v2816_v62 = vld [vmem:[%s4126_s3] ss:$0 sm:$0xff] }
  0x1a   : > { %v715_v4 = vadd.f32 %v647_v58, %v525_v57  ;;  %v1585_v13 = vmul.f32 %v2772_v7, %v1564_v2  ;;  %v2780_v15 = vmul.f32 %v2772_v7, %v1375_v0  ;;  %v1271_v16 = vunpack.c.l.bf16 %v2369_v3 }
  0x1b   : > { %v1145_v14 = vsel %vm644_vm1, %v1143_v60, %v1144_v63  ;;  %v1452_v18 = vrot.slane %v1396_v8, 1  ;;  %v1453_v19 = vrot.slane %v2776_v9, 1  ;;  %v308_v20 = vmul.f32 %v2725_v21, %v274_v10 }
  0x1c   : > { %v835_v12 = vadd.f32 %v807_v59, %v715_v4  ;;  %v1641_v26 = vrot.slane %v1585_v13, 2  ;;  %v1642_v27 = vrot.slane %v2780_v15, 2  ;;  %v808_v28 = vmul.f32 %v2742_v39, %v773_v11 }
  0x1d   : > { %v1454_v30 = vsel %vm454_vm0, %v1452_v18, %v1453_v19  ;;  %v526_v31 = vadd.f32 %v456_v46, %v308_v20  ;;  %v1306_v32 = vmul.f32 %v2758_v56, %v1271_v16  ;;  %v275_v34 = vunpack.c.l.bf16 %v247_v17 }
  0x1e   : > { %v1024_v25 = vadd.f32 %v956_v5, %v835_v12  ;;  %v1643_v37 = vsel %vm644_vm1, %v1641_v26, %v1642_v27  ;;  %v378_v38 = vunpack.c.h.bf16 %v247_v17  ;;  %v568_v40 = vunpack.c.l.bf16 %v554_v23  ;;  %v2370_v5 = vld [vmem:[%s2722_s16 + $0x18] sm:$0xff]  }
  0x1f   : > { %v716_v41 = vadd.f32 %v646_v49, %v526_v31  ;;  %v309_v42 = vmul.f32 %v2725_v21, %v275_v34  ;;  %v400_v44 = vmul.f32 %v2727_v22, %v275_v34  ;;  %v774_v45 = vunpack.c.l.bf16 %v2311_v29  ;;  %v2413_v23 = vld [vmem:[%s2722_s16 + $0x18] sm:$0xe] }
  0x20   : > { %v1213_v36 = vadd.f32 %v1145_v14, %v1024_v25  ;;  %v2802_v46 = vmul.f32 %v2727_v22, %v378_v38  ;;  %v590_v48 = vmul.f32 %v2730_v24, %v568_v40  ;;  %v2806_v50 = vmul.f32 %v2730_v24, %v378_v38  ;;  %v248_v38 = vld [vmem:[%s2722_s16 + $0xc] sm:$0x7] }
  0x21   : > { %v836_v54 = vadd.f32 %v808_v28, %v716_v41  ;;  %v458_v55 = vrot.slane %v400_v44, 1  ;;  %v809_v49 = vmul.f32 %v2742_v39, %v774_v45  ;;  %v878_v57 = vunpack.c.h.bf16 %v2311_v29  ;;  %v2869_v41 = vld [vmem:[%s2851_s26] ss:$8 sps:$4 sm:$0xff]  }
  0x22   : > { %v1333_v47 = vadd.f32 %v1305_v6, %v1213_v36  ;;  %v459_v59 = vrot.slane %v2802_v46, 1  ;;  %v648_v60 = vrot.slane %v590_v48, 2  ;;  %v649_v61 = vrot.slane %v2806_v50, 2 }
  0x23   : > { %v1025_v0 = vadd.f32 %v955_v51, %v836_v54  ;;  %v900_v2 = vmul.f32 %v2735_v33, %v774_v45  ;;  %v2822_v3 = vmul.f32 %v2735_v33, %v878_v57  ;;  %v1067_v4 = vunpack.c.l.bf16 %v2354_v53  ;;  %v2837_v51 = vld [vmem:[%s4127_s4] ss:$0 sm:$0xff]  ;;  %v2312_v53 = vld [vmem:[%s2722_s16 + $0x14] sm:$0x7]  ;;  %v2371_v54 = vld [vmem:[%s2722_s16 + $0x1c] sm:$0x7] }
  0x24   : > { %v1522_v58 = vadd.f32 %v1454_v30, %v1333_v47  ;;  %v460_v8 = vsel %vm454_vm0, %v458_v55, %v459_v59  ;;  %v650_v10 = vsel %vm644_vm1, %v648_v60, %v649_v61  ;;  %v2832_v43 = vmul.f32 %v2737_v35, %v878_v57  ;;  %v249_v57 = vld [vmem:[%s2722_s16 + $0x10] sm:$0xff]  }
  0x25   : > { %v1214_v11 = vadd.f32 %v1144_v63, %v1025_v0  ;;  %v527_v12 = vadd.f32 %v460_v8, %v309_v42  ;;  %v957_v13 = vrot.slane %v900_v2, 1  ;;  %v958_v16 = vrot.slane %v2822_v3, 1 }
  0x26   : > { %v1711_v6 = vadd.f32 %v1643_v37, %v1522_v58  ;;  %v1089_v14 = vmul.f32 %v2737_v35, %v1067_v4  ;;  %v1147_v18 = vrot.slane %v2832_v43, 2  ;;  %v1272_v20 = vunpack.c.l.bf16 %v2370_v5 }
  0x27   : > { %v1334_v52 = vadd.f32 %v1306_v32, %v1214_v11  ;;  %v717_v63 = vadd.f32 %v650_v10, %v527_v12  ;;  %v959_v25 = vsel %vm454_vm0, %v957_v13, %v958_v16  ;;  %v1376_v26 = vunpack.c.h.bf16 %v2370_v5  ;;  %v555_v12 = vld [vmem:[%s2722_s16 + $0x10] sm:$0xe] }
  0x28   : > { %v1746_v17 = vmul.f32 %v2816_v62, %v1711_v6  ;;  %v1146_v29 = vrot.slane %v1089_v14, 2  ;;  %v1307_v30 = vmul.f32 %v2758_v56, %v1272_v20  ;;  %v1398_v31 = vmul.f32 %v2765_v1, %v1272_v20 }
  0x29   : > { %v1523_v34 = vadd.f32 %v1453_v19, %v1334_v52  ;;  %v837_v32 = vadd.f32 %v809_v49, %v717_v63  ;;  %v2864_v36 = vmul.f32 %v2765_v1, %v1376_v26  ;;  %v1565_v37 = vunpack.c.l.bf16 %v2413_v23  ;;  %v2313_v23 = vld [vmem:[%s2722_s16 + $0x18] sm:$0xff]  }
  0x2a   : > { %v2857_v28 = vadd.f32 %v2837_v51, %v1746_v17  ;;  %v1148_v42 = vsel %vm644_vm1, %v1146_v29, %v1147_v18  ;;  %v1455_v44 = vrot.slane %v1398_v31, 1  ;;  %v2875_v9 = vmul.f32 %v2772_v7, %v1376_v26 }
  0x2b   : > { %v1712_v19 = vadd.f32 %v1642_v27, %v1523_v34  ;;  %v1026_v45 = vadd.f32 %v959_v25, %v837_v32  ;;  %v1456_v47 = vrot.slane %v2864_v36, 1  ;;  %v1587_v48 = vmul.f32 %v2772_v7, %v1565_v37  ;;  %v2355_v37 = vld [vmem:[%s2722_s16 + $0x18] sm:$0xe]  ;;  %v250_v36 = vld [vmem:[%s2722_s16 + $0x14] sm:$0x7] }
  0x2c   : > { %v2429_v40 = vmul.f32 -1.442695, %v2857_v28  ;;  %v1645_v55 = vrot.slane %v2875_v9, 2  ;;  %v276_v49 = vunpack.c.l.bf16 %v248_v38  ;;  %v2033_v58 = vunpack.c.l.bf16 %v2869_v41 }
  0x2d   : > { %v1747_v60 = vmul.f32 %v2816_v62, %v1712_v19  ;;  %v1215_v15 = vadd.f32 %v1148_v42, %v1026_v45  ;;  %v1644_v27 = vrot.slane %v1587_v48, 2  ;;  %v1457_v0 = vsel %vm454_vm0, %v1455_v44, %v1456_v47 }
  0x2e   : > { %2525 = vpow2.f32 %v2429_v40  ;;  %v310_v2 = vmul.f32 %v2725_v21, %v276_v49  ;;  %v775_v4 = vunpack.c.l.bf16 %v2312_v53  ;;  %v1273_v5 = vunpack.c.l.bf16 %v2371_v54 }
  0x2f   : > { %v2892_v6 = vadd.f32 %v2837_v51, %v1747_v60  ;;  %v1335_v8 = vadd.f32 %v1307_v30, %v1215_v15  ;;  %v1646_v10 = vsel %vm644_vm1, %v1644_v27, %v1645_v55  ;;  %v277_v11 = vunpack.c.l.bf16 %v249_v57 }
  0x30   : > { %v528_v13 = vadd.f32 %v459_v59, %v310_v2  ;;  %v810_v17 = vmul.f32 %v2742_v39, %v775_v4  ;;  %v1308_v14 = vmul.f32 %v2758_v56, %v1273_v5  ;;  %v379_v20 = vunpack.c.h.bf16 %v249_v57  ;;  %v2372_v2 = vld [vmem:[%s2722_s16 + $0x20] sm:$0xff]  }
  0x31   : > { %v2430_v52 = vmul.f32 -1.442695, %v2892_v6  ;;  %v1524_v63 = vadd.f32 %v1457_v0, %v1335_v8  ;;  %v311_v25 = vmul.f32 %v2725_v21, %v277_v11  ;;  %v402_v26 = vmul.f32 %v2727_v22, %v277_v11 }
  0x32   : > { %v718_v29 = vadd.f32 %v649_v61, %v528_v13  ;;  %v2909_v46 = vmul.f32 %v2727_v22, %v379_v20  ;;  %v569_v59 = vunpack.c.l.bf16 %v555_v12  ;;  %v2912_v30 = vmul.f32 %v2730_v24, %v379_v20 }
  0x33   : > { %2527 = vpow2.f32 %v2430_v52  ;;  %v1713_v31 = vadd.f32 %v1646_v10, %v1524_v63  ;;  %v461_v34 = vrot.slane %v402_v26, 1  ;;  %v776_v32 = vunpack.c.l.bf16 %v2313_v23 }
  0x34   : > { %v838_v38 = vadd.f32 %v810_v17, %v718_v29  ;;  %v462_v40 = vrot.slane %v2909_v46, 1  ;;  %v592_v42 = vmul.f32 %v2730_v24, %v569_v59  ;;  %v652_v50 = vrot.slane %v2912_v30, 2  ;;  %v2414_v17 = vld [vmem:[%s2722_s16 + $0x20] sm:$0xe]  ;;  %v2954_v59 = vld [vmem:[%s2851_s26 + $0x4] sm:$0x7] }
  0x35   : > { %v1748_v61 = vmul.f32 %v2816_v62, %v1713_v31  ;;  %v811_v44 = vmul.f32 %v2742_v39, %v776_v32  ;;  %v879_v19 = vunpack.c.h.bf16 %v2313_v23  ;;  %v902_v45 = vmul.f32 %v2735_v33, %v776_v32 }
  0x36   : > { %v1027_v53 = vadd.f32 %v958_v16, %v838_v38  ;;  %v463_v54 = vsel %vm454_vm0, %v461_v34, %v462_v40  ;;  %v651_v49 = vrot.slane %v592_v42, 2  ;;  %v1068_v57 = vunpack.c.l.bf16 %v2355_v37 }
  0x37   : > { %v2927_v15 = vadd.f32 %v2837_v51, %v1748_v61  ;;  %v529_v27 = vadd.f32 %v463_v54, %v311_v25  ;;  %v2930_v0 = vmul.f32 %v2735_v33, %v879_v19  ;;  %v960_v4 = vrot.slane %v902_v45, 1  ;;  %v2373_v54 = vld [vmem:[%s2722_s16 + $0x24] sm:$0x7] }
  0x38   : > { %v2526_v48 = vpop.eup %2525  ;;  %v1216_v3 = vadd.f32 %v1147_v18, %v1027_v53  ;;  %v653_v16 = vsel %vm644_vm1, %v651_v49, %v652_v50  ;;  %v1091_v5 = vmul.f32 %v2737_v35, %v1068_v57  ;;  %v2942_v13 = vmul.f32 %v2737_v35, %v879_v19  ;;  %v251_v57 = vld [vmem:[%s2722_s16 + $0x18] sm:$0xff]  }
  0x39   : > { %v1893_v60 = vadd.f32 1.0, %v2526_v48  ;;  %v2431_v8 = vmul.f32 -1.442695, %v2927_v15  ;;  %v719_v10 = vadd.f32 %v653_v16, %v529_v27  ;;  %v961_v11 = vrot.slane %v2930_v0, 1 }
  0x3a   : > { %v1336_v12 = vadd.f32 %v1308_v14, %v1216_v3  ;;  %v1149_v43 = vrot.slane %v1091_v5, 2  ;;  %v1274_v18 = vunpack.c.l.bf16 %v2372_v2  ;;  %v1377_v52 = vunpack.c.h.bf16 %v2372_v2 }
  0x3b   : > { %2529 = vrcp.f32 %v1893_v60  ;;  %v839_v20 = vadd.f32 %v811_v44, %v719_v10  ;;  %v962_v23 = vsel %vm454_vm0, %v960_v4, %v961_v11  ;;  %v1150_v14 = vrot.slane %v2942_v13, 2  ;;  %v2314_v44 = vld [vmem:[%s2722_s16 + $0x1c] sm:$0x7] }
  0x3c   : > { %2531 = vpow2.f32 %v2431_v8  ;;  %v1525_v63 = vadd.f32 %v1456_v47, %v1336_v12  ;;  %v1309_v25 = vmul.f32 %v2758_v56, %v1274_v18  ;;  %v1400_v26 = vmul.f32 %v2765_v1, %v1274_v18 }
  0x3d   : > { %v2528_v29 = vpop.eup %2527  ;;  %v1028_v31 = vadd.f32 %v962_v23, %v839_v20  ;;  %v2957_v34 = vmul.f32 %v2765_v1, %v1377_v52  ;;  %v1566_v32 = vunpack.c.l.bf16 %v2414_v17  ;;  %v2960_v37 = vmul.f32 %v2772_v7, %v1377_v52 }
  0x3e   : > { %v1894_v47 = vadd.f32 1.0, %v2528_v29  ;;  %v1714_v38 = vadd.f32 %v1645_v55, %v1525_v63  ;;  %v1151_v42 = vsel %vm644_vm1, %v1149_v43, %v1150_v14  ;;  %v1458_v61 = vrot.slane %v1400_v26, 1 }
  0x3f   : > { %v1217_v19 = vadd.f32 %v1151_v42, %v1028_v31  ;;  %v1459_v45 = vrot.slane %v2957_v34, 1  ;;  %v1589_v48 = vmul.f32 %v2772_v7, %v1566_v32  ;;  %v1648_v53 = vrot.slane %v2960_v37, 2  ;;  %v3058_v34 = vld [vmem:[%s2851_s26 + $0xc] sm:$0x7] }
  0x40   : > { %2533 = vrcp.f32 %v1894_v47  ;;  %v2034_v49 = vunpack.c.l.bf16 %v2954_v59  ;;  %v1749_v9 = vmul.f32 %v2816_v62, %v1714_v38  ;;  %v278_v55 = vunpack.c.l.bf16 %v250_v36 }
  0x41   : > { %v1337_v60 = vadd.f32 %v1309_v25, %v1217_v19  ;;  %v1460_v27 = vsel %vm454_vm0, %v1458_v61, %v1459_v45  ;;  %v1647_v2 = vrot.slane %v1589_v48, 2  ;;  %v777_v3 = vunpack.c.l.bf16 %v2314_v44  ;;  %v556_v25 = vld [vmem:[%s2722_s16 + $0x18] sm:$0xe]  ;;  %v2356_v61 = vld [vmem:[%s2722_s16 + $0x20] sm:$0xe] }
  0x42   : > { %v2035_v16 = vunpack.c.h.bf16 %v2869_v41  ;;  %v2981_v4 = vadd.f32 %v2837_v51, %v1749_v9  ;;  %v312_v5 = vmul.f32 %v2725_v21, %v278_v55  ;;  %v1275_v8 = vunpack.c.l.bf16 %v2373_v54 }
  0x43   : > { %v1526_v12 = vadd.f32 %v1460_v27, %v1337_v60  ;;  %v1649_v43 = vsel %vm644_vm1, %v1647_v2, %v1648_v53  ;;  %v812_v18 = vmul.f32 %v2742_v39, %v777_v3  ;;  %v279_v17 = vunpack.c.l.bf16 %v251_v57 }
  0x44   : > { %v2432_v23 = vmul.f32 -1.442695, %v2981_v4  ;;  %v530_v52 = vadd.f32 %v462_v40, %v312_v5  ;;  %v1310_v63 = vmul.f32 %v2758_v56, %v1275_v8  ;;  %v380_v31 = vunpack.c.h.bf16 %v251_v57  ;;  %v2315_v40 = vld [vmem:[%s2722_s16 + $0x20] sm:$0xff]  }
  0x45   : > { %v2530_v10 = vpop.eup %2529  ;;  %v1715_v29 = vadd.f32 %v1649_v43, %v1526_v12  ;;  %v313_v59 = vmul.f32 %v2725_v21, %v279_v17  ;;  %v404_v32 = vmul.f32 %v2727_v22, %v279_v17  ;;  %v570_v42 = vunpack.c.l.bf16 %v556_v25 }
  0x46   : > { %v1977_v20 = vmul.f32 %v2530_v10, %v2857_v28  ;;  %v2532_v26 = vpop.eup %2531  ;;  %2535 = vpow2.f32 %v2432_v23  ;;  %v720_v46 = vadd.f32 %v652_v50, %v530_v52  ;;  %v3010_v38 = vmul.f32 %v2727_v22, %v380_v31 }
  0x47   : > { %v1895_v36 = vadd.f32 1.0, %v2532_v26  ;;  %v1750_v47 = vmul.f32 %v2816_v62, %v1715_v29  ;;  %v3014_v50 = vmul.f32 %v2730_v24, %v380_v31  ;;  %v594_v54 = vmul.f32 %v2730_v24, %v570_v42 }
  0x48   : > { %v2061_v28 = vadd.f32 %v2033_v58, %v1977_v20  ;;  %v464_v58 = vrot.slane %v404_v32, 1  ;;  %v840_v30 = vadd.f32 %v812_v18, %v720_v46  ;;  %v465_v48 = vrot.slane %v3010_v38, 1  ;;  %v2374_v18 = vld [vmem:[%s2722_s16 + $0x28] sm:$0xff]  }
  0x49   : > { %2537 = vrcp.f32 %v1895_v36  ;;  %v3017_v19 = vadd.f32 %v2837_v51, %v1750_v47  ;;  %v778_v9 = vunpack.c.l.bf16 %v2315_v40  ;;  %v655_v60 = vrot.slane %v3014_v50, 2 }
  0x4a   : > { %v2488_v44 = vpack.c.bf16 %v2061_v28, %v2061_v28  ;;  %v2534_v55 = vpop.eup %2533  ;;  %v1029_v57 = vadd.f32 %v961_v11, %v840_v30  ;;  %v880_v27 = vunpack.c.h.bf16 %v2315_v40  ;;  %v1069_v2 = vunpack.c.l.bf16 %v2356_v61 }
  0x4b   : > { %v1978_v3 = vmul.f32 %v2534_v55, %v2892_v6  ;;  %v2433_v5 = vmul.f32 -1.442695, %v3017_v19  ;;  %v466_v8 = vsel %vm454_vm0, %v464_v58, %v465_v48  ;;  %v654_v10 = vrot.slane %v594_v54, 2 }
  0x4c   : > { %2202 = vst.msk [vmem:[%s3006_s29] sm:$0xf] %vm2201_vm2, %v2488_v44  ;;  %v1218_v12 = vadd.f32 %v1150_v14, %v1029_v57  ;;  %v531_v43 = vadd.f32 %v466_v8, %v313_v59  ;;  %v813_v0 = vmul.f32 %v2742_v39, %v778_v9  ;;  %v904_v11 = vmul.f32 %v2735_v33, %v778_v9  ;;  %v252_v57 = vld [vmem:[%s2722_s16 + $0x1c] sm:$0x7] }
  0x4d   : > { %v2062_v17 = vadd.f32 %v2034_v49, %v1978_v3  ;;  %2539 = vpow2.f32 %v2433_v5  ;;  %v656_v6 = vsel %vm644_vm1, %v654_v10, %v655_v60  ;;  %v3040_v20 = vmul.f32 %v2735_v33, %v880_v27  ;;  %v2316_v3 = vld [vmem:[%s2722_s16 + $0x24] sm:$0x7] }
  0x4e   : > { %v1338_v23 = vadd.f32 %v1310_v63, %v1218_v12  ;;  %v721_v13 = vadd.f32 %v656_v6, %v531_v43  ;;  %v963_v14 = vrot.slane %v904_v11, 1  ;;  %v1093_v52 = vmul.f32 %v2737_v35, %v1069_v2  ;;  %v2415_v63 = vld [vmem:[%s2722_s16 + $0x28] sm:$0xe]  ;;  %v3082_v12 = vld [vmem:[%s2851_s26 + $0x10] ss:$8 sps:$4 sm:$0xff]  }
  0x4f   : > { %v2489_v25 = vpack.c.bf16 %v2062_v17, %v2062_v17  ;;  %v964_v26 = vrot.slane %v3040_v20, 1  ;;  %v3045_v49 = vmul.f32 %v2737_v35, %v880_v27  ;;  %v1276_v29 = vunpack.c.l.bf16 %v2374_v18  ;;  %v2375_v11 = vld [vmem:[%s2722_s16 + $0x2c] sm:$0x7] }
  0x50   : > { %v2536_v59 = vpop.eup %2535  ;;  %v1527_v31 = vadd.f32 %v1459_v45, %v1338_v23  ;;  %v841_v32 = vadd.f32 %v813_v0, %v721_v13  ;;  %v1152_v28 = vrot.slane %v1093_v52, 2  ;;  %v1378_v36 = vunpack.c.h.bf16 %v2374_v18 }
  0x51   : > { %2204 = vst.msk [vmem:[%s3006_s29 + $0x4] sm:$0x7] %vm2203_vm3, %v2489_v25  ;;  %v1896_v46 = vadd.f32 1.0, %v2536_v59  ;;  %v965_v40 = vsel %vm454_vm0, %v963_v14, %v964_v26  ;;  %v1153_v47 = vrot.slane %v3045_v49, 2  ;;  %v1311_v58 = vmul.f32 %v2758_v56, %v1276_v29  ;;  %v253_v14 = vld [vmem:[%s2722_s16 + $0x20] sm:$0xff]  }
  0x52   : > { %v1716_v45 = vadd.f32 %v1648_v53, %v1527_v31  ;;  %v1030_v61 = vadd.f32 %v965_v40, %v841_v32  ;;  %v1402_v44 = vmul.f32 %v2765_v1, %v1276_v29  ;;  %v3064_v30 = vmul.f32 %v2765_v1, %v1378_v36  ;;  %v557_v31 = vld [vmem:[%s2722_s16 + $0x20] sm:$0xe] }
  0x53   : > { %v2538_v42 = vpop.eup %2537  ;;  %2541 = vrcp.f32 %v1896_v46  ;;  %v1154_v9 = vsel %vm644_vm1, %v1152_v28, %v1153_v47  ;;  %v1567_v55 = vunpack.c.l.bf16 %v2415_v63  ;;  %v3079_v10 = vmul.f32 %v2772_v7, %v1378_v36 }
  0x54   : > { %v1979_v54 = vmul.f32 %v2538_v42, %v2927_v15  ;;  %v1751_v37 = vmul.f32 %v2816_v62, %v1716_v45  ;;  %v1219_v53 = vadd.f32 %v1154_v9, %v1030_v61  ;;  %v1461_v27 = vrot.slane %v1402_v44, 1  ;;  %v2317_v42 = vld [vmem:[%s2722_s16 + $0x28] sm:$0xff]  }
  0x55   : > { %v1462_v2 = vrot.slane %v3064_v30, 1  ;;  %v2036_v15 = vunpack.c.l.bf16 %v3058_v34  ;;  %v1591_v8 = vmul.f32 %v2772_v7, %v1567_v55  ;;  %v1651_v23 = vrot.slane %v3079_v10, 2 }
  0x56   : > { %v2063_v5 = vadd.f32 %v2035_v16, %v1979_v54  ;;  %v3085_v43 = vadd.f32 %v2837_v51, %v1751_v37  ;;  %v1339_v0 = vadd.f32 %v1311_v58, %v1219_v53  ;;  %v280_v16 = vunpack.c.l.bf16 %v252_v57 }
  0x57   : > { %v1463_v41 = vsel %vm454_vm0, %v1461_v27, %v1462_v2  ;;  %v2540_v18 = vpop.eup %2539  ;;  %v1650_v6 = vrot.slane %v1591_v8, 2  ;;  %v779_v13 = vunpack.c.l.bf16 %v2316_v3  ;;  %v2037_v32 = vunpack.c.l.bf16 %v3082_v12 }
  0x58   : > { %v2490_v17 = vpack.c.bf16 %v2063_v5, %v2063_v5  ;;  %v1897_v52 = vadd.f32 1.0, %v2540_v18  ;;  %v2434_v25 = vmul.f32 -1.442695, %v3085_v43  ;;  %v1528_v29 = vadd.f32 %v1463_v41, %v1339_v0  ;;  %v2357_v5 = vld [vmem:[%s2722_s16 + $0x28] sm:$0xe] }
  0x59   : > { %v314_v59 = vmul.f32 %v2725_v21, %v280_v16  ;;  %v1652_v28 = vsel %vm644_vm1, %v1650_v6, %v1651_v23  ;;  %v814_v36 = vmul.f32 %v2742_v39, %v779_v13  ;;  %v1277_v63 = vunpack.c.l.bf16 %v2375_v11 }
  0x5a   : > { %2205 = vst.msk [vmem:[%s3006_s29 + $0x8] sm:$0xf] %vm2201_vm2, %v2490_v17  ;;  %2543 = vrcp.f32 %v1897_v52  ;;  %v1717_v46 = vadd.f32 %v1652_v28, %v1528_v29  ;;  %v281_v58 = vunpack.c.l.bf16 %v253_v14  ;;  %v381_v45 = vunpack.c.h.bf16 %v253_v14 }
  0x5b   : > { %v532_v40 = vadd.f32 %v465_v48, %v314_v59  ;;  %2545 = vpow2.f32 %v2434_v25  ;;  %v1312_v34 = vmul.f32 %v2758_v56, %v1277_v63  ;;  %v571_v61 = vunpack.c.l.bf16 %v557_v31  ;;  %v2376_v25 = vld [vmem:[%s2722_s16 + $0x30] sm:$0xff]  }
  0x5c   : > { %v1752_v44 = vmul.f32 %v2816_v62, %v1717_v46  ;;  %v315_v9 = vmul.f32 %v2725_v21, %v281_v58  ;;  %v406_v55 = vmul.f32 %v2727_v22, %v281_v58  ;;  %v3113_v38 = vmul.f32 %v2727_v22, %v381_v45 }
  0x5d   : > { %v722_v54 = vadd.f32 %v655_v60, %v532_v40  ;;  %v2542_v57 = vpop.eup %2541  ;;  %v596_v48 = vmul.f32 %v2730_v24, %v571_v61  ;;  %v3117_v37 = vmul.f32 %v2730_v24, %v381_v45  ;;  %v780_v53 = vunpack.c.l.bf16 %v2317_v42 }
  0x5e   : > { %v1980_v27 = vmul.f32 %v2542_v57, %v2981_v4  ;;  %v3121_v3 = vadd.f32 %v2837_v51, %v1752_v44  ;;  %v467_v60 = vrot.slane %v406_v55, 1  ;;  %v468_v8 = vrot.slane %v3113_v38, 1  ;;  %v2416_v55 = vld [vmem:[%s2722_s16 + $0x30] sm:$0xe] }
  0x5f   : > { %v842_v50 = vadd.f32 %v814_v36, %v722_v54  ;;  %v657_v0 = vrot.slane %v596_v48, 2  ;;  %v658_v41 = vrot.slane %v3117_v37, 2  ;;  %v815_v16 = vmul.f32 %v2742_v39, %v780_v53 }
  0x60   : > { %v2064_v11 = vadd.f32 %v2036_v15, %v1980_v27  ;;  %v2435_v18 = vmul.f32 -1.442695, %v3121_v3  ;;  %v881_v17 = vunpack.c.h.bf16 %v2317_v42  ;;  %v469_v6 = vsel %vm454_vm0, %v467_v60, %v468_v8  ;;  %v2318_v60 = vld [vmem:[%s2722_s16 + $0x2c] sm:$0x7] }
  0x61   : > { %v1031_v4 = vadd.f32 %v964_v26, %v842_v50  ;;  %v659_v13 = vsel %vm644_vm1, %v657_v0, %v658_v41  ;;  %v906_v14 = vmul.f32 %v2735_v33, %v780_v53  ;;  %v1070_v52 = vunpack.c.l.bf16 %v2357_v5  ;;  %v254_v50 = vld [vmem:[%s2722_s16 + $0x24] sm:$0x7] }
  0x62   : > { %v2491_v15 = vpack.c.bf16 %v2064_v11, %v2064_v11  ;;  %2547 = vpow2.f32 %v2435_v18  ;;  %v533_v26 = vadd.f32 %v469_v6, %v315_v9  ;;  %v3141_v29 = vmul.f32 %v2735_v33, %v881_v17  ;;  %v2377_v18 = vld [vmem:[%s2722_s16 + $0x34] sm:$0x7] }
  0x63   : > { %v1220_v20 = vadd.f32 %v1153_v47, %v1031_v4  ;;  %v966_v59 = vrot.slane %v906_v14, 1  ;;  %v1095_v31 = vmul.f32 %v2737_v35, %v1070_v52  ;;  %v3145_v28 = vmul.f32 %v2737_v35, %v881_v17 }
  0x64   : > { %v2544_v36 = vpop.eup %2543  ;;  %2206 = vst.msk [vmem:[%s3006_s29 + $0xc] sm:$0x7] %vm2203_vm3, %v2491_v15  ;;  %v723_v46 = vadd.f32 %v659_v13, %v533_v26  ;;  %v1278_v40 = vunpack.c.l.bf16 %v2376_v25  ;;  %v1379_v49 = vunpack.c.h.bf16 %v2376_v25  ;;  %v967_v42 = vrot.slane %v3141_v29, 1 }
  0x65   : > { %v1340_v63 = vadd.f32 %v1312_v34, %v1220_v20  ;;  %v2546_v47 = vpop.eup %2545  ;;  %v1981_v58 = vmul.f32 %v2544_v36, %v3017_v19  ;;  %v1155_v45 = vrot.slane %v1095_v31, 2  ;;  %v1156_v61 = vrot.slane %v3145_v28, 2  ;;  %v3159_v19 = vld [vmem:[%s2851_s26 + $0x14] sm:$0x7]  ;;  %v255_v31 = vld [vmem:[%s2722_s16 + $0x28] sm:$0xff]  }
  0x66   : > { %v1898_v44 = vadd.f32 1.0, %v2546_v47  ;;  %v843_v9 = vadd.f32 %v815_v16, %v723_v46  ;;  %v1313_v34 = vmul.f32 %v2758_v56, %v1278_v40  ;;  %v968_v48 = vsel %vm454_vm0, %v966_v59, %v967_v42 }
  0x67   : > { %v1529_v54 = vadd.f32 %v1462_v2, %v1340_v63  ;;  %v2065_v57 = vadd.f32 %v2037_v32, %v1981_v58  ;;  %v1157_v53 = vsel %vm644_vm1, %v1155_v45, %v1156_v61  ;;  %v1404_v30 = vmul.f32 %v2765_v1, %v1278_v40 }
  0x68   : > { %2549 = vrcp.f32 %v1898_v44  ;;  %v1032_v27 = vadd.f32 %v968_v48, %v843_v9  ;;  %v3171_v32 = vmul.f32 %v2765_v1, %v1379_v49  ;;  %v1568_v16 = vunpack.c.l.bf16 %v2416_v55 }
  0x69   : > { %v1718_v2 = vadd.f32 %v1651_v23, %v1529_v54  ;;  %v2492_v5 = vpack.c.bf16 %v2065_v57, %v2065_v57  ;;  %v1464_v0 = vrot.slane %v1404_v30, 1  ;;  %v3176_v11 = vmul.f32 %v2772_v7, %v1379_v49  ;;  %v558_v49 = vld [vmem:[%s2722_s16 + $0x28] sm:$0xe]  ;;  %v2319_v54 = vld [vmem:[%s2722_s16 + $0x30] sm:$0xff]  }
  0x6a   : > { %v2038_v4 = vunpack.c.l.bf16 %v3159_v19  ;;  %v1221_v10 = vadd.f32 %v1157_v53, %v1032_v27  ;;  %v1465_v23 = vrot.slane %v3171_v32, 1  ;;  %v1593_v6 = vmul.f32 %v2772_v7, %v1568_v16 }
  0x6b   : > { %v1753_v17 = vmul.f32 %v2816_v62, %v1718_v2  ;;  %2207 = vst.msk [vmem:[%s3006_s29 + $0x10] sm:$0xf] %vm2201_vm2, %v2492_v5  ;;  %v1654_v13 = vrot.slane %v3176_v11, 2  ;;  %v282_v14 = vunpack.c.l.bf16 %v254_v50  ;;  %v781_v52 = vunpack.c.l.bf16 %v2318_v60 }
  0x6c   : > { %v2548_v25 = vpop.eup %2547  ;;  %v1341_v20 = vadd.f32 %v1313_v34, %v1221_v10  ;;  %v1466_v26 = vsel %vm454_vm0, %v1464_v0, %v1465_v23  ;;  %v1279_v59 = vunpack.c.l.bf16 %v2377_v18  ;;  %v2039_v63 = vunpack.c.h.bf16 %v3082_v12  ;;  %v2358_v18 = vld [vmem:[%s2722_s16 + $0x30] sm:$0xe] }
  0x6d   : > { %v3187_v15 = vadd.f32 %v2837_v51, %v1753_v17  ;;  %v1899_v36 = vadd.f32 1.0, %v2548_v25  ;;  %v1653_v46 = vrot.slane %v1593_v6, 2  ;;  %v316_v40 = vmul.f32 %v2725_v21, %v282_v14 }
  0x6e   : > { %v1530_v58 = vadd.f32 %v1466_v26, %v1341_v20  ;;  %v816_v45 = vmul.f32 %v2742_v39, %v781_v52  ;;  %v1314_v44 = vmul.f32 %v2758_v56, %v1279_v59  ;;  %v283_v55 = vunpack.c.l.bf16 %v255_v31 }
  0x6f   : > { %v2436_v47 = vmul.f32 -1.442695, %v3187_v15  ;;  %2551 = vrcp.f32 %v1899_v36  ;;  %v1655_v9 = vsel %vm644_vm1, %v1653_v46, %v1654_v13  ;;  %v534_v34 = vadd.f32 %v468_v8, %v316_v40  ;;  %v2378_v46 = vld [vmem:[%s2722_s16 + $0x38] sm:$0xff]  }
  0x70   : > { %v1719_v57 = vadd.f32 %v1655_v9, %v1530_v58  ;;  %v382_v19 = vunpack.c.h.bf16 %v255_v31  ;;  %v572_v48 = vunpack.c.l.bf16 %v558_v49  ;;  %v317_v30 = vmul.f32 %v2725_v21, %v283_v55 }
  0x71   : > { %2553 = vpow2.f32 %v2436_v47  ;;  %v724_v53 = vadd.f32 %v658_v41, %v534_v34  ;;  %v408_v2 = vmul.f32 %v2727_v22, %v283_v55  ;;  %v782_v27 = vunpack.c.l.bf16 %v2319_v54 }
  0x72   : > { %v2550_v50 = vpop.eup %2549  ;;  %v1754_v60 = vmul.f32 %v2816_v62, %v1719_v57  ;;  %v3211_v38 = vmul.f32 %v2727_v22, %v382_v19  ;;  %v598_v8 = vmul.f32 %v2730_v24, %v572_v48  ;;  %v3215_v5 = vmul.f32 %v2730_v24, %v382_v19 }
  0x73   : > { %v1982_v0 = vmul.f32 %v2550_v50, %v3085_v43  ;;  %v844_v37 = vadd.f32 %v816_v45, %v724_v53  ;;  %v470_v41 = vrot.slane %v408_v2, 1  ;;  %v817_v16 = vmul.f32 %v2742_v39, %v782_v27  ;;  %v3259_v50 = vld [vmem:[%s2851_s26 + $0x1c] sm:$0x7] }
  0x74   : > { %v3221_v17 = vadd.f32 %v2837_v51, %v1754_v60  ;;  %v471_v10 = vrot.slane %v3211_v38, 1  ;;  %v660_v6 = vrot.slane %v598_v8, 2  ;;  %v661_v14 = vrot.slane %v3215_v5, 2 }
  0x75   : > { %v2066_v52 = vadd.f32 %v2038_v4, %v1982_v0  ;;  %v1033_v25 = vadd.f32 %v967_v42, %v844_v37  ;;  %v882_v20 = vunpack.c.h.bf16 %v2319_v54  ;;  %v908_v43 = vmul.f32 %v2735_v33, %v782_v27  ;;  %v2417_v27 = vld [vmem:[%s2722_s16 + $0x38] sm:$0xe]  ;;  %v2320_v37 = vld [vmem:[%s2722_s16 + $0x34] sm:$0x7] }
  0x76   : > { %v2437_v26 = vmul.f32 -1.442695, %v3221_v17  ;;  %v472_v59 = vsel %vm454_vm0, %v470_v41, %v471_v10  ;;  %v662_v31 = vsel %vm644_vm1, %v660_v6, %v661_v14  ;;  %v1071_v36 = vunpack.c.l.bf16 %v2358_v18 }
  0x77   : > { %v2493_v4 = vpack.c.bf16 %v2066_v52, %v2066_v52  ;;  %v1222_v29 = vadd.f32 %v1156_v61, %v1033_v25  ;;  %v535_v42 = vadd.f32 %v472_v59, %v317_v30  ;;  %v3239_v40 = vmul.f32 %v2735_v33, %v882_v20  ;;  %v2379_v52 = vld [vmem:[%s2722_s16 + $0x3c] sm:$0x7] }
  0x78   : > { %2555 = vpow2.f32 %v2437_v26  ;;  %v969_v49 = vrot.slane %v908_v43, 1  ;;  %v1097_v47 = vmul.f32 %v2737_v35, %v1071_v36  ;;  %v3243_v58 = vmul.f32 %v2737_v35, %v882_v20  ;;  %v3279_v20 = vld [vmem:[%s2851_s26 + $0x20] ss:$8 sps:$4 sm:$0xff]  }
  0x79   : > { %v2552_v45 = vpop.eup %2551  ;;  %2208 = vst.msk [vmem:[%s3006_s29 + $0x14] sm:$0x7] %vm2203_vm3, %v2493_v4  ;;  %v1342_v54 = vadd.f32 %v1314_v44, %v1222_v29  ;;  %v725_v9 = vadd.f32 %v662_v31, %v535_v42  ;;  %v970_v28 = vrot.slane %v3239_v40, 1  ;;  %v1280_v61 = vunpack.c.l.bf16 %v2378_v46 }
  0x7a   : > { %v1983_v55 = vmul.f32 %v2552_v45, %v3121_v3  ;;  %v1158_v57 = vrot.slane %v1097_v47, 2  ;;  %v1159_v19 = vrot.slane %v3243_v58, 2  ;;  %v1380_v48 = vunpack.c.h.bf16 %v2378_v46 }
  0x7b   : > { %v2554_v34 = vpop.eup %2553  ;;  %v1531_v30 = vadd.f32 %v1465_v23, %v1342_v54  ;;  %v845_v2 = vadd.f32 %v817_v16, %v725_v9  ;;  %v971_v44 = vsel %vm454_vm0, %v969_v49, %v970_v28  ;;  %v1315_v32 = vmul.f32 %v2758_v56, %v1280_v61  ;;  %v257_v49 = vld [vmem:[%s2722_s16 + $0x30] sm:$0xff]  }
  0x7c   : > { %v1900_v53 = vadd.f32 1.0, %v2554_v34  ;;  %v2067_v3 = vadd.f32 %v2039_v63, %v1983_v55  ;;  %v1160_v60 = vsel %vm644_vm1, %v1158_v57, %v1159_v19  ;;  %v1406_v23 = vmul.f32 %v2765_v1, %v1280_v61  ;;  %v256_v63 = vld [vmem:[%s2722_s16 + $0x2c] sm:$0x7]  ;;  %v559_v34 = vld [vmem:[%s2722_s16 + $0x30] sm:$0xe]  ;;  %v2321_v55 = vld [vmem:[%s2722_s16 + $0x38] sm:$0xff]  }
  0x7d   : > { %v1720_v8 = vadd.f32 %v1654_v13, %v1531_v30  ;;  %v1034_v0 = vadd.f32 %v971_v44, %v845_v2  ;;  %v3269_v12 = vmul.f32 %v2765_v1, %v1380_v48  ;;  %v1569_v18 = vunpack.c.l.bf16 %v2417_v27 }
  0x7e   : > { %2557 = vrcp.f32 %v1900_v53  ;;  %v2494_v41 = vpack.c.bf16 %v2067_v3, %v2067_v3  ;;  %v1467_v16 = vrot.slane %v1406_v23, 1  ;;  %v3274_v6 = vmul.f32 %v2772_v7, %v1380_v48 }
  0x7f   : > { %v2040_v25 = vunpack.c.l.bf16 %v3259_v50  ;;  %v1755_v11 = vmul.f32 %v2816_v62, %v1720_v8  ;;  %v1223_v13 = vadd.f32 %v1160_v60, %v1034_v0  ;;  %v1468_v43 = vrot.slane %v3269_v12, 1  ;;  %v3365_v12 = vld [vmem:[%s2851_s26 + $0x24] sm:$0x7] }
  0x80   : > { %2209 = vst.msk [vmem:[%s3006_s29 + $0x18] sm:$0xf] %vm2201_vm2, %v2494_v41  ;;  %v1595_v26 = vmul.f32 %v2772_v7, %v1569_v18  ;;  %v1657_v59 = vrot.slane %v3274_v6, 2  ;;  %v284_v31 = vunpack.c.l.bf16 %v256_v63  ;;  %v783_v36 = vunpack.c.l.bf16 %v2320_v37  ;;  %v3381_v6 = vld [vmem:[%s4126_s3] ss:$0 sm:$0xff] }
  0x81   : > { %v3288_v46 = vadd.f32 %v2837_v51, %v1755_v11  ;;  %v1343_v4 = vadd.f32 %v1315_v32, %v1223_v13  ;;  %v1469_v29 = vsel %vm454_vm0, %v1467_v16, %v1468_v43  ;;  %v1281_v42 = vunpack.c.l.bf16 %v2379_v52  ;;  %v2359_v52 = vld [vmem:[%s2722_s16 + $0x38] sm:$0xe] }
  0x82   : > { %v2556_v47 = vpop.eup %2555  ;;  %v2041_v45 = vunpack.c.l.bf16 %v3279_v20  ;;  %v1656_v54 = vrot.slane %v1595_v26, 2  ;;  %v318_v9 = vmul.f32 %v2725_v21, %v284_v31  ;;  %v818_v61 = vmul.f32 %v2742_v39, %v783_v36 }
  0x83   : > { %v1901_v57 = vadd.f32 1.0, %v2556_v47  ;;  %v2438_v48 = vmul.f32 -1.442695, %v3288_v46  ;;  %v1532_v53 = vadd.f32 %v1469_v29, %v1343_v4  ;;  %v1316_v30 = vmul.f32 %v2758_v56, %v1281_v42  ;;  %v2380_v47 = vld [vmem:[%s2722_s16 + $0x40] sm:$0xff]  }
  0x84   : > { %v1658_v2 = vsel %vm644_vm1, %v1656_v54, %v1657_v59  ;;  %v536_v44 = vadd.f32 %v471_v10, %v318_v9  ;;  %v285_v27 = vunpack.c.l.bf16 %v257_v49  ;;  %v383_v3 = vunpack.c.h.bf16 %v257_v49  ;;  %v2418_v9 = vld [vmem:[%s2722_s16 + $0x40] sm:$0xe] }
  0x85   : > { %2559 = vrcp.f32 %v1901_v57  ;;  %v1721_v50 = vadd.f32 %v1658_v2, %v1532_v53  ;;  %v573_v60 = vunpack.c.l.bf16 %v559_v34  ;;  %v784_v32 = vunpack.c.l.bf16 %v2321_v55 }
  0x86   : > { %2561 = vpow2.f32 %v2438_v48  ;;  %v726_v23 = vadd.f32 %v661_v14, %v536_v44  ;;  %v319_v8 = vmul.f32 %v2725_v21, %v285_v27  ;;  %v410_v0 = vmul.f32 %v2727_v22, %v285_v27 }
  0x87   : > { %v1756_v37 = vmul.f32 %v2816_v62, %v1721_v50  ;;  %v3312_v38 = vmul.f32 %v2727_v22, %v383_v3  ;;  %v600_v10 = vmul.f32 %v2730_v24, %v573_v60  ;;  %v3316_v41 = vmul.f32 %v2730_v24, %v383_v3 }
  0x88   : > { %v2558_v63 = vpop.eup %2557  ;;  %v846_v18 = vadd.f32 %v818_v61, %v726_v23  ;;  %v473_v5 = vrot.slane %v410_v0, 1  ;;  %v819_v14 = vmul.f32 %v2742_v39, %v784_v32  ;;  %v910_v4 = vmul.f32 %v2735_v33, %v784_v32 }
  0x89   : > { %v1984_v16 = vmul.f32 %v2558_v63, %v3187_v15  ;;  %v3322_v11 = vadd.f32 %v2837_v51, %v1756_v37  ;;  %v474_v62 = vrot.slane %v3312_v38, 1  ;;  %v663_v13 = vrot.slane %v600_v10, 2 }
  0x8a   : > { %v664_v26 = vrot.slane %v3316_v41, 2  ;;  %v1035_v36 = vadd.f32 %v970_v28, %v846_v18  ;;  %v883_v15 = vunpack.c.h.bf16 %v2321_v55  ;;  %v1072_v49 = vunpack.c.l.bf16 %v2359_v52  ;;  %v258_v18 = vld [vmem:[%s2722_s16 + $0x34] sm:$0x7] }
  0x8b   : > { %v2068_v31 = vadd.f32 %v2040_v25, %v1984_v16  ;;  %v2439_v29 = vmul.f32 -1.442695, %v3322_v11  ;;  %v475_v51 = vsel %vm454_vm0, %v473_v5, %v474_v62  ;;  %v972_v61 = vrot.slane %v910_v4, 1 }
  0x8c   : > { %v665_v42 = vsel %vm644_vm1, %v663_v13, %v664_v26  ;;  %v1224_v40 = vadd.f32 %v1159_v19, %v1035_v36  ;;  %v537_v28 = vadd.f32 %v475_v51, %v319_v8  ;;  %v3340_v54 = vmul.f32 %v2735_v33, %v883_v15 }
  0x8d   : > { %v2495_v25 = vpack.c.bf16 %v2068_v31, %v2068_v31  ;;  %2563 = vpow2.f32 %v2439_v29  ;;  %v1099_v34 = vmul.f32 %v2737_v35, %v1072_v49  ;;  %v3345_v55 = vmul.f32 %v2737_v35, %v883_v15  ;;  %v2381_v15 = vld [vmem:[%s2722_s16 + $0x44] sm:$0x7]  ;;  %v3393_v49 = vld [vmem:[%s4127_s4] ss:$0 sm:$0xff] }
  0x8e   : > { %v1344_v57 = vadd.f32 %v1316_v30, %v1224_v40  ;;  %v727_v48 = vadd.f32 %v665_v42, %v537_v28  ;;  %v973_v53 = vrot.slane %v3340_v54, 1  ;;  %v1282_v58 = vunpack.c.l.bf16 %v2380_v47 }
  0x8f   : > { %2210 = vst.msk [vmem:[%s3006_s29 + $0x1c] sm:$0x7] %vm2203_vm3, %v2495_v25  ;;  %v2560_v19 = vpop.eup %2559  ;;  %v1161_v2 = vrot.slane %v1099_v34, 2  ;;  %v1162_v44 = vrot.slane %v3345_v55, 2  ;;  %v1381_v27 = vunpack.c.h.bf16 %v2380_v47  ;;  %v1570_v3 = vunpack.c.l.bf16 %v2418_v9  ;;  %v259_v9 = vld [vmem:[%s2722_s16 + $0x38] sm:$0xff]  }
  0x90   : > { %v2562_v50 = vpop.eup %2561  ;;  %v1985_v60 = vmul.f32 %v2560_v19, %v3221_v17  ;;  %v1533_v32 = vadd.f32 %v1468_v43, %v1344_v57  ;;  %v847_v23 = vadd.f32 %v819_v14, %v727_v48  ;;  %v974_v30 = vsel %vm454_vm0, %v972_v61, %v973_v53  ;;  %v560_v19 = vld [vmem:[%s2722_s16 + $0x38] sm:$0xe] }
  0x91   : > { %v1902_v8 = vadd.f32 1.0, %v2562_v50  ;;  %v1163_v0 = vsel %vm644_vm1, %v1161_v2, %v1162_v44  ;;  %v1317_v63 = vmul.f32 %v2758_v56, %v1282_v58  ;;  %v1408_v37 = vmul.f32 %v2765_v1, %v1282_v58  ;;  %v2323_v2 = vld [vmem:[%s2722_s16 + $0x40] sm:$0xff]  }
  0x92   : > { %v2069_v17 = vadd.f32 %v2041_v45, %v1985_v60  ;;  %v1722_v43 = vadd.f32 %v1657_v59, %v1533_v32  ;;  %v1036_v10 = vadd.f32 %v974_v30, %v847_v23  ;;  %v3370_v16 = vmul.f32 %v2765_v1, %v1381_v27  ;;  %v2322_v45 = vld [vmem:[%s2722_s16 + $0x3c] sm:$0x7] }
  0x93   : > { %2565 = vrcp.f32 %v1902_v8  ;;  %v1470_v5 = vrot.slane %v1408_v37, 1  ;;  %v1597_v14 = vmul.f32 %v2772_v7, %v1570_v3  ;;  %v3375_v52 = vmul.f32 %v2772_v7, %v1381_v27 }
  0x94   : > { %v2496_v13 = vpack.c.bf16 %v2069_v17, %v2069_v17  ;;  %v1757_v59 = vmul.f32 %v3381_v6, %v1722_v43  ;;  %v1225_v31 = vadd.f32 %v1163_v0, %v1036_v10  ;;  %v1471_v36 = vrot.slane %v3370_v16, 1 }
  0x95   : > { %v2042_v4 = vunpack.c.l.bf16 %v3365_v12  ;;  %v1659_v29 = vrot.slane %v1597_v14, 2  ;;  %v1660_v51 = vrot.slane %v3375_v52, 2  ;;  %v286_v42 = vunpack.c.l.bf16 %v258_v18 }
  0x96   : > { %2211 = vst.msk [vmem:[%s3006_s29 + $0x20] sm:$0xf] %vm2201_vm2, %v2496_v13  ;;  %v3396_v47 = vadd.f32 %v3393_v49, %v1757_v59  ;;  %v1345_v25 = vadd.f32 %v1317_v63, %v1225_v31  ;;  %v1472_v40 = vsel %vm454_vm0, %v1470_v5, %v1471_v36  ;;  %v785_v28 = vunpack.c.l.bf16 %v2322_v45  ;;  %v2360_v13 = vld [vmem:[%s2722_s16 + $0x40] sm:$0xe] }
  0x97   : > { %v2564_v61 = vpop.eup %2563  ;;  %v2043_v34 = vunpack.c.h.bf16 %v3279_v20  ;;  %v1661_v57 = vsel %vm644_vm1, %v1659_v29, %v1660_v51  ;;  %v320_v48 = vmul.f32 %v2725_v21, %v286_v42  ;;  %v1283_v58 = vunpack.c.l.bf16 %v2381_v15 }
  0x98   : > { %v1903_v27 = vadd.f32 1.0, %v2564_v61  ;;  %v2440_v3 = vmul.f32 -1.442695, %v3396_v47  ;;  %v1534_v50 = vadd.f32 %v1472_v40, %v1345_v25  ;;  %v820_v60 = vmul.f32 %v2742_v39, %v785_v28 }
  0x99   : > { %v538_v32 = vadd.f32 %v474_v62, %v320_v48  ;;  %v1318_v23 = vmul.f32 %v2758_v56, %v1283_v58  ;;  %v287_v30 = vunpack.c.l.bf16 %v259_v9  ;;  %v384_v8 = vunpack.c.h.bf16 %v259_v9  ;;  %v2382_v48 = vld [vmem:[%s2722_s16 + $0x48] sm:$0xff]  }
  0x9a   : > { %2567 = vrcp.f32 %v1903_v27  ;;  %v1723_v0 = vadd.f32 %v1661_v57, %v1534_v50  ;;  %v574_v63 = vunpack.c.l.bf16 %v560_v19  ;;  %v786_v37 = vunpack.c.l.bf16 %v2323_v2 }
  0x9b   : > { %2569 = vpow2.f32 %v2440_v3  ;;  %v728_v17 = vadd.f32 %v664_v26, %v538_v32  ;;  %v321_v12 = vmul.f32 %v2725_v21, %v287_v30  ;;  %v412_v43 = vmul.f32 %v2727_v22, %v287_v30 }
  0x9c   : > { %v1758_v38 = vmul.f32 %v3381_v6, %v1723_v0  ;;  %v3420_v62 = vmul.f32 %v2727_v22, %v384_v8  ;;  %v602_v10 = vmul.f32 %v2730_v24, %v574_v63  ;;  %v3424_v18 = vmul.f32 %v2730_v24, %v384_v8 }
  0x9d   : > { %v2566_v5 = vpop.eup %2565  ;;  %v848_v14 = vadd.f32 %v820_v60, %v728_v17  ;;  %v476_v45 = vrot.slane %v412_v43, 1  ;;  %v821_v41 = vmul.f32 %v2742_v39, %v786_v37  ;;  %v884_v26 = vunpack.c.h.bf16 %v2323_v2  ;;  %v2419_v2 = vld [vmem:[%s2722_s16 + $0x48] sm:$0xe] }
  0x9e   : > { %v1986_v59 = vmul.f32 %v2566_v5, %v3288_v46  ;;  %v3430_v31 = vadd.f32 %v3393_v49, %v1758_v38  ;;  %v477_v15 = vrot.slane %v3420_v62, 1  ;;  %v666_v29 = vrot.slane %v602_v10, 2 }
  0x9f   : > { %v1037_v42 = vadd.f32 %v973_v53, %v848_v14  ;;  %v667_v25 = vrot.slane %v3424_v18, 2  ;;  %v912_v40 = vmul.f32 %v2735_v33, %v786_v37  ;;  %v3438_v28 = vmul.f32 %v2735_v33, %v884_v26 }
  0xa0   : > { %v2070_v9 = vadd.f32 %v2042_v4, %v1986_v59  ;;  %v2441_v46 = vmul.f32 -1.442695, %v3430_v31  ;;  %v478_v61 = vsel %vm454_vm0, %v476_v45, %v477_v15  ;;  %v1073_v57 = vunpack.c.l.bf16 %v2360_v13 }
  0xa1   : > { %v1226_v54 = vadd.f32 %v1162_v44, %v1037_v42  ;;  %v539_v53 = vadd.f32 %v478_v61, %v321_v12  ;;  %v668_v58 = vsel %vm644_vm1, %v666_v29, %v667_v25  ;;  %v975_v19 = vrot.slane %v912_v40, 1  ;;  %v3485_v42 = vld [vmem:[%s2851_s26 + $0x30] ss:$8 sps:$4 sm:$0xff]  }
  0xa2   : > { %v2497_v4 = vpack.c.bf16 %v2070_v9, %v2070_v9  ;;  %2571 = vpow2.f32 %v2441_v46  ;;  %v976_v27 = vrot.slane %v3438_v28, 1  ;;  %v1101_v3 = vmul.f32 %v2737_v35, %v1073_v57  ;;  %v2383_v9 = vld [vmem:[%s2722_s16 + $0x4c] sm:$0x7]  ;;  %v261_v46 = vld [vmem:[%s2722_s16 + $0x40] sm:$0xff]  }
  0xa3   : > { %v1346_v50 = vadd.f32 %v1318_v23, %v1226_v54  ;;  %v729_v60 = vadd.f32 %v668_v58, %v539_v53  ;;  %v3454_v32 = vmul.f32 %v2737_v35, %v884_v26  ;;  %v1284_v55 = vunpack.c.l.bf16 %v2382_v48  ;;  %v260_v26 = vld [vmem:[%s2722_s16 + $0x3c] sm:$0x7] }
  0xa4   : > { %v2568_v44 = vpop.eup %2567  ;;  %2212 = vst.msk [vmem:[%s3006_s29 + $0x24] sm:$0x7] %vm2203_vm3, %v2497_v4  ;;  %v977_v30 = vsel %vm454_vm0, %v975_v19, %v976_v27  ;;  %v1164_v8 = vrot.slane %v1101_v3, 2  ;;  %v1382_v0 = vunpack.c.h.bf16 %v2382_v48  ;;  %v1571_v63 = vunpack.c.l.bf16 %v2419_v2 }
  0xa5   : > { %v2570_v37 = vpop.eup %2569  ;;  %v1987_v23 = vmul.f32 %v2568_v44, %v3322_v11  ;;  %v1535_v17 = vadd.f32 %v1471_v36, %v1346_v50  ;;  %v849_v12 = vadd.f32 %v821_v41, %v729_v60  ;;  %v1165_v43 = vrot.slane %v3454_v32, 2  ;;  %v3473_v11 = vld [vmem:[%s2851_s26 + $0x2c] sm:$0x7] }
  0xa6   : > { %v1904_v38 = vadd.f32 1.0, %v2570_v37  ;;  %v1319_v10 = vmul.f32 %v2758_v56, %v1284_v55  ;;  %v1410_v5 = vmul.f32 %v2765_v1, %v1284_v55  ;;  %v3468_v14 = vmul.f32 %v2765_v1, %v1382_v0  ;;  %v2325_v37 = vld [vmem:[%s2722_s16 + $0x48] sm:$0xff]  }
  0xa7   : > { %v2071_v45 = vadd.f32 %v2043_v34, %v1987_v23  ;;  %v1724_v16 = vadd.f32 %v1660_v51, %v1535_v17  ;;  %v1038_v36 = vadd.f32 %v977_v30, %v849_v12  ;;  %v1166_v41 = vsel %vm644_vm1, %v1164_v8, %v1165_v43  ;;  %v2324_v34 = vld [vmem:[%s2722_s16 + $0x44] sm:$0x7] }
  0xa8   : > { %2573 = vrcp.f32 %v1904_v38  ;;  %v1473_v13 = vrot.slane %v1410_v5, 1  ;;  %v1474_v59 = vrot.slane %v3468_v14, 1  ;;  %v1599_v20 = vmul.f32 %v2772_v7, %v1571_v63  ;;  %v561_v63 = vld [vmem:[%s2722_s16 + $0x40] sm:$0xe] }
  0xa9   : > { %v2498_v29 = vpack.c.bf16 %v2071_v45, %v2071_v45  ;;  %v1759_v52 = vmul.f32 %v3381_v6, %v1724_v16  ;;  %v1227_v51 = vadd.f32 %v1166_v41, %v1038_v36  ;;  %v3489_v40 = vmul.f32 %v2772_v7, %v1382_v0 }
  0xaa   : > { %v2044_v61 = vunpack.c.l.bf16 %v3473_v11  ;;  %v1475_v57 = vsel %vm454_vm0, %v1473_v13, %v1474_v59  ;;  %v1662_v48 = vrot.slane %v1599_v20, 2  ;;  %v288_v54 = vunpack.c.l.bf16 %v260_v26 }
  0xab   : > { %2213 = vst.msk [vmem:[%s3006_s29 + $0x28] sm:$0xf] %vm2201_vm2, %v2498_v29  ;;  %v3500_v53 = vadd.f32 %v3393_v49, %v1759_v52  ;;  %v1347_v58 = vadd.f32 %v1319_v10, %v1227_v51  ;;  %v1663_v19 = vrot.slane %v3489_v40, 2  ;;  %v787_v2 = vunpack.c.l.bf16 %v2324_v34 }
  0xac   : > { %v2572_v4 = vpop.eup %2571  ;;  %v2045_v3 = vunpack.c.l.bf16 %v3485_v42  ;;  %v322_v50 = vmul.f32 %v2725_v21, %v288_v54  ;;  %v1285_v60 = vunpack.c.l.bf16 %v2383_v9  ;;  %v289_v55 = vunpack.c.l.bf16 %v261_v46 }
  0xad   : > { %v1905_v44 = vadd.f32 1.0, %v2572_v4  ;;  %v2442_v30 = vmul.f32 -1.442695, %v3500_v53  ;;  %v1536_v8 = vadd.f32 %v1475_v57, %v1347_v58  ;;  %v1664_v0 = vsel %vm644_vm1, %v1662_v48, %v1663_v19 }
  0xae   : > { %v540_v23 = vadd.f32 %v477_v15, %v322_v50  ;;  %v822_v17 = vmul.f32 %v2742_v39, %v787_v2  ;;  %v1320_v12 = vmul.f32 %v2758_v56, %v1285_v60  ;;  %v323_v38 = vmul.f32 %v2725_v21, %v289_v55  ;;  %v2384_v60 = vld [vmem:[%s2722_s16 + $0x50] sm:$0xff]  }
  0xaf   : > { %2575 = vrcp.f32 %v1905_v44  ;;  %v1725_v10 = vadd.f32 %v1664_v0, %v1536_v8  ;;  %v385_v5 = vunpack.c.h.bf16 %v261_v46  ;;  %v414_v45 = vmul.f32 %v2727_v22, %v289_v55 }
  0xb0   : > { %2577 = vpow2.f32 %v2442_v30  ;;  %v730_v11 = vadd.f32 %v667_v25, %v540_v23  ;;  %v575_v16 = vunpack.c.l.bf16 %v561_v63  ;;  %v788_v36 = vunpack.c.l.bf16 %v2325_v37  ;;  %v2361_v25 = vld [vmem:[%s2722_s16 + $0x48] sm:$0xe]  ;;  %v2420_v30 = vld [vmem:[%s2722_s16 + $0x50] sm:$0xe] }
  0xb1   : > { %v1760_v62 = vmul.f32 %v3381_v6, %v1725_v10  ;;  %v3521_v15 = vmul.f32 %v2727_v22, %v385_v5  ;;  %v479_v41 = vrot.slane %v414_v45, 1  ;;  %v3524_v26 = vmul.f32 %v2730_v24, %v385_v5 }
  0xb2   : > { %v2574_v13 = vpop.eup %2573  ;;  %v850_v20 = vadd.f32 %v822_v17, %v730_v11  ;;  %v604_v34 = vmul.f32 %v2730_v24, %v575_v16  ;;  %v823_v29 = vmul.f32 %v2742_v39, %v788_v36  ;;  %v885_v18 = vunpack.c.h.bf16 %v2325_v37 }
  0xb3   : > { %v1988_v52 = vmul.f32 %v2574_v13, %v3396_v47  ;;  %v3531_v51 = vadd.f32 %v3393_v49, %v1760_v62  ;;  %v480_v9 = vrot.slane %v3521_v15, 1  ;;  %v670_v46 = vrot.slane %v3524_v26, 2 }
  0xb4   : > { %v1039_v57 = vadd.f32 %v976_v27, %v850_v20  ;;  %v669_v48 = vrot.slane %v604_v34, 2  ;;  %v914_v54 = vmul.f32 %v2735_v33, %v788_v36  ;;  %v3539_v58 = vmul.f32 %v2735_v33, %v885_v18 }
  0xb5   : > { %v2072_v2 = vadd.f32 %v2044_v61, %v1988_v52  ;;  %v2443_v47 = vmul.f32 -1.442695, %v3531_v51  ;;  %v481_v4 = vsel %vm454_vm0, %v479_v41, %v480_v9  ;;  %v1074_v50 = vunpack.c.l.bf16 %v2361_v25 }
  0xb6   : > { %v1228_v28 = vadd.f32 %v1165_v43, %v1039_v57  ;;  %v541_v27 = vadd.f32 %v481_v4, %v323_v38  ;;  %v671_v55 = vsel %vm644_vm1, %v669_v48, %v670_v46  ;;  %v978_v44 = vrot.slane %v914_v54, 1 }
  0xb7   : > { %v2499_v61 = vpack.c.bf16 %v2072_v2, %v2072_v2  ;;  %2579 = vpow2.f32 %v2443_v47  ;;  %v979_v8 = vrot.slane %v3539_v58, 1  ;;  %v1103_v0 = vmul.f32 %v2737_v35, %v1074_v50  ;;  %v263_v47 = vld [vmem:[%s2722_s16 + $0x48] sm:$0xff]  }
  0xb8   : > { %v1348_v63 = vadd.f32 %v1320_v12, %v1228_v28  ;;  %v731_v37 = vadd.f32 %v671_v55, %v541_v27  ;;  %v3555_v23 = vmul.f32 %v2737_v35, %v885_v18  ;;  %v1286_v32 = vunpack.c.l.bf16 %v2384_v60  ;;  %v262_v18 = vld [vmem:[%s2722_s16 + $0x44] sm:$0x7] }
  0xb9   : > { %v2576_v43 = vpop.eup %2575  ;;  %2214 = vst.msk [vmem:[%s3006_s29 + $0x2c] sm:$0x7] %vm2203_vm3, %v2499_v61  ;;  %v980_v17 = vsel %vm454_vm0, %v978_v44, %v979_v8  ;;  %v1167_v38 = vrot.slane %v1103_v0, 2  ;;  %v1383_v10 = vunpack.c.h.bf16 %v2384_v60  ;;  %v1572_v5 = vunpack.c.l.bf16 %v2420_v30 }
  0xba   : > { %v2578_v45 = vpop.eup %2577  ;;  %v1989_v12 = vmul.f32 %v2576_v43, %v3430_v31  ;;  %v1537_v11 = vadd.f32 %v1474_v59, %v1348_v63  ;;  %v851_v16 = vadd.f32 %v823_v29, %v731_v37  ;;  %v1168_v36 = vrot.slane %v3555_v23, 2  ;;  %v3574_v31 = vld [vmem:[%s2851_s26 + $0x34] sm:$0x7] }
  0xbb   : > { %v1906_v62 = vadd.f32 1.0, %v2578_v45  ;;  %v1321_v41 = vmul.f32 %v2758_v56, %v1286_v32  ;;  %v1412_v13 = vmul.f32 %v2765_v1, %v1286_v32  ;;  %v3569_v20 = vmul.f32 %v2765_v1, %v1383_v10  ;;  %v2327_v45 = vld [vmem:[%s2722_s16 + $0x50] sm:$0xff]  }
  0xbc   : > { %v2073_v34 = vadd.f32 %v2045_v3, %v1989_v12  ;;  %v1726_v14 = vadd.f32 %v1663_v19, %v1537_v11  ;;  %v1040_v59 = vadd.f32 %v980_v17, %v851_v16  ;;  %v1169_v29 = vsel %vm644_vm1, %v1167_v38, %v1168_v36  ;;  %v2326_v3 = vld [vmem:[%s2722_s16 + $0x4c] sm:$0x7]  ;;  %v2385_v19 = vld [vmem:[%s2722_s16 + $0x54] sm:$0x7] }
  0xbd   : > { %2581 = vrcp.f32 %v1906_v62  ;;  %v1476_v25 = vrot.slane %v1412_v13, 1  ;;  %v1477_v52 = vrot.slane %v3569_v20, 1  ;;  %v1601_v57 = vmul.f32 %v2772_v7, %v1572_v5  ;;  %v562_v5 = vld [vmem:[%s2722_s16 + $0x48] sm:$0xe] }
  0xbe   : > { %v2500_v48 = vpack.c.bf16 %v2073_v34, %v2073_v34  ;;  %v1761_v54 = vmul.f32 %v3381_v6, %v1726_v14  ;;  %v1229_v2 = vadd.f32 %v1169_v29, %v1040_v59  ;;  %v3587_v40 = vmul.f32 %v2772_v7, %v1383_v10 }
  0xbf   : > { %v2046_v4 = vunpack.c.l.bf16 %v3574_v31  ;;  %v1478_v50 = vsel %vm454_vm0, %v1476_v25, %v1477_v52  ;;  %v1665_v60 = vrot.slane %v1601_v57, 2  ;;  %v290_v28 = vunpack.c.l.bf16 %v262_v18 }
  0xc0   : > { %2215 = vst.msk [vmem:[%s3006_s29 + $0x30] sm:$0xf] %vm2201_vm2, %v2500_v48  ;;  %v3598_v27 = vadd.f32 %v3393_v49, %v1761_v54  ;;  %v1349_v55 = vadd.f32 %v1321_v41, %v1229_v2  ;;  %v1666_v44 = vrot.slane %v3587_v40, 2  ;;  %v789_v30 = vunpack.c.l.bf16 %v2326_v3 }
  0xc1   : > { %v2580_v61 = vpop.eup %2579  ;;  %v2047_v0 = vunpack.c.h.bf16 %v3485_v42  ;;  %v324_v63 = vmul.f32 %v2725_v21, %v290_v28  ;;  %v1287_v37 = vunpack.c.l.bf16 %v2385_v19  ;;  %v291_v32 = vunpack.c.l.bf16 %v263_v47 }
  0xc2   : > { %v1907_v43 = vadd.f32 1.0, %v2580_v61  ;;  %v2444_v17 = vmul.f32 -1.442695, %v3598_v27  ;;  %v1538_v38 = vadd.f32 %v1478_v50, %v1349_v55  ;;  %v1667_v10 = vsel %vm644_vm1, %v1665_v60, %v1666_v44 }
  0xc3   : > { %v542_v12 = vadd.f32 %v480_v9, %v324_v63  ;;  %v824_v11 = vmul.f32 %v2742_v39, %v789_v30  ;;  %v1322_v16 = vmul.f32 %v2758_v56, %v1287_v37  ;;  %v325_v62 = vmul.f32 %v2725_v21, %v291_v32  ;;  %v2386_v37 = vld [vmem:[%s2722_s16 + $0x58] sm:$0xff]  }
  0xc4   : > { %2583 = vrcp.f32 %v1907_v43  ;;  %v1727_v41 = vadd.f32 %v1667_v10, %v1538_v38  ;;  %v386_v13 = vunpack.c.h.bf16 %v263_v47  ;;  %v416_v34 = vmul.f32 %v2727_v22, %v291_v32 }
  0xc5   : > { %2585 = vpow2.f32 %v2444_v17  ;;  %v732_v31 = vadd.f32 %v670_v46, %v542_v12  ;;  %v576_v14 = vunpack.c.l.bf16 %v562_v5  ;;  %v790_v59 = vunpack.c.l.bf16 %v2327_v45  ;;  %v2362_v46 = vld [vmem:[%s2722_s16 + $0x50] sm:$0xe]  ;;  %v2421_v17 = vld [vmem:[%s2722_s16 + $0x58] sm:$0xe] }
  0xc6   : > { %v1762_v15 = vmul.f32 %v3381_v6, %v1727_v41  ;;  %v3619_v9 = vmul.f32 %v2727_v22, %v386_v13  ;;  %v482_v29 = vrot.slane %v416_v34, 1  ;;  %v3622_v18 = vmul.f32 %v2730_v24, %v386_v13 }
  0xc7   : > { %v2582_v25 = vpop.eup %2581  ;;  %v852_v57 = vadd.f32 %v824_v11, %v732_v31  ;;  %v606_v3 = vmul.f32 %v2730_v24, %v576_v14  ;;  %v825_v48 = vmul.f32 %v2742_v39, %v790_v59  ;;  %v886_v26 = vunpack.c.h.bf16 %v2327_v45 }
  0xc8   : > { %v1990_v54 = vmul.f32 %v2582_v25, %v3500_v53  ;;  %v3629_v2 = vadd.f32 %v3393_v49, %v1762_v15  ;;  %v483_v19 = vrot.slane %v3619_v9, 1  ;;  %v673_v47 = vrot.slane %v3622_v18, 2 }
  0xc9   : > { %v1041_v50 = vadd.f32 %v979_v8, %v852_v57  ;;  %v672_v60 = vrot.slane %v606_v3, 2  ;;  %v916_v28 = vmul.f32 %v2735_v33, %v790_v59  ;;  %v3637_v55 = vmul.f32 %v2735_v33, %v886_v26 }
  0xca   : > { %v2074_v30 = vadd.f32 %v2046_v4, %v1990_v54  ;;  %v2445_v53 = vmul.f32 -1.442695, %v3629_v2  ;;  %v484_v61 = vsel %vm454_vm0, %v482_v29, %v483_v19  ;;  %v1075_v63 = vunpack.c.l.bf16 %v2362_v46 }
  0xcb   : > { %v1230_v58 = vadd.f32 %v1168_v36, %v1041_v50  ;;  %v543_v8 = vadd.f32 %v484_v61, %v325_v62  ;;  %v674_v32 = vsel %vm644_vm1, %v672_v60, %v673_v47  ;;  %v981_v43 = vrot.slane %v916_v28, 1  ;;  %v3684_v60 = vld [vmem:[%s2851_s26 + $0x40] ss:$8 sps:$4 sm:$0xff]  }
  0xcc   : > { %v2501_v4 = vpack.c.bf16 %v2074_v30, %v2074_v30  ;;  %2587 = vpow2.f32 %v2445_v53  ;;  %v982_v38 = vrot.slane %v3637_v55, 1  ;;  %v1105_v10 = vmul.f32 %v2737_v35, %v1075_v63  ;;  %v2387_v30 = vld [vmem:[%s2722_s16 + $0x5c] sm:$0x7]  ;;  %v265_v53 = vld [vmem:[%s2722_s16 + $0x50] sm:$0xff]  }
  0xcd   : > { %v1350_v5 = vadd.f32 %v1322_v16, %v1230_v58  ;;  %v733_v45 = vadd.f32 %v674_v32, %v543_v8  ;;  %v3653_v12 = vmul.f32 %v2737_v35, %v886_v26  ;;  %v1288_v23 = vunpack.c.l.bf16 %v2386_v37  ;;  %v264_v26 = vld [vmem:[%s2722_s16 + $0x4c] sm:$0x7] }
  0xce   : > { %v2584_v36 = vpop.eup %2583  ;;  %2216 = vst.msk [vmem:[%s3006_s29 + $0x34] sm:$0x7] %vm2203_vm3, %v2501_v4  ;;  %v983_v11 = vsel %vm454_vm0, %v981_v43, %v982_v38  ;;  %v1170_v62 = vrot.slane %v1105_v10, 2  ;;  %v1384_v41 = vunpack.c.h.bf16 %v2386_v37  ;;  %v1573_v13 = vunpack.c.l.bf16 %v2421_v17 }
  0xcf   : > { %v2586_v34 = vpop.eup %2585  ;;  %v1991_v16 = vmul.f32 %v2584_v36, %v3531_v51  ;;  %v1539_v31 = vadd.f32 %v1477_v52, %v1350_v5  ;;  %v853_v14 = vadd.f32 %v825_v48, %v733_v45  ;;  %v1171_v59 = vrot.slane %v3653_v12, 2  ;;  %v3672_v51 = vld [vmem:[%s2851_s26 + $0x3c] sm:$0x7] }
  0xd0   : > { %v1908_v15 = vadd.f32 1.0, %v2586_v34  ;;  %v1323_v29 = vmul.f32 %v2758_v56, %v1288_v23  ;;  %v1414_v25 = vmul.f32 %v2765_v1, %v1288_v23  ;;  %v3667_v57 = vmul.f32 %v2765_v1, %v1384_v41  ;;  %v2329_v34 = vld [vmem:[%s2722_s16 + $0x58] sm:$0xff]  }
  0xd1   : > { %v2075_v3 = vadd.f32 %v2047_v0, %v1991_v16  ;;  %v1728_v20 = vadd.f32 %v1666_v44, %v1539_v31  ;;  %v1042_v52 = vadd.f32 %v983_v11, %v853_v14  ;;  %v1172_v48 = vsel %vm644_vm1, %v1170_v62, %v1171_v59  ;;  %v2328_v0 = vld [vmem:[%s2722_s16 + $0x54] sm:$0x7] }
  0xd2   : > { %2589 = vrcp.f32 %v1908_v15  ;;  %v1479_v46 = vrot.slane %v1414_v25, 1  ;;  %v1480_v54 = vrot.slane %v3667_v57, 1  ;;  %v1603_v42 = vmul.f32 %v2772_v7, %v1573_v13  ;;  %v563_v13 = vld [vmem:[%s2722_s16 + $0x50] sm:$0xe] }
  0xd3   : > { %v2502_v50 = vpack.c.bf16 %v2075_v3, %v2075_v3  ;;  %v1763_v40 = vmul.f32 %v3381_v6, %v1728_v20  ;;  %v1231_v44 = vadd.f32 %v1172_v48, %v1042_v52  ;;  %v3688_v28 = vmul.f32 %v2772_v7, %v1384_v41 }
  0xd4   : > { %v2048_v61 = vunpack.c.l.bf16 %v3672_v51  ;;  %v1481_v63 = vsel %vm454_vm0, %v1479_v46, %v1480_v54  ;;  %v1668_v37 = vrot.slane %v1603_v42, 2  ;;  %v292_v58 = vunpack.c.l.bf16 %v264_v26 }
  0xd5   : > { %2217 = vst.msk [vmem:[%s3006_s29 + $0x38] sm:$0xf] %vm2201_vm2, %v2502_v50  ;;  %v3699_v8 = vadd.f32 %v3393_v49, %v1763_v40  ;;  %v1351_v32 = vadd.f32 %v1323_v29, %v1231_v44  ;;  %v1669_v43 = vrot.slane %v3688_v28, 2  ;;  %v791_v17 = vunpack.c.l.bf16 %v2328_v0 }
  0xd6   : > { %v2588_v4 = vpop.eup %2587  ;;  %v2049_v10 = vunpack.c.l.bf16 %v3684_v60  ;;  %v326_v5 = vmul.f32 %v2725_v21, %v292_v58  ;;  %v1289_v45 = vunpack.c.l.bf16 %v2387_v30  ;;  %v293_v23 = vunpack.c.l.bf16 %v265_v53 }
  0xd7   : > { %v1909_v36 = vadd.f32 1.0, %v2588_v4  ;;  %v2446_v11 = vmul.f32 -1.442695, %v3699_v8  ;;  %v1540_v62 = vadd.f32 %v1481_v63, %v1351_v32  ;;  %v1670_v41 = vsel %vm644_vm1, %v1668_v37, %v1669_v43 }
  0xd8   : > { %v544_v16 = vadd.f32 %v483_v19, %v326_v5  ;;  %v826_v31 = vmul.f32 %v2742_v39, %v791_v17  ;;  %v1324_v14 = vmul.f32 %v2758_v56, %v1289_v45  ;;  %v327_v15 = vmul.f32 %v2725_v21, %v293_v23  ;;  %v2388_v45 = vld [vmem:[%s2722_s16 + $0x60] sm:$0xff]  }
  0xd9   : > { %2591 = vrcp.f32 %v1909_v36  ;;  %v1729_v29 = vadd.f32 %v1670_v41, %v1540_v62  ;;  %v387_v25 = vunpack.c.h.bf16 %v265_v53  ;;  %v418_v3 = vmul.f32 %v2727_v22, %v293_v23 }
  0xda   : > { %2593 = vpow2.f32 %v2446_v11  ;;  %v734_v51 = vadd.f32 %v673_v47, %v544_v16  ;;  %v577_v20 = vunpack.c.l.bf16 %v563_v13  ;;  %v792_v52 = vunpack.c.l.bf16 %v2329_v34  ;;  %v2363_v47 = vld [vmem:[%s2722_s16 + $0x58] sm:$0xe]  ;;  %v2422_v11 = vld [vmem:[%s2722_s16 + $0x60] sm:$0xe] }
  0xdb   : > { %v1764_v9 = vmul.f32 %v3381_v6, %v1729_v29  ;;  %v3720_v19 = vmul.f32 %v2727_v22, %v387_v25  ;;  %v485_v48 = vrot.slane %v418_v3, 1  ;;  %v3723_v26 = vmul.f32 %v2730_v24, %v387_v25 }
  0xdc   : > { %v2590_v46 = vpop.eup %2589  ;;  %v854_v42 = vadd.f32 %v826_v31, %v734_v51  ;;  %v608_v0 = vmul.f32 %v2730_v24, %v577_v20  ;;  %v827_v50 = vmul.f32 %v2742_v39, %v792_v52  ;;  %v887_v18 = vunpack.c.h.bf16 %v2329_v34 }
  0xdd   : > { %v1992_v40 = vmul.f32 %v2590_v46, %v3598_v27  ;;  %v3730_v44 = vadd.f32 %v3393_v49, %v1764_v9  ;;  %v486_v30 = vrot.slane %v3720_v19, 1  ;;  %v676_v53 = vrot.slane %v3723_v26, 2 }
  0xde   : > { %v1043_v63 = vadd.f32 %v982_v38, %v854_v42  ;;  %v675_v37 = vrot.slane %v608_v0, 2  ;;  %v918_v58 = vmul.f32 %v2735_v33, %v792_v52  ;;  %v3738_v32 = vmul.f32 %v2735_v33, %v887_v18 }
  0xdf   : > { %v2076_v17 = vadd.f32 %v2048_v61, %v1992_v40  ;;  %v2447_v27 = vmul.f32 -1.442695, %v3730_v44  ;;  %v487_v4 = vsel %vm454_vm0, %v485_v48, %v486_v30  ;;  %v1076_v5 = vunpack.c.l.bf16 %v2363_v47 }
  0xe0   : > { %v1232_v55 = vadd.f32 %v1171_v59, %v1043_v63  ;;  %v545_v38 = vadd.f32 %v487_v4, %v327_v15  ;;  %v677_v23 = vsel %vm644_vm1, %v675_v37, %v676_v53  ;;  %v984_v36 = vrot.slane %v918_v58, 1 }
  0xe1   : > { %v2503_v61 = vpack.c.bf16 %v2076_v17, %v2076_v17  ;;  %2595 = vpow2.f32 %v2447_v27  ;;  %v985_v62 = vrot.slane %v3738_v32, 1  ;;  %v1107_v41 = vmul.f32 %v2737_v35, %v1076_v5  ;;  %v267_v27 = vld [vmem:[%s2722_s16 + $0x58] sm:$0xff]  }
  0xe2   : > { %v1352_v13 = vadd.f32 %v1324_v14, %v1232_v55  ;;  %v735_v34 = vadd.f32 %v677_v23, %v545_v38  ;;  %v3754_v16 = vmul.f32 %v2737_v35, %v887_v18  ;;  %v1290_v12 = vunpack.c.l.bf16 %v2388_v45  ;;  %v266_v18 = vld [vmem:[%s2722_s16 + $0x54] sm:$0x7] }
  0xe3   : > { %v2592_v59 = vpop.eup %2591  ;;  %2218 = vst.msk [vmem:[%s3006_s29 + $0x3c] sm:$0x7] %vm2203_vm3, %v2503_v61  ;;  %v986_v31 = vsel %vm454_vm0, %v984_v36, %v985_v62  ;;  %v1173_v15 = vrot.slane %v1107_v41, 2  ;;  %v1385_v29 = vunpack.c.h.bf16 %v2388_v45  ;;  %v1574_v25 = vunpack.c.l.bf16 %v2422_v11 }
  0xe4   : > { %v2594_v3 = vpop.eup %2593  ;;  %v1993_v14 = vmul.f32 %v2592_v59, %v3629_v2  ;;  %v1541_v51 = vadd.f32 %v1480_v54, %v1352_v13  ;;  %v855_v20 = vadd.f32 %v827_v50, %v735_v34  ;;  %v1174_v52 = vrot.slane %v3754_v16, 2  ;;  %v3773_v2 = vld [vmem:[%s2851_s26 + $0x44] sm:$0x7] }
  0xe5   : > { %v1910_v9 = vadd.f32 1.0, %v2594_v3  ;;  %v1325_v48 = vmul.f32 %v2758_v56, %v1290_v12  ;;  %v1416_v46 = vmul.f32 %v2765_v1, %v1290_v12  ;;  %v3768_v42 = vmul.f32 %v2765_v1, %v1385_v29  ;;  %v2331_v3 = vld [vmem:[%s2722_s16 + $0x60] sm:$0xff]  }
  0xe6   : > { %v2077_v0 = vadd.f32 %v2049_v10, %v1993_v14  ;;  %v1730_v57 = vadd.f32 %v1669_v43, %v1541_v51  ;;  %v1044_v54 = vadd.f32 %v986_v31, %v855_v20  ;;  %v1175_v50 = vsel %vm644_vm1, %v1173_v15, %v1174_v52  ;;  %v2330_v10 = vld [vmem:[%s2722_s16 + $0x5c] sm:$0x7]  ;;  %v2389_v43 = vld [vmem:[%s2722_s16 + $0x64] sm:$0x7] }
  0xe7   : > { %2597 = vrcp.f32 %v1910_v9  ;;  %v1482_v47 = vrot.slane %v1416_v46, 1  ;;  %v1483_v40 = vrot.slane %v3768_v42, 1  ;;  %v1605_v63 = vmul.f32 %v2772_v7, %v1574_v25  ;;  %v564_v25 = vld [vmem:[%s2722_s16 + $0x58] sm:$0xe] }
  0xe8   : > { %v2504_v37 = vpack.c.bf16 %v2077_v0, %v2077_v0  ;;  %v1765_v58 = vmul.f32 %v3381_v6, %v1730_v57  ;;  %v1233_v17 = vadd.f32 %v1175_v50, %v1044_v54  ;;  %v3786_v28 = vmul.f32 %v2772_v7, %v1385_v29 }
  0xe9   : > { %v2050_v4 = vunpack.c.l.bf16 %v3773_v2  ;;  %v1484_v5 = vsel %vm454_vm0, %v1482_v47, %v1483_v40  ;;  %v1671_v45 = vrot.slane %v1605_v63, 2  ;;  %v294_v55 = vunpack.c.l.bf16 %v266_v18 }
  0xea   : > { %2219 = vst.msk [vmem:[%s3006_s29 + $0x40] sm:$0xf] %vm2201_vm2, %v2504_v37  ;;  %v3797_v38 = vadd.f32 %v3393_v49, %v1765_v58  ;;  %v1353_v23 = vadd.f32 %v1325_v48, %v1233_v17  ;;  %v1672_v36 = vrot.slane %v3786_v28, 2  ;;  %v793_v11 = vunpack.c.l.bf16 %v2330_v10 }
  0xeb   : > { %v2596_v61 = vpop.eup %2595  ;;  %v2051_v41 = vunpack.c.h.bf16 %v3684_v60  ;;  %v328_v13 = vmul.f32 %v2725_v21, %v294_v55  ;;  %v1291_v34 = vunpack.c.l.bf16 %v2389_v43  ;;  %v295_v12 = vunpack.c.l.bf16 %v267_v27 }
  0xec   : > { %v1911_v59 = vadd.f32 1.0, %v2596_v61  ;;  %v2448_v31 = vmul.f32 -1.442695, %v3797_v38  ;;  %v1542_v15 = vadd.f32 %v1484_v5, %v1353_v23  ;;  %v1673_v29 = vsel %vm644_vm1, %v1671_v45, %v1672_v36 }
  0xed   : > { %v546_v14 = vadd.f32 %v486_v30, %v328_v13  ;;  %v828_v51 = vmul.f32 %v2742_v39, %v793_v11  ;;  %v1326_v20 = vmul.f32 %v2758_v56, %v1291_v34  ;;  %v329_v9 = vmul.f32 %v2725_v21, %v295_v12  ;;  %v2390_v34 = vld [vmem:[%s2722_s16 + $0x68] sm:$0xff]  }
  0xee   : > { %2599 = vrcp.f32 %v1911_v59  ;;  %v1731_v48 = vadd.f32 %v1673_v29, %v1542_v15  ;;  %v388_v46 = vunpack.c.h.bf16 %v267_v27  ;;  %v420_v0 = vmul.f32 %v2727_v22, %v295_v12 }
  0xef   : > { %2601 = vpow2.f32 %v2448_v31  ;;  %v736_v2 = vadd.f32 %v676_v53, %v546_v14  ;;  %v578_v57 = vunpack.c.l.bf16 %v564_v25  ;;  %v794_v54 = vunpack.c.l.bf16 %v2331_v3  ;;  %v2364_v53 = vld [vmem:[%s2722_s16 + $0x60] sm:$0xe]  ;;  %v2423_v31 = vld [vmem:[%s2722_s16 + $0x68] sm:$0xe] }
  0xf0   : > { %v1766_v19 = vmul.f32 %v3381_v6, %v1731_v48  ;;  %v3818_v30 = vmul.f32 %v2727_v22, %v388_v46  ;;  %v488_v50 = vrot.slane %v420_v0, 1  ;;  %v3821_v18 = vmul.f32 %v2730_v24, %v388_v46 }
  0xf1   : > { %v2598_v47 = vpop.eup %2597  ;;  %v856_v63 = vadd.f32 %v828_v51, %v736_v2  ;;  %v610_v10 = vmul.f32 %v2730_v24, %v578_v57  ;;  %v829_v37 = vmul.f32 %v2742_v39, %v794_v54  ;;  %v888_v26 = vunpack.c.h.bf16 %v2331_v3 }
  0xf2   : > { %v1994_v58 = vmul.f32 %v2598_v47, %v3699_v8  ;;  %v3828_v17 = vadd.f32 %v3393_v49, %v1766_v19  ;;  %v489_v43 = vrot.slane %v3818_v30, 1  ;;  %v679_v27 = vrot.slane %v3821_v18, 2  ;;  %v3920_v30 = vld [vmem:[%s4126_s3] ss:$0 sm:$0xff] }
  0xf3   : > { %v1045_v5 = vadd.f32 %v985_v62, %v856_v63  ;;  %v678_v45 = vrot.slane %v610_v10, 2  ;;  %v920_v55 = vmul.f32 %v2735_v33, %v794_v54  ;;  %v3836_v23 = vmul.f32 %v2735_v33, %v888_v26 }
  0xf4   : > { %v2078_v11 = vadd.f32 %v2050_v4, %v1994_v58  ;;  %v2449_v8 = vmul.f32 -1.442695, %v3828_v17  ;;  %v490_v61 = vsel %vm454_vm0, %v488_v50, %v489_v43  ;;  %v1077_v13 = vunpack.c.l.bf16 %v2364_v53 }
  0xf5   : > { %v1234_v32 = vadd.f32 %v1174_v52, %v1045_v5  ;;  %v547_v62 = vadd.f32 %v490_v61, %v329_v9  ;;  %v680_v12 = vsel %vm644_vm1, %v678_v45, %v679_v27  ;;  %v987_v59 = vrot.slane %v920_v55, 1  ;;  %v3883_v45 = vld [vmem:[%s2851_s26 + $0x50] ss:$8 sps:$4 sm:$0xff]  }
  0xf6   : > { %v2505_v4 = vpack.c.bf16 %v2078_v11, %v2078_v11  ;;  %2603 = vpow2.f32 %v2449_v8  ;;  %v988_v15 = vrot.slane %v3836_v23, 1  ;;  %v1109_v29 = vmul.f32 %v2737_v35, %v1077_v13  ;;  %v2391_v11 = vld [vmem:[%s2722_s16 + $0x6c] sm:$0x7]  ;;  %v269_v8 = vld [vmem:[%s2722_s16 + $0x60] sm:$0xff]  }
  0xf7   : > { %v1354_v25 = vadd.f32 %v1326_v20, %v1234_v32  ;;  %v737_v3 = vadd.f32 %v680_v12, %v547_v62  ;;  %v3852_v14 = vmul.f32 %v2737_v35, %v888_v26  ;;  %v1292_v16 = vunpack.c.l.bf16 %v2390_v34  ;;  %v268_v26 = vld [vmem:[%s2722_s16 + $0x5c] sm:$0x7] }
  0xf8   : > { %v2600_v52 = vpop.eup %2599  ;;  %2220 = vst.msk [vmem:[%s3006_s29 + $0x44] sm:$0x7] %vm2203_vm3, %v2505_v4  ;;  %v989_v51 = vsel %vm454_vm0, %v987_v59, %v988_v15  ;;  %v1176_v9 = vrot.slane %v1109_v29, 2  ;;  %v1386_v48 = vunpack.c.h.bf16 %v2390_v34  ;;  %v1575_v46 = vunpack.c.l.bf16 %v2423_v31 }
  0xf9   : > { %v2602_v0 = vpop.eup %2601  ;;  %v1995_v20 = vmul.f32 %v2600_v52, %v3730_v44  ;;  %v1543_v2 = vadd.f32 %v1483_v40, %v1354_v25  ;;  %v857_v57 = vadd.f32 %v829_v37, %v737_v3  ;;  %v1177_v54 = vrot.slane %v3852_v14, 2  ;;  %v3871_v44 = vld [vmem:[%s2851_s26 + $0x4c] sm:$0x7] }
  0xfa   : > { %v1912_v19 = vadd.f32 1.0, %v2602_v0  ;;  %v1327_v50 = vmul.f32 %v2758_v56, %v1292_v16  ;;  %v1418_v47 = vmul.f32 %v2765_v1, %v1292_v16  ;;  %v3866_v63 = vmul.f32 %v2765_v1, %v1386_v48 }
  0xfb   : > { %v2079_v10 = vadd.f32 %v2051_v41, %v1995_v20  ;;  %v1732_v42 = vadd.f32 %v1672_v36, %v1543_v2  ;;  %v1046_v40 = vadd.f32 %v989_v51, %v857_v57  ;;  %v1178_v37 = vsel %vm644_vm1, %v1176_v9, %v1177_v54  ;;  %v2332_v41 = vld [vmem:[%s2722_s16 + $0x64] sm:$0x7]  ;;  %v565_v9 = vld [vmem:[%s2722_s16 + $0x60] sm:$0xe] }
  0xfc   : > { %2605 = vrcp.f32 %v1912_v19  ;;  %v1485_v53 = vrot.slane %v1418_v47, 1  ;;  %v1486_v58 = vrot.slane %v3866_v63, 1  ;;  %v1607_v60 = vmul.f32 %v2772_v7, %v1575_v46 }
  0xfd   : > { %v2506_v5 = vpack.c.bf16 %v2079_v10, %v2079_v10  ;;  %v1767_v28 = vmul.f32 %v3381_v6, %v1732_v42  ;;  %v1235_v36 = vadd.f32 %v1178_v37, %v1046_v40  ;;  %v3887_v55 = vmul.f32 %v2772_v7, %v1386_v48  ;;  %v2333_v48 = vld [vmem:[%s2722_s16 + $0x68] sm:$0xff]  }
  0xfe   : > { %v2052_v61 = vunpack.c.l.bf16 %v3871_v44  ;;  %v1487_v13 = vsel %vm454_vm0, %v1485_v53, %v1486_v58  ;;  %v1674_v34 = vrot.slane %v1607_v60, 2  ;;  %v296_v32 = vunpack.c.l.bf16 %v268_v26 }
  0xff   : > { %2221 = vst.msk [vmem:[%s3006_s29 + $0x48] sm:$0xf] %vm2201_vm2, %v2506_v5  ;;  %v3898_v6 = vadd.f32 %v3393_v49, %v1767_v28  ;;  %v1355_v62 = vadd.f32 %v1327_v50, %v1235_v36  ;;  %v1675_v12 = vrot.slane %v3887_v55, 2  ;;  %v795_v59 = vunpack.c.l.bf16 %v2332_v41  ;;  %v2365_v41 = vld [vmem:[%s2722_s16 + $0x68] sm:$0xe] }
 0x100   : > { %v2604_v31 = vpop.eup %2603  ;;  %v2053_v4 = vunpack.c.l.bf16 %v3883_v45  ;;  %v330_v29 = vmul.f32 %v2725_v21, %v296_v32  ;;  %v1293_v25 = vunpack.c.l.bf16 %v2391_v11  ;;  %v297_v3 = vunpack.c.l.bf16 %v269_v8  ;;  %v3936_v28 = vld [vmem:[%s4127_s4] ss:$0 sm:$0xff] }
 0x101   : > { %v1913_v16 = vadd.f32 1.0, %v2604_v31  ;;  %v2450_v52 = vmul.f32 -1.442695, %v3898_v6  ;;  %v1544_v51 = vadd.f32 %v1487_v13, %v1355_v62  ;;  %v1676_v49 = vsel %vm644_vm1, %v1674_v34, %v1675_v12 }
 0x102   : > { %v548_v46 = vadd.f32 %v489_v43, %v330_v29  ;;  %v830_v0 = vmul.f32 %v2742_v39, %v795_v59  ;;  %v1328_v20 = vmul.f32 %v2758_v56, %v1293_v25  ;;  %v331_v2 = vmul.f32 %v2725_v21, %v297_v3  ;;  %v2392_v25 = vld [vmem:[%s2722_s16 + $0x70] sm:$0xff]  }
 0x103   : > { %2607 = vrcp.f32 %v1913_v16  ;;  %v1733_v57 = vadd.f32 %v1676_v49, %v1544_v51  ;;  %v389_v19 = vunpack.c.h.bf16 %v269_v8  ;;  %v422_v50 = vmul.f32 %v2727_v22, %v297_v3 }
 0x104   : > { %2609 = vpow2.f32 %v2450_v52  ;;  %v738_v47 = vadd.f32 %v679_v27, %v548_v46  ;;  %v579_v10 = vunpack.c.l.bf16 %v565_v9  ;;  %v796_v44 = vunpack.c.l.bf16 %v2333_v48  ;;  %v2424_v52 = vld [vmem:[%s2722_s16 + $0x70] sm:$0xe] }
 0x105   : > { %v1768_v43 = vmul.f32 %v3920_v30, %v1733_v57  ;;  %v3924_v42 = vmul.f32 %v2727_v22, %v389_v19  ;;  %v491_v40 = vrot.slane %v422_v50, 1  ;;  %v3927_v37 = vmul.f32 %v2730_v24, %v389_v19 }
 0x106   : > { %v2606_v26 = vpop.eup %2605  ;;  %v858_v53 = vadd.f32 %v830_v0, %v738_v47  ;;  %v612_v18 = vmul.f32 %v2730_v24, %v579_v10  ;;  %v831_v27 = vmul.f32 %v2742_v39, %v796_v44  ;;  %v889_v60 = vunpack.c.h.bf16 %v2333_v48 }
 0x107   : > { %v1996_v5 = vmul.f32 %v2606_v26, %v3797_v38  ;;  %v3939_v36 = vadd.f32 %v3936_v28, %v1768_v43  ;;  %v492_v11 = vrot.slane %v3924_v42, 1  ;;  %v682_v8 = vrot.slane %v3927_v37, 2 }
 0x108   : > { %v1047_v13 = vadd.f32 %v988_v15, %v858_v53  ;;  %v681_v34 = vrot.slane %v612_v18, 2  ;;  %v922_v32 = vmul.f32 %v2735_v33, %v796_v44  ;;  %v3947_v38 = vmul.f32 %v2735_v33, %v889_v60 }
 0x109   : > { %v2080_v62 = vadd.f32 %v2052_v61, %v1996_v5  ;;  %v2451_v59 = vmul.f32 -1.442695, %v3939_v36  ;;  %v493_v31 = vsel %vm454_vm0, %v491_v40, %v492_v11  ;;  %v1078_v29 = vunpack.c.l.bf16 %v2365_v41 }
 0x10a   : > { %v1236_v23 = vadd.f32 %v1177_v54, %v1047_v13  ;;  %v549_v15 = vadd.f32 %v493_v31, %v331_v2  ;;  %v683_v3 = vsel %vm644_vm1, %v681_v34, %v682_v8  ;;  %v990_v16 = vrot.slane %v922_v32, 1 }
 0x10b   : > { %v2507_v61 = vpack.c.bf16 %v2080_v62, %v2080_v62  ;;  %2611 = vpow2.f32 %v2451_v59  ;;  %v991_v51 = vrot.slane %v3947_v38, 1  ;;  %v1111_v49 = vmul.f32 %v2737_v35, %v1078_v29  ;;  %v271_v59 = vld [vmem:[%s2722_s16 + $0x68] sm:$0xff]  }
 0x10c   : > { %v1356_v9 = vadd.f32 %v1328_v20, %v1236_v23  ;;  %v739_v48 = vadd.f32 %v683_v3, %v549_v15  ;;  %v3963_v46 = vmul.f32 %v2737_v35, %v889_v60  ;;  %v1294_v14 = vunpack.c.l.bf16 %v2392_v25  ;;  %v270_v60 = vld [vmem:[%s2722_s16 + $0x64] sm:$0x7] }
 0x10d   : > { %v2608_v54 = vpop.eup %2607  ;;  %2222 = vst.msk [vmem:[%s3006_s29 + $0x4c] sm:$0x7] %vm2203_vm3, %v2507_v61  ;;  %v992_v0 = vsel %vm454_vm0, %v990_v16, %v991_v51  ;;  %v1179_v2 = vrot.slane %v1111_v49, 2  ;;  %v1387_v57 = vunpack.c.h.bf16 %v2392_v25  ;;  %v1576_v19 = vunpack.c.l.bf16 %v2424_v52 }
 0x10e   : > { %v2610_v50 = vpop.eup %2609  ;;  %v1997_v20 = vmul.f32 %v2608_v54, %v3828_v17  ;;  %v1545_v47 = vadd.f32 %v1486_v58, %v1356_v9  ;;  %v859_v10 = vadd.f32 %v831_v27, %v739_v48  ;;  %v1180_v44 = vrot.slane %v3963_v46, 2  ;;  %v3982_v17 = vld [vmem:[%s2851_s26 + $0x54] sm:$0x7] }
 0x10f   : > { %v1914_v43 = vadd.f32 1.0, %v2610_v50  ;;  %v1329_v40 = vmul.f32 %v2758_v56, %v1294_v14  ;;  %v1420_v26 = vmul.f32 %v2765_v1, %v1294_v14  ;;  %v3977_v53 = vmul.f32 %v2765_v1, %v1387_v57  ;;  %v2335_v50 = vld [vmem:[%s2722_s16 + $0x70] sm:$0xff]  }
 0x110   : > { %v2081_v18 = vadd.f32 %v2053_v4, %v1997_v20  ;;  %v1734_v63 = vadd.f32 %v1675_v12, %v1545_v47  ;;  %v1048_v58 = vadd.f32 %v992_v0, %v859_v10  ;;  %v1181_v27 = vsel %vm644_vm1, %v1179_v2, %v1180_v44  ;;  %v2334_v4 = vld [vmem:[%s2722_s16 + $0x6c] sm:$0x7]  ;;  %v2393_v12 = vld [vmem:[%s2722_s16 + $0x74] sm:$0x7] }
 0x111   : > { %2613 = vrcp.f32 %v1914_v43  ;;  %v1488_v41 = vrot.slane %v1420_v26, 1  ;;  %v1489_v5 = vrot.slane %v3977_v53, 1  ;;  %v1609_v13 = vmul.f32 %v2772_v7, %v1576_v19  ;;  %v566_v19 = vld [vmem:[%s2722_s16 + $0x68] sm:$0xe] }
 0x112   : > { %v2508_v34 = vpack.c.bf16 %v2081_v18, %v2081_v18  ;;  %v1769_v32 = vmul.f32 %v3920_v30, %v1734_v63  ;;  %v1237_v62 = vadd.f32 %v1181_v27, %v1048_v58  ;;  %v3995_v55 = vmul.f32 %v2772_v7, %v1387_v57 }
 0x113   : > { %v2054_v31 = vunpack.c.l.bf16 %v3982_v17  ;;  %v1490_v29 = vsel %vm454_vm0, %v1488_v41, %v1489_v5  ;;  %v1677_v25 = vrot.slane %v1609_v13, 2  ;;  %v298_v23 = vunpack.c.l.bf16 %v270_v60 }
 0x114   : > { %2223 = vst.msk [vmem:[%s3006_s29 + $0x50] sm:$0xf] %vm2201_vm2, %v2508_v34  ;;  %v4006_v15 = vadd.f32 %v3936_v28, %v1769_v32  ;;  %v1357_v3 = vadd.f32 %v1329_v40, %v1237_v62  ;;  %v1678_v16 = vrot.slane %v3995_v55, 2  ;;  %v797_v52 = vunpack.c.l.bf16 %v2334_v4 }
 0x115   : > { %v2612_v61 = vpop.eup %2611  ;;  %v2055_v49 = vunpack.c.h.bf16 %v3883_v45  ;;  %v332_v9 = vmul.f32 %v2725_v21, %v298_v23  ;;  %v1295_v48 = vunpack.c.l.bf16 %v2393_v12  ;;  %v299_v14 = vunpack.c.l.bf16 %v271_v59 }
 0x116   : > { %v1915_v54 = vadd.f32 1.0, %v2612_v61  ;;  %v2452_v0 = vmul.f32 -1.442695, %v4006_v15  ;;  %v1546_v2 = vadd.f32 %v1490_v29, %v1357_v3  ;;  %v1679_v57 = vsel %vm644_vm1, %v1677_v25, %v1678_v16  ;;  %v2394_v61 = vld [vmem:[%s2722_s16 + $0x78] sm:$0xff]  }
 0x117   : > { %v550_v20 = vadd.f32 %v492_v11, %v332_v9  ;;  %v832_v47 = vmul.f32 %v2742_v39, %v797_v52  ;;  %v1330_v10 = vmul.f32 %v2758_v56, %v1295_v48  ;;  %v333_v43 = vmul.f32 %v2725_v21, %v299_v14  ;;  %v2425_v48 = vld [vmem:[%s2722_s16 + $0x78] sm:$0xe] }
 0x118   : > { %2615 = vrcp.f32 %v1915_v54  ;;  %v1735_v40 = vadd.f32 %v1679_v57, %v1546_v2  ;;  %v390_v26 = vunpack.c.h.bf16 %v271_v59  ;;  %v424_v18 = vmul.f32 %v2727_v22, %v299_v14 }
 0x119   : > { %2617 = vpow2.f32 %v2452_v0  ;;  %v740_v17 = vadd.f32 %v682_v8, %v550_v20  ;;  %v580_v63 = vunpack.c.l.bf16 %v566_v19  ;;  %v798_v58 = vunpack.c.l.bf16 %v2335_v50  ;;  %v2366_v8 = vld [vmem:[%s2722_s16 + $0x70] sm:$0xe] }
 0x11a   : > { %v1770_v42 = vmul.f32 %v3920_v30, %v1735_v40  ;;  %v4027_v11 = vmul.f32 %v2727_v22, %v390_v26  ;;  %v494_v27 = vrot.slane %v424_v18, 1  ;;  %v4030_v60 = vmul.f32 %v2730_v24, %v390_v26 }
 0x11b   : > { %v2614_v41 = vpop.eup %2613  ;;  %v860_v13 = vadd.f32 %v832_v47, %v740_v17  ;;  %v614_v4 = vmul.f32 %v2730_v24, %v580_v63  ;;  %v833_v34 = vmul.f32 %v2742_v39, %v798_v58  ;;  %v890_v37 = vunpack.c.h.bf16 %v2335_v50 }
 0x11c   : > { %v1998_v32 = vmul.f32 %v2614_v41, %v3898_v6  ;;  %v4037_v62 = vadd.f32 %v3936_v28, %v1770_v42  ;;  %v495_v22 = vrot.slane %v4027_v11, 1  ;;  %v685_v12 = vrot.slane %v4030_v60, 2 }
 0x11d   : > { %v1049_v59 = vadd.f32 %v991_v51, %v860_v13  ;;  %v684_v29 = vrot.slane %v614_v4, 2  ;;  %v924_v24 = vmul.f32 %v2735_v33, %v798_v58  ;;  %v4045_v25 = vmul.f32 %v2735_v33, %v890_v37 }
 0x11e   : > { %v2082_v23 = vadd.f32 %v2054_v31, %v1998_v32  ;;  %v2453_v6 = vmul.f32 -1.442695, %v4037_v62  ;;  %v496_v3 = vsel %vm454_vm0, %v494_v27, %v495_v22  ;;  %v1079_v52 = vunpack.c.l.bf16 %v2366_v8  ;;  %v272_v27 = vld [vmem:[%s2722_s16 + $0x6c] sm:$0x7] }
 0x11f   : > { %v1238_v38 = vadd.f32 %v1180_v44, %v1049_v59  ;;  %v551_v51 = vadd.f32 %v496_v3, %v333_v43  ;;  %v686_v9 = vsel %vm644_vm1, %v684_v29, %v685_v12  ;;  %v993_v33 = vrot.slane %v924_v24, 1 }
 0x120   : > { %v2509_v31 = vpack.c.bf16 %v2082_v23, %v2082_v23  ;;  %2619 = vpow2.f32 %v2453_v6  ;;  %v994_v14 = vrot.slane %v4045_v25, 1  ;;  %v1113_v54 = vmul.f32 %v2737_v35, %v1079_v52 }
 0x121   : > { %v1358_v0 = vadd.f32 %v1330_v10, %v1238_v38  ;;  %v741_v2 = vadd.f32 %v686_v9, %v551_v51  ;;  %v4061_v57 = vmul.f32 %v2737_v35, %v890_v37  ;;  %v1296_v46 = vunpack.c.l.bf16 %v2394_v61  ;;  %v2395_v38 = vld [vmem:[%s2722_s16 + $0x7c] sm:$0x7] }
 0x122   : > { %v2616_v44 = vpop.eup %2615  ;;  %2224 = vst.msk [vmem:[%s3006_s29 + $0x54] sm:$0x7] %vm2203_vm3, %v2509_v31  ;;  %v995_v19 = vsel %vm454_vm0, %v993_v33, %v994_v14  ;;  %v1182_v50 = vrot.slane %v1113_v54, 2  ;;  %v1388_v20 = vunpack.c.h.bf16 %v2394_v61  ;;  %v1577_v47 = vunpack.c.l.bf16 %v2425_v48  ;;  %v2028_v51 = vld [vmem:[%s2851_s26 + $0x5c] sm:$0x7] }
 0x123   : > { %v2618_v43 = vpop.eup %2617  ;;  %v1999_v40 = vmul.f32 %v2616_v44, %v3939_v36  ;;  %v1547_v10 = vadd.f32 %v1489_v5, %v1358_v0  ;;  %v861_v35 = vadd.f32 %v833_v34, %v741_v2  ;;  %v1183_v26 = vrot.slane %v4061_v57, 2  ;;  %v2336_v34 = vld [vmem:[%s2722_s16 + $0x74] sm:$0x7] }
 0x124   : > { %v1916_v18 = vadd.f32 1.0, %v2618_v43  ;;  %v1331_v17 = vmul.f32 %v2758_v56, %v1296_v46  ;;  %v1422_v63 = vmul.f32 %v2765_v1, %v1296_v46  ;;  %v1423_v58 = vmul.f32 %v2765_v1, %v1388_v20 }
 0x125   : > { %v2083_v42 = vadd.f32 %v2055_v49, %v1999_v40  ;;  %v1736_v36 = vadd.f32 %v1678_v16, %v1547_v10  ;;  %v1050_v53 = vadd.f32 %v995_v19, %v861_v35  ;;  %v1184_v5 = vsel %vm644_vm1, %v1182_v50, %v1183_v26  ;;  %v2029_v19 = vld [vmem:[%s2851_s26 + $0x60] ss:$8 sps:$4 sm:$0xff]  }
 0x126   : > { %2621 = vrcp.f32 %v1916_v18  ;;  %v1491_v41 = vrot.slane %v1422_v63, 1  ;;  %v1492_v13 = vrot.slane %v1423_v58, 1  ;;  %v1611_v4 = vmul.f32 %v2772_v7, %v1577_v47 }
 0x127   : > { %v2510_v37 = vpack.c.bf16 %v2083_v42, %v2083_v42  ;;  %v1771_v1 = vmul.f32 %v3920_v30, %v1736_v36  ;;  %v1239_v8 = vadd.f32 %v1184_v5, %v1050_v53  ;;  %v1612_v45 = vmul.f32 %v2772_v7, %v1388_v20  ;;  %v2030_v42 = vld [vmem:[%s2851_s26 + $0x64] sm:$0x7] }
 0x128   : > { %v1493_v55 = vsel %vm454_vm0, %v1491_v41, %v1492_v13  ;;  %v1680_v16 = vrot.slane %v1611_v4, 2  ;;  %v300_v49 = vunpack.c.l.bf16 %v272_v27  ;;  %v799_v24 = vunpack.c.l.bf16 %v2336_v34 }
 0x129   : > { %2225 = vst.msk [vmem:[%s3006_s29 + $0x58] sm:$0xf] %vm2201_vm2, %v2510_v37  ;;  %v1806_v32 = vadd.f32 %v3936_v28, %v1771_v1  ;;  %v1359_v59 = vadd.f32 %v1331_v17, %v1239_v8  ;;  %v1681_v29 = vrot.slane %v1612_v45, 2  ;;  %v2056_v54 = vunpack.c.l.bf16 %v2028_v51  ;;  %v2032_v1 = vld [vmem:[%s2851_s26 + $0x6c] sm:$0x7] }
 0x12a   : > { %v2620_v23 = vpop.eup %2619  ;;  %v334_v6 = vmul.f32 %v2725_v21, %v300_v49  ;;  %v834_v33 = vmul.f32 %v2742_v39, %v799_v24  ;;  %v1297_v21 = vunpack.c.l.bf16 %v2395_v38  ;;  %v2057_v20 = vunpack.c.l.bf16 %v2029_v19 }
 0x12b   : > { %v1917_v3 = vadd.f32 1.0, %v2620_v23  ;;  %v2454_v52 = vmul.f32 -1.442695, %v1806_v32  ;;  %v1548_v61 = vadd.f32 %v1493_v55, %v1359_v59  ;;  %v1682_v7 = vsel %vm644_vm1, %v1680_v16, %v1681_v29 }
 0x12c   : > { %v552_v9 = vadd.f32 %v495_v22, %v334_v6  ;;  %v1332_v22 = vmul.f32 %v2758_v56, %v1297_v21  ;;  %v2059_v41 = vunpack.c.h.bf16 %v2029_v19  ;;  %v2060_v8 = vunpack.c.l.bf16 %v2032_v1 }
 0x12d   : > { %2623 = vrcp.f32 %v1917_v3  ;;  %v1737_v48 = vadd.f32 %v1682_v7, %v1548_v61 }
 0x12e   : > { %2625 = vpow2.f32 %v2454_v52  ;;  %v742_v31 = vadd.f32 %v685_v12, %v552_v9 }
 0x12f   : > { %v1772_v0 = vmul.f32 %v3920_v30, %v1737_v48 }
 0x130   : > { %v2622_v2 = vpop.eup %2621  ;;  %v862_v57 = vadd.f32 %v834_v33, %v742_v31 }
 0x131   : > { %v2000_v46 = vmul.f32 %v2622_v2, %v4006_v15  ;;  %v1807_v11 = vadd.f32 %v3936_v28, %v1772_v0 }
 0x132   : > { %v1051_v39 = vadd.f32 %v994_v14, %v862_v57 }
 0x133   : > { %v2084_v44 = vadd.f32 %v2056_v54, %v2000_v46  ;;  %v2455_v60 = vmul.f32 -1.442695, %v1807_v11 }
 0x134   : > { %v1240_v12 = vadd.f32 %v1183_v26, %v1051_v39 }
 0x135   : > { %v2511_v50 = vpack.c.bf16 %v2084_v44, %v2084_v44  ;;  %2627 = vpow2.f32 %v2455_v60 }
 0x136   : > { %v1360_v47 = vadd.f32 %v1332_v22, %v1240_v12 }
 0x137   : > { %v2624_v43 = vpop.eup %2623  ;;  %2226 = vst.msk [vmem:[%s3006_s29 + $0x5c] sm:$0x7] %vm2203_vm3, %v2511_v50 }
 0x138   : > { %v2626_v15 = vpop.eup %2625  ;;  %v2001_v40 = vmul.f32 %v2624_v43, %v4037_v62  ;;  %v1549_v25 = vadd.f32 %v1492_v13, %v1360_v47  ;;  %v2058_v62 = vunpack.c.l.bf16 %v2030_v42 }
 0x139   : > { %v1918_v14 = vadd.f32 1.0, %v2626_v15 }
 0x13a   : > { %v2085_v10 = vadd.f32 %v2057_v20, %v2001_v40  ;;  %v1738_v56 = vadd.f32 %v1681_v29, %v1549_v25 }
 0x13b   : > { %2629 = vrcp.f32 %v1918_v14 }
 0x13c   : > { %v2512_v35 = vpack.c.bf16 %v2085_v10, %v2085_v10  ;;  %v1773_v26 = vmul.f32 %v3920_v30, %v1738_v56 }
 0x13e   : > { %2227 = vst.msk [vmem:[%s3006_s29 + $0x60] sm:$0xf] %vm2201_vm2, %v2512_v35  ;;  %v1808_v18 = vadd.f32 %v3936_v28, %v1773_v26 }
 0x13f   : > { %v2628_v17 = vpop.eup %2627 }
 0x140   : > { %v1919_v63 = vadd.f32 1.0, %v2628_v17  ;;  %v2456_v58 = vmul.f32 -1.442695, %v1808_v18 }
 0x142   : > { %2631 = vrcp.f32 %v1919_v63 }
 0x143   : > { %2633 = vpow2.f32 %v2456_v58 }
 0x145   : > { %v2630_v36 = vpop.eup %2629 }
 0x146   : > { %v2002_v53 = vmul.f32 %v2630_v36, %v1806_v32 }
 0x148   : > { %v2086_v5 = vadd.f32 %v2058_v62, %v2002_v53 }
 0x14a   : > { %v2513_v27 = vpack.c.bf16 %v2086_v5, %v2086_v5 }
 0x14c   : > { %v2632_v30 = vpop.eup %2631  ;;  %2228 = vst.msk [vmem:[%s3006_s29 + $0x64] sm:$0x7] %vm2203_vm3, %v2513_v27 }
 0x14d   : > { %v2634_v13 = vpop.eup %2633  ;;  %v2003_v28 = vmul.f32 %v2632_v30, %v1807_v11 }
 0x14e   : > { %v1920_v4 = vadd.f32 1.0, %v2634_v13 }
 0x14f   : > { %v2087_v34 = vadd.f32 %v2059_v41, %v2003_v28 }
 0x150   : > { %2635 = vrcp.f32 %v1920_v4 }
 0x151   : > { %v2514_v37 = vpack.c.bf16 %v2087_v34, %v2087_v34 }
 0x153   : > { %2229 = vst.msk [vmem:[%s3006_s29 + $0x68] sm:$0xf] %vm2201_vm2, %v2514_v37 }
 0x15a   : > { %v2636_v45 = vpop.eup %2635 }
 0x15b   : > { %v2004_v55 = vmul.f32 %v2636_v45, %v1808_v18 }
 0x15d   : > { %v2088_v16 = vadd.f32 %v2060_v8, %v2004_v55 }
 0x15f   : > { %v2515_v49 = vpack.c.bf16 %v2088_v16, %v2088_v16 }
 0x161   : > { %2230 = vst.msk [vmem:[%s3006_s29 + $0x6c] sm:$0x7] %vm2203_vm3, %v2515_v49 }
 0x162 PF: > { %s15_s18 = sadd.s32 1, %s2647_s18  }
 0x163   : > { %p12_p4 = scmp.ge.s32.totalorder %s15_s18, 4  }
 0x165   :  { %14 = sbr.rel (!%p12_p4) target bundleno = 1 (0x1), region = 83 }

</bundles_post_ra>
